<compile_context>
chip_gen: v7x
topology: tpu7x:2x2x1
jax: 0.10.0
libtpu: 0.0.40
codegen_flags: <defaults>
</compile_context>

<pallas_src>
import jax
import jax.numpy as jnp
from jax.experimental import pallas as pl
from jax.experimental.pallas import tpu as pltpu


def _conv_stride2(a_ref, w_ref, b_ref, ho, wo, relu):
    """Stride-2 3x3 conv as 3 kw-folded matmuls.

    a_ref : (2*ho+2, wo, 3*cin) f32 scratch,
            A[h, j, kw*cin + c] = x_pad[h, 2j+kw, c]
            (for the width-covering conv4, j is the unstrided column w').
    w_ref : (3, 3*cin, cout) bf16, rows ordered kw*cin + c.
    b_ref : (1, cout) f32.
    Returns (ho*wo, cout) f32, rows in (i, j) row-major order.
    """
    k3 = a_ref.shape[-1]
    acc = None
    for kh in range(3):
        blk = a_ref[kh:kh + 2 * ho, :, :]                  # (2*ho, wo, 3cin)
        blk = blk.reshape(ho, 2, wo, k3)[:, 0]             # heights kh + 2*i
        lhs = blk.reshape(ho * wo, k3).astype(jnp.bfloat16)
        p = jnp.dot(lhs, w_ref[kh], preferred_element_type=jnp.float32)
        acc = p if acc is None else acc + p
    acc = acc + b_ref[...]
    return jnp.maximum(acc, 0.0) if relu else acc


def _encoder_kernel(x_ref, w1_ref, b1_ref, w2_ref, b2_ref, w3_ref, b3_ref,
                    w4_ref, b4_ref, wfc_ref, bfc_ref, o_ref,
                    a2_ref, a3_ref, a4_ref, y1_ref, y2_ref, y4_ref):
    """Whole VAE encoder for one image; all intermediates stay in VMEM."""
    f32 = jnp.float32

    # ---- conv1: 32x32x(3->pad8, kw-folded K=24) -> 32x32x32, stride 1 -------
    acc = None
    for kh in range(3):
        lhs = x_ref[0, pl.ds(kh * 32, 1024), :]            # (1024, 24) bf16
        p = jnp.dot(lhs, w1_ref[kh], preferred_element_type=f32)
        acc = p if acc is None else acc + p
    y1_ref[...] = jnp.maximum(acc + b1_ref[...], 0.0)      # (1024, 32) f32

    # ---- build a2 : A2[h, j, kw*32+c] = y1_pad[h, 2j+kw, c] ------------------
    ev = y1_ref[pl.ds(0, 512, 2), :].reshape(32, 16, 32)   # y1[i, 2j]
    od = y1_ref[pl.ds(1, 512, 2), :].reshape(32, 16, 32)   # y1[i, 2j+1]
    a2_ref[0:1, :, :] = jnp.zeros((1, 16, 96), f32)        # top halo row
    a2_ref[33:34, :, :] = jnp.zeros((1, 16, 96), f32)      # bottom halo row
    a2_ref[1:33, 0:1, 0:32] = jnp.zeros((32, 1, 32), f32)  # left pad (kw=0)
    a2_ref[1:33, 1:16, 0:32] = od[:, 0:15, :]              # kw=0 block
    a2_ref[1:33, :, 32:64] = ev                            # kw=1 block
    a2_ref[1:33, :, 64:96] = od                            # kw=2 block

    # ---- conv2: 32x32x32 -> 16x16x64, stride 2 -------------------------------
    y2_ref[...] = _conv_stride2(a2_ref, w2_ref, b2_ref, 16, 16, True)  # (256,64)

    # ---- build a3 : A3[h, j, kw*64+c] = y2_pad[h, 2j+kw, c] ------------------
    ev = y2_ref[pl.ds(0, 128, 2), :].reshape(16, 8, 64)
    od = y2_ref[pl.ds(1, 128, 2), :].reshape(16, 8, 64)
    a3_ref[0:1, :, :] = jnp.zeros((1, 8, 192), f32)
    a3_ref[17:18, :, :] = jnp.zeros((1, 8, 192), f32)
    a3_ref[1:17, 0:1, 0:64] = jnp.zeros((16, 1, 64), f32)
    a3_ref[1:17, 1:8, 0:64] = od[:, 0:7, :]
    a3_ref[1:17, :, 64:128] = ev
    a3_ref[1:17, :, 128:192] = od

    # ---- conv3: 16x16x64 -> 8x8x128, stride 2 --------------------------------
    y3 = _conv_stride2(a3_ref, w3_ref, b3_ref, 8, 8, True)             # (64,128)

    # ---- build a4 (width-covering): A4[h, w, kw*128+c] = y3_pad[h, w+kw, c] --
    y3r = y3.reshape(8, 8, 128)
    a4_ref[0:1, :, :] = jnp.zeros((1, 8, 384), f32)
    a4_ref[9:10, :, :] = jnp.zeros((1, 8, 384), f32)
    a4_ref[1:9, 0:1, 0:128] = jnp.zeros((8, 1, 128), f32)  # left pad (kw=0)
    a4_ref[1:9, 1:8, 0:128] = y3r[:, 0:7, :]               # kw=0 block
    a4_ref[1:9, :, 128:256] = y3r                          # kw=1 block
    a4_ref[1:9, 0:7, 256:384] = y3r[:, 1:8, :]             # kw=2 block
    a4_ref[1:9, 7:8, 256:384] = jnp.zeros((8, 1, 128), f32)  # right pad (kw=2)

    # ---- conv4: 8x8x128 -> 4x(4 of 8)x256, stride 2 (width-covering), no ReLU
    y4_ref[...] = _conv_stride2(a4_ref, w4_ref, b4_ref, 4, 8, False)   # (32,256)

    # ---- Linear(4096 -> 2*latent); one bf16 matmul ---------------------------
    # Needed conv4 pixels (i, j) live at covering rows i*8 + 2j == 2*k, k=i*4+j.
    pieces = [y4_ref[pl.ds(2 * k, 1), :].astype(jnp.bfloat16) for k in range(16)]
    fc_in = jnp.concatenate(pieces, axis=1)                # (1, 4096) bf16
    z = jnp.dot(fc_in, wfc_ref[...], preferred_element_type=f32) + bfc_ref[...]
    o_ref[0] = z


def encoder_forward_fused(fp, a1):
    """a1: (N, 1088, 24) bf16 -- kw-folded, zero-padded conv1 input."""
    n = a1.shape[0]
    l2 = fp["bfc"].shape[-1]

    macs = (3 * (1024 * 24 * 32 + 256 * 96 * 64 + 64 * 192 * 128
                 + 32 * 384 * 256) + 4096 * l2)
    weight_bytes = sum(int(v.size) * v.dtype.itemsize for v in fp.values())
    cost = pl.CostEstimate(
        flops=2 * macs * n, transcendentals=0,
        bytes_accessed=int(a1.size) * 2 + n * l2 * 4 + weight_bytes)

    out = pl.pallas_call(
        _encoder_kernel,
        out_shape=jax.ShapeDtypeStruct((n, 1, l2), jnp.float32),
        grid=(n,),
        in_specs=[
            pl.BlockSpec((1, 1088, 24), lambda b: (b, 0, 0)),   # a1
            pl.BlockSpec((3, 24, 32), lambda b: (0, 0, 0)),     # w1 (kw-folded)
            pl.BlockSpec((1, 32), lambda b: (0, 0)),            # b1
            pl.BlockSpec((3, 96, 64), lambda b: (0, 0, 0)),     # w2
            pl.BlockSpec((1, 64), lambda b: (0, 0)),            # b2
            pl.BlockSpec((3, 192, 128), lambda b: (0, 0, 0)),   # w3
            pl.BlockSpec((1, 128), lambda b: (0, 0)),           # b3
            pl.BlockSpec((3, 384, 256), lambda b: (0, 0, 0)),   # w4
            pl.BlockSpec((1, 256), lambda b: (0, 0)),           # b4
            pl.BlockSpec((4096, l2), lambda b: (0, 0)),         # wfc (flatten folded)
            pl.BlockSpec((1, l2), lambda b: (0, 0)),            # bfc
        ],
        out_specs=pl.BlockSpec((1, 1, l2), lambda b: (b, 0, 0)),
        scratch_shapes=[
            pltpu.VMEM((34, 16, 96), jnp.float32),   # a2: conv2 kw-folded input
            pltpu.VMEM((18, 8, 192), jnp.float32),   # a3: conv3 kw-folded input
            pltpu.VMEM((10, 8, 384), jnp.float32),   # a4: conv4 kw-folded input
            pltpu.VMEM((1024, 32), jnp.float32),     # y1: conv1 output
            pltpu.VMEM((256, 64), jnp.float32),      # y2: conv2 output
            pltpu.VMEM((32, 256), jnp.float32),      # y4: conv4 covering output
        ],
        compiler_params=pltpu.CompilerParams(
            dimension_semantics=("parallel",),
            vmem_limit_bytes=32 * 1024 * 1024),
        cost_estimate=cost,
    )(a1, fp["w1"], fp["b1"], fp["w2"], fp["b2"], fp["w3"], fp["b3"],
      fp["w4"], fp["b4"], fp["wfc"], fp["bfc"])
    return out[:, 0, :]


# ------------------------------- parameters -----------------------------------
def init_params(key, latent_dim):
    def _conv_w(k, cin, cout):
        return (jax.random.normal(k, (3, 3, cin, cout), jnp.float32)
                / jnp.sqrt(9.0 * cin))

    ks = jax.random.split(key, 10)
    return {
        "w1": _conv_w(ks[0], 3, 32), "b1": 0.01 * jax.random.normal(ks[1], (32,)),
        "w2": _conv_w(ks[2], 32, 64), "b2": 0.01 * jax.random.normal(ks[3], (64,)),
        "w3": _conv_w(ks[4], 64, 128), "b3": 0.01 * jax.random.normal(ks[5], (128,)),
        "w4": _conv_w(ks[6], 128, 256), "b4": 0.01 * jax.random.normal(ks[7], (256,)),
        "wfc": jax.random.normal(ks[8], (4096, 2 * latent_dim), jnp.float32)
               / jnp.sqrt(4096.0),
        "bfc": 0.01 * jax.random.normal(ks[9], (2 * latent_dim,)),
    }


def prepare_fused_params(params):
    """One-time repack of HWIO / PyTorch-layout weights into the kernel layout."""
    def taps(w, cin_pad=None):
        # w: (3, 3, cin, cout) HWIO -> (3, 3*cin, cout), rows kw*cin + c, bf16
        cin, cout = w.shape[2], w.shape[3]
        if cin_pad is not None and cin < cin_pad:
            w = jnp.pad(w, ((0, 0), (0, 0), (0, cin_pad - cin), (0, 0)))
        return w.reshape(3, -1, cout).astype(jnp.bfloat16)

    l2 = params["wfc"].shape[1]
    # Fold PyTorch's NCHW flatten into the FC weight:
    # flatten index c*16 + k  ->  kernel FC input index k*256 + c.
    wfc_k = (params["wfc"].reshape(256, 16, l2).transpose(1, 0, 2)
             .reshape(4096, l2).astype(jnp.bfloat16))

    return {
        "w1": taps(params["w1"], cin_pad=8),
        "w2": taps(params["w2"]),
        "w3": taps(params["w3"]),
        "w4": taps(params["w4"]),
        "b1": params["b1"].reshape(1, -1).astype(jnp.float32),
        "b2": params["b2"].reshape(1, -1).astype(jnp.float32),
        "b3": params["b3"].reshape(1, -1).astype(jnp.float32),
        "b4": params["b4"].reshape(1, -1).astype(jnp.float32),
        "wfc": wfc_k,
        "bfc": params["bfc"].reshape(1, -1).astype(jnp.float32),
    }


# ------------------------------ forward pass ----------------------------------
@jax.jit
def vae_encoder_forward(fused_params, x_nchw):
    n = x_nchw.shape[0]
    x = jnp.transpose(x_nchw, (0, 2, 3, 1)).astype(jnp.float32)     # (n,32,32,3)
    xp = jnp.pad(x, ((0, 0), (1, 1), (1, 1), (0, 5)))               # (n,34,34,8)
    # kw-folded conv1 input: A1[n, h, w, kw*8+c] = x_pad[n, h, w+kw, c]
    a1 = jnp.concatenate(
        [xp[:, :, 0:32, :], xp[:, :, 1:33, :], xp[:, :, 2:34, :]], axis=-1)
    a1 = a1.reshape(n, 34 * 32, 24).astype(jnp.bfloat16)            # (n,1088,24)
    z = encoder_forward_fused(fused_params, a1)                     # (n, 2*latent)
    latent = z.shape[1] // 2
    return z[:, :latent], z[:, latent:]                             # torch.chunk(2,1)


# ---------------------------- pure-JAX reference ------------------------------
def reference_forward(params, x_nchw):
    def conv(x, w_hwio, b, stride, relu):
        y = jax.lax.conv_general_dilated(
            x, w_hwio, window_strides=(stride, stride),
            padding=((1, 1), (1, 1)),
            dimension_numbers=("NCHW", "HWIO", "NCHW"))
        y = y + b.reshape(1, -1, 1, 1)
        return jnp.maximum(y, 0.0) if relu else y

    x = conv(x_nchw, params["w1"], params["b1"], 1, True)
    x = conv(x, params["w2"], params["b2"], 2, True)
    x = conv(x, params["w3"], params["b3"], 2, True)
    x = conv(x, params["w4"], params["b4"], 2, False)
    x = x.reshape(x.shape[0], -1)                                   # NCHW flatten
    z = x @ params["wfc"] + params["bfc"]
    latent = z.shape[1] // 2
    return z[:, :latent], z[:, latent:]


# ----------------------------------- main --------------------------------------
if __name__ == "__main__":
    key = jax.random.PRNGKey(0)
    k_param, k_x = jax.random.split(key)

    latent_dim = 16
    # Spatial size must be 32 so that 256 * 4 * 4 == 4096 feeds the Linear.
    x = jax.random.normal(k_x, (2, 3, 32, 32), jnp.float32)

    params = init_params(k_param, latent_dim)
    fused = prepare_fused_params(params)

    mu, log_std = vae_encoder_forward(fused, x)
    jax.block_until_ready((mu, log_std))

    assert mu.shape == (2, latent_dim) and log_std.shape == (2, latent_dim)

    mu_ref, log_std_ref = reference_forward(params, x)
    # bf16 MXU inputs with f32 accumulation -> bf16-level comparison tolerance.
    assert jnp.allclose(mu, mu_ref, atol=2e-2, rtol=2e-2), \
        float(jnp.max(jnp.abs(mu - mu_ref)))
    assert jnp.allclose(log_std, log_std_ref, atol=2e-2, rtol=2e-2), \
        float(jnp.max(jnp.abs(log_std - log_std_ref)))

    print("KERNEL_OK")
</pallas_src>

<mosaic_0001>
module attributes {stable_mosaic.version = 11 : i64} {
  func.func @_encoder_kernel(%arg0: i32, %arg1: memref<1x1088x24xbf16, #tpu.memory_space<vmem>>, %arg2: memref<3x24x32xbf16, #tpu.memory_space<vmem>>, %arg3: memref<1x32xf32, #tpu.memory_space<vmem>>, %arg4: memref<3x96x64xbf16, #tpu.memory_space<vmem>>, %arg5: memref<1x64xf32, #tpu.memory_space<vmem>>, %arg6: memref<3x192x128xbf16, #tpu.memory_space<vmem>>, %arg7: memref<1x128xf32, #tpu.memory_space<vmem>>, %arg8: memref<3x384x256xbf16, #tpu.memory_space<vmem>>, %arg9: memref<1x256xf32, #tpu.memory_space<vmem>>, %arg10: memref<4096x32xbf16, #tpu.memory_space<vmem>>, %arg11: memref<1x32xf32, #tpu.memory_space<vmem>>, %arg12: memref<1x1x32xf32, #tpu.memory_space<vmem>>, %arg13: memref<34x16x96xf32, #tpu.memory_space<vmem>>, %arg14: memref<18x8x192xf32, #tpu.memory_space<vmem>>, %arg15: memref<10x8x384xf32, #tpu.memory_space<vmem>>, %arg16: memref<1024x32xf32, #tpu.memory_space<vmem>>, %arg17: memref<256x64xf32, #tpu.memory_space<vmem>>, %arg18: memref<32x256xf32, #tpu.memory_space<vmem>>) attributes {dimension_semantics = [#tpu.dimension_semantics<parallel>], iteration_bounds = array<i64: 2>, scalar_prefetch = 0 : i64, scratch_operands = 6 : i64, tpu.core_type = #tpu.core_type<tc>, window_params = [{transform_indices = @transform_0, window_bounds = array<i64: 1, 1088, 24>}, {pipeline_mode = #tpu.pipeline_mode<synchronous>, transform_indices = @transform_1, window_bounds = array<i64: 3, 24, 32>}, {pipeline_mode = #tpu.pipeline_mode<synchronous>, transform_indices = @transform_2, window_bounds = array<i64: 1, 32>}, {pipeline_mode = #tpu.pipeline_mode<synchronous>, transform_indices = @transform_3, window_bounds = array<i64: 3, 96, 64>}, {pipeline_mode = #tpu.pipeline_mode<synchronous>, transform_indices = @transform_4, window_bounds = array<i64: 1, 64>}, {pipeline_mode = #tpu.pipeline_mode<synchronous>, transform_indices = @transform_5, window_bounds = array<i64: 3, 192, 128>}, {pipeline_mode = #tpu.pipeline_mode<synchronous>, transform_indices = @transform_6, window_bounds = array<i64: 1, 128>}, {pipeline_mode = #tpu.pipeline_mode<synchronous>, transform_indices = @transform_7, window_bounds = array<i64: 3, 384, 256>}, {pipeline_mode = #tpu.pipeline_mode<synchronous>, transform_indices = @transform_8, window_bounds = array<i64: 1, 256>}, {pipeline_mode = #tpu.pipeline_mode<synchronous>, transform_indices = @transform_9, window_bounds = array<i64: 4096, 32>}, {pipeline_mode = #tpu.pipeline_mode<synchronous>, transform_indices = @transform_10, window_bounds = array<i64: 1, 32>}, {transform_indices = @transform_11, window_bounds = array<i64: 1, 1, 32>}]} {
    %c0 = arith.constant 0 : index
    %c0_0 = arith.constant 0 : index
    %c0_1 = arith.constant 0 : index
    %0 = vector.load %arg1[%c0, %c0_0, %c0_1] : memref<1x1088x24xbf16, #tpu.memory_space<vmem>>, vector<1x1024x24xbf16>
    %1 = vector.shape_cast %0 : vector<1x1024x24xbf16> to vector<1024x24xbf16>
    %c0_2 = arith.constant 0 : index
    %c0_3 = arith.constant 0 : index
    %c0_4 = arith.constant 0 : index
    %2 = vector.load %arg2[%c0_2, %c0_3, %c0_4] : memref<3x24x32xbf16, #tpu.memory_space<vmem>>, vector<1x24x32xbf16>
    %3 = vector.shape_cast %2 : vector<1x24x32xbf16> to vector<24x32xbf16>
    %cst = arith.constant dense<0.000000e+00> : vector<1024x32xf32>
    %4 = tpu.matmul %1, %3, %cst {dimension_numbers = #tpu.dot_dimension_numbers<[1], [0], [0], [1], [0, 0, 1, 1], [], []>} : vector<1024x24xbf16>, vector<24x32xbf16>, vector<1024x32xf32> -> vector<1024x32xf32>
    %c0_5 = arith.constant 0 : index
    %c32 = arith.constant 32 : index
    %c0_6 = arith.constant 0 : index
    %5 = vector.load %arg1[%c0_5, %c32, %c0_6] : memref<1x1088x24xbf16, #tpu.memory_space<vmem>>, vector<1x1024x24xbf16>
    %6 = vector.shape_cast %5 : vector<1x1024x24xbf16> to vector<1024x24xbf16>
    %c1 = arith.constant 1 : index
    %c0_7 = arith.constant 0 : index
    %c0_8 = arith.constant 0 : index
    %7 = vector.load %arg2[%c1, %c0_7, %c0_8] : memref<3x24x32xbf16, #tpu.memory_space<vmem>>, vector<1x24x32xbf16>
    %8 = vector.shape_cast %7 : vector<1x24x32xbf16> to vector<24x32xbf16>
    %cst_9 = arith.constant dense<0.000000e+00> : vector<1024x32xf32>
    %9 = tpu.matmul %6, %8, %cst_9 {dimension_numbers = #tpu.dot_dimension_numbers<[1], [0], [0], [1], [0, 0, 1, 1], [], []>} : vector<1024x24xbf16>, vector<24x32xbf16>, vector<1024x32xf32> -> vector<1024x32xf32>
    %10 = arith.addf %4, %9 : vector<1024x32xf32>
    %c0_10 = arith.constant 0 : index
    %c64 = arith.constant 64 : index
    %c0_11 = arith.constant 0 : index
    %11 = vector.load %arg1[%c0_10, %c64, %c0_11] : memref<1x1088x24xbf16, #tpu.memory_space<vmem>>, vector<1x1024x24xbf16>
    %12 = vector.shape_cast %11 : vector<1x1024x24xbf16> to vector<1024x24xbf16>
    %c2 = arith.constant 2 : index
    %c0_12 = arith.constant 0 : index
    %c0_13 = arith.constant 0 : index
    %13 = vector.load %arg2[%c2, %c0_12, %c0_13] : memref<3x24x32xbf16, #tpu.memory_space<vmem>>, vector<1x24x32xbf16>
    %14 = vector.shape_cast %13 : vector<1x24x32xbf16> to vector<24x32xbf16>
    %cst_14 = arith.constant dense<0.000000e+00> : vector<1024x32xf32>
    %15 = tpu.matmul %12, %14, %cst_14 {dimension_numbers = #tpu.dot_dimension_numbers<[1], [0], [0], [1], [0, 0, 1, 1], [], []>} : vector<1024x24xbf16>, vector<24x32xbf16>, vector<1024x32xf32> -> vector<1024x32xf32>
    %16 = arith.addf %10, %15 : vector<1024x32xf32>
    %c0_15 = arith.constant 0 : index
    %c0_16 = arith.constant 0 : index
    %17 = vector.load %arg3[%c0_15, %c0_16] : memref<1x32xf32, #tpu.memory_space<vmem>>, vector<1x32xf32>
    %18 = vector.broadcast %17 : vector<1x32xf32> to vector<1024x32xf32>
    %19 = arith.addf %16, %18 : vector<1024x32xf32>
    %cst_17 = arith.constant 0.000000e+00 : f32
    %20 = vector.broadcast %cst_17 : f32 to vector<1024x32xf32>
    %21 = arith.maximumf %19, %20 : vector<1024x32xf32>
    %c0_18 = arith.constant 0 : index
    %c0_19 = arith.constant 0 : index
    %22 = vector.load %arg16[%c0_18, %c0_19] : memref<1024x32xf32, #tpu.memory_space<vmem>>, vector<1024x32xf32>
    tpu.vector_store %arg16[%c0_18, %c0_19], %21 {strides = array<i32>} : memref<1024x32xf32, #tpu.memory_space<vmem>>, vector<1024x32xf32>,
    %c0_20 = arith.constant 0 : index
    %c0_21 = arith.constant 0 : index
    %23 = tpu.strided_load %arg16[%c0_20, %c0_21] {strides = array<i32: 2, 1>} : memref<1024x32xf32, #tpu.memory_space<vmem>>, vector<512x32xf32>
    %24 = vector.shape_cast %23 : vector<512x32xf32> to vector<32x16x32xf32>
    %c1_22 = arith.constant 1 : index
    %c0_23 = arith.constant 0 : index
    %25 = tpu.strided_load %arg16[%c1_22, %c0_23] {strides = array<i32: 2, 1>} : memref<1024x32xf32, #tpu.memory_space<vmem>>, vector<512x32xf32>
    %26 = vector.shape_cast %25 : vector<512x32xf32> to vector<32x16x32xf32>
    %cst_24 = arith.constant 0.000000e+00 : f32
    %27 = vector.broadcast %cst_24 : f32 to vector<1x16x96xf32>
    %c0_25 = arith.constant 0 : index
    %c0_26 = arith.constant 0 : index
    %c0_27 = arith.constant 0 : index
    %28 = vector.load %arg13[%c0_25, %c0_26, %c0_27] : memref<34x16x96xf32, #tpu.memory_space<vmem>>, vector<1x16x96xf32>
    tpu.vector_store %arg13[%c0_25, %c0_26, %c0_27], %27 {strides = array<i32>} : memref<34x16x96xf32, #tpu.memory_space<vmem>>, vector<1x16x96xf32>,
    %cst_28 = arith.constant 0.000000e+00 : f32
    %29 = vector.broadcast %cst_28 : f32 to vector<1x16x96xf32>
    %c33 = arith.constant 33 : index
    %c0_29 = arith.constant 0 : index
    %c0_30 = arith.constant 0 : index
    %30 = vector.load %arg13[%c33, %c0_29, %c0_30] : memref<34x16x96xf32, #tpu.memory_space<vmem>>, vector<1x16x96xf32>
    tpu.vector_store %arg13[%c33, %c0_29, %c0_30], %29 {strides = array<i32>} : memref<34x16x96xf32, #tpu.memory_space<vmem>>, vector<1x16x96xf32>,
    %cst_31 = arith.constant 0.000000e+00 : f32
    %31 = vector.broadcast %cst_31 : f32 to vector<32x1x32xf32>
    %c1_32 = arith.constant 1 : index
    %c0_33 = arith.constant 0 : index
    %c0_34 = arith.constant 0 : index
    %32 = vector.load %arg13[%c1_32, %c0_33, %c0_34] : memref<34x16x96xf32, #tpu.memory_space<vmem>>, vector<32x1x32xf32>
    tpu.vector_store %arg13[%c1_32, %c0_33, %c0_34], %31 {strides = array<i32>} : memref<34x16x96xf32, #tpu.memory_space<vmem>>, vector<32x1x32xf32>,
    %33 = vector.extract_strided_slice %26 {offsets = [0, 0, 0], sizes = [32, 15, 32], strides = [1, 1, 1]} : vector<32x16x32xf32> to vector<32x15x32xf32>
    %c1_35 = arith.constant 1 : index
    %c1_36 = arith.constant 1 : index
    %c0_37 = arith.constant 0 : index
    %34 = vector.load %arg13[%c1_35, %c1_36, %c0_37] : memref<34x16x96xf32, #tpu.memory_space<vmem>>, vector<32x15x32xf32>
    tpu.vector_store %arg13[%c1_35, %c1_36, %c0_37], %33 {strides = array<i32>} : memref<34x16x96xf32, #tpu.memory_space<vmem>>, vector<32x15x32xf32>,
    %c1_38 = arith.constant 1 : index
    %c0_39 = arith.constant 0 : index
    %c32_40 = arith.constant 32 : index
    %35 = vector.load %arg13[%c1_38, %c0_39, %c32_40] : memref<34x16x96xf32, #tpu.memory_space<vmem>>, vector<32x16x32xf32>
    tpu.vector_store %arg13[%c1_38, %c0_39, %c32_40], %24 {strides = array<i32>} : memref<34x16x96xf32, #tpu.memory_space<vmem>>, vector<32x16x32xf32>,
    %c1_41 = arith.constant 1 : index
    %c0_42 = arith.constant 0 : index
    %c64_43 = arith.constant 64 : index
    %36 = vector.load %arg13[%c1_41, %c0_42, %c64_43] : memref<34x16x96xf32, #tpu.memory_space<vmem>>, vector<32x16x32xf32>
    tpu.vector_store %arg13[%c1_41, %c0_42, %c64_43], %26 {strides = array<i32>} : memref<34x16x96xf32, #tpu.memory_space<vmem>>, vector<32x16x32xf32>,
    %c0_44 = arith.constant 0 : index
    %c0_45 = arith.constant 0 : index
    %c0_46 = arith.constant 0 : index
    %37 = vector.load %arg13[%c0_44, %c0_45, %c0_46] : memref<34x16x96xf32, #tpu.memory_space<vmem>>, vector<32x16x96xf32>
    %38 = vector.shape_cast %37 : vector<32x16x96xf32> to vector<16x2x16x96xf32>
    %39 = vector.extract_strided_slice %38 {offsets = [0, 0, 0, 0], sizes = [16, 1, 16, 96], strides = [1, 1, 1, 1]} : vector<16x2x16x96xf32> to vector<16x1x16x96xf32>
    %40 = vector.shape_cast %39 : vector<16x1x16x96xf32> to vector<16x16x96xf32>
    %41 = vector.shape_cast %40 : vector<16x16x96xf32> to vector<256x96xf32>
    %42 = arith.truncf %41 : vector<256x96xf32> to vector<256x96xbf16>
    %c0_47 = arith.constant 0 : index
    %c0_48 = arith.constant 0 : index
    %c0_49 = arith.constant 0 : index
    %43 = vector.load %arg4[%c0_47, %c0_48, %c0_49] : memref<3x96x64xbf16, #tpu.memory_space<vmem>>, vector<1x96x64xbf16>
    %44 = vector.shape_cast %43 : vector<1x96x64xbf16> to vector<96x64xbf16>
    %cst_50 = arith.constant dense<0.000000e+00> : vector<256x64xf32>
    %45 = tpu.matmul %42, %44, %cst_50 {dimension_numbers = #tpu.dot_dimension_numbers<[1], [0], [0], [1], [0, 0, 1, 1], [], []>} : vector<256x96xbf16>, vector<96x64xbf16>, vector<256x64xf32> -> vector<256x64xf32>
    %c1_51 = arith.constant 1 : index
    %c0_52 = arith.constant 0 : index
    %c0_53 = arith.constant 0 : index
    %46 = vector.load %arg13[%c1_51, %c0_52, %c0_53] : memref<34x16x96xf32, #tpu.memory_space<vmem>>, vector<32x16x96xf32>
    %47 = vector.shape_cast %46 : vector<32x16x96xf32> to vector<16x2x16x96xf32>
    %48 = vector.extract_strided_slice %47 {offsets = [0, 0, 0, 0], sizes = [16, 1, 16, 96], strides = [1, 1, 1, 1]} : vector<16x2x16x96xf32> to vector<16x1x16x96xf32>
    %49 = vector.shape_cast %48 : vector<16x1x16x96xf32> to vector<16x16x96xf32>
    %50 = vector.shape_cast %49 : vector<16x16x96xf32> to vector<256x96xf32>
    %51 = arith.truncf %50 : vector<256x96xf32> to vector<256x96xbf16>
    %c1_54 = arith.constant 1 : index
    %c0_55 = arith.constant 0 : index
    %c0_56 = arith.constant 0 : index
    %52 = vector.load %arg4[%c1_54, %c0_55, %c0_56] : memref<3x96x64xbf16, #tpu.memory_space<vmem>>, vector<1x96x64xbf16>
    %53 = vector.shape_cast %52 : vector<1x96x64xbf16> to vector<96x64xbf16>
    %cst_57 = arith.constant dense<0.000000e+00> : vector<256x64xf32>
    %54 = tpu.matmul %51, %53, %cst_57 {dimension_numbers = #tpu.dot_dimension_numbers<[1], [0], [0], [1], [0, 0, 1, 1], [], []>} : vector<256x96xbf16>, vector<96x64xbf16>, vector<256x64xf32> -> vector<256x64xf32>
    %55 = arith.addf %45, %54 : vector<256x64xf32>
    %c2_58 = arith.constant 2 : index
    %c0_59 = arith.constant 0 : index
    %c0_60 = arith.constant 0 : index
    %56 = vector.load %arg13[%c2_58, %c0_59, %c0_60] : memref<34x16x96xf32, #tpu.memory_space<vmem>>, vector<32x16x96xf32>
    %57 = vector.shape_cast %56 : vector<32x16x96xf32> to vector<16x2x16x96xf32>
    %58 = vector.extract_strided_slice %57 {offsets = [0, 0, 0, 0], sizes = [16, 1, 16, 96], strides = [1, 1, 1, 1]} : vector<16x2x16x96xf32> to vector<16x1x16x96xf32>
    %59 = vector.shape_cast %58 : vector<16x1x16x96xf32> to vector<16x16x96xf32>
    %60 = vector.shape_cast %59 : vector<16x16x96xf32> to vector<256x96xf32>
    %61 = arith.truncf %60 : vector<256x96xf32> to vector<256x96xbf16>
    %c2_61 = arith.constant 2 : index
    %c0_62 = arith.constant 0 : index
    %c0_63 = arith.constant 0 : index
    %62 = vector.load %arg4[%c2_61, %c0_62, %c0_63] : memref<3x96x64xbf16, #tpu.memory_space<vmem>>, vector<1x96x64xbf16>
    %63 = vector.shape_cast %62 : vector<1x96x64xbf16> to vector<96x64xbf16>
    %cst_64 = arith.constant dense<0.000000e+00> : vector<256x64xf32>
    %64 = tpu.matmul %61, %63, %cst_64 {dimension_numbers = #tpu.dot_dimension_numbers<[1], [0], [0], [1], [0, 0, 1, 1], [], []>} : vector<256x96xbf16>, vector<96x64xbf16>, vector<256x64xf32> -> vector<256x64xf32>
    %65 = arith.addf %55, %64 : vector<256x64xf32>
    %c0_65 = arith.constant 0 : index
    %c0_66 = arith.constant 0 : index
    %66 = vector.load %arg5[%c0_65, %c0_66] : memref<1x64xf32, #tpu.memory_space<vmem>>, vector<1x64xf32>
    %67 = vector.broadcast %66 : vector<1x64xf32> to vector<256x64xf32>
    %68 = arith.addf %65, %67 : vector<256x64xf32>
    %cst_67 = arith.constant 0.000000e+00 : f32
    %69 = vector.broadcast %cst_67 : f32 to vector<256x64xf32>
    %70 = arith.maximumf %68, %69 : vector<256x64xf32>
    %c0_68 = arith.constant 0 : index
    %c0_69 = arith.constant 0 : index
    %71 = vector.load %arg17[%c0_68, %c0_69] : memref<256x64xf32, #tpu.memory_space<vmem>>, vector<256x64xf32>
    tpu.vector_store %arg17[%c0_68, %c0_69], %70 {strides = array<i32>} : memref<256x64xf32, #tpu.memory_space<vmem>>, vector<256x64xf32>,
    %c0_70 = arith.constant 0 : index
    %c0_71 = arith.constant 0 : index
    %72 = tpu.strided_load %arg17[%c0_70, %c0_71] {strides = array<i32: 2, 1>} : memref<256x64xf32, #tpu.memory_space<vmem>>, vector<128x64xf32>
    %73 = vector.shape_cast %72 : vector<128x64xf32> to vector<16x8x64xf32>
    %c1_72 = arith.constant 1 : index
    %c0_73 = arith.constant 0 : index
    %74 = tpu.strided_load %arg17[%c1_72, %c0_73] {strides = array<i32: 2, 1>} : memref<256x64xf32, #tpu.memory_space<vmem>>, vector<128x64xf32>
    %75 = vector.shape_cast %74 : vector<128x64xf32> to vector<16x8x64xf32>
    %cst_74 = arith.constant 0.000000e+00 : f32
    %76 = vector.broadcast %cst_74 : f32 to vector<1x8x192xf32>
    %c0_75 = arith.constant 0 : index
    %c0_76 = arith.constant 0 : index
    %c0_77 = arith.constant 0 : index
    %77 = vector.load %arg14[%c0_75, %c0_76, %c0_77] : memref<18x8x192xf32, #tpu.memory_space<vmem>>, vector<1x8x192xf32>
    tpu.vector_store %arg14[%c0_75, %c0_76, %c0_77], %76 {strides = array<i32>} : memref<18x8x192xf32, #tpu.memory_space<vmem>>, vector<1x8x192xf32>,
    %cst_78 = arith.constant 0.000000e+00 : f32
    %78 = vector.broadcast %cst_78 : f32 to vector<1x8x192xf32>
    %c17 = arith.constant 17 : index
    %c0_79 = arith.constant 0 : index
    %c0_80 = arith.constant 0 : index
    %79 = vector.load %arg14[%c17, %c0_79, %c0_80] : memref<18x8x192xf32, #tpu.memory_space<vmem>>, vector<1x8x192xf32>
    tpu.vector_store %arg14[%c17, %c0_79, %c0_80], %78 {strides = array<i32>} : memref<18x8x192xf32, #tpu.memory_space<vmem>>, vector<1x8x192xf32>,
    %cst_81 = arith.constant 0.000000e+00 : f32
    %80 = vector.broadcast %cst_81 : f32 to vector<16x1x64xf32>
    %c1_82 = arith.constant 1 : index
    %c0_83 = arith.constant 0 : index
    %c0_84 = arith.constant 0 : index
    %81 = vector.load %arg14[%c1_82, %c0_83, %c0_84] : memref<18x8x192xf32, #tpu.memory_space<vmem>>, vector<16x1x64xf32>
    tpu.vector_store %arg14[%c1_82, %c0_83, %c0_84], %80 {strides = array<i32>} : memref<18x8x192xf32, #tpu.memory_space<vmem>>, vector<16x1x64xf32>,
    %82 = vector.extract_strided_slice %75 {offsets = [0, 0, 0], sizes = [16, 7, 64], strides = [1, 1, 1]} : vector<16x8x64xf32> to vector<16x7x64xf32>
    %c1_85 = arith.constant 1 : index
    %c1_86 = arith.constant 1 : index
    %c0_87 = arith.constant 0 : index
    %83 = vector.load %arg14[%c1_85, %c1_86, %c0_87] : memref<18x8x192xf32, #tpu.memory_space<vmem>>, vector<16x7x64xf32>
    tpu.vector_store %arg14[%c1_85, %c1_86, %c0_87], %82 {strides = array<i32>} : memref<18x8x192xf32, #tpu.memory_space<vmem>>, vector<16x7x64xf32>,
    %c1_88 = arith.constant 1 : index
    %c0_89 = arith.constant 0 : index
    %c64_90 = arith.constant 64 : index
    %84 = vector.load %arg14[%c1_88, %c0_89, %c64_90] : memref<18x8x192xf32, #tpu.memory_space<vmem>>, vector<16x8x64xf32>
    tpu.vector_store %arg14[%c1_88, %c0_89, %c64_90], %73 {strides = array<i32>} : memref<18x8x192xf32, #tpu.memory_space<vmem>>, vector<16x8x64xf32>,
    %c1_91 = arith.constant 1 : index
    %c0_92 = arith.constant 0 : index
    %c128 = arith.constant 128 : index
    %85 = vector.load %arg14[%c1_91, %c0_92, %c128] : memref<18x8x192xf32, #tpu.memory_space<vmem>>, vector<16x8x64xf32>
    tpu.vector_store %arg14[%c1_91, %c0_92, %c128], %75 {strides = array<i32>} : memref<18x8x192xf32, #tpu.memory_space<vmem>>, vector<16x8x64xf32>,
    %c0_93 = arith.constant 0 : index
    %c0_94 = arith.constant 0 : index
    %c0_95 = arith.constant 0 : index
    %86 = vector.load %arg14[%c0_93, %c0_94, %c0_95] : memref<18x8x192xf32, #tpu.memory_space<vmem>>, vector<16x8x192xf32>
    %87 = vector.shape_cast %86 : vector<16x8x192xf32> to vector<8x2x8x192xf32>
    %88 = vector.extract_strided_slice %87 {offsets = [0, 0, 0, 0], sizes = [8, 1, 8, 192], strides = [1, 1, 1, 1]} : vector<8x2x8x192xf32> to vector<8x1x8x192xf32>
    %89 = vector.shape_cast %88 : vector<8x1x8x192xf32> to vector<8x8x192xf32>
    %90 = vector.shape_cast %89 : vector<8x8x192xf32> to vector<64x192xf32>
    %91 = arith.truncf %90 : vector<64x192xf32> to vector<64x192xbf16>
    %c0_96 = arith.constant 0 : index
    %c0_97 = arith.constant 0 : index
    %c0_98 = arith.constant 0 : index
    %92 = vector.load %arg6[%c0_96, %c0_97, %c0_98] : memref<3x192x128xbf16, #tpu.memory_space<vmem>>, vector<1x192x128xbf16>
    %93 = vector.shape_cast %92 : vector<1x192x128xbf16> to vector<192x128xbf16>
    %cst_99 = arith.constant dense<0.000000e+00> : vector<64x128xf32>
    %94 = tpu.matmul %91, %93, %cst_99 {dimension_numbers = #tpu.dot_dimension_numbers<[1], [0], [0], [1], [0, 0, 1, 1], [], []>} : vector<64x192xbf16>, vector<192x128xbf16>, vector<64x128xf32> -> vector<64x128xf32>
    %c1_100 = arith.constant 1 : index
    %c0_101 = arith.constant 0 : index
    %c0_102 = arith.constant 0 : index
    %95 = vector.load %arg14[%c1_100, %c0_101, %c0_102] : memref<18x8x192xf32, #tpu.memory_space<vmem>>, vector<16x8x192xf32>
    %96 = vector.shape_cast %95 : vector<16x8x192xf32> to vector<8x2x8x192xf32>
    %97 = vector.extract_strided_slice %96 {offsets = [0, 0, 0, 0], sizes = [8, 1, 8, 192], strides = [1, 1, 1, 1]} : vector<8x2x8x192xf32> to vector<8x1x8x192xf32>
    %98 = vector.shape_cast %97 : vector<8x1x8x192xf32> to vector<8x8x192xf32>
    %99 = vector.shape_cast %98 : vector<8x8x192xf32> to vector<64x192xf32>
    %100 = arith.truncf %99 : vector<64x192xf32> to vector<64x192xbf16>
    %c1_103 = arith.constant 1 : index
    %c0_104 = arith.constant 0 : index
    %c0_105 = arith.constant 0 : index
    %101 = vector.load %arg6[%c1_103, %c0_104, %c0_105] : memref<3x192x128xbf16, #tpu.memory_space<vmem>>, vector<1x192x128xbf16>
    %102 = vector.shape_cast %101 : vector<1x192x128xbf16> to vector<192x128xbf16>
    %cst_106 = arith.constant dense<0.000000e+00> : vector<64x128xf32>
    %103 = tpu.matmul %100, %102, %cst_106 {dimension_numbers = #tpu.dot_dimension_numbers<[1], [0], [0], [1], [0, 0, 1, 1], [], []>} : vector<64x192xbf16>, vector<192x128xbf16>, vector<64x128xf32> -> vector<64x128xf32>
    %104 = arith.addf %94, %103 : vector<64x128xf32>
    %c2_107 = arith.constant 2 : index
    %c0_108 = arith.constant 0 : index
    %c0_109 = arith.constant 0 : index
    %105 = vector.load %arg14[%c2_107, %c0_108, %c0_109] : memref<18x8x192xf32, #tpu.memory_space<vmem>>, vector<16x8x192xf32>
    %106 = vector.shape_cast %105 : vector<16x8x192xf32> to vector<8x2x8x192xf32>
    %107 = vector.extract_strided_slice %106 {offsets = [0, 0, 0, 0], sizes = [8, 1, 8, 192], strides = [1, 1, 1, 1]} : vector<8x2x8x192xf32> to vector<8x1x8x192xf32>
    %108 = vector.shape_cast %107 : vector<8x1x8x192xf32> to vector<8x8x192xf32>
    %109 = vector.shape_cast %108 : vector<8x8x192xf32> to vector<64x192xf32>
    %110 = arith.truncf %109 : vector<64x192xf32> to vector<64x192xbf16>
    %c2_110 = arith.constant 2 : index
    %c0_111 = arith.constant 0 : index
    %c0_112 = arith.constant 0 : index
    %111 = vector.load %arg6[%c2_110, %c0_111, %c0_112] : memref<3x192x128xbf16, #tpu.memory_space<vmem>>, vector<1x192x128xbf16>
    %112 = vector.shape_cast %111 : vector<1x192x128xbf16> to vector<192x128xbf16>
    %cst_113 = arith.constant dense<0.000000e+00> : vector<64x128xf32>
    %113 = tpu.matmul %110, %112, %cst_113 {dimension_numbers = #tpu.dot_dimension_numbers<[1], [0], [0], [1], [0, 0, 1, 1], [], []>} : vector<64x192xbf16>, vector<192x128xbf16>, vector<64x128xf32> -> vector<64x128xf32>
    %114 = arith.addf %104, %113 : vector<64x128xf32>
    %c0_114 = arith.constant 0 : index
    %c0_115 = arith.constant 0 : index
    %115 = vector.load %arg7[%c0_114, %c0_115] : memref<1x128xf32, #tpu.memory_space<vmem>>, vector<1x128xf32>
    %116 = vector.broadcast %115 : vector<1x128xf32> to vector<64x128xf32>
    %117 = arith.addf %114, %116 : vector<64x128xf32>
    %cst_116 = arith.constant 0.000000e+00 : f32
    %118 = vector.broadcast %cst_116 : f32 to vector<64x128xf32>
    %119 = arith.maximumf %117, %118 : vector<64x128xf32>
    %120 = vector.shape_cast %119 : vector<64x128xf32> to vector<8x8x128xf32>
    %cst_117 = arith.constant 0.000000e+00 : f32
    %121 = vector.broadcast %cst_117 : f32 to vector<1x8x384xf32>
    %c0_118 = arith.constant 0 : index
    %c0_119 = arith.constant 0 : index
    %c0_120 = arith.constant 0 : index
    %122 = vector.load %arg15[%c0_118, %c0_119, %c0_120] : memref<10x8x384xf32, #tpu.memory_space<vmem>>, vector<1x8x384xf32>
    tpu.vector_store %arg15[%c0_118, %c0_119, %c0_120], %121 {strides = array<i32>} : memref<10x8x384xf32, #tpu.memory_space<vmem>>, vector<1x8x384xf32>,
    %cst_121 = arith.constant 0.000000e+00 : f32
    %123 = vector.broadcast %cst_121 : f32 to vector<1x8x384xf32>
    %c9 = arith.constant 9 : index
    %c0_122 = arith.constant 0 : index
    %c0_123 = arith.constant 0 : index
    %124 = vector.load %arg15[%c9, %c0_122, %c0_123] : memref<10x8x384xf32, #tpu.memory_space<vmem>>, vector<1x8x384xf32>
    tpu.vector_store %arg15[%c9, %c0_122, %c0_123], %123 {strides = array<i32>} : memref<10x8x384xf32, #tpu.memory_space<vmem>>, vector<1x8x384xf32>,
    %cst_124 = arith.constant 0.000000e+00 : f32
    %125 = vector.broadcast %cst_124 : f32 to vector<8x1x128xf32>
    %c1_125 = arith.constant 1 : index
    %c0_126 = arith.constant 0 : index
    %c0_127 = arith.constant 0 : index
    %126 = vector.load %arg15[%c1_125, %c0_126, %c0_127] : memref<10x8x384xf32, #tpu.memory_space<vmem>>, vector<8x1x128xf32>
    tpu.vector_store %arg15[%c1_125, %c0_126, %c0_127], %125 {strides = array<i32>} : memref<10x8x384xf32, #tpu.memory_space<vmem>>, vector<8x1x128xf32>,
    %127 = vector.extract_strided_slice %120 {offsets = [0, 0, 0], sizes = [8, 7, 128], strides = [1, 1, 1]} : vector<8x8x128xf32> to vector<8x7x128xf32>
    %c1_128 = arith.constant 1 : index
    %c1_129 = arith.constant 1 : index
    %c0_130 = arith.constant 0 : index
    %128 = vector.load %arg15[%c1_128, %c1_129, %c0_130] : memref<10x8x384xf32, #tpu.memory_space<vmem>>, vector<8x7x128xf32>
    tpu.vector_store %arg15[%c1_128, %c1_129, %c0_130], %127 {strides = array<i32>} : memref<10x8x384xf32, #tpu.memory_space<vmem>>, vector<8x7x128xf32>,
    %c1_131 = arith.constant 1 : index
    %c0_132 = arith.constant 0 : index
    %c128_133 = arith.constant 128 : index
    %129 = vector.load %arg15[%c1_131, %c0_132, %c128_133] : memref<10x8x384xf32, #tpu.memory_space<vmem>>, vector<8x8x128xf32>
    tpu.vector_store %arg15[%c1_131, %c0_132, %c128_133], %120 {strides = array<i32>} : memref<10x8x384xf32, #tpu.memory_space<vmem>>, vector<8x8x128xf32>,
    %130 = vector.extract_strided_slice %120 {offsets = [0, 1, 0], sizes = [8, 7, 128], strides = [1, 1, 1]} : vector<8x8x128xf32> to vector<8x7x128xf32>
    %c1_134 = arith.constant 1 : index
    %c0_135 = arith.constant 0 : index
    %c256 = arith.constant 256 : index
    %131 = vector.load %arg15[%c1_134, %c0_135, %c256] : memref<10x8x384xf32, #tpu.memory_space<vmem>>, vector<8x7x128xf32>
    tpu.vector_store %arg15[%c1_134, %c0_135, %c256], %130 {strides = array<i32>} : memref<10x8x384xf32, #tpu.memory_space<vmem>>, vector<8x7x128xf32>,
    %cst_136 = arith.constant 0.000000e+00 : f32
    %132 = vector.broadcast %cst_136 : f32 to vector<8x1x128xf32>
    %c1_137 = arith.constant 1 : index
    %c7 = arith.constant 7 : index
    %c256_138 = arith.constant 256 : index
    %133 = vector.load %arg15[%c1_137, %c7, %c256_138] : memref<10x8x384xf32, #tpu.memory_space<vmem>>, vector<8x1x128xf32>
    tpu.vector_store %arg15[%c1_137, %c7, %c256_138], %132 {strides = array<i32>} : memref<10x8x384xf32, #tpu.memory_space<vmem>>, vector<8x1x128xf32>,
    %c0_139 = arith.constant 0 : index
    %c0_140 = arith.constant 0 : index
    %c0_141 = arith.constant 0 : index
    %134 = vector.load %arg15[%c0_139, %c0_140, %c0_141] : memref<10x8x384xf32, #tpu.memory_space<vmem>>, vector<8x8x384xf32>
    %135 = vector.shape_cast %134 : vector<8x8x384xf32> to vector<4x2x8x384xf32>
    %136 = vector.extract_strided_slice %135 {offsets = [0, 0, 0, 0], sizes = [4, 1, 8, 384], strides = [1, 1, 1, 1]} : vector<4x2x8x384xf32> to vector<4x1x8x384xf32>
    %137 = vector.shape_cast %136 : vector<4x1x8x384xf32> to vector<4x8x384xf32>
    %138 = vector.shape_cast %137 : vector<4x8x384xf32> to vector<32x384xf32>
    %139 = arith.truncf %138 : vector<32x384xf32> to vector<32x384xbf16>
    %c0_142 = arith.constant 0 : index
    %c0_143 = arith.constant 0 : index
    %c0_144 = arith.constant 0 : index
    %140 = vector.load %arg8[%c0_142, %c0_143, %c0_144] : memref<3x384x256xbf16, #tpu.memory_space<vmem>>, vector<1x384x256xbf16>
    %141 = vector.shape_cast %140 : vector<1x384x256xbf16> to vector<384x256xbf16>
    %cst_145 = arith.constant dense<0.000000e+00> : vector<32x256xf32>
    %142 = tpu.matmul %139, %141, %cst_145 {dimension_numbers = #tpu.dot_dimension_numbers<[1], [0], [0], [1], [0, 0, 1, 1], [], []>} : vector<32x384xbf16>, vector<384x256xbf16>, vector<32x256xf32> -> vector<32x256xf32>
    %c1_146 = arith.constant 1 : index
    %c0_147 = arith.constant 0 : index
    %c0_148 = arith.constant 0 : index
    %143 = vector.load %arg15[%c1_146, %c0_147, %c0_148] : memref<10x8x384xf32, #tpu.memory_space<vmem>>, vector<8x8x384xf32>
    %144 = vector.shape_cast %143 : vector<8x8x384xf32> to vector<4x2x8x384xf32>
    %145 = vector.extract_strided_slice %144 {offsets = [0, 0, 0, 0], sizes = [4, 1, 8, 384], strides = [1, 1, 1, 1]} : vector<4x2x8x384xf32> to vector<4x1x8x384xf32>
    %146 = vector.shape_cast %145 : vector<4x1x8x384xf32> to vector<4x8x384xf32>
    %147 = vector.shape_cast %146 : vector<4x8x384xf32> to vector<32x384xf32>
    %148 = arith.truncf %147 : vector<32x384xf32> to vector<32x384xbf16>
    %c1_149 = arith.constant 1 : index
    %c0_150 = arith.constant 0 : index
    %c0_151 = arith.constant 0 : index
    %149 = vector.load %arg8[%c1_149, %c0_150, %c0_151] : memref<3x384x256xbf16, #tpu.memory_space<vmem>>, vector<1x384x256xbf16>
    %150 = vector.shape_cast %149 : vector<1x384x256xbf16> to vector<384x256xbf16>
    %cst_152 = arith.constant dense<0.000000e+00> : vector<32x256xf32>
    %151 = tpu.matmul %148, %150, %cst_152 {dimension_numbers = #tpu.dot_dimension_numbers<[1], [0], [0], [1], [0, 0, 1, 1], [], []>} : vector<32x384xbf16>, vector<384x256xbf16>, vector<32x256xf32> -> vector<32x256xf32>
    %152 = arith.addf %142, %151 : vector<32x256xf32>
    %c2_153 = arith.constant 2 : index
    %c0_154 = arith.constant 0 : index
    %c0_155 = arith.constant 0 : index
    %153 = vector.load %arg15[%c2_153, %c0_154, %c0_155] : memref<10x8x384xf32, #tpu.memory_space<vmem>>, vector<8x8x384xf32>
    %154 = vector.shape_cast %153 : vector<8x8x384xf32> to vector<4x2x8x384xf32>
    %155 = vector.extract_strided_slice %154 {offsets = [0, 0, 0, 0], sizes = [4, 1, 8, 384], strides = [1, 1, 1, 1]} : vector<4x2x8x384xf32> to vector<4x1x8x384xf32>
    %156 = vector.shape_cast %155 : vector<4x1x8x384xf32> to vector<4x8x384xf32>
    %157 = vector.shape_cast %156 : vector<4x8x384xf32> to vector<32x384xf32>
    %158 = arith.truncf %157 : vector<32x384xf32> to vector<32x384xbf16>
    %c2_156 = arith.constant 2 : index
    %c0_157 = arith.constant 0 : index
    %c0_158 = arith.constant 0 : index
    %159 = vector.load %arg8[%c2_156, %c0_157, %c0_158] : memref<3x384x256xbf16, #tpu.memory_space<vmem>>, vector<1x384x256xbf16>
    %160 = vector.shape_cast %159 : vector<1x384x256xbf16> to vector<384x256xbf16>
    %cst_159 = arith.constant dense<0.000000e+00> : vector<32x256xf32>
    %161 = tpu.matmul %158, %160, %cst_159 {dimension_numbers = #tpu.dot_dimension_numbers<[1], [0], [0], [1], [0, 0, 1, 1], [], []>} : vector<32x384xbf16>, vector<384x256xbf16>, vector<32x256xf32> -> vector<32x256xf32>
    %162 = arith.addf %152, %161 : vector<32x256xf32>
    %c0_160 = arith.constant 0 : index
    %c0_161 = arith.constant 0 : index
    %163 = vector.load %arg9[%c0_160, %c0_161] : memref<1x256xf32, #tpu.memory_space<vmem>>, vector<1x256xf32>
    %164 = vector.broadcast %163 : vector<1x256xf32> to vector<32x256xf32>
    %165 = arith.addf %162, %164 : vector<32x256xf32>
    %c0_162 = arith.constant 0 : index
    %c0_163 = arith.constant 0 : index
    %166 = vector.load %arg18[%c0_162, %c0_163] : memref<32x256xf32, #tpu.memory_space<vmem>>, vector<32x256xf32>
    tpu.vector_store %arg18[%c0_162, %c0_163], %165 {strides = array<i32>} : memref<32x256xf32, #tpu.memory_space<vmem>>, vector<32x256xf32>,
    %c0_164 = arith.constant 0 : index
    %c0_165 = arith.constant 0 : index
    %167 = vector.load %arg18[%c0_164, %c0_165] : memref<32x256xf32, #tpu.memory_space<vmem>>, vector<1x256xf32>
    %168 = arith.truncf %167 : vector<1x256xf32> to vector<1x256xbf16>
    %c2_166 = arith.constant 2 : index
    %c0_167 = arith.constant 0 : index
    %169 = vector.load %arg18[%c2_166, %c0_167] : memref<32x256xf32, #tpu.memory_space<vmem>>, vector<1x256xf32>
    %170 = arith.truncf %169 : vector<1x256xf32> to vector<1x256xbf16>
    %c4 = arith.constant 4 : index
    %c0_168 = arith.constant 0 : index
    %171 = vector.load %arg18[%c4, %c0_168] : memref<32x256xf32, #tpu.memory_space<vmem>>, vector<1x256xf32>
    %172 = arith.truncf %171 : vector<1x256xf32> to vector<1x256xbf16>
    %c6 = arith.constant 6 : index
    %c0_169 = arith.constant 0 : index
    %173 = vector.load %arg18[%c6, %c0_169] : memref<32x256xf32, #tpu.memory_space<vmem>>, vector<1x256xf32>
    %174 = arith.truncf %173 : vector<1x256xf32> to vector<1x256xbf16>
    %c8 = arith.constant 8 : index
    %c0_170 = arith.constant 0 : index
    %175 = vector.load %arg18[%c8, %c0_170] : memref<32x256xf32, #tpu.memory_space<vmem>>, vector<1x256xf32>
    %176 = arith.truncf %175 : vector<1x256xf32> to vector<1x256xbf16>
    %c10 = arith.constant 10 : index
    %c0_171 = arith.constant 0 : index
    %177 = vector.load %arg18[%c10, %c0_171] : memref<32x256xf32, #tpu.memory_space<vmem>>, vector<1x256xf32>
    %178 = arith.truncf %177 : vector<1x256xf32> to vector<1x256xbf16>
    %c12 = arith.constant 12 : index
    %c0_172 = arith.constant 0 : index
    %179 = vector.load %arg18[%c12, %c0_172] : memref<32x256xf32, #tpu.memory_space<vmem>>, vector<1x256xf32>
    %180 = arith.truncf %179 : vector<1x256xf32> to vector<1x256xbf16>
    %c14 = arith.constant 14 : index
    %c0_173 = arith.constant 0 : index
    %181 = vector.load %arg18[%c14, %c0_173] : memref<32x256xf32, #tpu.memory_space<vmem>>, vector<1x256xf32>
    %182 = arith.truncf %181 : vector<1x256xf32> to vector<1x256xbf16>
    %c16 = arith.constant 16 : index
    %c0_174 = arith.constant 0 : index
    %183 = vector.load %arg18[%c16, %c0_174] : memref<32x256xf32, #tpu.memory_space<vmem>>, vector<1x256xf32>
    %184 = arith.truncf %183 : vector<1x256xf32> to vector<1x256xbf16>
    %c18 = arith.constant 18 : index
    %c0_175 = arith.constant 0 : index
    %185 = vector.load %arg18[%c18, %c0_175] : memref<32x256xf32, #tpu.memory_space<vmem>>, vector<1x256xf32>
    %186 = arith.truncf %185 : vector<1x256xf32> to vector<1x256xbf16>
    %c20 = arith.constant 20 : index
    %c0_176 = arith.constant 0 : index
    %187 = vector.load %arg18[%c20, %c0_176] : memref<32x256xf32, #tpu.memory_space<vmem>>, vector<1x256xf32>
    %188 = arith.truncf %187 : vector<1x256xf32> to vector<1x256xbf16>
    %c22 = arith.constant 22 : index
    %c0_177 = arith.constant 0 : index
    %189 = vector.load %arg18[%c22, %c0_177] : memref<32x256xf32, #tpu.memory_space<vmem>>, vector<1x256xf32>
    %190 = arith.truncf %189 : vector<1x256xf32> to vector<1x256xbf16>
    %c24 = arith.constant 24 : index
    %c0_178 = arith.constant 0 : index
    %191 = vector.load %arg18[%c24, %c0_178] : memref<32x256xf32, #tpu.memory_space<vmem>>, vector<1x256xf32>
    %192 = arith.truncf %191 : vector<1x256xf32> to vector<1x256xbf16>
    %c26 = arith.constant 26 : index
    %c0_179 = arith.constant 0 : index
    %193 = vector.load %arg18[%c26, %c0_179] : memref<32x256xf32, #tpu.memory_space<vmem>>, vector<1x256xf32>
    %194 = arith.truncf %193 : vector<1x256xf32> to vector<1x256xbf16>
    %c28 = arith.constant 28 : index
    %c0_180 = arith.constant 0 : index
    %195 = vector.load %arg18[%c28, %c0_180] : memref<32x256xf32, #tpu.memory_space<vmem>>, vector<1x256xf32>
    %196 = arith.truncf %195 : vector<1x256xf32> to vector<1x256xbf16>
    %c30 = arith.constant 30 : index
    %c0_181 = arith.constant 0 : index
    %197 = vector.load %arg18[%c30, %c0_181] : memref<32x256xf32, #tpu.memory_space<vmem>>, vector<1x256xf32>
    %198 = arith.truncf %197 : vector<1x256xf32> to vector<1x256xbf16>
    %199 = tpu.concatenate %168, %170, %172, %174, %176, %178, %180, %182, %184, %186, %188, %190, %192, %194, %196, %198 in 1 : vector<1x256xbf16>, vector<1x256xbf16>, vector<1x256xbf16>, vector<1x256xbf16>, vector<1x256xbf16>, vector<1x256xbf16>, vector<1x256xbf16>, vector<1x256xbf16>, vector<1x256xbf16>, vector<1x256xbf16>, vector<1x256xbf16>, vector<1x256xbf16>, vector<1x256xbf16>, vector<1x256xbf16>, vector<1x256xbf16>, vector<1x256xbf16> -> vector<1x4096xbf16>
    %c0_182 = arith.constant 0 : index
    %c0_183 = arith.constant 0 : index
    %200 = vector.load %arg10[%c0_182, %c0_183] : memref<4096x32xbf16, #tpu.memory_space<vmem>>, vector<4096x32xbf16>
    %cst_184 = arith.constant dense<0.000000e+00> : vector<1x32xf32>
    %201 = tpu.matmul %199, %200, %cst_184 {dimension_numbers = #tpu.dot_dimension_numbers<[1], [0], [0], [1], [0, 0, 1, 1], [], []>} : vector<1x4096xbf16>, vector<4096x32xbf16>, vector<1x32xf32> -> vector<1x32xf32>
    %c0_185 = arith.constant 0 : index
    %c0_186 = arith.constant 0 : index
    %202 = vector.load %arg11[%c0_185, %c0_186] : memref<1x32xf32, #tpu.memory_space<vmem>>, vector<1x32xf32>
    %203 = arith.addf %201, %202 : vector<1x32xf32>
    %c0_187 = arith.constant 0 : index
    %c0_188 = arith.constant 0 : index
    %c0_189 = arith.constant 0 : index
    %204 = vector.load %arg12[%c0_187, %c0_188, %c0_189] : memref<1x1x32xf32, #tpu.memory_space<vmem>>, vector<1x1x32xf32>
    %205 = vector.shape_cast %204 : vector<1x1x32xf32> to vector<1x32xf32>
    %206 = vector.shape_cast %203 : vector<1x32xf32> to vector<1x1x32xf32>
    tpu.vector_store %arg12[%c0_187, %c0_188, %c0_189], %206 {strides = array<i32>} : memref<1x1x32xf32, #tpu.memory_space<vmem>>, vector<1x1x32xf32>,
    return
  }
  func.func @transform_0(%arg0: i32) -> (i32, i32, i32) {
    %c0_i32 = arith.constant 0 : i32
    %c0_i32_0 = arith.constant 0 : i32
    %c0_i32_1 = arith.constant 0 : i32
    return %arg0, %c0_i32, %c0_i32_0 : i32, i32, i32
  }
  func.func @transform_1(%arg0: i32) -> (i32, i32, i32) {
    %c0_i32 = arith.constant 0 : i32
    %c0_i32_0 = arith.constant 0 : i32
    %c0_i32_1 = arith.constant 0 : i32
    %c0_i32_2 = arith.constant 0 : i32
    return %c0_i32, %c0_i32_0, %c0_i32_1 : i32, i32, i32
  }
  func.func @transform_2(%arg0: i32) -> (i32, i32) {
    %c0_i32 = arith.constant 0 : i32
    %c0_i32_0 = arith.constant 0 : i32
    %c0_i32_1 = arith.constant 0 : i32
    return %c0_i32, %c0_i32_0 : i32, i32
  }
  func.func @transform_3(%arg0: i32) -> (i32, i32, i32) {
    %c0_i32 = arith.constant 0 : i32
    %c0_i32_0 = arith.constant 0 : i32
    %c0_i32_1 = arith.constant 0 : i32
    %c0_i32_2 = arith.constant 0 : i32
    return %c0_i32, %c0_i32_0, %c0_i32_1 : i32, i32, i32
  }
  func.func @transform_4(%arg0: i32) -> (i32, i32) {
    %c0_i32 = arith.constant 0 : i32
    %c0_i32_0 = arith.constant 0 : i32
    %c0_i32_1 = arith.constant 0 : i32
    return %c0_i32, %c0_i32_0 : i32, i32
  }
  func.func @transform_5(%arg0: i32) -> (i32, i32, i32) {
    %c0_i32 = arith.constant 0 : i32
    %c0_i32_0 = arith.constant 0 : i32
    %c0_i32_1 = arith.constant 0 : i32
    %c0_i32_2 = arith.constant 0 : i32
    return %c0_i32, %c0_i32_0, %c0_i32_1 : i32, i32, i32
  }
  func.func @transform_6(%arg0: i32) -> (i32, i32) {
    %c0_i32 = arith.constant 0 : i32
    %c0_i32_0 = arith.constant 0 : i32
    %c0_i32_1 = arith.constant 0 : i32
    return %c0_i32, %c0_i32_0 : i32, i32
  }
  func.func @transform_7(%arg0: i32) -> (i32, i32, i32) {
    %c0_i32 = arith.constant 0 : i32
    %c0_i32_0 = arith.constant 0 : i32
    %c0_i32_1 = arith.constant 0 : i32
    %c0_i32_2 = arith.constant 0 : i32
    return %c0_i32, %c0_i32_0, %c0_i32_1 : i32, i32, i32
  }
  func.func @transform_8(%arg0: i32) -> (i32, i32) {
    %c0_i32 = arith.constant 0 : i32
    %c0_i32_0 = arith.constant 0 : i32
    %c0_i32_1 = arith.constant 0 : i32
    return %c0_i32, %c0_i32_0 : i32, i32
  }
  func.func @transform_9(%arg0: i32) -> (i32, i32) {
    %c0_i32 = arith.constant 0 : i32
    %c0_i32_0 = arith.constant 0 : i32
    %c0_i32_1 = arith.constant 0 : i32
    return %c0_i32, %c0_i32_0 : i32, i32
  }
  func.func @transform_10(%arg0: i32) -> (i32, i32) {
    %c0_i32 = arith.constant 0 : i32
    %c0_i32_0 = arith.constant 0 : i32
    %c0_i32_1 = arith.constant 0 : i32
    return %c0_i32, %c0_i32_0 : i32, i32
  }
  func.func @transform_11(%arg0: i32) -> (i32, i32, i32) {
    %c0_i32 = arith.constant 0 : i32
    %c0_i32_0 = arith.constant 0 : i32
    %c0_i32_1 = arith.constant 0 : i32
    return %arg0, %c0_i32, %c0_i32_0 : i32, i32, i32
  }
}

</mosaic_0001>

<bundles_post_ra>
// kernel: vae_encoder_forward.1
= control target key start
LH: loop header
LB: loop body
LE: loop exit
PB: predicated region body
PF: predicated region fallthrough
CT: control target
= control target key end

     0   :  { %s14497_s17 = smov 0   ;;  %s17549_s0 = inlined_call_operand.vmem [shape: bf16[2,1088,24], index: 0, kind: input, shape index: {}]   ;;  %s17550_s1 = inlined_call_operand.vmem [shape: bf16[3,24,32], index: 1, kind: input, shape index: {}]   ;;  %s17551_s2 = inlined_call_operand.vmem [shape: f32[1,32], index: 2, kind: input, shape index: {}]   ;;  %s17552_s3 = inlined_call_operand.vmem [shape: bf16[3,96,64], index: 3, kind: input, shape index: {}]   ;;  %s17553_s4 = inlined_call_operand.vmem [shape: f32[1,64], index: 4, kind: input, shape index: {}]   ;;  %s17554_s5 = inlined_call_operand.vmem [shape: bf16[3,192,128], index: 5, kind: input, shape index: {}]   ;;  %s17555_s6 = inlined_call_operand.vmem [shape: f32[1,128], index: 6, kind: input, shape index: {}]   ;;  %s17556_s7 = inlined_call_operand.vmem [shape: bf16[3,384,256], index: 7, kind: input, shape index: {}]   ;;  %s17557_s8 = inlined_call_operand.vmem [shape: f32[1,256], index: 8, kind: input, shape index: {}]   ;;  %s17558_s9 = inlined_call_operand.vmem [shape: bf16[4096,32], index: 9, kind: input, shape index: {}]   ;;  %s17559_s10 = inlined_call_operand.vmem [shape: f32[1,32], index: 10, kind: input, shape index: {}]   ;;  %s17560_s11 = inlined_call_operand.vmem [shape: f32[2,1,32], index: 11, kind: output, shape index: {}]  }
   0x1 LB: > { %s11156_s18 = sadd.s32 4294967295, %s14431_s17   ;;  %p11160_p0 = scmp.ge.s32.totalorder %s14431_s17, 1  ;;  %s14431_s17 = sphi %s14497_s17, %s21_s17  }
   0x2   : > { %p337_p1 = scmp.lt.s32.totalorder %s14431_s17, 3 }
   0x4   : > { %p338_p2 = pnand %p11160_p0, %p337_p1 }
   0x5   : > { %v13703_v0 = vld [vmem:[%s17550_s1 + $0xc] sm:$0xff] (!%p338_p2)   ;;  %vm1045_vm0 = vcmask (!%p338_p2), 1043456   ;;  %v13704_v1 = vld [vmem:[%s17550_s1 + $0x14] ss:$0 sps:$4 sm:$0xff] (!%p338_p2)   ;;  %p375_p3 = scmp.lt.s32.totalorder (!%p338_p2), %s11156_s18, 1  ;;  %vm852_vm1 = vcmask (!%p338_p2), 195584  }
   0x6   : > { %341 = sbr.rel (%p338_p2) target bundleno = 2862 (0xb2e), region = 64  ;;  %12799 = vmatprep.subr.bf16.mxu0 (!%p338_p2), %v13703_v0  ;;  %v13707_v2 = vld [vmem:[%s17550_s1] sm:$0xff] (!%p338_p2)   ;;  %v1047_v3 = vsel (!%p338_p2), %vm1045_vm0, %v13704_v1, 0  ;;  %v13740_v15 = vld [vmem:[%s17550_s1 + $0x8] ss:$0 sps:$4 sm:$0xff] (!%p338_p2)   ;;  %v14601_v41 = vld [vmem:[%s17550_s1 + $0x18] sm:$0xff] (!%p338_p2)  }
   0x7   : > { %12800 = vmatpush3.bf16.msra.mxu0 (!%p338_p2), %v13703_v0  ;;  %v1620_v16 = vsel (!%p338_p2), %vm1045_vm0, %v13740_v15, 0  ;;  %vm3759_vm2 = vcmask (!%p338_p2), 261120   ;;  %vm4150_vm3 = vcmask (!%p338_p2), 253952   ;;  %vm4184_vm4 = vcmask (!%p338_p2), 260096   ;;  %s14434_s22 = smov (!%p338_p2), 64   ;;  %s14435_s23 = smov (!%p338_p2), 32  }
   0x8   : > { %13687 = vmatprep.subr.msk.bf16.mxu0 (!%p338_p2), %vm1045_vm0, %v13704_v1  ;;  %vm4143_vm5 = vcmask (!%p338_p2), 785408   ;;  %vm4504_vm6 = vcmask (!%p338_p2), 523520   ;;  %vm4825_vm7 = vcmask (!%p338_p2), 785920   ;;  %vm5911_vm8 = vcmask (!%p338_p2), 523264  }
   0x9   : > { %vm6013_vm9 = vcmask (!%p338_p2), 516096   ;;  %vm6078_vm10 = vcmask (!%p338_p2), 523265   ;;  %vm6159_vm11 = vcmask (!%p338_p2), 1048064  }
   0xb   : > { %12802 = vmatpush3.bf16.msra.mxu0 (!%p338_p2), %v1047_v3 }
   0xc   : > { %12931 = vmatprep.subr.bf16.mxu0 (!%p338_p2), %v13707_v2 }
   0xd   : > { %s17562_s18 = smov (!%p375_p3, %s11156_s18), 1 }
   0xe   : > { %s13690_s25 = smul.u32 544, %s17562_s18  ;;  %s382_s29 = scalar_lea.vmem %s17560_s11, %s17562_s18 }
  0x10   : > { %s14522_s28 = scalar_lea.vmem %s17549_s0, %s13690_s25 }
  0x11   : > { %v13705_v4 = vld [vmem:[%s14522_s28 + $0x10] sm:$0xff]   ;;  %v13706_v5 = vld [vmem:[%s14522_s28 + $0x18] sm:$0xff]   ;;  %v13708_v6 = vld [vmem:[%s14522_s28 + $0x20] sm:$0xff]  }
  0x12   : > { %12803 = vmatprep.mubr.msk.bf16.mxu0 %vm852_vm1, %v13705_v4  ;;  %v13709_v7 = vld [vmem:[%s14522_s28 + $0x28] sm:$0xff]   ;;  %v13710_v8 = vld [vmem:[%s14522_s28 + $0x30] sm:$0xff]   ;;  %v13711_v9 = vld [vmem:[%s14522_s28 + $0x38] sm:$0xff]  }
  0x13   : > { %12804 = vmatmul.mubr.msk.bf16.vlgmr.msra.gmra.mrb[0].mxu0 %vm852_vm1, %v13706_v5  ;;  %v13712_v10 = vld [vmem:[%s14522_s28 + $0x40] sm:$0xff]   ;;  %v13713_v11 = vld [vmem:[%s14522_s28 + $0x48] sm:$0xff]   ;;  %v13714_v12 = vld [vmem:[%s14522_s28 + $0x50] sm:$0xff]  }
  0x14   : > { %12932 = vmatpush3.bf16.msra.mxu0 %v13707_v2  ;;  %12807 = vmatprep.mubr.msk.bf16.mxu0 %vm852_vm1, %v13708_v6  ;;  %v13715_v13 = vld [vmem:[%s14522_s28 + $0x58] sm:$0xff]   ;;  %v13716_v14 = vld [vmem:[%s14522_s28 + $0x60] sm:$0xff]   ;;  %v13717_v17 = vld [vmem:[%s14522_s28 + $0x68] sm:$0xff]  }
  0x15   : > { %13688 = vmatprep.subr.msk.bf16.mxu0 %vm1045_vm0, %v13740_v15  ;;  %v13718_v18 = vld [vmem:[%s14522_s28 + $0x70] sm:$0xff]   ;;  %v13719_v19 = vld [vmem:[%s14522_s28 + $0x78] sm:$0xff]   ;;  %v13720_v20 = vld [vmem:[%s14522_s28 + $0x80] sm:$0xff]  }
  0x16   : > { %v13721_v21 = vld [vmem:[%s14522_s28 + $0x88] sm:$0xff]   ;;  %v13722_v22 = vld [vmem:[%s14522_s28 + $0x90] sm:$0xff]   ;;  %v13723_v23 = vld [vmem:[%s14522_s28 + $0x98] sm:$0xff]  }
  0x17   : > { %v13724_v24 = vld [vmem:[%s14522_s28 + $0xa0] sm:$0xff]   ;;  %v13725_v25 = vld [vmem:[%s14522_s28 + $0xa8] sm:$0xff]   ;;  %v13726_v26 = vld [vmem:[%s14522_s28 + $0xb0] sm:$0xff]  }
  0x18   : > { %12934 = vmatpush3.bf16.msra.mxu0 %v1620_v16  ;;  %v13727_v27 = vld [vmem:[%s14522_s28 + $0xb8] sm:$0xff]   ;;  %v13728_v28 = vld [vmem:[%s14522_s28 + $0xc0] sm:$0xff]   ;;  %v13729_v29 = vld [vmem:[%s14522_s28 + $0xc8] sm:$0xff]  }
  0x19   : > { %v13730_v30 = vld [vmem:[%s14522_s28 + $0xd0] sm:$0xff]   ;;  %v13731_v31 = vld [vmem:[%s14522_s28 + $0xd8] sm:$0xff]   ;;  %v13732_v32 = vld [vmem:[%s14522_s28 + $0xe0] sm:$0xff]   ;;  %13063 = vmatprep.subr.bf16.mxu0 %v14601_v41 }
  0x1a   : > { %v13733_v33 = vld [vmem:[%s14522_s28 + $0xe8] sm:$0xff]   ;;  %v13734_v34 = vld [vmem:[%s14522_s28 + $0xf0] sm:$0xff]   ;;  %v13735_v35 = vld [vmem:[%s14522_s28 + $0xf8] sm:$0xff]  }
  0x1b   : > { %12808 = vmatmul.mubr.msk.bf16.gmra.mrb[4].mxu0 %vm852_vm1, %v13709_v7  ;;  %v13736_v36 = vld [vmem:[%s14522_s28 + $0x100] sm:$0xff]   ;;  %v13737_v37 = vld [vmem:[%s14522_s28 + $0x108] sm:$0xff]   ;;  %v13738_v38 = vld [vmem:[%s14522_s28 + $0x110] sm:$0xff]  }
  0x1c   : > { %12811 = vmatprep.mubr.msk.bf16.mxu0 %vm852_vm1, %v13710_v8  ;;  %v13739_v39 = vld [vmem:[%s14522_s28 + $0x118] sm:$0xff]   ;;  %v13741_v40 = vld [vmem:[%s14522_s28 + $0x120] sm:$0xff]   ;;  %v13742_v42 = vld [vmem:[%s14522_s28 + $0x128] sm:$0xff]  }
  0x1d   : > { %v13743_v43 = vld [vmem:[%s14522_s28 + $0x130] sm:$0xff]   ;;  %v13744_v44 = vld [vmem:[%s14522_s28 + $0x138] sm:$0xff]   ;;  %v13745_v45 = vld [vmem:[%s14522_s28 + $0x140] sm:$0xff]  }
  0x1e   : > { %v13746_v46 = vld [vmem:[%s14522_s28 + $0x148] sm:$0xff]   ;;  %v13747_v47 = vld [vmem:[%s14522_s28 + $0x150] sm:$0xff]   ;;  %v13748_v48 = vld [vmem:[%s14522_s28 + $0x158] sm:$0xff]  }
  0x1f   : > { %v13749_v49 = vld [vmem:[%s14522_s28 + $0x160] sm:$0xff]   ;;  %v13750_v50 = vld [vmem:[%s14522_s28 + $0x168] sm:$0xff]   ;;  %v13751_v51 = vld [vmem:[%s14522_s28 + $0x170] sm:$0xff]  }
  0x20   : > { %v13752_v52 = vld [vmem:[%s14522_s28 + $0x178] sm:$0xff]   ;;  %v13753_v53 = vld [vmem:[%s14522_s28 + $0x180] sm:$0xff]   ;;  %v13754_v54 = vld [vmem:[%s14522_s28 + $0x188] sm:$0xff]  }
  0x21   : > { %v13755_v55 = vld [vmem:[%s14522_s28 + $0x190] sm:$0xff]   ;;  %v13756_v56 = vld [vmem:[%s14522_s28 + $0x198] sm:$0xff]   ;;  %v13757_v57 = vld [vmem:[%s14522_s28 + $0x1a0] sm:$0xff]  }
  0x22   : > { %v13758_v58 = vld [vmem:[%s14522_s28 + $0x1a8] sm:$0xff]   ;;  %v13759_v59 = vld [vmem:[%s14522_s28 + $0x1b0] sm:$0xff]   ;;  %v13760_v60 = vld [vmem:[%s14522_s28 + $0x1b8] sm:$0xff]  }
  0x23   : > { %12812 = vmatmul.mubr.msk.bf16.gmra.mrb[8].mxu0 %vm852_vm1, %v13711_v9  ;;  %v13761_v61 = vld [vmem:[%s14522_s28 + $0x1c0] sm:$0xff]   ;;  %v13762_v62 = vld [vmem:[%s14522_s28 + $0x1c8] sm:$0xff]   ;;  %v13763_v63 = vld [vmem:[%s14522_s28 + $0x1d0] sm:$0xff]  }
  0x24   : > { %12815 = vmatprep.mubr.msk.bf16.mxu0 %vm852_vm1, %v13712_v10  ;;  %v14650_v0 = vld [vmem:[%s14522_s28 + $0x1d8] sm:$0xff]   ;;  %v14653_v1 = vld [vmem:[%s14522_s28 + $0x1e0] sm:$0xff]   ;;  %v14660_v2 = vld [vmem:[%s14522_s28 + $0x1e8] sm:$0xff]  }
  0x25   : > { %v14663_v3 = vld [vmem:[%s14522_s28 + $0x1f0] sm:$0xff]   ;;  %v14670_v4 = vld [vmem:[%s14522_s28 + $0x1f8] sm:$0xff]   ;;  %v13769_v5 = vld [vmem:[%s14522_s28 + $0x200] sm:$0xff]  }
  0x26   : > { %v13770_v6 = vld [vmem:[%s14522_s28 + $0x208] sm:$0xff]   ;;  %v13771_v7 = vld [vmem:[%s14522_s28] sm:$0xff]   ;;  %v14365_v10 = vld [vmem:[%s14522_s28 + $0x10] sm:$0xff]  }
  0x27   : > { %v13772_v8 = vld [vmem:[%s14522_s28 + $0x8] sm:$0xff]   ;;  %v13774_v9 = vld [vmem:[%s17550_s1 + $0x20] ss:$0 sps:$4 sm:$0xff]   ;;  %v14369_v15 = vld [vmem:[%s14522_s28 + $0x30] sm:$0xff]  }
  0x28   : > { %v14370_v16 = vld [vmem:[%s14522_s28 + $0x38] sm:$0xff]  }
  0x2b   : > { %12816 = vmatmul.mubr.msk.bf16.gmra.mrb[12].mxu0 %vm852_vm1, %v13713_v11  ;;  %v2821_v11 = vsel %vm1045_vm0, %v13774_v9, 0 }
  0x2c   : > { %12819 = vmatprep.mubr.msk.bf16.mxu0 %vm852_vm1, %v13714_v12  ;;  %v14366_v12 = vld [vmem:[%s14522_s28 + $0x18] sm:$0xff]  }
  0x33   : > { %12820 = vmatmul.mubr.msk.bf16.gmra.mrb[16].mxu0 %vm852_vm1, %v13715_v13  ;;  %v14367_v13 = vld [vmem:[%s14522_s28 + $0x20] sm:$0xff]  }
  0x34   : > { %12823 = vmatprep.mubr.msk.bf16.mxu0 %vm852_vm1, %v13716_v14  ;;  %v14368_v14 = vld [vmem:[%s14522_s28 + $0x28] sm:$0xff]  }
  0x3b   : > { %12824 = vmatmul.mubr.msk.bf16.gmra.mrb[20].mxu0 %vm852_vm1, %v13717_v17  ;;  %v14371_v17 = vld [vmem:[%s14522_s28 + $0x40] sm:$0xff]  }
  0x3c   : > { %12827 = vmatprep.mubr.msk.bf16.mxu0 %vm852_vm1, %v13718_v18  ;;  %v14372_v18 = vld [vmem:[%s14522_s28 + $0x48] sm:$0xff]  }
  0x43   : > { %12828 = vmatmul.mubr.msk.bf16.gmra.mrb[24].mxu0 %vm852_vm1, %v13719_v19  ;;  %v14373_v19 = vld [vmem:[%s14522_s28 + $0x50] sm:$0xff]  }
  0x44   : > { %12831 = vmatprep.mubr.msk.bf16.mxu0 %vm852_vm1, %v13720_v20  ;;  %v14374_v20 = vld [vmem:[%s14522_s28 + $0x58] sm:$0xff]  }
  0x4b   : > { %12832 = vmatmul.mubr.msk.bf16.gmra.mrb[28].mxu0 %vm852_vm1, %v13721_v21  ;;  %v14375_v21 = vld [vmem:[%s14522_s28 + $0x60] sm:$0xff]  }
  0x4c   : > { %12835 = vmatprep.mubr.msk.bf16.mxu0 %vm852_vm1, %v13722_v22  ;;  %v14376_v22 = vld [vmem:[%s14522_s28 + $0x68] sm:$0xff]  }
  0x53   : > { %12836 = vmatmul.mubr.msk.bf16.gmra.mrb[32].mxu0 %vm852_vm1, %v13723_v23  ;;  %v14377_v23 = vld [vmem:[%s14522_s28 + $0x70] sm:$0xff]  }
  0x54   : > { %12839 = vmatprep.mubr.msk.bf16.mxu0 %vm852_vm1, %v13724_v24  ;;  %v14378_v24 = vld [vmem:[%s14522_s28 + $0x78] sm:$0xff]  }
  0x5b   : > { %12840 = vmatmul.mubr.msk.bf16.gmra.mrb[36].mxu0 %vm852_vm1, %v13725_v25  ;;  %v14379_v25 = vld [vmem:[%s14522_s28 + $0x80] sm:$0xff]  }
  0x5c   : > { %12843 = vmatprep.mubr.msk.bf16.mxu0 %vm852_vm1, %v13726_v26  ;;  %v14380_v26 = vld [vmem:[%s14522_s28 + $0x88] sm:$0xff]  }
  0x63   : > { %12844 = vmatmul.mubr.msk.bf16.gmra.mrb[40].mxu0 %vm852_vm1, %v13727_v27  ;;  %v14381_v27 = vld [vmem:[%s14522_s28 + $0x90] sm:$0xff]  }
  0x64   : > { %12847 = vmatprep.mubr.msk.bf16.mxu0 %vm852_vm1, %v13728_v28  ;;  %v14382_v28 = vld [vmem:[%s14522_s28 + $0x98] sm:$0xff]  }
  0x6b   : > { %12848 = vmatmul.mubr.msk.bf16.gmra.mrb[44].mxu0 %vm852_vm1, %v13729_v29  ;;  %v14383_v29 = vld [vmem:[%s14522_s28 + $0xa0] sm:$0xff]  }
  0x6c   : > { %12851 = vmatprep.mubr.msk.bf16.mxu0 %vm852_vm1, %v13730_v30  ;;  %v14384_v30 = vld [vmem:[%s14522_s28 + $0xa8] sm:$0xff]  }
  0x73   : > { %12852 = vmatmul.mubr.msk.bf16.gmra.mrb[48].mxu0 %vm852_vm1, %v13731_v31  ;;  %v14385_v31 = vld [vmem:[%s14522_s28 + $0xb0] sm:$0xff]  }
  0x74   : > { %12855 = vmatprep.mubr.msk.bf16.mxu0 %vm852_vm1, %v13732_v32  ;;  %v14386_v32 = vld [vmem:[%s14522_s28 + $0xb8] sm:$0xff]  }
  0x7b   : > { %12856 = vmatmul.mubr.msk.bf16.gmra.mrb[52].mxu0 %vm852_vm1, %v13733_v33  ;;  %v14387_v33 = vld [vmem:[%s14522_s28 + $0xc0] sm:$0xff]  }
  0x7c   : > { %12859 = vmatprep.mubr.msk.bf16.mxu0 %vm852_vm1, %v13734_v34  ;;  %v14388_v34 = vld [vmem:[%s14522_s28 + $0xc8] sm:$0xff]  }
  0x83   : > { %12860 = vmatmul.mubr.msk.bf16.gmra.mrb[56].mxu0 %vm852_vm1, %v13735_v35  ;;  %v14389_v35 = vld [vmem:[%s14522_s28 + $0xd0] sm:$0xff]  }
  0x84   : > { %12863 = vmatprep.mubr.msk.bf16.mxu0 %vm852_vm1, %v13736_v36  ;;  %v14390_v36 = vld [vmem:[%s14522_s28 + $0xd8] sm:$0xff]  }
  0x8b   : > { %12864 = vmatmul.mubr.msk.bf16.gmra.mrb[60].mxu0 %vm852_vm1, %v13737_v37  ;;  %v14391_v37 = vld [vmem:[%s14522_s28 + $0xe0] sm:$0xff]  }
  0x8c   : > { %12867 = vmatprep.mubr.msk.bf16.mxu0 %vm852_vm1, %v13738_v38  ;;  %v14392_v38 = vld [vmem:[%s14522_s28 + $0xe8] sm:$0xff]  }
  0x93   : > { %12868 = vmatmul.mubr.msk.bf16.gmra.mrb[64].mxu0 %vm852_vm1, %v13739_v39  ;;  %v14393_v39 = vld [vmem:[%s14522_s28 + $0xf0] sm:$0xff]  }
  0x94   : > { %12871 = vmatprep.mubr.msk.bf16.mxu0 %vm852_vm1, %v13741_v40  ;;  %v14394_v40 = vld [vmem:[%s14522_s28 + $0xf8] sm:$0xff]  }
  0x9b   : > { %12872 = vmatmul.mubr.msk.bf16.gmra.mrb[68].mxu0 %vm852_vm1, %v13742_v42  ;;  %v14396_v42 = vld [vmem:[%s14522_s28 + $0x108] sm:$0xff]  }
  0x9c   : > { %12875 = vmatprep.mubr.msk.bf16.mxu0 %vm852_vm1, %v13743_v43  ;;  %v14397_v43 = vld [vmem:[%s14522_s28 + $0x110] sm:$0xff]  }
  0xa3   : > { %12876 = vmatmul.mubr.msk.bf16.gmra.mrb[72].mxu0 %vm852_vm1, %v13744_v44  ;;  %v14398_v44 = vld [vmem:[%s14522_s28 + $0x118] sm:$0xff]  }
  0xa4   : > { %12879 = vmatprep.mubr.msk.bf16.mxu0 %vm852_vm1, %v13745_v45  ;;  %v14399_v45 = vld [vmem:[%s14522_s28 + $0x120] sm:$0xff]  }
  0xab   : > { %12880 = vmatmul.mubr.msk.bf16.gmra.mrb[76].mxu0 %vm852_vm1, %v13746_v46  ;;  %v14400_v46 = vld [vmem:[%s14522_s28 + $0x128] sm:$0xff]  }
  0xac   : > { %12883 = vmatprep.mubr.msk.bf16.mxu0 %vm852_vm1, %v13747_v47  ;;  %v14401_v47 = vld [vmem:[%s14522_s28 + $0x130] sm:$0xff]  }
  0xb3   : > { %12884 = vmatmul.mubr.msk.bf16.gmra.mrb[80].mxu0 %vm852_vm1, %v13748_v48  ;;  %v14402_v48 = vld [vmem:[%s14522_s28 + $0x138] sm:$0xff]  }
  0xb4   : > { %12887 = vmatprep.mubr.msk.bf16.mxu0 %vm852_vm1, %v13749_v49  ;;  %v14403_v49 = vld [vmem:[%s14522_s28 + $0x140] sm:$0xff]  }
  0xbb   : > { %12888 = vmatmul.mubr.msk.bf16.gmra.mrb[84].mxu0 %vm852_vm1, %v13750_v50  ;;  %v14404_v50 = vld [vmem:[%s14522_s28 + $0x148] sm:$0xff]  }
  0xbc   : > { %12891 = vmatprep.mubr.msk.bf16.mxu0 %vm852_vm1, %v13751_v51  ;;  %v14405_v51 = vld [vmem:[%s14522_s28 + $0x150] sm:$0xff]  }
  0xc3   : > { %12892 = vmatmul.mubr.msk.bf16.gmra.mrb[88].mxu0 %vm852_vm1, %v13752_v52  ;;  %v14406_v52 = vld [vmem:[%s14522_s28 + $0x158] sm:$0xff]  }
  0xc4   : > { %12895 = vmatprep.mubr.msk.bf16.mxu0 %vm852_vm1, %v13753_v53  ;;  %v14407_v53 = vld [vmem:[%s14522_s28 + $0x160] sm:$0xff]  }
  0xcb   : > { %12896 = vmatmul.mubr.msk.bf16.gmra.mrb[92].mxu0 %vm852_vm1, %v13754_v54  ;;  %v14408_v54 = vld [vmem:[%s14522_s28 + $0x168] sm:$0xff]  }
  0xcc   : > { %12899 = vmatprep.mubr.msk.bf16.mxu0 %vm852_vm1, %v13755_v55  ;;  %v14409_v55 = vld [vmem:[%s14522_s28 + $0x170] sm:$0xff]  }
  0xd3   : > { %12900 = vmatmul.mubr.msk.bf16.gmra.mrb[96].mxu0 %vm852_vm1, %v13756_v56  ;;  %v14410_v56 = vld [vmem:[%s14522_s28 + $0x178] sm:$0xff]  }
  0xd4   : > { %12903 = vmatprep.mubr.msk.bf16.mxu0 %vm852_vm1, %v13757_v57  ;;  %v14411_v57 = vld [vmem:[%s14522_s28 + $0x180] sm:$0xff]  }
  0xdb   : > { %12904 = vmatmul.mubr.msk.bf16.gmra.mrb[100].mxu0 %vm852_vm1, %v13758_v58  ;;  %v14412_v58 = vld [vmem:[%s14522_s28 + $0x188] sm:$0xff]  }
  0xdc   : > { %12907 = vmatprep.mubr.msk.bf16.mxu0 %vm852_vm1, %v13759_v59  ;;  %v14413_v59 = vld [vmem:[%s14522_s28 + $0x190] sm:$0xff]  }
  0xe3   : > { %12908 = vmatmul.mubr.msk.bf16.gmra.mrb[104].mxu0 %vm852_vm1, %v13760_v60  ;;  %v14414_v60 = vld [vmem:[%s14522_s28 + $0x198] sm:$0xff]  }
  0xe4   : > { %12911 = vmatprep.mubr.msk.bf16.mxu0 %vm852_vm1, %v13761_v61  ;;  %v14415_v61 = vld [vmem:[%s14522_s28 + $0x1a0] sm:$0xff]  }
  0xeb   : > { %12912 = vmatmul.mubr.msk.bf16.gmra.mrb[108].mxu0 %vm852_vm1, %v13762_v62  ;;  %v14416_v62 = vld [vmem:[%s14522_s28 + $0x1a8] sm:$0xff]  }
  0xec   : > { %12915 = vmatprep.mubr.msk.bf16.mxu0 %vm852_vm1, %v13763_v63  ;;  %v14417_v63 = vld [vmem:[%s14522_s28 + $0x1b0] sm:$0xff]  }
  0xf3   : > { %12916 = vmatmul.mubr.msk.bf16.gmra.mrb[112].mxu0 %vm852_vm1, %v14650_v0 }
  0xf4   : > { %12919 = vmatprep.mubr.msk.bf16.mxu0 %vm852_vm1, %v14653_v1 }
  0xfb   : > { %12920 = vmatmul.mubr.msk.bf16.gmra.mrb[116].mxu0 %vm852_vm1, %v14660_v2 }
  0xfc   : > { %12923 = vmatprep.mubr.msk.bf16.mxu0 %vm852_vm1, %v14663_v3 }
 0x103   : > { %12924 = vmatmul.mubr.msk.bf16.gmra.mrb[120].mxu0 %vm852_vm1, %v14670_v4 }
 0x104   : > { %12927 = vmatprep.mubr.msk.bf16.mxu0 %vm852_vm1, %v13769_v5  ;;  %v14418_v5 = vld [vmem:[%s14522_s28 + $0x1b8] sm:$0xff]  }
 0x10b   : > { %12928 = vmatmul.mubr.msk.bf16.gmra.mrb[124].mxu0 %vm852_vm1, %v13770_v6  ;;  %v14419_v6 = vld [vmem:[%s14522_s28 + $0x1c0] sm:$0xff]  }
 0x10c   : > { %12935 = vmatprep.mubr.msk.bf16.mxu0 %vm852_vm1, %v13771_v7  ;;  %v14420_v7 = vld [vmem:[%s14522_s28 + $0x1c8] sm:$0xff]  }
 0x113   : > { %12936 = vmatmul.mubr.msk.bf16.vlgmr.msra.gmra.mrb[0].mxu0 %vm852_vm1, %v13772_v8  ;;  %v14421_v8 = vld [vmem:[%s14522_s28 + $0x1d0] sm:$0xff]  }
 0x114   : > { %13064 = vmatpush3.bf16.msra.mxu0 %v14601_v41  ;;  %12939 = vmatprep.mubr.msk.bf16.mxu0 %vm852_vm1, %v14365_v10  ;;  %v14395_v41 = vld [vmem:[%s14522_s28 + $0x100] sm:$0xff]   ;;  %v13776_v10 = vld [vmem:[%s14522_s28 + $0x28] sm:$0xff]  }
 0x115   : > { %13689 = vmatprep.subr.msk.bf16.mxu0 %vm1045_vm0, %v13774_v9  ;;  %v13775_v9 = vld [vmem:[%s14522_s28 + $0x20] sm:$0xff]  }
 0x118   : > { %13066 = vmatpush3.bf16.msra.mxu0 %v2821_v11  ;;  %v13782_v11 = vld [vmem:[%s14522_s28 + $0x58] sm:$0xff]  }
 0x11b   : > { %12940 = vmatmul.mubr.msk.bf16.gmra.mrb[4].mxu0 %vm852_vm1, %v14366_v12  ;;  %v13783_v12 = vld [vmem:[%s14522_s28 + $0x60] sm:$0xff]  }
 0x11c   : > { %12943 = vmatprep.mubr.msk.bf16.mxu0 %vm852_vm1, %v14367_v13  ;;  %v13784_v13 = vld [vmem:[%s14522_s28 + $0x68] sm:$0xff]  }
 0x123   : > { %12944 = vmatmul.mubr.msk.bf16.gmra.mrb[8].mxu0 %vm852_vm1, %v14368_v14  ;;  %v13785_v14 = vld [vmem:[%s14522_s28 + $0x70] sm:$0xff]  }
 0x124   : > { %12947 = vmatprep.mubr.msk.bf16.mxu0 %vm852_vm1, %v14369_v15  ;;  %v13786_v15 = vld [vmem:[%s14522_s28 + $0x78] sm:$0xff]  }
 0x12b   : > { %12948 = vmatmul.mubr.msk.bf16.gmra.mrb[12].mxu0 %vm852_vm1, %v14370_v16  ;;  %v13787_v16 = vld [vmem:[%s14522_s28 + $0x80] sm:$0xff]  }
 0x12c   : > { %12951 = vmatprep.mubr.msk.bf16.mxu0 %vm852_vm1, %v14371_v17  ;;  %v13788_v17 = vld [vmem:[%s14522_s28 + $0x88] sm:$0xff]  }
 0x133   : > { %12952 = vmatmul.mubr.msk.bf16.gmra.mrb[16].mxu0 %vm852_vm1, %v14372_v18  ;;  %v13789_v18 = vld [vmem:[%s14522_s28 + $0x90] sm:$0xff]  }
 0x134   : > { %12955 = vmatprep.mubr.msk.bf16.mxu0 %vm852_vm1, %v14373_v19  ;;  %v13790_v19 = vld [vmem:[%s14522_s28 + $0x98] sm:$0xff]  }
 0x13b   : > { %12956 = vmatmul.mubr.msk.bf16.gmra.mrb[20].mxu0 %vm852_vm1, %v14374_v20  ;;  %v13791_v20 = vld [vmem:[%s14522_s28 + $0xa0] sm:$0xff]  }
 0x13c   : > { %12959 = vmatprep.mubr.msk.bf16.mxu0 %vm852_vm1, %v14375_v21  ;;  %v13792_v21 = vld [vmem:[%s14522_s28 + $0xa8] sm:$0xff]  }
 0x143   : > { %12960 = vmatmul.mubr.msk.bf16.gmra.mrb[24].mxu0 %vm852_vm1, %v14376_v22  ;;  %v13793_v22 = vld [vmem:[%s14522_s28 + $0xb0] sm:$0xff]  }
 0x144   : > { %12963 = vmatprep.mubr.msk.bf16.mxu0 %vm852_vm1, %v14377_v23  ;;  %v13794_v23 = vld [vmem:[%s14522_s28 + $0xb8] sm:$0xff]  }
 0x14b   : > { %12964 = vmatmul.mubr.msk.bf16.gmra.mrb[28].mxu0 %vm852_vm1, %v14378_v24  ;;  %v13795_v24 = vld [vmem:[%s14522_s28 + $0xc0] sm:$0xff]  }
 0x14c   : > { %12967 = vmatprep.mubr.msk.bf16.mxu0 %vm852_vm1, %v14379_v25  ;;  %v13796_v25 = vld [vmem:[%s14522_s28 + $0xc8] sm:$0xff]  }
 0x153   : > { %12968 = vmatmul.mubr.msk.bf16.gmra.mrb[32].mxu0 %vm852_vm1, %v14380_v26  ;;  %v13797_v26 = vld [vmem:[%s14522_s28 + $0xd0] sm:$0xff]  }
 0x154   : > { %12971 = vmatprep.mubr.msk.bf16.mxu0 %vm852_vm1, %v14381_v27  ;;  %v13798_v27 = vld [vmem:[%s14522_s28 + $0xd8] sm:$0xff]  }
 0x15b   : > { %12972 = vmatmul.mubr.msk.bf16.gmra.mrb[36].mxu0 %vm852_vm1, %v14382_v28  ;;  %v13799_v28 = vld [vmem:[%s14522_s28 + $0xe0] sm:$0xff]  }
 0x15c   : > { %12975 = vmatprep.mubr.msk.bf16.mxu0 %vm852_vm1, %v14383_v29  ;;  %v13800_v29 = vld [vmem:[%s14522_s28 + $0xe8] sm:$0xff]  }
 0x163   : > { %12976 = vmatmul.mubr.msk.bf16.gmra.mrb[40].mxu0 %vm852_vm1, %v14384_v30  ;;  %v13801_v30 = vld [vmem:[%s14522_s28 + $0xf0] sm:$0xff]  }
 0x164   : > { %12979 = vmatprep.mubr.msk.bf16.mxu0 %vm852_vm1, %v14385_v31  ;;  %v13802_v31 = vld [vmem:[%s14522_s28 + $0xf8] sm:$0xff]  }
 0x16b   : > { %12980 = vmatmul.mubr.msk.bf16.gmra.mrb[44].mxu0 %vm852_vm1, %v14386_v32  ;;  %v13803_v32 = vld [vmem:[%s14522_s28 + $0x100] sm:$0xff]  }
 0x16c   : > { %12983 = vmatprep.mubr.msk.bf16.mxu0 %vm852_vm1, %v14387_v33  ;;  %v13804_v33 = vld [vmem:[%s14522_s28 + $0x108] sm:$0xff]  }
 0x173   : > { %12984 = vmatmul.mubr.msk.bf16.gmra.mrb[48].mxu0 %vm852_vm1, %v14388_v34  ;;  %v13805_v34 = vld [vmem:[%s14522_s28 + $0x110] sm:$0xff]  }
 0x174   : > { %12987 = vmatprep.mubr.msk.bf16.mxu0 %vm852_vm1, %v14389_v35  ;;  %v13806_v35 = vld [vmem:[%s14522_s28 + $0x118] sm:$0xff]  }
 0x17b   : > { %12988 = vmatmul.mubr.msk.bf16.gmra.mrb[52].mxu0 %vm852_vm1, %v14390_v36  ;;  %v13807_v36 = vld [vmem:[%s14522_s28 + $0x120] sm:$0xff]  }
 0x17c   : > { %12991 = vmatprep.mubr.msk.bf16.mxu0 %vm852_vm1, %v14391_v37  ;;  %v13808_v37 = vld [vmem:[%s14522_s28 + $0x128] sm:$0xff]  }
 0x183   : > { %12992 = vmatmul.mubr.msk.bf16.gmra.mrb[56].mxu0 %vm852_vm1, %v14392_v38  ;;  %v13809_v38 = vld [vmem:[%s14522_s28 + $0x130] sm:$0xff]  }
 0x184   : > { %12995 = vmatprep.mubr.msk.bf16.mxu0 %vm852_vm1, %v14393_v39  ;;  %v13810_v39 = vld [vmem:[%s14522_s28 + $0x138] sm:$0xff]  }
 0x18b   : > { %12996 = vmatmul.mubr.msk.bf16.gmra.mrb[60].mxu0 %vm852_vm1, %v14394_v40  ;;  %v13811_v40 = vld [vmem:[%s14522_s28 + $0x140] sm:$0xff]  }
 0x18c   : > { %12999 = vmatprep.mubr.msk.bf16.mxu0 %vm852_vm1, %v14395_v41  ;;  %v13812_v41 = vld [vmem:[%s14522_s28 + $0x148] sm:$0xff]  }
 0x193   : > { %13000 = vmatmul.mubr.msk.bf16.gmra.mrb[64].mxu0 %vm852_vm1, %v14396_v42  ;;  %v13813_v42 = vld [vmem:[%s14522_s28 + $0x150] sm:$0xff]  }
 0x194   : > { %13003 = vmatprep.mubr.msk.bf16.mxu0 %vm852_vm1, %v14397_v43  ;;  %v13814_v43 = vld [vmem:[%s14522_s28 + $0x158] sm:$0xff]  }
 0x19b   : > { %13004 = vmatmul.mubr.msk.bf16.gmra.mrb[68].mxu0 %vm852_vm1, %v14398_v44  ;;  %v13815_v44 = vld [vmem:[%s14522_s28 + $0x160] sm:$0xff]  }
 0x19c   : > { %13007 = vmatprep.mubr.msk.bf16.mxu0 %vm852_vm1, %v14399_v45  ;;  %v13816_v45 = vld [vmem:[%s14522_s28 + $0x168] sm:$0xff]  }
 0x1a3   : > { %13008 = vmatmul.mubr.msk.bf16.gmra.mrb[72].mxu0 %vm852_vm1, %v14400_v46  ;;  %v13817_v46 = vld [vmem:[%s14522_s28 + $0x170] sm:$0xff]  }
 0x1a4   : > { %13011 = vmatprep.mubr.msk.bf16.mxu0 %vm852_vm1, %v14401_v47  ;;  %v13818_v47 = vld [vmem:[%s14522_s28 + $0x178] sm:$0xff]  }
 0x1ab   : > { %13012 = vmatmul.mubr.msk.bf16.gmra.mrb[76].mxu0 %vm852_vm1, %v14402_v48  ;;  %v13819_v48 = vld [vmem:[%s14522_s28 + $0x180] sm:$0xff]  }
 0x1ac   : > { %13015 = vmatprep.mubr.msk.bf16.mxu0 %vm852_vm1, %v14403_v49  ;;  %v13820_v49 = vld [vmem:[%s14522_s28 + $0x188] sm:$0xff]  }
 0x1b3   : > { %13016 = vmatmul.mubr.msk.bf16.gmra.mrb[80].mxu0 %vm852_vm1, %v14404_v50  ;;  %v13821_v50 = vld [vmem:[%s14522_s28 + $0x190] sm:$0xff]  }
 0x1b4   : > { %13019 = vmatprep.mubr.msk.bf16.mxu0 %vm852_vm1, %v14405_v51  ;;  %v13822_v51 = vld [vmem:[%s14522_s28 + $0x198] sm:$0xff]  }
 0x1bb   : > { %13020 = vmatmul.mubr.msk.bf16.gmra.mrb[84].mxu0 %vm852_vm1, %v14406_v52  ;;  %v13823_v52 = vld [vmem:[%s14522_s28 + $0x1a0] sm:$0xff]  }
 0x1bc   : > { %13023 = vmatprep.mubr.msk.bf16.mxu0 %vm852_vm1, %v14407_v53  ;;  %v13824_v53 = vld [vmem:[%s14522_s28 + $0x1a8] sm:$0xff]  }
 0x1c3   : > { %13024 = vmatmul.mubr.msk.bf16.gmra.mrb[88].mxu0 %vm852_vm1, %v14408_v54  ;;  %v13825_v54 = vld [vmem:[%s14522_s28 + $0x1b0] sm:$0xff]  }
 0x1c4   : > { %13027 = vmatprep.mubr.msk.bf16.mxu0 %vm852_vm1, %v14409_v55  ;;  %v13826_v55 = vld [vmem:[%s14522_s28 + $0x1b8] sm:$0xff]  }
 0x1cb   : > { %13028 = vmatmul.mubr.msk.bf16.gmra.mrb[92].mxu0 %vm852_vm1, %v14410_v56  ;;  %v13827_v56 = vld [vmem:[%s14522_s28 + $0x1c0] sm:$0xff]  }
 0x1cc   : > { %13031 = vmatprep.mubr.msk.bf16.mxu0 %vm852_vm1, %v14411_v57  ;;  %v13828_v57 = vld [vmem:[%s14522_s28 + $0x1c8] sm:$0xff]  }
 0x1d3   : > { %13032 = vmatmul.mubr.msk.bf16.gmra.mrb[96].mxu0 %vm852_vm1, %v14412_v58  ;;  %v13829_v58 = vld [vmem:[%s14522_s28 + $0x1d0] sm:$0xff]  }
 0x1d4   : > { %13035 = vmatprep.mubr.msk.bf16.mxu0 %vm852_vm1, %v14413_v59  ;;  %v14924_v59 = vld [vmem:[%s17551_s2] ss:$0 sm:$0xff] }
 0x1db   : > { %13036 = vmatmul.mubr.msk.bf16.gmra.mrb[100].mxu0 %vm852_vm1, %v14414_v60 }
 0x1dc   : > { %13039 = vmatprep.mubr.msk.bf16.mxu0 %vm852_vm1, %v14415_v61 }
 0x1e3   : > { %13040 = vmatmul.mubr.msk.bf16.gmra.mrb[104].mxu0 %vm852_vm1, %v14416_v62 }
 0x1e4   : > { %13043 = vmatprep.mubr.msk.bf16.mxu0 %vm852_vm1, %v14417_v63  ;;  %v13830_v63 = vld [vmem:[%s14522_s28 + $0x1d8] sm:$0xff]  }
 0x1eb   : > { %13044 = vmatmul.mubr.msk.bf16.gmra.mrb[108].mxu0 %vm852_vm1, %v14418_v5 }
 0x1ec   : > { %13047 = vmatprep.mubr.msk.bf16.mxu0 %vm852_vm1, %v14419_v6 }
 0x1f3   : > { %13048 = vmatmul.mubr.msk.bf16.gmra.mrb[112].mxu0 %vm852_vm1, %v14420_v7  ;;  %v13831_v7 = vld [vmem:[%s14522_s28 + $0x1e0] sm:$0xff]  }
 0x1f4   : > { %13051 = vmatprep.mubr.msk.bf16.mxu0 %vm852_vm1, %v14421_v8 }
 0x1fb   : > { %13052 = vmatmul.mubr.msk.bf16.gmra.mrb[116].mxu0 %vm852_vm1, %v14650_v0  ;;  %v13777_v0 = vld [vmem:[%s14522_s28 + $0x30] sm:$0xff]  }
 0x1fc   : > { %13055 = vmatprep.mubr.msk.bf16.mxu0 %vm852_vm1, %v14653_v1  ;;  %v13778_v1 = vld [vmem:[%s14522_s28 + $0x38] sm:$0xff]  }
 0x203   : > { %13056 = vmatmul.mubr.msk.bf16.gmra.mrb[120].mxu0 %vm852_vm1, %v14660_v2  ;;  %v13779_v2 = vld [vmem:[%s14522_s28 + $0x40] sm:$0xff]  }
 0x204   : > { %13059 = vmatprep.mubr.msk.bf16.mxu0 %vm852_vm1, %v14663_v3  ;;  %v13780_v3 = vld [vmem:[%s14522_s28 + $0x48] sm:$0xff]  }
 0x20b   : > { %13060 = vmatmul.mubr.msk.bf16.gmra.mrb[124].mxu0 %vm852_vm1, %v14670_v4  ;;  %v13781_v4 = vld [vmem:[%s14522_s28 + $0x50] sm:$0xff]  }
 0x20c   : > { %13067 = vmatprep.mubr.msk.bf16.mxu0 %vm852_vm1, %v13775_v9 }
 0x213   : > { %13068 = vmatmul.mubr.msk.bf16.vlgmr.msra.gmra.mrb[0].mxu0 %vm852_vm1, %v13776_v10 }
 0x214   : > { %13071 = vmatprep.mubr.msk.bf16.mxu0 %vm852_vm1, %v13777_v0 }
 0x21b   : > { %13072 = vmatmul.mubr.msk.bf16.gmra.mrb[4].mxu0 %vm852_vm1, %v13778_v1 }
 0x21c   : > { %13075 = vmatprep.mubr.msk.bf16.mxu0 %vm852_vm1, %v13779_v2 }
 0x223   : > { %13076 = vmatmul.mubr.msk.bf16.gmra.mrb[8].mxu0 %vm852_vm1, %v13780_v3 }
 0x224   : > { %13079 = vmatprep.mubr.msk.bf16.mxu0 %vm852_vm1, %v13781_v4  ;;  %v14433_v4 = vmov 0.0  }
 0x225   : > { %4151 = vst.msk [vmem:[#allocation2 + $0x10] sm:$0x1] %vm4150_vm3, %v14433_v4  ;;  %4152 = vst.msk [vmem:[#allocation2 + $0x20] sm:$0x1] %vm4150_vm3, %v14433_v4 }
 0x226   : > { %4153 = vst.msk [vmem:[#allocation2 + $0x30] sm:$0x1] %vm4150_vm3, %v14433_v4  ;;  %4154 = vst.msk [vmem:[#allocation2 + $0x40] sm:$0x1] %vm4150_vm3, %v14433_v4 }
 0x227   : > { %4155 = vst.msk [vmem:[#allocation2 + $0x50] sm:$0x1] %vm4150_vm3, %v14433_v4  ;;  %4156 = vst.msk [vmem:[#allocation2 + $0x60] sm:$0x1] %vm4150_vm3, %v14433_v4 }
 0x228   : > { %4157 = vst.msk [vmem:[#allocation2 + $0x70] sm:$0x1] %vm4150_vm3, %v14433_v4  ;;  %4158 = vst.msk [vmem:[#allocation2 + $0x80] sm:$0x1] %vm4150_vm3, %v14433_v4 }
 0x229   : > { %4159 = vst.msk [vmem:[#allocation2 + $0x90] sm:$0x1] %vm4150_vm3, %v14433_v4  ;;  %4160 = vst.msk [vmem:[#allocation2 + $0xa0] sm:$0x1] %vm4150_vm3, %v14433_v4 }
 0x22a   : > { %4161 = vst.msk [vmem:[#allocation2 + $0xb0] sm:$0x1] %vm4150_vm3, %v14433_v4  ;;  %4162 = vst.msk [vmem:[#allocation2 + $0xc0] sm:$0x1] %vm4150_vm3, %v14433_v4 }
 0x22b   : > { %13080 = vmatmul.mubr.msk.bf16.gmra.mrb[12].mxu0 %vm852_vm1, %v13782_v11  ;;  %4163 = vst.msk [vmem:[#allocation2 + $0xd0] sm:$0x1] %vm4150_vm3, %v14433_v4  ;;  %4164 = vst.msk [vmem:[#allocation2 + $0xe0] sm:$0x1] %vm4150_vm3, %v14433_v4 }
 0x22c   : > { %13083 = vmatprep.mubr.msk.bf16.mxu0 %vm852_vm1, %v13783_v12  ;;  %4165 = vst.msk [vmem:[#allocation2 + $0xf0] sm:$0x1] %vm4150_vm3, %v14433_v4  ;;  %4166 = vst.msk [vmem:[#allocation2 + $0x100] sm:$0x1] %vm4150_vm3, %v14433_v4 }
 0x22d   : > { %4167 = vst.msk [vmem:[#allocation2 + $0x110] sm:$0x1] %vm4150_vm3, %v14433_v4  ;;  %4168 = vst.msk [vmem:[#allocation2 + $0x120] sm:$0x1] %vm4150_vm3, %v14433_v4 }
 0x22e   : > { %4169 = vst.msk [vmem:[#allocation2 + $0x130] sm:$0x1] %vm4150_vm3, %v14433_v4  ;;  %4170 = vst.msk [vmem:[#allocation2 + $0x140] sm:$0x1] %vm4150_vm3, %v14433_v4 }
 0x22f   : > { %4171 = vst.msk [vmem:[#allocation2 + $0x150] sm:$0x1] %vm4150_vm3, %v14433_v4  ;;  %4172 = vst.msk [vmem:[#allocation2 + $0x160] sm:$0x1] %vm4150_vm3, %v14433_v4 }
 0x230   : > { %4173 = vst.msk [vmem:[#allocation2 + $0x170] sm:$0x1] %vm4150_vm3, %v14433_v4  ;;  %4174 = vst.msk [vmem:[#allocation2 + $0x180] sm:$0x1] %vm4150_vm3, %v14433_v4 }
 0x231   : > { %4175 = vst.msk [vmem:[#allocation2 + $0x190] sm:$0x1] %vm4150_vm3, %v14433_v4  ;;  %4176 = vst.msk [vmem:[#allocation2 + $0x1a0] sm:$0x1] %vm4150_vm3, %v14433_v4 }
 0x232   : > { %4177 = vst.msk [vmem:[#allocation2 + $0x1b0] sm:$0x1] %vm4150_vm3, %v14433_v4  ;;  %4178 = vst.msk [vmem:[#allocation2 + $0x1c0] sm:$0x1] %vm4150_vm3, %v14433_v4 }
 0x233   : > { %13084 = vmatmul.mubr.msk.bf16.gmra.mrb[16].mxu0 %vm852_vm1, %v13784_v13  ;;  %4179 = vst.msk [vmem:[#allocation2 + $0x1d0] sm:$0x1] %vm4150_vm3, %v14433_v4  ;;  %4180 = vst.msk [vmem:[#allocation2 + $0x1e0] sm:$0x1] %vm4150_vm3, %v14433_v4 }
 0x234   : > { %13087 = vmatprep.mubr.msk.bf16.mxu0 %vm852_vm1, %v13785_v14  ;;  %4181 = vst.msk [vmem:[#allocation2 + $0x1f0] sm:$0x1] %vm4150_vm3, %v14433_v4  ;;  %4182 = vst.msk [vmem:[#allocation2 + $0x200] sm:$0x1] %vm4150_vm3, %v14433_v4  ;;  %v13832_v14 = vld [vmem:[%s14522_s28 + $0x1e8] sm:$0xff]  }
 0x235   : > { %6007 = vst [vmem:[#allocation3] sm:$0xff] %v14433_v4  ;;  %6825 = vst [vmem:[#allocation4 + $0x18] sm:$0x1] %v14433_v4 }
 0x236   : > { %6826 = vst [vmem:[#allocation4 + $0x30] sm:$0x1] %v14433_v4  ;;  %6827 = vst [vmem:[#allocation4 + $0x48] sm:$0x1] %v14433_v4 }
 0x237   : > { %6828 = vst [vmem:[#allocation4 + $0x60] sm:$0x1] %v14433_v4  ;;  %6829 = vst [vmem:[#allocation4 + $0x78] sm:$0x1] %v14433_v4 }
 0x238   : > { %6830 = vst [vmem:[#allocation4 + $0x90] sm:$0x1] %v14433_v4  ;;  %6831 = vst [vmem:[#allocation4 + $0xa8] sm:$0x1] %v14433_v4 }
 0x239   : > { %6832 = vst [vmem:[#allocation4 + $0xc0] sm:$0x1] %v14433_v4  ;;  %6897 = vst [vmem:[#allocation4 + $0x2f] sm:$0x1] %v14433_v4 }
 0x23a   : > { %6898 = vst [vmem:[#allocation4 + $0x47] sm:$0x1] %v14433_v4  ;;  %6899 = vst [vmem:[#allocation4 + $0x5f] sm:$0x1] %v14433_v4 }
 0x23b   : > { %13088 = vmatmul.mubr.msk.bf16.gmra.mrb[20].mxu0 %vm852_vm1, %v13786_v15  ;;  %6900 = vst [vmem:[#allocation4 + $0x77] sm:$0x1] %v14433_v4  ;;  %6901 = vst [vmem:[#allocation4 + $0x8f] sm:$0x1] %v14433_v4 }
 0x23c   : > { %13091 = vmatprep.mubr.msk.bf16.mxu0 %vm852_vm1, %v13787_v16  ;;  %6902 = vst [vmem:[#allocation4 + $0xa7] sm:$0x1] %v14433_v4  ;;  %6903 = vst [vmem:[#allocation4 + $0xbf] sm:$0x1] %v14433_v4 }
 0x23d   : > { %6904 = vst [vmem:[#allocation4 + $0xd7] sm:$0x1] %v14433_v4  ;;  %4144 = vst.msk [vmem:[#allocation2] sm:$0xff] %vm4143_vm5, %v14433_v4 }
 0x23e   : > { %4145 = vst.msk [vmem:[#allocation2 + $0x8] sm:$0xff] %vm4143_vm5, %v14433_v4  ;;  %v13838_v4 = vld [vmem:[%s14522_s28 + $0x218] sm:$0xff]  }
 0x243   : > { %13092 = vmatmul.mubr.msk.bf16.gmra.mrb[24].mxu0 %vm852_vm1, %v13788_v17  ;;  %v13833_v17 = vld [vmem:[%s14522_s28 + $0x1f0] sm:$0xff]  }
 0x244   : > { %13095 = vmatprep.mubr.msk.bf16.mxu0 %vm852_vm1, %v13789_v18 }
 0x24b   : > { %13096 = vmatmul.mubr.msk.bf16.gmra.mrb[28].mxu0 %vm852_vm1, %v13790_v19 }
 0x24c   : > { %13099 = vmatprep.mubr.msk.bf16.mxu0 %vm852_vm1, %v13791_v20 }
 0x253   : > { %13100 = vmatmul.mubr.msk.bf16.gmra.mrb[32].mxu0 %vm852_vm1, %v13792_v21 }
 0x254   : > { %13103 = vmatprep.mubr.msk.bf16.mxu0 %vm852_vm1, %v13793_v22 }
 0x25b   : > { %13104 = vmatmul.mubr.msk.bf16.gmra.mrb[36].mxu0 %vm852_vm1, %v13794_v23  ;;  %v13839_v23 = vld [vmem:[%s17552_s3 + $0x30] sm:$0xff]  }
 0x25c   : > { %13107 = vmatprep.mubr.msk.bf16.mxu0 %vm852_vm1, %v13795_v24  ;;  %13195 = vmatprep.subr.bf16.mxu1 %v13839_v23 }
 0x25d   : > { %13196 = vmatpush3.bf16.msra.mxu1 %v13839_v23 }
 0x263   : > { %13108 = vmatmul.mubr.msk.bf16.gmra.mrb[40].mxu0 %vm852_vm1, %v13796_v25 }
 0x264   : > { %13111 = vmatprep.mubr.msk.bf16.mxu0 %vm852_vm1, %v13797_v26 }
 0x26b   : > { %13112 = vmatmul.mubr.msk.bf16.gmra.mrb[44].mxu0 %vm852_vm1, %v13798_v27 }
 0x26c   : > { %13115 = vmatprep.mubr.msk.bf16.mxu0 %vm852_vm1, %v13799_v28 }
 0x273   : > { %13116 = vmatmul.mubr.msk.bf16.gmra.mrb[48].mxu0 %vm852_vm1, %v13800_v29 }
 0x274   : > { %13119 = vmatprep.mubr.msk.bf16.mxu0 %vm852_vm1, %v13801_v30  ;;  %v13840_v30 = vld [vmem:[%s17552_s3 + $0x38] sm:$0xff]  }
 0x275   : > { %13197 = vmatprep.subr.bf16.mxu1 %v13840_v30 }
 0x276   : > { %13198 = vmatpush3.bf16.msra.mxu1 %v13840_v30 }
 0x27b   : > { %13120 = vmatmul.mubr.msk.bf16.gmra.mrb[52].mxu0 %vm852_vm1, %v13802_v31 }
 0x27c   : > { %13123 = vmatprep.mubr.msk.bf16.mxu0 %vm852_vm1, %v13803_v32 }
 0x283   : > { %13124 = vmatmul.mubr.msk.bf16.gmra.mrb[56].mxu0 %vm852_vm1, %v13804_v33  ;;  %v13834_v33 = vld [vmem:[%s14522_s28 + $0x1f8] sm:$0xff]  }
 0x284   : > { %13127 = vmatprep.mubr.msk.bf16.mxu0 %vm852_vm1, %v13805_v34 }
 0x28b   : > { %13128 = vmatmul.mubr.msk.bf16.gmra.mrb[60].mxu0 %vm852_vm1, %v13806_v35 }
 0x28c   : > { %13131 = vmatprep.mubr.msk.bf16.mxu0 %vm852_vm1, %v13807_v36 }
 0x293   : > { %13132 = vmatmul.mubr.msk.bf16.gmra.mrb[64].mxu0 %vm852_vm1, %v13808_v37  ;;  %v13835_v37 = vld [vmem:[%s14522_s28 + $0x200] sm:$0xff]  }
 0x294   : > { %13135 = vmatprep.mubr.msk.bf16.mxu0 %vm852_vm1, %v13809_v38 }
 0x29b   : > { %13136 = vmatmul.mubr.msk.bf16.gmra.mrb[68].mxu0 %vm852_vm1, %v13810_v39 }
 0x29c   : > { %13139 = vmatprep.mubr.msk.bf16.mxu0 %vm852_vm1, %v13811_v40 }
 0x2a3   : > { %13140 = vmatmul.mubr.msk.bf16.gmra.mrb[72].mxu0 %vm852_vm1, %v13812_v41 }
 0x2a4   : > { %13143 = vmatprep.mubr.msk.bf16.mxu0 %vm852_vm1, %v13813_v42 }
 0x2ab   : > { %13144 = vmatmul.mubr.msk.bf16.gmra.mrb[76].mxu0 %vm852_vm1, %v13814_v43  ;;  %v13841_v43 = vld [vmem:[%s17552_s3 + $0x40] sm:$0xff]  }
 0x2ac   : > { %13147 = vmatprep.mubr.msk.bf16.mxu0 %vm852_vm1, %v13815_v44  ;;  %13199 = vmatprep.subr.bf16.mxu1 %v13841_v43 }
 0x2ad   : > { %13200 = vmatpush3.bf16.msra.mxu1 %v13841_v43 }
 0x2b3   : > { %13148 = vmatmul.mubr.msk.bf16.gmra.mrb[80].mxu0 %vm852_vm1, %v13816_v45 }
 0x2b4   : > { %13151 = vmatprep.mubr.msk.bf16.mxu0 %vm852_vm1, %v13817_v46 }
 0x2bb   : > { %13152 = vmatmul.mubr.msk.bf16.gmra.mrb[84].mxu0 %vm852_vm1, %v13818_v47 }
 0x2bc   : > { %13155 = vmatprep.mubr.msk.bf16.mxu0 %vm852_vm1, %v13819_v48 }
 0x2c3   : > { %13156 = vmatmul.mubr.msk.bf16.gmra.mrb[88].mxu0 %vm852_vm1, %v13820_v49 }
 0x2c4   : > { %13159 = vmatprep.mubr.msk.bf16.mxu0 %vm852_vm1, %v13821_v50  ;;  %v13842_v50 = vld [vmem:[%s17552_s3 + $0x48] sm:$0xff]  }
 0x2c5   : > { %13201 = vmatprep.subr.bf16.mxu1 %v13842_v50 }
 0x2c6   : > { %13202 = vmatpush3.bf16.msra.mxu1 %v13842_v50 }
 0x2cb   : > { %13160 = vmatmul.mubr.msk.bf16.gmra.mrb[92].mxu0 %vm852_vm1, %v13822_v51 }
 0x2cc   : > { %13163 = vmatprep.mubr.msk.bf16.mxu0 %vm852_vm1, %v13823_v52 }
 0x2d3   : > { %13164 = vmatmul.mubr.msk.bf16.gmra.mrb[96].mxu0 %vm852_vm1, %v13824_v53  ;;  %v13836_v53 = vld [vmem:[%s14522_s28 + $0x208] sm:$0xff]  }
 0x2d4   : > { %13167 = vmatprep.mubr.msk.bf16.mxu0 %vm852_vm1, %v13825_v54 }
 0x2db   : > { %13168 = vmatmul.mubr.msk.bf16.gmra.mrb[100].mxu0 %vm852_vm1, %v13826_v55 }
 0x2dc   : > { %13171 = vmatprep.mubr.msk.bf16.mxu0 %vm852_vm1, %v13827_v56 }
 0x2e3   : > { %13172 = vmatmul.mubr.msk.bf16.gmra.mrb[104].mxu0 %vm852_vm1, %v13828_v57  ;;  %v13837_v57 = vld [vmem:[%s14522_s28 + $0x210] sm:$0xff]  }
 0x2e4   : > { %13175 = vmatprep.mubr.msk.bf16.mxu0 %vm852_vm1, %v13829_v58 }
 0x2e6   : > { %v13069_v60 = vpop.f32.mrb[0].mxu0 }
 0x2e7   : > { %v3505_v61 = vadd.f32 %v13069_v60, %v14924_v59  ;;  %v2857_v62 = vpop.f32.mrb[1].mxu0 }
 0x2e8   : > { %v3503_v5 = vadd.f32 %v14924_v59, %v2857_v62  ;;  %v13070_v6 = vpop.f32.mrb[2].mxu0 }
 0x2e9   : > { %v3633_v8 = vmax.f32 %v3505_v61, 0.0  ;;  %v3506_v9 = vadd.f32 %v13070_v6, %v14924_v59  ;;  %v2860_v10 = vpop.f32.mrb[3].mxu0 }
 0x2ea   : > { %v3631_v0 = vmax.f32 %v3503_v5, 0.0  ;;  %v3504_v1 = vadd.f32 %v14924_v59, %v2860_v10  ;;  %v13843_v5 = vld [vmem:[%s17552_s3 + $0x50] sm:$0xff]  }
 0x2eb   : > { %3762 = vst.msk [vmem:[#allocation5 + $0x10] sm:$0xff] %vm3759_vm2, %v3633_v8  ;;  %v3634_v2 = vmax.f32 %v3506_v9, 0.0  ;;  %13176 = vmatmul.mubr.msk.bf16.gmra.mrb[108].mxu0 %vm852_vm1, %v13830_v63  ;;  %13203 = vmatprep.subr.bf16.mxu1 %v13843_v5 }
 0x2ec   : > { %3760 = vst.msk [vmem:[#allocation5] sm:$0xff] %vm3759_vm2, %v3631_v0  ;;  %v3632_v3 = vmax.f32 %v3504_v1, 0.0  ;;  %13179 = vmatprep.mubr.msk.bf16.mxu0 %vm852_vm1, %v13831_v7  ;;  %13204 = vmatpush3.bf16.msra.mxu1 %v13843_v5  ;;  %v13844_v1 = vld [vmem:[%s17552_s3 + $0x58] sm:$0xff]  }
 0x2ed   : > { %3763 = vst.msk [vmem:[#allocation5 + $0x18] sm:$0xff] %vm3759_vm2, %v3634_v2  ;;  %13205 = vmatprep.subr.bf16.mxu1 %v13844_v1 }
 0x2ee   : > { %3761 = vst.msk [vmem:[#allocation5 + $0x8] sm:$0xff] %vm3759_vm2, %v3632_v3  ;;  %v13073_v11 = vpop.f32.mrb[4].mxu0 }
 0x2ef   : > { %v3509_v12 = vadd.f32 %v13073_v11, %v14924_v59  ;;  %v2873_v13 = vpop.f32.mrb[5].mxu0 }
 0x2f0   : > { %v3507_v15 = vadd.f32 %v14924_v59, %v2873_v13  ;;  %v13074_v16 = vpop.f32.mrb[6].mxu0  ;;  %13206 = vmatpush3.bf16.msra.mxu1 %v13844_v1 }
 0x2f1   : > { %v3637_v18 = vmax.f32 %v3509_v12, 0.0  ;;  %v3510_v19 = vadd.f32 %v13074_v16, %v14924_v59  ;;  %v2876_v20 = vpop.f32.mrb[7].mxu0 }
 0x2f2   : > { %v3635_v21 = vmax.f32 %v3507_v15, 0.0  ;;  %v3508_v22 = vadd.f32 %v14924_v59, %v2876_v20 }
 0x2f3   : > { %3766 = vst.msk [vmem:[#allocation5 + $0x30] sm:$0xff] %vm3759_vm2, %v3637_v18  ;;  %v3638_v24 = vmax.f32 %v3510_v19, 0.0  ;;  %13180 = vmatmul.mubr.msk.bf16.gmra.mrb[112].mxu0 %vm852_vm1, %v13832_v14 }
 0x2f4   : > { %3764 = vst.msk [vmem:[#allocation5 + $0x20] sm:$0xff] %vm3759_vm2, %v3635_v21  ;;  %v3636_v25 = vmax.f32 %v3508_v22, 0.0  ;;  %v4018_v26 = vld [vmem:[#allocation5 + $0x11] ss:$2 sm:$0xff]  ;;  %v3890_v27 = vld [vmem:[#allocation5 + $0x10] ss:$2 sm:$0xff]  ;;  %13183 = vmatprep.mubr.msk.bf16.mxu0 %vm852_vm1, %v13833_v17 }
 0x2f5   : > { %3767 = vst.msk [vmem:[#allocation5 + $0x38] sm:$0xff] %vm3759_vm2, %v3638_v24  ;;  %4635 = vrot.lane.b32.xlu1 %v4018_v26, %s14434_s22  ;;  %4314 = vrot.lane.b32.xlu0 %v3890_v27, %s14435_s23  ;;  %v4016_v28 = vld [vmem:[#allocation5 + $0x1] ss:$2 sm:$0xff]  ;;  %v3888_v36 = vld [vmem:[#allocation5] ss:$2 sm:$0xff] }
 0x2f6   : > { %4185 = vst.msk [vmem:[#allocation2 + $0x19] sm:$0x7f] %vm4184_vm4, %v4018_v26  ;;  %v13077_v29 = vpop.f32.mrb[8].mxu0 }
 0x2f7   : > { %3765 = vst.msk [vmem:[#allocation5 + $0x28] sm:$0xff] %vm3759_vm2, %v3636_v25  ;;  %4183 = vst.msk [vmem:[#allocation2 + $0x11] sm:$0xff] %vm3759_vm2, %v4016_v28  ;;  %v3513_v31 = vadd.f32 %v13077_v29, %v14924_v59  ;;  %v2889_v32 = vpop.f32.mrb[9].mxu0 }
 0x2f8   : > { %v3511_v34 = vadd.f32 %v14924_v59, %v2889_v32  ;;  %v13078_v35 = vpop.f32.mrb[10].mxu0 }
 0x2f9   : > { %v3641_v38 = vmax.f32 %v3513_v31, 0.0  ;;  %v3514_v39 = vadd.f32 %v13078_v35, %v14924_v59  ;;  %4312 = vrot.lane.b32.xlu0 %v3888_v36, %s14435_s23  ;;  %v2892_v40 = vpop.f32.mrb[11].mxu0 }
 0x2fa   : > { %v3639_v41 = vmax.f32 %v3511_v34, 0.0  ;;  %v3512_v42 = vadd.f32 %v14924_v59, %v2892_v40 }
 0x2fb   : > { %3770 = vst.msk [vmem:[#allocation5 + $0x50] sm:$0xff] %vm3759_vm2, %v3641_v38  ;;  %v3642_v44 = vmax.f32 %v3514_v39, 0.0  ;;  %13184 = vmatmul.mubr.msk.bf16.gmra.mrb[116].mxu0 %vm852_vm1, %v13834_v33 }
 0x2fc   : > { %3768 = vst.msk [vmem:[#allocation5 + $0x40] sm:$0xff] %vm3759_vm2, %v3639_v41  ;;  %v3640_v45 = vmax.f32 %v3512_v42, 0.0  ;;  %v3894_v46 = vld [vmem:[#allocation5 + $0x30] ss:$2 sm:$0xff]  ;;  %v4022_v47 = vld [vmem:[#allocation5 + $0x31] ss:$2 sm:$0xff]  ;;  %13187 = vmatprep.mubr.msk.bf16.mxu0 %vm852_vm1, %v13835_v37 }
 0x2fd   : > { %3771 = vst.msk [vmem:[#allocation5 + $0x58] sm:$0xff] %vm3759_vm2, %v3642_v44  ;;  %4633 = vrot.lane.b32.xlu0 %v4016_v28, %s14434_s22  ;;  %4318 = vrot.lane.b32.xlu1 %v3894_v46, %s14435_s23 }
 0x2fe   : > { %4187 = vst.msk [vmem:[#allocation2 + $0x29] sm:$0x7f] %vm4184_vm4, %v4022_v47  ;;  %v4020_v48 = vld [vmem:[#allocation5 + $0x21] ss:$2 sm:$0xff]  ;;  %v13081_v49 = vpop.f32.mrb[12].mxu0 }
 0x2ff   : > { %3769 = vst.msk [vmem:[#allocation5 + $0x48] sm:$0xff] %vm3759_vm2, %v3640_v45  ;;  %4186 = vst.msk [vmem:[#allocation2 + $0x21] sm:$0xff] %vm3759_vm2, %v4020_v48  ;;  %v3517_v51 = vadd.f32 %v13081_v49, %v14924_v59  ;;  %v2905_v52 = vpop.f32.mrb[13].mxu0  ;;  %v3892_v56 = vld [vmem:[#allocation5 + $0x20] ss:$2 sm:$0xff] }
 0x300   : > { %v3515_v54 = vadd.f32 %v14924_v59, %v2905_v52  ;;  %v13082_v55 = vpop.f32.mrb[14].mxu0 }
 0x301   : > { %v3645_v58 = vmax.f32 %v3517_v51, 0.0  ;;  %v3518_v60 = vadd.f32 %v13082_v55, %v14924_v59  ;;  %4639 = vrot.lane.b32.xlu1 %v4022_v47, %s14434_s22  ;;  %4316 = vrot.lane.b32.xlu0 %v3892_v56, %s14435_s23  ;;  %v2908_v61 = vpop.f32.mrb[15].mxu0 }
 0x302   : > { %v3643_v62 = vmax.f32 %v3515_v54, 0.0  ;;  %v3516_v63 = vadd.f32 %v14924_v59, %v2908_v61 }
 0x303   : > { %3774 = vst.msk [vmem:[#allocation5 + $0x70] sm:$0xff] %vm3759_vm2, %v3645_v58  ;;  %v3646_v6 = vmax.f32 %v3518_v60, 0.0  ;;  %13188 = vmatmul.mubr.msk.bf16.gmra.mrb[120].mxu0 %vm852_vm1, %v13836_v53 }
 0x304   : > { %3772 = vst.msk [vmem:[#allocation5 + $0x60] sm:$0xff] %vm3759_vm2, %v3643_v62  ;;  %v3644_v7 = vmax.f32 %v3516_v63, 0.0  ;;  %v3898_v8 = vld [vmem:[#allocation5 + $0x50] ss:$2 sm:$0xff]  ;;  %v4026_v9 = vld [vmem:[#allocation5 + $0x51] ss:$2 sm:$0xff]  ;;  %13191 = vmatprep.mubr.msk.bf16.mxu0 %vm852_vm1, %v13837_v57 }
 0x305   : > { %3775 = vst.msk [vmem:[#allocation5 + $0x78] sm:$0xff] %vm3759_vm2, %v3646_v6  ;;  %4637 = vrot.lane.b32.xlu0 %v4020_v48, %s14434_s22  ;;  %4322 = vrot.lane.b32.xlu1 %v3898_v8, %s14435_s23 }
 0x306   : > { %4189 = vst.msk [vmem:[#allocation2 + $0x39] sm:$0x7f] %vm4184_vm4, %v4026_v9  ;;  %v4024_v10 = vld [vmem:[#allocation5 + $0x41] ss:$2 sm:$0xff]  ;;  %v13085_v0 = vpop.f32.mrb[16].mxu0 }
 0x307   : > { %3773 = vst.msk [vmem:[#allocation5 + $0x68] sm:$0xff] %vm3759_vm2, %v3644_v7  ;;  %4188 = vst.msk [vmem:[#allocation2 + $0x31] sm:$0xff] %vm3759_vm2, %v4024_v10  ;;  %v3521_v2 = vadd.f32 %v13085_v0, %v14924_v59  ;;  %v2921_v3 = vpop.f32.mrb[17].mxu0  ;;  %v3896_v20 = vld [vmem:[#allocation5 + $0x40] ss:$2 sm:$0xff] }
 0x308   : > { %v3519_v11 = vadd.f32 %v14924_v59, %v2921_v3  ;;  %v13086_v12 = vpop.f32.mrb[18].mxu0 }
 0x309   : > { %v3649_v13 = vmax.f32 %v3521_v2, 0.0  ;;  %v3522_v14 = vadd.f32 %v13086_v12, %v14924_v59  ;;  %4643 = vrot.lane.b32.xlu1 %v4026_v9, %s14434_s22  ;;  %4641 = vrot.lane.b32.xlu0 %v4024_v10, %s14434_s22  ;;  %v2924_v15 = vpop.f32.mrb[19].mxu0 }
 0x30a   : > { %v3647_v16 = vmax.f32 %v3519_v11, 0.0  ;;  %v3520_v17 = vadd.f32 %v14924_v59, %v2924_v15 }
 0x30b   : > { %3778 = vst.msk [vmem:[#allocation5 + $0x90] sm:$0xff] %vm3759_vm2, %v3649_v13  ;;  %v3650_v18 = vmax.f32 %v3522_v14, 0.0  ;;  %13192 = vmatmul.mubr.msk.bf16.gmra.mrb[124].mxu0 %vm852_vm1, %v13838_v4 }
 0x30c   : > { %3776 = vst.msk [vmem:[#allocation5 + $0x80] sm:$0xff] %vm3759_vm2, %v3647_v16  ;;  %v3648_v19 = vmax.f32 %v3520_v17, 0.0  ;;  %v4030_v21 = vld [vmem:[#allocation5 + $0x71] ss:$2 sm:$0xff]  ;;  %v3902_v29 = vld [vmem:[#allocation5 + $0x70] ss:$2 sm:$0xff] }
 0x30d   : > { %3779 = vst.msk [vmem:[#allocation5 + $0x98] sm:$0xff] %vm3759_vm2, %v3650_v18  ;;  %4320 = vrot.lane.b32.xlu1 %v3896_v20, %s14435_s23 }
 0x30e   : > { %v3900_v22 = vld [vmem:[#allocation5 + $0x60] ss:$2 sm:$0xff]  ;;  %v4028_v23 = vld [vmem:[#allocation5 + $0x61] ss:$2 sm:$0xff]  ;;  %4191 = vst.msk [vmem:[#allocation2 + $0x49] sm:$0x7f] %vm4184_vm4, %v4030_v21 }
 0x30f   : > { %3777 = vst.msk [vmem:[#allocation5 + $0x88] sm:$0xff] %vm3759_vm2, %v3648_v19  ;;  %4324 = vrot.lane.b32.xlu0 %v3900_v22, %s14435_s23  ;;  %v13089_v24 = vpop.f32.mrb[20].mxu0  ;;  %4190 = vst.msk [vmem:[#allocation2 + $0x41] sm:$0xff] %vm3759_vm2, %v4028_v23 }
 0x310   : > { %v3525_v25 = vadd.f32 %v13089_v24, %v14924_v59  ;;  %v2937_v26 = vpop.f32.mrb[21].mxu0 }
 0x311   : > { %v3523_v27 = vadd.f32 %v14924_v59, %v2937_v26  ;;  %v13090_v28 = vpop.f32.mrb[22].mxu0  ;;  %4326 = vrot.lane.b32.xlu1 %v3902_v29, %s14435_s23 }
 0x312   : > { %v3653_v30 = vmax.f32 %v3525_v25, 0.0  ;;  %v3526_v31 = vadd.f32 %v13090_v28, %v14924_v59  ;;  %v2940_v32 = vpop.f32.mrb[23].mxu0 }
 0x313   : > { %v3651_v33 = vmax.f32 %v3523_v27, 0.0  ;;  %v3524_v34 = vadd.f32 %v14924_v59, %v2940_v32  ;;  %4645 = vrot.lane.b32.xlu0 %v4028_v23, %s14434_s22 }
 0x314   : > { %3782 = vst.msk [vmem:[#allocation5 + $0xb0] sm:$0xff] %vm3759_vm2, %v3653_v30  ;;  %v3654_v35 = vmax.f32 %v3526_v31, 0.0  ;;  %v4034_v37 = vld [vmem:[#allocation5 + $0x91] ss:$2 sm:$0xff]  ;;  %v3906_v45 = vld [vmem:[#allocation5 + $0x90] ss:$2 sm:$0xff] }
 0x315   : > { %3780 = vst.msk [vmem:[#allocation5 + $0xa0] sm:$0xff] %vm3759_vm2, %v3651_v33  ;;  %v3652_v36 = vmax.f32 %v3524_v34, 0.0  ;;  %4647 = vrot.lane.b32.xlu1 %v4030_v21, %s14434_s22 }
 0x316   : > { %3783 = vst.msk [vmem:[#allocation5 + $0xb8] sm:$0xff] %vm3759_vm2, %v3654_v35  ;;  %v3904_v38 = vld [vmem:[#allocation5 + $0x80] ss:$2 sm:$0xff]  ;;  %v4032_v39 = vld [vmem:[#allocation5 + $0x81] ss:$2 sm:$0xff]  ;;  %v13093_v40 = vpop.f32.mrb[24].mxu0 }
 0x317   : > { %4193 = vst.msk [vmem:[#allocation2 + $0x59] sm:$0x7f] %vm4184_vm4, %v4034_v37  ;;  %4328 = vrot.lane.b32.xlu0 %v3904_v38, %s14435_s23  ;;  %v3529_v41 = vadd.f32 %v13093_v40, %v14924_v59  ;;  %v2953_v42 = vpop.f32.mrb[25].mxu0 }
 0x318   : > { %3781 = vst.msk [vmem:[#allocation5 + $0xa8] sm:$0xff] %vm3759_vm2, %v3652_v36  ;;  %4192 = vst.msk [vmem:[#allocation2 + $0x51] sm:$0xff] %vm3759_vm2, %v4032_v39  ;;  %v3527_v43 = vadd.f32 %v14924_v59, %v2953_v42  ;;  %v13094_v44 = vpop.f32.mrb[26].mxu0 }
 0x319   : > { %v3657_v46 = vmax.f32 %v3529_v41, 0.0  ;;  %v3530_v47 = vadd.f32 %v13094_v44, %v14924_v59  ;;  %4330 = vrot.lane.b32.xlu1 %v3906_v45, %s14435_s23  ;;  %v2956_v48 = vpop.f32.mrb[27].mxu0 }
 0x31a   : > { %v3655_v49 = vmax.f32 %v3527_v43, 0.0  ;;  %v3528_v50 = vadd.f32 %v14924_v59, %v2956_v48 }
 0x31b   : > { %4649 = vrot.lane.b32.xlu0 %v4032_v39, %s14434_s22  ;;  %3786 = vst.msk [vmem:[#allocation5 + $0xd0] sm:$0xff] %vm3759_vm2, %v3657_v46  ;;  %v3658_v51 = vmax.f32 %v3530_v47, 0.0 }
 0x31c   : > { %3784 = vst.msk [vmem:[#allocation5 + $0xc0] sm:$0xff] %vm3759_vm2, %v3655_v49  ;;  %v3656_v52 = vmax.f32 %v3528_v50, 0.0 }
 0x31d   : > { %v4038_v53 = vld [vmem:[#allocation5 + $0xb1] ss:$2 sm:$0xff]  ;;  %3787 = vst.msk [vmem:[#allocation5 + $0xd8] sm:$0xff] %vm3759_vm2, %v3658_v51  ;;  %4651 = vrot.lane.b32.xlu1 %v4034_v37, %s14434_s22  ;;  %v3910_v62 = vld [vmem:[#allocation5 + $0xb0] ss:$2 sm:$0xff] }
 0x31e   : > { %4195 = vst.msk [vmem:[#allocation2 + $0x69] sm:$0x7f] %vm4184_vm4, %v4038_v53  ;;  %v13097_v56 = vpop.f32.mrb[28].mxu0 }
 0x31f   : > { %v3908_v54 = vld [vmem:[#allocation5 + $0xa0] ss:$2 sm:$0xff]  ;;  %v4036_v55 = vld [vmem:[#allocation5 + $0xa1] ss:$2 sm:$0xff]  ;;  %3785 = vst.msk [vmem:[#allocation5 + $0xc8] sm:$0xff] %vm3759_vm2, %v3656_v52  ;;  %v3533_v57 = vadd.f32 %v13097_v56, %v14924_v59  ;;  %v2969_v58 = vpop.f32.mrb[29].mxu0 }
 0x320   : > { %4332 = vrot.lane.b32.xlu0 %v3908_v54, %s14435_s23  ;;  %4194 = vst.msk [vmem:[#allocation2 + $0x61] sm:$0xff] %vm3759_vm2, %v4036_v55  ;;  %v3531_v60 = vadd.f32 %v14924_v59, %v2969_v58  ;;  %v13098_v61 = vpop.f32.mrb[30].mxu0 }
 0x321   : > { %v3661_v63 = vmax.f32 %v3533_v57, 0.0  ;;  %v3534_v5 = vadd.f32 %v13098_v61, %v14924_v59  ;;  %4334 = vrot.lane.b32.xlu1 %v3910_v62, %s14435_s23  ;;  %v2972_v6 = vpop.f32.mrb[31].mxu0 }
 0x322   : > { %v3659_v7 = vmax.f32 %v3531_v60, 0.0  ;;  %v3532_v8 = vadd.f32 %v14924_v59, %v2972_v6 }
 0x323   : > { %3790 = vst.msk [vmem:[#allocation5 + $0xf0] sm:$0xff] %vm3759_vm2, %v3661_v63  ;;  %v3662_v9 = vmax.f32 %v3534_v5, 0.0 }
 0x324   : > { %4653 = vrot.lane.b32.xlu0 %v4036_v55, %s14434_s22  ;;  %3788 = vst.msk [vmem:[#allocation5 + $0xe0] sm:$0xff] %vm3759_vm2, %v3659_v7  ;;  %v3660_v10 = vmax.f32 %v3532_v8, 0.0  ;;  %v4042_v0 = vld [vmem:[#allocation5 + $0xd1] ss:$2 sm:$0xff]  ;;  %v3914_v14 = vld [vmem:[#allocation5 + $0xd0] ss:$2 sm:$0xff] }
 0x325   : > { %3791 = vst.msk [vmem:[#allocation5 + $0xf8] sm:$0xff] %vm3759_vm2, %v3662_v9  ;;  %4655 = vrot.lane.b32.xlu1 %v4038_v53, %s14434_s22 }
 0x326   : > { %v3912_v1 = vld [vmem:[#allocation5 + $0xc0] ss:$2 sm:$0xff]  ;;  %v4040_v2 = vld [vmem:[#allocation5 + $0xc1] ss:$2 sm:$0xff]  ;;  %4197 = vst.msk [vmem:[#allocation2 + $0x79] sm:$0x7f] %vm4184_vm4, %v4042_v0 }
 0x327   : > { %3789 = vst.msk [vmem:[#allocation5 + $0xe8] sm:$0xff] %vm3759_vm2, %v3660_v10  ;;  %v13101_v3 = vpop.f32.mrb[32].mxu0  ;;  %4196 = vst.msk [vmem:[#allocation2 + $0x71] sm:$0xff] %vm3759_vm2, %v4040_v2 }
 0x328   : > { %4336 = vrot.lane.b32.xlu0 %v3912_v1, %s14435_s23  ;;  %v3537_v4 = vadd.f32 %v13101_v3, %v14924_v59  ;;  %v2985_v11 = vpop.f32.mrb[33].mxu0 }
 0x329   : > { %v3535_v12 = vadd.f32 %v14924_v59, %v2985_v11  ;;  %v13102_v13 = vpop.f32.mrb[34].mxu0  ;;  %4338 = vrot.lane.b32.xlu1 %v3914_v14, %s14435_s23 }
 0x32a   : > { %v3665_v15 = vmax.f32 %v3537_v4, 0.0  ;;  %v3538_v16 = vadd.f32 %v13102_v13, %v14924_v59  ;;  %v2988_v17 = vpop.f32.mrb[35].mxu0 }
 0x32b   : > { %v3663_v18 = vmax.f32 %v3535_v12, 0.0  ;;  %v3536_v19 = vadd.f32 %v14924_v59, %v2988_v17 }
 0x32c   : > { %4657 = vrot.lane.b32.xlu0 %v4040_v2, %s14434_s22  ;;  %3794 = vst.msk [vmem:[#allocation5 + $0x110] sm:$0xff] %vm3759_vm2, %v3665_v15  ;;  %v3666_v20 = vmax.f32 %v3538_v16, 0.0  ;;  %v4046_v22 = vld [vmem:[#allocation5 + $0xf1] ss:$2 sm:$0xff]  ;;  %v3918_v30 = vld [vmem:[#allocation5 + $0xf0] ss:$2 sm:$0xff] }
 0x32d   : > { %3792 = vst.msk [vmem:[#allocation5 + $0x100] sm:$0xff] %vm3759_vm2, %v3663_v18  ;;  %v3664_v21 = vmax.f32 %v3536_v19, 0.0  ;;  %4659 = vrot.lane.b32.xlu1 %v4042_v0, %s14434_s22 }
 0x32e   : > { %3795 = vst.msk [vmem:[#allocation5 + $0x118] sm:$0xff] %vm3759_vm2, %v3666_v20  ;;  %v3916_v23 = vld [vmem:[#allocation5 + $0xe0] ss:$2 sm:$0xff]  ;;  %v4044_v24 = vld [vmem:[#allocation5 + $0xe1] ss:$2 sm:$0xff]  ;;  %v13105_v25 = vpop.f32.mrb[36].mxu0 }
 0x32f   : > { %4199 = vst.msk [vmem:[#allocation2 + $0x89] sm:$0x7f] %vm4184_vm4, %v4046_v22  ;;  %v3541_v26 = vadd.f32 %v13105_v25, %v14924_v59  ;;  %v3001_v27 = vpop.f32.mrb[37].mxu0 }
 0x330   : > { %3793 = vst.msk [vmem:[#allocation5 + $0x108] sm:$0xff] %vm3759_vm2, %v3664_v21  ;;  %4340 = vrot.lane.b32.xlu0 %v3916_v23, %s14435_s23  ;;  %4198 = vst.msk [vmem:[#allocation2 + $0x81] sm:$0xff] %vm3759_vm2, %v4044_v24  ;;  %v3539_v28 = vadd.f32 %v14924_v59, %v3001_v27  ;;  %v13106_v29 = vpop.f32.mrb[38].mxu0 }
 0x331   : > { %v3669_v31 = vmax.f32 %v3541_v26, 0.0  ;;  %v3542_v32 = vadd.f32 %v13106_v29, %v14924_v59  ;;  %4342 = vrot.lane.b32.xlu1 %v3918_v30, %s14435_s23  ;;  %v3004_v33 = vpop.f32.mrb[39].mxu0 }
 0x332   : > { %v3667_v34 = vmax.f32 %v3539_v28, 0.0  ;;  %v3540_v35 = vadd.f32 %v14924_v59, %v3004_v33 }
 0x333   : > { %3798 = vst.msk [vmem:[#allocation5 + $0x130] sm:$0xff] %vm3759_vm2, %v3669_v31  ;;  %v3670_v36 = vmax.f32 %v3542_v32, 0.0 }
 0x334   : > { %4661 = vrot.lane.b32.xlu0 %v4044_v24, %s14434_s22  ;;  %3796 = vst.msk [vmem:[#allocation5 + $0x120] sm:$0xff] %vm3759_vm2, %v3667_v34  ;;  %v3668_v37 = vmax.f32 %v3540_v35, 0.0 }
 0x335   : > { %v4050_v38 = vld [vmem:[#allocation5 + $0x111] ss:$2 sm:$0xff]  ;;  %3799 = vst.msk [vmem:[#allocation5 + $0x138] sm:$0xff] %vm3759_vm2, %v3670_v36  ;;  %4663 = vrot.lane.b32.xlu1 %v4046_v22, %s14434_s22  ;;  %v3922_v46 = vld [vmem:[#allocation5 + $0x110] ss:$2 sm:$0xff] }
 0x336   : > { %4201 = vst.msk [vmem:[#allocation2 + $0x99] sm:$0x7f] %vm4184_vm4, %v4050_v38  ;;  %v13109_v41 = vpop.f32.mrb[40].mxu0 }
 0x337   : > { %v3920_v39 = vld [vmem:[#allocation5 + $0x100] ss:$2 sm:$0xff]  ;;  %v4048_v40 = vld [vmem:[#allocation5 + $0x101] ss:$2 sm:$0xff]  ;;  %3797 = vst.msk [vmem:[#allocation5 + $0x128] sm:$0xff] %vm3759_vm2, %v3668_v37  ;;  %v3545_v42 = vadd.f32 %v13109_v41, %v14924_v59  ;;  %v3017_v43 = vpop.f32.mrb[41].mxu0 }
 0x338   : > { %4344 = vrot.lane.b32.xlu0 %v3920_v39, %s14435_s23  ;;  %4200 = vst.msk [vmem:[#allocation2 + $0x91] sm:$0xff] %vm3759_vm2, %v4048_v40  ;;  %v3543_v44 = vadd.f32 %v14924_v59, %v3017_v43  ;;  %v13110_v45 = vpop.f32.mrb[42].mxu0 }
 0x339   : > { %v3673_v47 = vmax.f32 %v3545_v42, 0.0  ;;  %v3546_v48 = vadd.f32 %v13110_v45, %v14924_v59  ;;  %4346 = vrot.lane.b32.xlu1 %v3922_v46, %s14435_s23  ;;  %v3020_v49 = vpop.f32.mrb[43].mxu0 }
 0x33a   : > { %v3671_v50 = vmax.f32 %v3543_v44, 0.0  ;;  %v3544_v51 = vadd.f32 %v14924_v59, %v3020_v49 }
 0x33b   : > { %3802 = vst.msk [vmem:[#allocation5 + $0x150] sm:$0xff] %vm3759_vm2, %v3673_v47  ;;  %v3674_v52 = vmax.f32 %v3546_v48, 0.0 }
 0x33c   : > { %4665 = vrot.lane.b32.xlu0 %v4048_v40, %s14434_s22  ;;  %3800 = vst.msk [vmem:[#allocation5 + $0x140] sm:$0xff] %vm3759_vm2, %v3671_v50  ;;  %v3672_v53 = vmax.f32 %v3544_v51, 0.0  ;;  %v4054_v54 = vld [vmem:[#allocation5 + $0x131] ss:$2 sm:$0xff]  ;;  %v3926_v63 = vld [vmem:[#allocation5 + $0x130] ss:$2 sm:$0xff] }
 0x33d   : > { %3803 = vst.msk [vmem:[#allocation5 + $0x158] sm:$0xff] %vm3759_vm2, %v3674_v52  ;;  %4667 = vrot.lane.b32.xlu1 %v4050_v38, %s14434_s22 }
 0x33e   : > { %v3924_v55 = vld [vmem:[#allocation5 + $0x120] ss:$2 sm:$0xff]  ;;  %v4052_v56 = vld [vmem:[#allocation5 + $0x121] ss:$2 sm:$0xff]  ;;  %4203 = vst.msk [vmem:[#allocation2 + $0xa9] sm:$0x7f] %vm4184_vm4, %v4054_v54 }
 0x33f   : > { %3801 = vst.msk [vmem:[#allocation5 + $0x148] sm:$0xff] %vm3759_vm2, %v3672_v53  ;;  %v13113_v57 = vpop.f32.mrb[44].mxu0  ;;  %4202 = vst.msk [vmem:[#allocation2 + $0xa1] sm:$0xff] %vm3759_vm2, %v4052_v56 }
 0x340   : > { %4348 = vrot.lane.b32.xlu0 %v3924_v55, %s14435_s23  ;;  %v3549_v58 = vadd.f32 %v13113_v57, %v14924_v59  ;;  %v3033_v60 = vpop.f32.mrb[45].mxu0 }
 0x341   : > { %v3547_v61 = vadd.f32 %v14924_v59, %v3033_v60  ;;  %v13114_v62 = vpop.f32.mrb[46].mxu0  ;;  %4350 = vrot.lane.b32.xlu1 %v3926_v63, %s14435_s23 }
 0x342   : > { %v3677_v5 = vmax.f32 %v3549_v58, 0.0  ;;  %v3550_v6 = vadd.f32 %v13114_v62, %v14924_v59  ;;  %v3036_v7 = vpop.f32.mrb[47].mxu0 }
 0x343   : > { %v3675_v8 = vmax.f32 %v3547_v61, 0.0  ;;  %v3548_v9 = vadd.f32 %v14924_v59, %v3036_v7 }
 0x344   : > { %4669 = vrot.lane.b32.xlu0 %v4052_v56, %s14434_s22  ;;  %3806 = vst.msk [vmem:[#allocation5 + $0x170] sm:$0xff] %vm3759_vm2, %v3677_v5  ;;  %v3678_v10 = vmax.f32 %v3550_v6, 0.0  ;;  %v4058_v1 = vld [vmem:[#allocation5 + $0x151] ss:$2 sm:$0xff]  ;;  %v3930_v15 = vld [vmem:[#allocation5 + $0x150] ss:$2 sm:$0xff] }
 0x345   : > { %3804 = vst.msk [vmem:[#allocation5 + $0x160] sm:$0xff] %vm3759_vm2, %v3675_v8  ;;  %v3676_v0 = vmax.f32 %v3548_v9, 0.0  ;;  %4671 = vrot.lane.b32.xlu1 %v4054_v54, %s14434_s22 }
 0x346   : > { %3807 = vst.msk [vmem:[#allocation5 + $0x178] sm:$0xff] %vm3759_vm2, %v3678_v10  ;;  %v3928_v2 = vld [vmem:[#allocation5 + $0x140] ss:$2 sm:$0xff]  ;;  %v4056_v3 = vld [vmem:[#allocation5 + $0x141] ss:$2 sm:$0xff]  ;;  %v13117_v4 = vpop.f32.mrb[48].mxu0 }
 0x347   : > { %4205 = vst.msk [vmem:[#allocation2 + $0xb9] sm:$0x7f] %vm4184_vm4, %v4058_v1  ;;  %v3553_v11 = vadd.f32 %v13117_v4, %v14924_v59  ;;  %v3049_v12 = vpop.f32.mrb[49].mxu0 }
 0x348   : > { %3805 = vst.msk [vmem:[#allocation5 + $0x168] sm:$0xff] %vm3759_vm2, %v3676_v0  ;;  %4352 = vrot.lane.b32.xlu0 %v3928_v2, %s14435_s23  ;;  %4204 = vst.msk [vmem:[#allocation2 + $0xb1] sm:$0xff] %vm3759_vm2, %v4056_v3  ;;  %v3551_v13 = vadd.f32 %v14924_v59, %v3049_v12  ;;  %v13118_v14 = vpop.f32.mrb[50].mxu0 }
 0x349   : > { %v3681_v16 = vmax.f32 %v3553_v11, 0.0  ;;  %v3554_v17 = vadd.f32 %v13118_v14, %v14924_v59  ;;  %4354 = vrot.lane.b32.xlu1 %v3930_v15, %s14435_s23  ;;  %v3052_v18 = vpop.f32.mrb[51].mxu0 }
 0x34a   : > { %v3679_v19 = vmax.f32 %v3551_v13, 0.0  ;;  %v3552_v20 = vadd.f32 %v14924_v59, %v3052_v18  ;;  %v15269_v18 = vld [vmem:[%s17551_s2] ss:$0 sm:$0xff] }
 0x34b   : > { %3810 = vst.msk [vmem:[#allocation5 + $0x190] sm:$0xff] %vm3759_vm2, %v3681_v16  ;;  %v3682_v21 = vmax.f32 %v3554_v17, 0.0 }
 0x34c   : > { %4673 = vrot.lane.b32.xlu0 %v4056_v3, %s14434_s22  ;;  %3808 = vst.msk [vmem:[#allocation5 + $0x180] sm:$0xff] %vm3759_vm2, %v3679_v19  ;;  %v3680_v22 = vmax.f32 %v3552_v20, 0.0 }
 0x34d   : > { %v4062_v23 = vld [vmem:[#allocation5 + $0x171] ss:$2 sm:$0xff]  ;;  %3811 = vst.msk [vmem:[#allocation5 + $0x198] sm:$0xff] %vm3759_vm2, %v3682_v21  ;;  %4675 = vrot.lane.b32.xlu1 %v4058_v1, %s14434_s22  ;;  %v3934_v31 = vld [vmem:[#allocation5 + $0x170] ss:$2 sm:$0xff] }
 0x34e   : > { %4207 = vst.msk [vmem:[#allocation2 + $0xc9] sm:$0x7f] %vm4184_vm4, %v4062_v23  ;;  %v13121_v26 = vpop.f32.mrb[52].mxu0 }
 0x34f   : > { %v3932_v24 = vld [vmem:[#allocation5 + $0x160] ss:$2 sm:$0xff]  ;;  %v4060_v25 = vld [vmem:[#allocation5 + $0x161] ss:$2 sm:$0xff]  ;;  %3809 = vst.msk [vmem:[#allocation5 + $0x188] sm:$0xff] %vm3759_vm2, %v3680_v22  ;;  %v3557_v27 = vadd.f32 %v13121_v26, %v14924_v59  ;;  %v3065_v28 = vpop.f32.mrb[53].mxu0 }
 0x350   : > { %4356 = vrot.lane.b32.xlu0 %v3932_v24, %s14435_s23  ;;  %4206 = vst.msk [vmem:[#allocation2 + $0xc1] sm:$0xff] %vm3759_vm2, %v4060_v25  ;;  %v3555_v29 = vadd.f32 %v14924_v59, %v3065_v28  ;;  %v13122_v30 = vpop.f32.mrb[54].mxu0 }
 0x351   : > { %v3685_v32 = vmax.f32 %v3557_v27, 0.0  ;;  %v3558_v33 = vadd.f32 %v13122_v30, %v14924_v59  ;;  %4358 = vrot.lane.b32.xlu1 %v3934_v31, %s14435_s23  ;;  %v3068_v34 = vpop.f32.mrb[55].mxu0 }
 0x352   : > { %v3683_v35 = vmax.f32 %v3555_v29, 0.0  ;;  %v3556_v36 = vadd.f32 %v14924_v59, %v3068_v34 }
 0x353   : > { %3814 = vst.msk [vmem:[#allocation5 + $0x1b0] sm:$0xff] %vm3759_vm2, %v3685_v32  ;;  %v3686_v37 = vmax.f32 %v3558_v33, 0.0 }
 0x354   : > { %4677 = vrot.lane.b32.xlu0 %v4060_v25, %s14434_s22  ;;  %3812 = vst.msk [vmem:[#allocation5 + $0x1a0] sm:$0xff] %vm3759_vm2, %v3683_v35  ;;  %v3684_v38 = vmax.f32 %v3556_v36, 0.0  ;;  %v4066_v39 = vld [vmem:[#allocation5 + $0x191] ss:$2 sm:$0xff]  ;;  %v3938_v47 = vld [vmem:[#allocation5 + $0x190] ss:$2 sm:$0xff] }
 0x355   : > { %3815 = vst.msk [vmem:[#allocation5 + $0x1b8] sm:$0xff] %vm3759_vm2, %v3686_v37  ;;  %4679 = vrot.lane.b32.xlu1 %v4062_v23, %s14434_s22 }
 0x356   : > { %v3936_v40 = vld [vmem:[#allocation5 + $0x180] ss:$2 sm:$0xff]  ;;  %v4064_v41 = vld [vmem:[#allocation5 + $0x181] ss:$2 sm:$0xff]  ;;  %4209 = vst.msk [vmem:[#allocation2 + $0xd9] sm:$0x7f] %vm4184_vm4, %v4066_v39 }
 0x357   : > { %3813 = vst.msk [vmem:[#allocation5 + $0x1a8] sm:$0xff] %vm3759_vm2, %v3684_v38  ;;  %v13125_v42 = vpop.f32.mrb[56].mxu0  ;;  %4208 = vst.msk [vmem:[#allocation2 + $0xd1] sm:$0xff] %vm3759_vm2, %v4064_v41 }
 0x358   : > { %4360 = vrot.lane.b32.xlu0 %v3936_v40, %s14435_s23  ;;  %v3561_v43 = vadd.f32 %v13125_v42, %v14924_v59  ;;  %v3081_v44 = vpop.f32.mrb[57].mxu0 }
 0x359   : > { %v3559_v45 = vadd.f32 %v14924_v59, %v3081_v44  ;;  %v13126_v46 = vpop.f32.mrb[58].mxu0  ;;  %4362 = vrot.lane.b32.xlu1 %v3938_v47, %s14435_s23 }
 0x35a   : > { %v3689_v48 = vmax.f32 %v3561_v43, 0.0  ;;  %v3562_v49 = vadd.f32 %v13126_v46, %v14924_v59  ;;  %v3084_v50 = vpop.f32.mrb[59].mxu0 }
 0x35b   : > { %v3687_v51 = vmax.f32 %v3559_v45, 0.0  ;;  %v3560_v52 = vadd.f32 %v14924_v59, %v3084_v50 }
 0x35c   : > { %4681 = vrot.lane.b32.xlu0 %v4064_v41, %s14434_s22  ;;  %3818 = vst.msk [vmem:[#allocation5 + $0x1d0] sm:$0xff] %vm3759_vm2, %v3689_v48  ;;  %v3690_v53 = vmax.f32 %v3562_v49, 0.0  ;;  %v4070_v55 = vld [vmem:[#allocation5 + $0x1b1] ss:$2 sm:$0xff]  ;;  %v3942_v5 = vld [vmem:[#allocation5 + $0x1b0] ss:$2 sm:$0xff] }
 0x35d   : > { %3816 = vst.msk [vmem:[#allocation5 + $0x1c0] sm:$0xff] %vm3759_vm2, %v3687_v51  ;;  %v3688_v54 = vmax.f32 %v3560_v52, 0.0  ;;  %4683 = vrot.lane.b32.xlu1 %v4066_v39, %s14434_s22 }
 0x35e   : > { %3819 = vst.msk [vmem:[#allocation5 + $0x1d8] sm:$0xff] %vm3759_vm2, %v3690_v53  ;;  %v3940_v56 = vld [vmem:[#allocation5 + $0x1a0] ss:$2 sm:$0xff]  ;;  %v4068_v57 = vld [vmem:[#allocation5 + $0x1a1] ss:$2 sm:$0xff]  ;;  %v13129_v58 = vpop.f32.mrb[60].mxu0 }
 0x35f   : > { %4211 = vst.msk [vmem:[#allocation2 + $0xe9] sm:$0x7f] %vm4184_vm4, %v4070_v55  ;;  %v3565_v60 = vadd.f32 %v13129_v58, %v14924_v59  ;;  %v3097_v61 = vpop.f32.mrb[61].mxu0 }
 0x360   : > { %3817 = vst.msk [vmem:[#allocation5 + $0x1c8] sm:$0xff] %vm3759_vm2, %v3688_v54  ;;  %4364 = vrot.lane.b32.xlu0 %v3940_v56, %s14435_s23  ;;  %4210 = vst.msk [vmem:[#allocation2 + $0xe1] sm:$0xff] %vm3759_vm2, %v4068_v57  ;;  %v3563_v62 = vadd.f32 %v14924_v59, %v3097_v61  ;;  %v13130_v63 = vpop.f32.mrb[62].mxu0 }
 0x361   : > { %v3693_v6 = vmax.f32 %v3565_v60, 0.0  ;;  %v3566_v7 = vadd.f32 %v13130_v63, %v14924_v59  ;;  %4366 = vrot.lane.b32.xlu1 %v3942_v5, %s14435_s23  ;;  %v3100_v8 = vpop.f32.mrb[63].mxu0 }
 0x362   : > { %v3691_v9 = vmax.f32 %v3563_v62, 0.0  ;;  %v3564_v10 = vadd.f32 %v14924_v59, %v3100_v8 }
 0x363   : > { %3822 = vst.msk [vmem:[#allocation5 + $0x1f0] sm:$0xff] %vm3759_vm2, %v3693_v6  ;;  %v3694_v0 = vmax.f32 %v3566_v7, 0.0 }
 0x364   : > { %4685 = vrot.lane.b32.xlu0 %v4068_v57, %s14434_s22  ;;  %3820 = vst.msk [vmem:[#allocation5 + $0x1e0] sm:$0xff] %vm3759_vm2, %v3691_v9  ;;  %v3692_v1 = vmax.f32 %v3564_v10, 0.0 }
 0x365   : > { %v4074_v2 = vld [vmem:[#allocation5 + $0x1d1] ss:$2 sm:$0xff]  ;;  %3823 = vst.msk [vmem:[#allocation5 + $0x1f8] sm:$0xff] %vm3759_vm2, %v3694_v0  ;;  %4687 = vrot.lane.b32.xlu1 %v4070_v55, %s14434_s22  ;;  %v3946_v16 = vld [vmem:[#allocation5 + $0x1d0] ss:$2 sm:$0xff] }
 0x366   : > { %4213 = vst.msk [vmem:[#allocation2 + $0xf9] sm:$0x7f] %vm4184_vm4, %v4074_v2  ;;  %v13133_v11 = vpop.f32.mrb[64].mxu0 }
 0x367   : > { %v3944_v3 = vld [vmem:[#allocation5 + $0x1c0] ss:$2 sm:$0xff]  ;;  %v4072_v4 = vld [vmem:[#allocation5 + $0x1c1] ss:$2 sm:$0xff]  ;;  %3821 = vst.msk [vmem:[#allocation5 + $0x1e8] sm:$0xff] %vm3759_vm2, %v3692_v1  ;;  %v3569_v12 = vadd.f32 %v13133_v11, %v14924_v59  ;;  %v4636_v13 = vpop.permute.xlu1 %4635  ;;  %v4315_v14 = vpop.permute.xlu0 %4314 }
 0x368   : > { %4368 = vrot.lane.b32.xlu0 %v3944_v3, %s14435_s23  ;;  %4212 = vst.msk [vmem:[#allocation2 + $0xf1] sm:$0xff] %vm3759_vm2, %v4072_v4  ;;  %v3113_v15 = vpop.f32.mrb[65].mxu0 }
 0x369   : > { %4506 = vst.msk [vmem:[#allocation2 + $0x18] sm:$0xff] %vm4504_vm6, %v4315_v14  ;;  %v3697_v17 = vmax.f32 %v3569_v12, 0.0  ;;  %v3567_v19 = vadd.f32 %v15269_v18, %v3113_v15  ;;  %v13134_v20 = vpop.f32.mrb[66].mxu0  ;;  %4370 = vrot.lane.b32.xlu1 %v3946_v16, %s14435_s23 }
 0x36a   : > { %4827 = vst.msk [vmem:[#allocation2 + $0x18] sm:$0xff] %vm4825_vm7, %v4636_v13  ;;  %v3570_v59 = vadd.f32 %v15269_v18, %v13134_v20  ;;  %v3116_v21 = vpop.f32.mrb[67].mxu0 }
 0x36b   : > { %3826 = vst.msk [vmem:[#allocation5 + $0x210] sm:$0xff] %vm3759_vm2, %v3697_v17  ;;  %v3695_v22 = vmax.f32 %v3567_v19, 0.0  ;;  %v3568_v23 = vadd.f32 %v15269_v18, %v3116_v21  ;;  %v4313_v24 = vpop.permute.xlu0 %4312 }
 0x36c   : > { %4689 = vrot.lane.b32.xlu0 %v4072_v4, %s14434_s22  ;;  %v3698_v25 = vmax.f32 %v3570_v59, 0.0  ;;  %4505 = vst.msk [vmem:[#allocation2 + $0x10] sm:$0xff] %vm4504_vm6, %v4313_v24  ;;  %v15278_v26 = vld [vmem:[#allocation5 + $0x1f1] ss:$2 sm:$0xff] }
 0x36d   : > { %3824 = vst.msk [vmem:[#allocation5 + $0x200] sm:$0xff] %vm3759_vm2, %v3695_v22  ;;  %v3696_v27 = vmax.f32 %v3568_v23, 0.0  ;;  %4691 = vrot.lane.b32.xlu1 %v4074_v2, %s14434_s22 }
 0x36e   : > { %4215 = vst.msk [vmem:[#allocation2 + $0x109] sm:$0x7f] %vm4184_vm4, %v15278_v26  ;;  %v15284_v28 = vld [vmem:[#allocation5 + $0x1e1] ss:$2 sm:$0xff]  ;;  %v13137_v29 = vpop.f32.mrb[68].mxu0 }
 0x36f   : > { %3827 = vst.msk [vmem:[#allocation5 + $0x218] sm:$0xff] %vm3759_vm2, %v3698_v25  ;;  %4214 = vst.msk [vmem:[#allocation2 + $0x101] sm:$0xff] %vm3759_vm2, %v15284_v28  ;;  %v3573_v30 = vadd.f32 %v15269_v18, %v13137_v29  ;;  %v4634_v31 = vpop.permute.xlu0 %4633  ;;  %v4319_v32 = vpop.permute.xlu1 %4318 }
 0x370   : > { %3825 = vst.msk [vmem:[#allocation5 + $0x208] sm:$0xff] %vm3759_vm2, %v3696_v27  ;;  %v3129_v33 = vpop.f32.mrb[69].mxu0 }
 0x371   : > { %4826 = vst.msk [vmem:[#allocation2 + $0x10] sm:$0xff] %vm4825_vm7, %v4634_v31  ;;  %v3701_v34 = vmax.f32 %v3573_v30, 0.0  ;;  %v3571_v35 = vadd.f32 %v15269_v18, %v3129_v33  ;;  %v13138_v36 = vpop.f32.mrb[70].mxu0  ;;  %v4951_v54 = vld [vmem:[#allocation2 + $0x18] sm:$0xff] }
 0x372   : > { %4508 = vst.msk [vmem:[#allocation2 + $0x28] sm:$0xff] %vm4504_vm6, %v4319_v32  ;;  %v3574_v37 = vadd.f32 %v15269_v18, %v13138_v36  ;;  %v3132_v38 = vpop.f32.mrb[71].mxu0 }
 0x373   : > { %3830 = vst.msk [vmem:[#allocation5 + $0x230] sm:$0xff] %vm3759_vm2, %v3701_v34  ;;  %v3699_v39 = vmax.f32 %v3571_v35, 0.0  ;;  %v3572_v40 = vadd.f32 %v15269_v18, %v3132_v38  ;;  %v4640_v41 = vpop.permute.xlu1 %4639  ;;  %v4317_v42 = vpop.permute.xlu0 %4316 }
 0x374   : > { %v3702_v43 = vmax.f32 %v3574_v37, 0.0  ;;  %4829 = vst.msk [vmem:[#allocation2 + $0x28] sm:$0xff] %vm4825_vm7, %v4640_v41 }
 0x375   : > { %4507 = vst.msk [vmem:[#allocation2 + $0x20] sm:$0xff] %vm4504_vm6, %v4317_v42  ;;  %v3700_v44 = vmax.f32 %v3572_v40, 0.0 }
 0x376   : > { %3828 = vst.msk [vmem:[#allocation5 + $0x220] sm:$0xff] %vm3759_vm2, %v3699_v39  ;;  %v3954_v45 = vld [vmem:[#allocation5 + $0x210] ss:$2 sm:$0xff]  ;;  %v4082_v46 = vld [vmem:[#allocation5 + $0x211] ss:$2 sm:$0xff]  ;;  %3831 = vst.msk [vmem:[#allocation5 + $0x238] sm:$0xff] %vm3759_vm2, %v3702_v43 }
 0x377   : > { %4378 = vrot.lane.b32.xlu1 %v3954_v45, %s14435_s23  ;;  %v3952_v47 = vld [vmem:[#allocation5 + $0x200] ss:$2 sm:$0xff]  ;;  %v13141_v48 = vpop.f32.mrb[72].mxu0  ;;  %4217 = vst.msk [vmem:[#allocation2 + $0x119] sm:$0x7f] %vm4184_vm4, %v4082_v46  ;;  %v4638_v51 = vpop.permute.xlu0 %4637 }
 0x378   : > { %v4080_v49 = vld [vmem:[#allocation5 + $0x201] ss:$2 sm:$0xff]  ;;  %3829 = vst.msk [vmem:[#allocation5 + $0x228] sm:$0xff] %vm3759_vm2, %v3700_v44  ;;  %4376 = vrot.lane.b32.xlu0 %v3952_v47, %s14435_s23  ;;  %v3577_v50 = vadd.f32 %v15269_v18, %v13141_v48  ;;  %v4323_v52 = vpop.permute.xlu1 %4322  ;;  %v3145_v55 = vpop.f32.mrb[73].mxu0 }
 0x379   : > { %v4950_v53 = vld [vmem:[#allocation2 + $0x10] sm:$0xff]  ;;  %4216 = vst.msk [vmem:[#allocation2 + $0x111] sm:$0xff] %vm3759_vm2, %v4080_v49  ;;  %v3575_v58 = vadd.f32 %v15269_v18, %v3145_v55  ;;  %v13142_v60 = vpop.f32.mrb[74].mxu0 }
 0x37a   : > { %4828 = vst.msk [vmem:[#allocation2 + $0x20] sm:$0xff] %vm4825_vm7, %v4638_v51  ;;  %v4982_v56 = vpack.c.bf16 %v4951_v54, %v4950_v53  ;;  %v3705_v57 = vmax.f32 %v3577_v50, 0.0  ;;  %v3578_v61 = vadd.f32 %v15269_v18, %v13142_v60  ;;  %v3148_v62 = vpop.f32.mrb[75].mxu0 }
 0x37b   : > { %4510 = vst.msk [vmem:[#allocation2 + $0x38] sm:$0xff] %vm4504_vm6, %v4323_v52  ;;  %4699 = vrot.lane.b32.xlu1 %v4082_v46, %s14434_s22  ;;  %v3703_v63 = vmax.f32 %v3575_v58, 0.0  ;;  %v3576_v5 = vadd.f32 %v15269_v18, %v3148_v62  ;;  %v4642_v7 = vpop.permute.xlu0 %4641 }
 0x37c   : > { %13207 = vmatprep.mubr.msk.bf16.mxu1 %vm4143_vm5, %v4982_v56  ;;  %3834 = vst.msk [vmem:[#allocation5 + $0x250] sm:$0xff] %vm3759_vm2, %v3705_v57  ;;  %4697 = vrot.lane.b32.xlu0 %v4080_v49, %s14434_s22  ;;  %v4644_v6 = vpop.permute.xlu1 %4643  ;;  %v3706_v8 = vmax.f32 %v3578_v61, 0.0 }
 0x37d   : > { %4831 = vst.msk [vmem:[#allocation2 + $0x38] sm:$0xff] %vm4825_vm7, %v4644_v6  ;;  %v3704_v9 = vmax.f32 %v3576_v5, 0.0  ;;  %v15318_v10 = vld [vmem:[#allocation5 + $0x231] ss:$2 sm:$0xff] }
 0x37e   : > { %3832 = vst.msk [vmem:[#allocation5 + $0x240] sm:$0xff] %vm3759_vm2, %v3703_v63  ;;  %3835 = vst.msk [vmem:[#allocation5 + $0x258] sm:$0xff] %vm3759_vm2, %v3706_v8  ;;  %v13145_v0 = vpop.f32.mrb[76].mxu0 }
 0x37f   : > { %4219 = vst.msk [vmem:[#allocation2 + $0x129] sm:$0x7f] %vm4184_vm4, %v15318_v10  ;;  %v15323_v1 = vld [vmem:[#allocation5 + $0x221] ss:$2 sm:$0xff]  ;;  %v3581_v2 = vadd.f32 %v15269_v18, %v13145_v0  ;;  %v3161_v4 = vpop.f32.mrb[77].mxu0 }
 0x380   : > { %3833 = vst.msk [vmem:[#allocation5 + $0x248] sm:$0xff] %vm3759_vm2, %v3704_v9  ;;  %v4321_v3 = vpop.permute.xlu1 %4320  ;;  %4218 = vst.msk [vmem:[#allocation2 + $0x121] sm:$0xff] %vm3759_vm2, %v15323_v1  ;;  %v3579_v11 = vadd.f32 %v15269_v18, %v3161_v4  ;;  %v13146_v13 = vpop.f32.mrb[78].mxu0 }
 0x381   : > { %4509 = vst.msk [vmem:[#allocation2 + $0x30] sm:$0xff] %vm4504_vm6, %v4321_v3  ;;  %v4325_v12 = vpop.permute.xlu0 %4324  ;;  %v3709_v14 = vmax.f32 %v3581_v2, 0.0  ;;  %v3582_v15 = vadd.f32 %v15269_v18, %v13146_v13  ;;  %v3164_v16 = vpop.f32.mrb[79].mxu0 }
 0x382   : > { %4830 = vst.msk [vmem:[#allocation2 + $0x30] sm:$0xff] %vm4825_vm7, %v4642_v7  ;;  %v3707_v17 = vmax.f32 %v3579_v11, 0.0  ;;  %v3580_v19 = vadd.f32 %v15269_v18, %v3164_v16 }
 0x383   : > { %4511 = vst.msk [vmem:[#allocation2 + $0x40] sm:$0xff] %vm4504_vm6, %v4325_v12  ;;  %v3710_v20 = vmax.f32 %v3582_v15, 0.0 }
 0x384   : > { %3838 = vst.msk [vmem:[#allocation5 + $0x270] sm:$0xff] %vm3759_vm2, %v3709_v14  ;;  %v4327_v59 = vpop.permute.xlu1 %4326  ;;  %3836 = vst.msk [vmem:[#allocation5 + $0x260] sm:$0xff] %vm3759_vm2, %v3707_v17  ;;  %v3708_v21 = vmax.f32 %v3580_v19, 0.0  ;;  %v4953_v37 = vld [vmem:[#allocation2 + $0x38] sm:$0xff] }
 0x385   : > { %4512 = vst.msk [vmem:[#allocation2 + $0x48] sm:$0xff] %vm4504_vm6, %v4327_v59  ;;  %v4646_v22 = vpop.permute.xlu0 %4645  ;;  %v3962_v23 = vld [vmem:[#allocation5 + $0x250] ss:$2 sm:$0xff]  ;;  %v4090_v24 = vld [vmem:[#allocation5 + $0x251] ss:$2 sm:$0xff] }
 0x386   : > { %3839 = vst.msk [vmem:[#allocation5 + $0x278] sm:$0xff] %vm3759_vm2, %v3710_v20  ;;  %3837 = vst.msk [vmem:[#allocation5 + $0x268] sm:$0xff] %vm3759_vm2, %v3708_v21  ;;  %4386 = vrot.lane.b32.xlu1 %v3962_v23, %s14435_s23  ;;  %v13149_v27 = vpop.f32.mrb[80].mxu0 }
 0x387   : > { %4832 = vst.msk [vmem:[#allocation2 + $0x40] sm:$0xff] %vm4825_vm7, %v4646_v22  ;;  %v3960_v25 = vld [vmem:[#allocation5 + $0x240] ss:$2 sm:$0xff]  ;;  %v4088_v29 = vld [vmem:[#allocation5 + $0x241] ss:$2 sm:$0xff]  ;;  %v3585_v30 = vadd.f32 %v15269_v18, %v13149_v27  ;;  %v3177_v32 = vpop.f32.mrb[81].mxu0 }
 0x388   : > { %4221 = vst.msk [vmem:[#allocation2 + $0x139] sm:$0x7f] %vm4184_vm4, %v4090_v24  ;;  %4384 = vrot.lane.b32.xlu0 %v3960_v25, %s14435_s23  ;;  %v4648_v31 = vpop.permute.xlu1 %4647  ;;  %v3583_v33 = vadd.f32 %v15269_v18, %v3177_v32  ;;  %v13150_v35 = vpop.f32.mrb[82].mxu0 }
 0x389   : > { %4220 = vst.msk [vmem:[#allocation2 + $0x131] sm:$0xff] %vm3759_vm2, %v4088_v29  ;;  %v4329_v34 = vpop.permute.xlu0 %4328  ;;  %v4952_v36 = vld [vmem:[#allocation2 + $0x30] sm:$0xff]  ;;  %v3713_v38 = vmax.f32 %v3585_v30, 0.0  ;;  %v3586_v39 = vadd.f32 %v15269_v18, %v13150_v35  ;;  %v3180_v40 = vpop.f32.mrb[83].mxu0 }
 0x38a   : > { %4833 = vst.msk [vmem:[#allocation2 + $0x48] sm:$0xff] %vm4825_vm7, %v4648_v31  ;;  %v4983_v41 = vpack.c.bf16 %v4953_v37, %v4952_v36  ;;  %v3711_v42 = vmax.f32 %v3583_v33, 0.0  ;;  %4707 = vrot.lane.b32.xlu1 %v4090_v24, %s14434_s22  ;;  %v3584_v43 = vadd.f32 %v15269_v18, %v3180_v40 }
 0x38b   : > { %4513 = vst.msk [vmem:[#allocation2 + $0x50] sm:$0xff] %vm4504_vm6, %v4329_v34  ;;  %v3714_v44 = vmax.f32 %v3586_v39, 0.0 }
 0x38c   : > { %3842 = vst.msk [vmem:[#allocation5 + $0x290] sm:$0xff] %vm3759_vm2, %v3713_v38  ;;  %4705 = vrot.lane.b32.xlu0 %v4088_v29, %s14434_s22  ;;  %13208 = vmatmul.mubr.msk.bf16.vlgmr.msra.gmra.mrb[0].mxu1 %vm4143_vm5, %v4983_v41  ;;  %v4331_v45 = vpop.permute.xlu1 %4330  ;;  %3840 = vst.msk [vmem:[#allocation5 + $0x280] sm:$0xff] %vm3759_vm2, %v3711_v42  ;;  %v3712_v46 = vmax.f32 %v3584_v43, 0.0 }
 0x38d   : > { %4514 = vst.msk [vmem:[#allocation2 + $0x58] sm:$0xff] %vm4504_vm6, %v4331_v45  ;;  %v4650_v47 = vpop.permute.xlu0 %4649  ;;  %v15357_v48 = vld [vmem:[#allocation5 + $0x271] ss:$2 sm:$0xff]  ;;  %v15363_v49 = vld [vmem:[#allocation5 + $0x261] ss:$2 sm:$0xff] }
 0x38e   : > { %3843 = vst.msk [vmem:[#allocation5 + $0x298] sm:$0xff] %vm3759_vm2, %v3714_v44  ;;  %3841 = vst.msk [vmem:[#allocation5 + $0x288] sm:$0xff] %vm3759_vm2, %v3712_v46  ;;  %v13153_v50 = vpop.f32.mrb[84].mxu0 }
 0x38f   : > { %4834 = vst.msk [vmem:[#allocation2 + $0x50] sm:$0xff] %vm4825_vm7, %v4650_v47  ;;  %v3589_v51 = vadd.f32 %v15269_v18, %v13153_v50  ;;  %v3193_v53 = vpop.f32.mrb[85].mxu0 }
 0x390   : > { %4223 = vst.msk [vmem:[#allocation2 + $0x149] sm:$0x7f] %vm4184_vm4, %v15357_v48  ;;  %v4652_v52 = vpop.permute.xlu1 %4651  ;;  %v3587_v54 = vadd.f32 %v15269_v18, %v3193_v53  ;;  %v13154_v56 = vpop.f32.mrb[86].mxu0 }
 0x391   : > { %4222 = vst.msk [vmem:[#allocation2 + $0x141] sm:$0xff] %vm3759_vm2, %v15363_v49  ;;  %v3717_v57 = vmax.f32 %v3589_v51, 0.0  ;;  %v3590_v58 = vadd.f32 %v15269_v18, %v13154_v56  ;;  %v3196_v60 = vpop.f32.mrb[87].mxu0 }
 0x392   : > { %4835 = vst.msk [vmem:[#allocation2 + $0x58] sm:$0xff] %vm4825_vm7, %v4652_v52  ;;  %v4333_v55 = vpop.permute.xlu0 %4332  ;;  %v3715_v61 = vmax.f32 %v3587_v54, 0.0  ;;  %v3588_v62 = vadd.f32 %v15269_v18, %v3196_v60 }
 0x393   : > { %4515 = vst.msk [vmem:[#allocation2 + $0x60] sm:$0xff] %vm4504_vm6, %v4333_v55  ;;  %v3718_v63 = vmax.f32 %v3590_v58, 0.0 }
 0x394   : > { %3846 = vst.msk [vmem:[#allocation5 + $0x2b0] sm:$0xff] %vm3759_vm2, %v3717_v57  ;;  %v4335_v5 = vpop.permute.xlu1 %4334  ;;  %3844 = vst.msk [vmem:[#allocation5 + $0x2a0] sm:$0xff] %vm3759_vm2, %v3715_v61  ;;  %v3716_v6 = vmax.f32 %v3588_v62, 0.0 }
 0x395   : > { %4516 = vst.msk [vmem:[#allocation2 + $0x68] sm:$0xff] %vm4504_vm6, %v4335_v5  ;;  %v3970_v8 = vld [vmem:[#allocation5 + $0x290] ss:$2 sm:$0xff]  ;;  %v4098_v9 = vld [vmem:[#allocation5 + $0x291] ss:$2 sm:$0xff] }
 0x396   : > { %v4654_v7 = vpop.permute.xlu0 %4653  ;;  %3847 = vst.msk [vmem:[#allocation5 + $0x2b8] sm:$0xff] %vm3759_vm2, %v3718_v63  ;;  %4394 = vrot.lane.b32.xlu1 %v3970_v8, %s14435_s23  ;;  %v3968_v0 = vld [vmem:[#allocation5 + $0x280] ss:$2 sm:$0xff]  ;;  %v4096_v2 = vld [vmem:[#allocation5 + $0x281] ss:$2 sm:$0xff]  ;;  %3845 = vst.msk [vmem:[#allocation5 + $0x2a8] sm:$0xff] %vm3759_vm2, %v3716_v6 }
 0x397   : > { %4836 = vst.msk [vmem:[#allocation2 + $0x60] sm:$0xff] %vm4825_vm7, %v4654_v7  ;;  %4392 = vrot.lane.b32.xlu0 %v3968_v0, %s14435_s23  ;;  %v13157_v3 = vpop.f32.mrb[88].mxu0  ;;  %v4954_v13 = vld [vmem:[#allocation2 + $0x50] sm:$0xff] }
 0x398   : > { %4225 = vst.msk [vmem:[#allocation2 + $0x159] sm:$0x7f] %vm4184_vm4, %v4098_v9  ;;  %v3593_v4 = vadd.f32 %v15269_v18, %v13157_v3  ;;  %v4656_v11 = vpop.permute.xlu1 %4655  ;;  %v3209_v12 = vpop.f32.mrb[89].mxu0 }
 0x399   : > { %4224 = vst.msk [vmem:[#allocation2 + $0x151] sm:$0xff] %vm3759_vm2, %v4096_v2  ;;  %v4955_v14 = vld [vmem:[#allocation2 + $0x58] sm:$0xff]  ;;  %v3591_v15 = vadd.f32 %v15269_v18, %v3209_v12  ;;  %v13158_v17 = vpop.f32.mrb[90].mxu0 }
 0x39a   : > { %4837 = vst.msk [vmem:[#allocation2 + $0x68] sm:$0xff] %vm4825_vm7, %v4656_v11  ;;  %v4337_v16 = vpop.permute.xlu0 %4336  ;;  %v4984_v19 = vpack.c.bf16 %v4955_v14, %v4954_v13  ;;  %v3721_v20 = vmax.f32 %v3593_v4, 0.0  ;;  %v3594_v59 = vadd.f32 %v15269_v18, %v13158_v17  ;;  %4715 = vrot.lane.b32.xlu1 %v4098_v9, %s14434_s22  ;;  %v3212_v21 = vpop.f32.mrb[91].mxu0 }
 0x39b   : > { %4517 = vst.msk [vmem:[#allocation2 + $0x70] sm:$0xff] %vm4504_vm6, %v4337_v16  ;;  %v3719_v22 = vmax.f32 %v3591_v15, 0.0  ;;  %v3592_v23 = vadd.f32 %v15269_v18, %v3212_v21  ;;  %4713 = vrot.lane.b32.xlu0 %v4096_v2, %s14434_s22  ;;  %v13845_v15 = vld [vmem:[%s17552_s3] sm:$0xff]  }
 0x39c   : > { %13211 = vmatprep.mubr.msk.bf16.mxu1 %vm4143_vm5, %v4984_v19  ;;  %3850 = vst.msk [vmem:[#allocation5 + $0x2d0] sm:$0xff] %vm3759_vm2, %v3721_v20  ;;  %v3722_v24 = vmax.f32 %v3594_v59, 0.0  ;;  %v4339_v25 = vpop.permute.xlu1 %4338  ;;  %13239 = vmatprep.subr.bf16.mxu1 %v13845_v15 }
 0x39d   : > { %3848 = vst.msk [vmem:[#allocation5 + $0x2c0] sm:$0xff] %vm3759_vm2, %v3719_v22  ;;  %v3720_v27 = vmax.f32 %v3592_v23, 0.0  ;;  %v15396_v30 = vld [vmem:[#allocation5 + $0x2b1] ss:$2 sm:$0xff]  ;;  %v15402_v31 = vld [vmem:[#allocation5 + $0x2a1] ss:$2 sm:$0xff]  ;;  %13240 = vmatpush3.bf16.msra.mxu1 %v13845_v15 }
 0x39e   : > { %4518 = vst.msk [vmem:[#allocation2 + $0x78] sm:$0xff] %vm4504_vm6, %v4339_v25  ;;  %v4658_v29 = vpop.permute.xlu0 %4657  ;;  %v13161_v32 = vpop.f32.mrb[92].mxu0 }
 0x39f   : > { %3851 = vst.msk [vmem:[#allocation5 + $0x2d8] sm:$0xff] %vm3759_vm2, %v3722_v24  ;;  %3849 = vst.msk [vmem:[#allocation5 + $0x2c8] sm:$0xff] %vm3759_vm2, %v3720_v27  ;;  %v3597_v33 = vadd.f32 %v15269_v18, %v13161_v32  ;;  %v3225_v35 = vpop.f32.mrb[93].mxu0 }
 0x3a0   : > { %4838 = vst.msk [vmem:[#allocation2 + $0x70] sm:$0xff] %vm4825_vm7, %v4658_v29  ;;  %v4660_v34 = vpop.permute.xlu1 %4659  ;;  %v3595_v36 = vadd.f32 %v15269_v18, %v3225_v35  ;;  %v13162_v38 = vpop.f32.mrb[94].mxu0 }
 0x3a1   : > { %4227 = vst.msk [vmem:[#allocation2 + $0x169] sm:$0x7f] %vm4184_vm4, %v15396_v30  ;;  %v3725_v39 = vmax.f32 %v3597_v33, 0.0  ;;  %v3598_v40 = vadd.f32 %v15269_v18, %v13162_v38  ;;  %v3228_v41 = vpop.f32.mrb[95].mxu0 }
 0x3a2   : > { %4226 = vst.msk [vmem:[#allocation2 + $0x161] sm:$0xff] %vm3759_vm2, %v15402_v31  ;;  %v4341_v37 = vpop.permute.xlu0 %4340  ;;  %v3723_v42 = vmax.f32 %v3595_v36, 0.0  ;;  %v3596_v43 = vadd.f32 %v15269_v18, %v3228_v41 }
 0x3a3   : > { %4839 = vst.msk [vmem:[#allocation2 + $0x78] sm:$0xff] %vm4825_vm7, %v4660_v34  ;;  %v3726_v44 = vmax.f32 %v3598_v40, 0.0 }
 0x3a4   : > { %4519 = vst.msk [vmem:[#allocation2 + $0x80] sm:$0xff] %vm4504_vm6, %v4341_v37  ;;  %v4343_v45 = vpop.permute.xlu1 %4342  ;;  %v3724_v46 = vmax.f32 %v3596_v43, 0.0 }
 0x3a5   : > { %3854 = vst.msk [vmem:[#allocation5 + $0x2f0] sm:$0xff] %vm3759_vm2, %v3725_v39  ;;  %3852 = vst.msk [vmem:[#allocation5 + $0x2e0] sm:$0xff] %vm3759_vm2, %v3723_v42 }
 0x3a6   : > { %4520 = vst.msk [vmem:[#allocation2 + $0x88] sm:$0xff] %vm4504_vm6, %v4343_v45  ;;  %v4662_v47 = vpop.permute.xlu0 %4661  ;;  %v3978_v50 = vld [vmem:[#allocation5 + $0x2d0] ss:$2 sm:$0xff]  ;;  %v4106_v51 = vld [vmem:[#allocation5 + $0x2d1] ss:$2 sm:$0xff]  ;;  %v13165_v54 = vpop.f32.mrb[96].mxu0 }
 0x3a7   : > { %3855 = vst.msk [vmem:[#allocation5 + $0x2f8] sm:$0xff] %vm3759_vm2, %v3726_v44  ;;  %4402 = vrot.lane.b32.xlu1 %v3978_v50, %s14435_s23  ;;  %v3976_v52 = vld [vmem:[#allocation5 + $0x2c0] ss:$2 sm:$0xff]  ;;  %v4104_v53 = vld [vmem:[#allocation5 + $0x2c1] ss:$2 sm:$0xff]  ;;  %3853 = vst.msk [vmem:[#allocation5 + $0x2e8] sm:$0xff] %vm3759_vm2, %v3724_v46  ;;  %v3601_v55 = vadd.f32 %v15269_v18, %v13165_v54 }
 0x3a8   : > { %4840 = vst.msk [vmem:[#allocation2 + $0x80] sm:$0xff] %vm4825_vm7, %v4662_v47  ;;  %4400 = vrot.lane.b32.xlu0 %v3976_v52, %s14435_s23  ;;  %v4664_v56 = vpop.permute.xlu1 %4663  ;;  %v3241_v57 = vpop.f32.mrb[97].mxu0  ;;  %v4956_v58 = vld [vmem:[#allocation2 + $0x70] sm:$0xff]  ;;  %v13846_v54 = vld [vmem:[%s17552_s3 + $0x8] sm:$0xff]  }
 0x3a9   : > { %4229 = vst.msk [vmem:[#allocation2 + $0x179] sm:$0x7f] %vm4184_vm4, %v4106_v51  ;;  %v3599_v61 = vadd.f32 %v15269_v18, %v3241_v57  ;;  %v13166_v63 = vpop.f32.mrb[98].mxu0  ;;  %v3729_v6 = vmax.f32 %v3601_v55, 0.0  ;;  %13241 = vmatprep.subr.bf16.mxu1 %v13846_v54 }
 0x3aa   : > { %4228 = vst.msk [vmem:[#allocation2 + $0x171] sm:$0xff] %vm3759_vm2, %v4104_v53  ;;  %v4957_v60 = vld [vmem:[#allocation2 + $0x78] sm:$0xff]  ;;  %v4345_v62 = vpop.permute.xlu0 %4344  ;;  %v3602_v7 = vadd.f32 %v15269_v18, %v13166_v63  ;;  %v3244_v8 = vpop.f32.mrb[99].mxu0  ;;  %13242 = vmatpush3.bf16.msra.mxu1 %v13846_v54 }
 0x3ab   : > { %4841 = vst.msk [vmem:[#allocation2 + $0x88] sm:$0xff] %vm4825_vm7, %v4664_v56  ;;  %v4985_v5 = vpack.c.bf16 %v4957_v60, %v4956_v58  ;;  %4723 = vrot.lane.b32.xlu1 %v4106_v51, %s14434_s22  ;;  %v3727_v9 = vmax.f32 %v3599_v61, 0.0  ;;  %v3600_v0 = vadd.f32 %v15269_v18, %v3244_v8 }
 0x3ac   : > { %4521 = vst.msk [vmem:[#allocation2 + $0x90] sm:$0xff] %vm4504_vm6, %v4345_v62  ;;  %4721 = vrot.lane.b32.xlu0 %v4104_v53, %s14434_s22  ;;  %v3730_v2 = vmax.f32 %v3602_v7, 0.0  ;;  %v4347_v3 = vpop.permute.xlu1 %4346 }
 0x3ad   : > { %13212 = vmatmul.mubr.msk.bf16.gmra.mrb[4].mxu1 %vm4143_vm5, %v4985_v5  ;;  %3858 = vst.msk [vmem:[#allocation5 + $0x310] sm:$0xff] %vm3759_vm2, %v3729_v6  ;;  %3856 = vst.msk [vmem:[#allocation5 + $0x300] sm:$0xff] %vm3759_vm2, %v3727_v9  ;;  %v3728_v4 = vmax.f32 %v3600_v0, 0.0  ;;  %v13847_v5 = vld [vmem:[%s17552_s3 + $0x10] sm:$0xff]  }
 0x3ae   : > { %4522 = vst.msk [vmem:[#allocation2 + $0x98] sm:$0xff] %vm4504_vm6, %v4347_v3  ;;  %v4666_v11 = vpop.permute.xlu0 %4665  ;;  %v15435_v12 = vld [vmem:[#allocation5 + $0x2f1] ss:$2 sm:$0xff]  ;;  %v15441_v13 = vld [vmem:[#allocation5 + $0x2e1] ss:$2 sm:$0xff]  ;;  %v13169_v14 = vpop.f32.mrb[100].mxu0  ;;  %13243 = vmatprep.subr.bf16.mxu1 %v13847_v5 }
 0x3af   : > { %3859 = vst.msk [vmem:[#allocation5 + $0x318] sm:$0xff] %vm3759_vm2, %v3730_v2  ;;  %3857 = vst.msk [vmem:[#allocation5 + $0x308] sm:$0xff] %vm3759_vm2, %v3728_v4  ;;  %v3605_v16 = vadd.f32 %v15269_v18, %v13169_v14  ;;  %v3257_v19 = vpop.f32.mrb[101].mxu0  ;;  %13244 = vmatpush3.bf16.msra.mxu1 %v13847_v5 }
 0x3b0   : > { %4842 = vst.msk [vmem:[#allocation2 + $0x90] sm:$0xff] %vm4825_vm7, %v4666_v11  ;;  %v4668_v17 = vpop.permute.xlu1 %4667  ;;  %v3603_v20 = vadd.f32 %v15269_v18, %v3257_v19  ;;  %v13170_v21 = vpop.f32.mrb[102].mxu0 }
 0x3b1   : > { %4231 = vst.msk [vmem:[#allocation2 + $0x189] sm:$0x7f] %vm4184_vm4, %v15435_v12  ;;  %v3733_v22 = vmax.f32 %v3605_v16, 0.0  ;;  %v3606_v23 = vadd.f32 %v15269_v18, %v13170_v21  ;;  %v3260_v24 = vpop.f32.mrb[103].mxu0 }
 0x3b2   : > { %4230 = vst.msk [vmem:[#allocation2 + $0x181] sm:$0xff] %vm3759_vm2, %v15441_v13  ;;  %v4349_v59 = vpop.permute.xlu0 %4348  ;;  %v3731_v25 = vmax.f32 %v3603_v20, 0.0  ;;  %v3604_v27 = vadd.f32 %v15269_v18, %v3260_v24 }
 0x3b3   : > { %4843 = vst.msk [vmem:[#allocation2 + $0x98] sm:$0xff] %vm4825_vm7, %v4668_v17  ;;  %v3734_v29 = vmax.f32 %v3606_v23, 0.0 }
 0x3b4   : > { %4523 = vst.msk [vmem:[#allocation2 + $0xa0] sm:$0xff] %vm4504_vm6, %v4349_v59  ;;  %v4351_v32 = vpop.permute.xlu1 %4350  ;;  %v3732_v33 = vmax.f32 %v3604_v27, 0.0 }
 0x3b5   : > { %3862 = vst.msk [vmem:[#allocation5 + $0x330] sm:$0xff] %vm3759_vm2, %v3733_v22  ;;  %3860 = vst.msk [vmem:[#allocation5 + $0x320] sm:$0xff] %vm3759_vm2, %v3731_v25 }
 0x3b6   : > { %4524 = vst.msk [vmem:[#allocation2 + $0xa8] sm:$0xff] %vm4504_vm6, %v4351_v32  ;;  %v4670_v34 = vpop.permute.xlu0 %4669  ;;  %v3986_v35 = vld [vmem:[#allocation5 + $0x310] ss:$2 sm:$0xff]  ;;  %v4114_v36 = vld [vmem:[#allocation5 + $0x311] ss:$2 sm:$0xff]  ;;  %v13173_v39 = vpop.f32.mrb[104].mxu0 }
 0x3b7   : > { %3863 = vst.msk [vmem:[#allocation5 + $0x338] sm:$0xff] %vm3759_vm2, %v3734_v29  ;;  %4410 = vrot.lane.b32.xlu1 %v3986_v35, %s14435_s23  ;;  %v3984_v37 = vld [vmem:[#allocation5 + $0x300] ss:$2 sm:$0xff]  ;;  %v4112_v38 = vld [vmem:[#allocation5 + $0x301] ss:$2 sm:$0xff]  ;;  %3861 = vst.msk [vmem:[#allocation5 + $0x328] sm:$0xff] %vm3759_vm2, %v3732_v33  ;;  %v3609_v40 = vadd.f32 %v15269_v18, %v13173_v39 }
 0x3b8   : > { %4844 = vst.msk [vmem:[#allocation2 + $0xa0] sm:$0xff] %vm4825_vm7, %v4670_v34  ;;  %4408 = vrot.lane.b32.xlu0 %v3984_v37, %s14435_s23  ;;  %v4672_v41 = vpop.permute.xlu1 %4671  ;;  %v3273_v42 = vpop.f32.mrb[105].mxu0  ;;  %v4958_v43 = vld [vmem:[#allocation2 + $0x90] sm:$0xff] }
 0x3b9   : > { %4233 = vst.msk [vmem:[#allocation2 + $0x199] sm:$0x7f] %vm4184_vm4, %v4114_v36  ;;  %v3607_v45 = vadd.f32 %v15269_v18, %v3273_v42  ;;  %v13174_v47 = vpop.f32.mrb[106].mxu0  ;;  %v3737_v51 = vmax.f32 %v3609_v40, 0.0 }
 0x3ba   : > { %4232 = vst.msk [vmem:[#allocation2 + $0x191] sm:$0xff] %vm3759_vm2, %v4112_v38  ;;  %v4959_v44 = vld [vmem:[#allocation2 + $0x98] sm:$0xff]  ;;  %v4353_v46 = vpop.permute.xlu0 %4352  ;;  %v3610_v52 = vadd.f32 %v15269_v18, %v13174_v47  ;;  %v3276_v53 = vpop.f32.mrb[107].mxu0 }
 0x3bb   : > { %4845 = vst.msk [vmem:[#allocation2 + $0xa8] sm:$0xff] %vm4825_vm7, %v4672_v41  ;;  %v4986_v50 = vpack.c.bf16 %v4959_v44, %v4958_v43  ;;  %4731 = vrot.lane.b32.xlu1 %v4114_v36, %s14434_s22  ;;  %v3735_v55 = vmax.f32 %v3607_v45, 0.0  ;;  %v3608_v56 = vadd.f32 %v15269_v18, %v3276_v53 }
 0x3bc   : > { %4525 = vst.msk [vmem:[#allocation2 + $0xb0] sm:$0xff] %vm4504_vm6, %v4353_v46  ;;  %4729 = vrot.lane.b32.xlu0 %v4112_v38, %s14434_s22  ;;  %v3738_v57 = vmax.f32 %v3610_v52, 0.0  ;;  %v4355_v58 = vpop.permute.xlu1 %4354  ;;  %v13848_v52 = vld [vmem:[%s17552_s3 + $0x18] sm:$0xff]  }
 0x3bd   : > { %13215 = vmatprep.mubr.msk.bf16.mxu1 %vm4143_vm5, %v4986_v50  ;;  %3866 = vst.msk [vmem:[#allocation5 + $0x350] sm:$0xff] %vm3759_vm2, %v3737_v51  ;;  %3864 = vst.msk [vmem:[#allocation5 + $0x340] sm:$0xff] %vm3759_vm2, %v3735_v55  ;;  %v3736_v60 = vmax.f32 %v3608_v56, 0.0  ;;  %13245 = vmatprep.subr.bf16.mxu1 %v13848_v52 }
 0x3be   : > { %4526 = vst.msk [vmem:[#allocation2 + $0xb8] sm:$0xff] %vm4504_vm6, %v4355_v58  ;;  %v4674_v61 = vpop.permute.xlu0 %4673  ;;  %v15480_v62 = vld [vmem:[#allocation5 + $0x331] ss:$2 sm:$0xff]  ;;  %v15486_v63 = vld [vmem:[#allocation5 + $0x321] ss:$2 sm:$0xff]  ;;  %v13177_v6 = vpop.f32.mrb[108].mxu0  ;;  %13246 = vmatpush3.bf16.msra.mxu1 %v13848_v52 }
 0x3bf   : > { %3867 = vst.msk [vmem:[#allocation5 + $0x358] sm:$0xff] %vm3759_vm2, %v3738_v57  ;;  %3865 = vst.msk [vmem:[#allocation5 + $0x348] sm:$0xff] %vm3759_vm2, %v3736_v60  ;;  %v3613_v7 = vadd.f32 %v15269_v18, %v13177_v6  ;;  %v3289_v9 = vpop.f32.mrb[109].mxu0 }
 0x3c0   : > { %4846 = vst.msk [vmem:[#allocation2 + $0xb0] sm:$0xff] %vm4825_vm7, %v4674_v61  ;;  %v4676_v8 = vpop.permute.xlu1 %4675  ;;  %v3611_v0 = vadd.f32 %v15269_v18, %v3289_v9  ;;  %v13178_v3 = vpop.f32.mrb[110].mxu0 }
 0x3c1   : > { %4235 = vst.msk [vmem:[#allocation2 + $0x1a9] sm:$0x7f] %vm4184_vm4, %v15480_v62  ;;  %v3741_v4 = vmax.f32 %v3613_v7, 0.0  ;;  %v3614_v11 = vadd.f32 %v15269_v18, %v13178_v3  ;;  %v3292_v14 = vpop.f32.mrb[111].mxu0 }
 0x3c2   : > { %4234 = vst.msk [vmem:[#allocation2 + $0x1a1] sm:$0xff] %vm3759_vm2, %v15486_v63  ;;  %v4357_v2 = vpop.permute.xlu0 %4356  ;;  %v3739_v15 = vmax.f32 %v3611_v0, 0.0  ;;  %v3612_v16 = vadd.f32 %v15269_v18, %v3292_v14 }
 0x3c3   : > { %4847 = vst.msk [vmem:[#allocation2 + $0xb8] sm:$0xff] %vm4825_vm7, %v4676_v8  ;;  %v3742_v17 = vmax.f32 %v3614_v11, 0.0 }
 0x3c4   : > { %4527 = vst.msk [vmem:[#allocation2 + $0xc0] sm:$0xff] %vm4504_vm6, %v4357_v2  ;;  %v4359_v19 = vpop.permute.xlu1 %4358  ;;  %v3740_v20 = vmax.f32 %v3612_v16, 0.0 }
 0x3c5   : > { %3870 = vst.msk [vmem:[#allocation5 + $0x370] sm:$0xff] %vm3759_vm2, %v3741_v4  ;;  %3868 = vst.msk [vmem:[#allocation5 + $0x360] sm:$0xff] %vm3759_vm2, %v3739_v15 }
 0x3c6   : > { %4528 = vst.msk [vmem:[#allocation2 + $0xc8] sm:$0xff] %vm4504_vm6, %v4359_v19  ;;  %v4678_v59 = vpop.permute.xlu0 %4677  ;;  %v3994_v21 = vld [vmem:[#allocation5 + $0x350] ss:$2 sm:$0xff]  ;;  %v4122_v22 = vld [vmem:[#allocation5 + $0x351] ss:$2 sm:$0xff]  ;;  %v13181_v25 = vpop.f32.mrb[112].mxu0 }
 0x3c7   : > { %3871 = vst.msk [vmem:[#allocation5 + $0x378] sm:$0xff] %vm3759_vm2, %v3742_v17  ;;  %4418 = vrot.lane.b32.xlu1 %v3994_v21, %s14435_s23  ;;  %v3992_v23 = vld [vmem:[#allocation5 + $0x340] ss:$2 sm:$0xff]  ;;  %v4120_v24 = vld [vmem:[#allocation5 + $0x341] ss:$2 sm:$0xff]  ;;  %3869 = vst.msk [vmem:[#allocation5 + $0x368] sm:$0xff] %vm3759_vm2, %v3740_v20  ;;  %v3617_v27 = vadd.f32 %v15269_v18, %v13181_v25 }
 0x3c8   : > { %4848 = vst.msk [vmem:[#allocation2 + $0xc0] sm:$0xff] %vm4825_vm7, %v4678_v59  ;;  %4416 = vrot.lane.b32.xlu0 %v3992_v23, %s14435_s23  ;;  %v4680_v29 = vpop.permute.xlu1 %4679  ;;  %v3305_v32 = vpop.f32.mrb[113].mxu0  ;;  %v4960_v33 = vld [vmem:[#allocation2 + $0xb0] sm:$0xff] }
 0x3c9   : > { %4237 = vst.msk [vmem:[#allocation2 + $0x1b9] sm:$0x7f] %vm4184_vm4, %v4122_v22  ;;  %v3615_v35 = vadd.f32 %v15269_v18, %v3305_v32  ;;  %v13182_v37 = vpop.f32.mrb[114].mxu0  ;;  %v3745_v39 = vmax.f32 %v3617_v27, 0.0 }
 0x3ca   : > { %4236 = vst.msk [vmem:[#allocation2 + $0x1b1] sm:$0xff] %vm3759_vm2, %v4120_v24  ;;  %v4961_v34 = vld [vmem:[#allocation2 + $0xb8] sm:$0xff]  ;;  %v4361_v36 = vpop.permute.xlu0 %4360  ;;  %v3618_v40 = vadd.f32 %v15269_v18, %v13182_v37  ;;  %v3308_v41 = vpop.f32.mrb[115].mxu0 }
 0x3cb   : > { %4849 = vst.msk [vmem:[#allocation2 + $0xc8] sm:$0xff] %vm4825_vm7, %v4680_v29  ;;  %v4987_v38 = vpack.c.bf16 %v4961_v34, %v4960_v33  ;;  %4739 = vrot.lane.b32.xlu1 %v4122_v22, %s14434_s22  ;;  %v3743_v42 = vmax.f32 %v3615_v35, 0.0  ;;  %v3616_v43 = vadd.f32 %v15269_v18, %v3308_v41  ;;  %v13849_v33 = vld [vmem:[%s17552_s3 + $0x20] sm:$0xff]  }
 0x3cc   : > { %4529 = vst.msk [vmem:[#allocation2 + $0xd0] sm:$0xff] %vm4504_vm6, %v4361_v36  ;;  %4737 = vrot.lane.b32.xlu0 %v4120_v24, %s14434_s22  ;;  %v3746_v44 = vmax.f32 %v3618_v40, 0.0  ;;  %v4363_v45 = vpop.permute.xlu1 %4362  ;;  %13247 = vmatprep.subr.bf16.mxu1 %v13849_v33 }
 0x3cd   : > { %13216 = vmatmul.mubr.msk.bf16.gmra.mrb[8].mxu1 %vm4143_vm5, %v4987_v38  ;;  %3874 = vst.msk [vmem:[#allocation5 + $0x390] sm:$0xff] %vm3759_vm2, %v3745_v39  ;;  %3872 = vst.msk [vmem:[#allocation5 + $0x380] sm:$0xff] %vm3759_vm2, %v3743_v42  ;;  %v3744_v46 = vmax.f32 %v3616_v43, 0.0 }
 0x3ce   : > { %4530 = vst.msk [vmem:[#allocation2 + $0xd8] sm:$0xff] %vm4504_vm6, %v4363_v45  ;;  %v4682_v47 = vpop.permute.xlu0 %4681  ;;  %v15522_v50 = vld [vmem:[#allocation5 + $0x371] ss:$2 sm:$0xff]  ;;  %v15528_v51 = vld [vmem:[#allocation5 + $0x361] ss:$2 sm:$0xff]  ;;  %v13185_v53 = vpop.f32.mrb[116].mxu0  ;;  %13248 = vmatpush3.bf16.msra.mxu1 %v13849_v33 }
 0x3cf   : > { %3875 = vst.msk [vmem:[#allocation5 + $0x398] sm:$0xff] %vm3759_vm2, %v3746_v44  ;;  %3873 = vst.msk [vmem:[#allocation5 + $0x388] sm:$0xff] %vm3759_vm2, %v3744_v46  ;;  %v3621_v54 = vadd.f32 %v15269_v18, %v13185_v53  ;;  %v3321_v56 = vpop.f32.mrb[117].mxu0 }
 0x3d0   : > { %4850 = vst.msk [vmem:[#allocation2 + $0xd0] sm:$0xff] %vm4825_vm7, %v4682_v47  ;;  %v4684_v55 = vpop.permute.xlu1 %4683  ;;  %v3619_v57 = vadd.f32 %v15269_v18, %v3321_v56  ;;  %v13186_v60 = vpop.f32.mrb[118].mxu0 }
 0x3d1   : > { %4239 = vst.msk [vmem:[#allocation2 + $0x1c9] sm:$0x7f] %vm4184_vm4, %v15522_v50  ;;  %v3749_v61 = vmax.f32 %v3621_v54, 0.0  ;;  %v3622_v5 = vadd.f32 %v15269_v18, %v13186_v60  ;;  %v3324_v6 = vpop.f32.mrb[119].mxu0 }
 0x3d2   : > { %4238 = vst.msk [vmem:[#allocation2 + $0x1c1] sm:$0xff] %vm3759_vm2, %v15528_v51  ;;  %v4365_v58 = vpop.permute.xlu0 %4364  ;;  %v3747_v7 = vmax.f32 %v3619_v57, 0.0  ;;  %v3620_v8 = vadd.f32 %v15269_v18, %v3324_v6 }
 0x3d3   : > { %4851 = vst.msk [vmem:[#allocation2 + $0xd8] sm:$0xff] %vm4825_vm7, %v4684_v55  ;;  %v3750_v9 = vmax.f32 %v3622_v5, 0.0 }
 0x3d4   : > { %4531 = vst.msk [vmem:[#allocation2 + $0xe0] sm:$0xff] %vm4504_vm6, %v4365_v58  ;;  %v4367_v0 = vpop.permute.xlu1 %4366  ;;  %v3748_v2 = vmax.f32 %v3620_v8, 0.0 }
 0x3d5   : > { %3878 = vst.msk [vmem:[#allocation5 + $0x3b0] sm:$0xff] %vm3759_vm2, %v3749_v61  ;;  %3876 = vst.msk [vmem:[#allocation5 + $0x3a0] sm:$0xff] %vm3759_vm2, %v3747_v7 }
 0x3d6   : > { %4532 = vst.msk [vmem:[#allocation2 + $0xe8] sm:$0xff] %vm4504_vm6, %v4367_v0  ;;  %v4686_v3 = vpop.permute.xlu0 %4685  ;;  %v4002_v4 = vld [vmem:[#allocation5 + $0x390] ss:$2 sm:$0xff]  ;;  %v4130_v11 = vld [vmem:[#allocation5 + $0x391] ss:$2 sm:$0xff]  ;;  %v13189_v16 = vpop.f32.mrb[120].mxu0 }
 0x3d7   : > { %3879 = vst.msk [vmem:[#allocation5 + $0x3b8] sm:$0xff] %vm3759_vm2, %v3750_v9  ;;  %4426 = vrot.lane.b32.xlu1 %v4002_v4, %s14435_s23  ;;  %v4000_v14 = vld [vmem:[#allocation5 + $0x380] ss:$2 sm:$0xff]  ;;  %v4128_v15 = vld [vmem:[#allocation5 + $0x381] ss:$2 sm:$0xff]  ;;  %3877 = vst.msk [vmem:[#allocation5 + $0x3a8] sm:$0xff] %vm3759_vm2, %v3748_v2  ;;  %v3625_v17 = vadd.f32 %v15269_v18, %v13189_v16 }
 0x3d8   : > { %4852 = vst.msk [vmem:[#allocation2 + $0xe0] sm:$0xff] %vm4825_vm7, %v4686_v3  ;;  %4424 = vrot.lane.b32.xlu0 %v4000_v14, %s14435_s23  ;;  %v4688_v19 = vpop.permute.xlu1 %4687  ;;  %v3337_v20 = vpop.f32.mrb[121].mxu0  ;;  %v4962_v59 = vld [vmem:[#allocation2 + $0xd0] sm:$0xff]  ;;  %v3950_v4 = vld [vmem:[#allocation5 + $0x1f0] ss:$2 sm:$0xff] }
 0x3d9   : > { %4241 = vst.msk [vmem:[#allocation2 + $0x1d9] sm:$0x7f] %vm4184_vm4, %v4130_v11  ;;  %v3623_v22 = vadd.f32 %v15269_v18, %v3337_v20  ;;  %v13190_v24 = vpop.f32.mrb[122].mxu0  ;;  %v3753_v27 = vmax.f32 %v3625_v17, 0.0  ;;  %v15614_v17 = vld [vmem:[%s17552_s3 + $0x60] sm:$0xff]  }
 0x3da   : > { %4240 = vst.msk [vmem:[#allocation2 + $0x1d1] sm:$0xff] %vm3759_vm2, %v4128_v15  ;;  %v4963_v21 = vld [vmem:[#allocation2 + $0xd8] sm:$0xff]  ;;  %v4369_v23 = vpop.permute.xlu0 %4368  ;;  %v3626_v29 = vadd.f32 %v15269_v18, %v13190_v24  ;;  %v3340_v32 = vpop.f32.mrb[123].mxu0 }
 0x3db   : > { %4853 = vst.msk [vmem:[#allocation2 + $0xe8] sm:$0xff] %vm4825_vm7, %v4688_v19  ;;  %v4988_v25 = vpack.c.bf16 %v4963_v21, %v4962_v59  ;;  %4747 = vrot.lane.b32.xlu1 %v4130_v11, %s14434_s22  ;;  %v3751_v34 = vmax.f32 %v3623_v22, 0.0  ;;  %v3624_v35 = vadd.f32 %v15269_v18, %v3340_v32  ;;  %v3958_v19 = vld [vmem:[#allocation5 + $0x230] ss:$2 sm:$0xff]  ;;  %v3956_v20 = vld [vmem:[#allocation5 + $0x220] ss:$2 sm:$0xff] }
 0x3dc   : > { %4533 = vst.msk [vmem:[#allocation2 + $0xf0] sm:$0xff] %vm4504_vm6, %v4369_v23  ;;  %4745 = vrot.lane.b32.xlu0 %v4128_v15, %s14434_s22  ;;  %v3754_v36 = vmax.f32 %v3626_v29, 0.0  ;;  %v4371_v37 = vpop.permute.xlu1 %4370  ;;  %v3948_v15 = vld [vmem:[#allocation5 + $0x1e0] ss:$2 sm:$0xff]  ;;  %v3974_v29 = vld [vmem:[#allocation5 + $0x2b0] ss:$2 sm:$0xff] }
 0x3dd   : > { %13219 = vmatprep.mubr.msk.bf16.mxu1 %vm4143_vm5, %v4988_v25  ;;  %3882 = vst.msk [vmem:[#allocation5 + $0x3d0] sm:$0xff] %vm3759_vm2, %v3753_v27  ;;  %3880 = vst.msk [vmem:[#allocation5 + $0x3c0] sm:$0xff] %vm3759_vm2, %v3751_v34  ;;  %v3752_v38 = vmax.f32 %v3624_v35, 0.0  ;;  %v3966_v25 = vld [vmem:[#allocation5 + $0x270] ss:$2 sm:$0xff] }
 0x3de   : > { %4534 = vst.msk [vmem:[#allocation2 + $0xf8] sm:$0xff] %vm4504_vm6, %v4371_v37  ;;  %v4690_v39 = vpop.permute.xlu0 %4689  ;;  %v15567_v40 = vld [vmem:[#allocation5 + $0x3b1] ss:$2 sm:$0xff]  ;;  %v15573_v41 = vld [vmem:[#allocation5 + $0x3a1] ss:$2 sm:$0xff]  ;;  %v13193_v42 = vpop.f32.mrb[124].mxu0 }
 0x3df   : > { %3883 = vst.msk [vmem:[#allocation5 + $0x3d8] sm:$0xff] %vm3759_vm2, %v3754_v36  ;;  %3881 = vst.msk [vmem:[#allocation5 + $0x3c8] sm:$0xff] %vm3759_vm2, %v3752_v38  ;;  %v3629_v43 = vadd.f32 %v15269_v18, %v13193_v42  ;;  %v3353_v45 = vpop.f32.mrb[125].mxu0  ;;  %v3964_v27 = vld [vmem:[#allocation5 + $0x260] ss:$2 sm:$0xff] }
 0x3e0   : > { %4854 = vst.msk [vmem:[#allocation2 + $0xf0] sm:$0xff] %vm4825_vm7, %v4690_v39  ;;  %v4692_v44 = vpop.permute.xlu1 %4691  ;;  %v3627_v46 = vadd.f32 %v15269_v18, %v3353_v45  ;;  %v13194_v47 = vpop.f32.mrb[126].mxu0  ;;  %v3980_v37 = vld [vmem:[#allocation5 + $0x2e0] ss:$2 sm:$0xff]  ;;  %v3990_v38 = vld [vmem:[#allocation5 + $0x330] ss:$2 sm:$0xff] }
 0x3e1   : > { %4243 = vst.msk [vmem:[#allocation2 + $0x1e9] sm:$0x7f] %vm4184_vm4, %v15567_v40  ;;  %v3757_v52 = vmax.f32 %v3629_v43, 0.0  ;;  %v3630_v53 = vadd.f32 %v15269_v18, %v13194_v47  ;;  %v3356_v54 = vpop.f32.mrb[127].mxu0  ;;  %v3988_v39 = vld [vmem:[#allocation5 + $0x320] ss:$2 sm:$0xff] }
 0x3e2   : > { %4242 = vst.msk [vmem:[#allocation2 + $0x1e1] sm:$0xff] %vm3759_vm2, %v15573_v41  ;;  %v3755_v55 = vmax.f32 %v3627_v46, 0.0  ;;  %v3628_v56 = vadd.f32 %v15269_v18, %v3356_v54  ;;  %v13850_v18 = vld [vmem:[%s17552_s3 + $0x28] sm:$0xff]  }
 0x3e3   : > { %4855 = vst.msk [vmem:[#allocation2 + $0xf8] sm:$0xff] %vm4825_vm7, %v4692_v44  ;;  %v3758_v57 = vmax.f32 %v3630_v53, 0.0  ;;  %13249 = vmatprep.subr.bf16.mxu1 %v13850_v18  ;;  %v3998_v46 = vld [vmem:[#allocation5 + $0x370] ss:$2 sm:$0xff] }
 0x3e4   : > { %3886 = vst.msk [vmem:[#allocation5 + $0x3f0] sm:$0xff] %vm3759_vm2, %v3757_v52  ;;  %3884 = vst.msk [vmem:[#allocation5 + $0x3e0] sm:$0xff] %vm3759_vm2, %v3755_v55  ;;  %v3756_v58 = vmax.f32 %v3628_v56, 0.0  ;;  %13250 = vmatpush3.bf16.msra.mxu1 %v13850_v18  ;;  %v4006_v47 = vld [vmem:[#allocation5 + $0x3b0] ss:$2 sm:$0xff] }
 0x3e5   : > { %3887 = vst.msk [vmem:[#allocation5 + $0x3f8] sm:$0xff] %vm3759_vm2, %v3758_v57  ;;  %13283 = vmatprep.subr.bf16.mxu1 %v15614_v17  ;;  %v4004_v52 = vld [vmem:[#allocation5 + $0x3a0] ss:$2 sm:$0xff] }
 0x3e6   : > { %v4010_v60 = vld [vmem:[#allocation5 + $0x3d0] ss:$2 sm:$0xff]  ;;  %v4138_v61 = vld [vmem:[#allocation5 + $0x3d1] ss:$2 sm:$0xff]  ;;  %v4008_v5 = vld [vmem:[#allocation5 + $0x3c0] ss:$2 sm:$0xff] }
 0x3e7   : > { %4434 = vrot.lane.b32.xlu1 %v4010_v60, %s14435_s23  ;;  %4245 = vst.msk [vmem:[#allocation2 + $0x1f9] sm:$0x7f] %vm4184_vm4, %v4138_v61  ;;  %v4136_v6 = vld [vmem:[#allocation5 + $0x3c1] ss:$2 sm:$0xff]  ;;  %4432 = vrot.lane.b32.xlu0 %v4008_v5, %s14435_s23 }
 0x3e8   : > { %3885 = vst.msk [vmem:[#allocation5 + $0x3e8] sm:$0xff] %vm3759_vm2, %v3756_v58  ;;  %4244 = vst.msk [vmem:[#allocation2 + $0x1f1] sm:$0xff] %vm3759_vm2, %v4136_v6  ;;  %v4964_v7 = vld [vmem:[#allocation2 + $0xf0] sm:$0xff] }
 0x3e9   : > { %v4379_v9 = vpop.permute.xlu1 %4378 }
 0x3ea   : > { %v4965_v8 = vld [vmem:[#allocation2 + $0xf8] sm:$0xff]  ;;  %4538 = vst.msk [vmem:[#allocation2 + $0x118] sm:$0xff] %vm4504_vm6, %v4379_v9  ;;  %v4377_v2 = vpop.permute.xlu0 %4376 }
 0x3eb   : > { %v4989_v0 = vpack.c.bf16 %v4965_v8, %v4964_v7  ;;  %4755 = vrot.lane.b32.xlu1 %v4138_v61, %s14434_s22  ;;  %4537 = vst.msk [vmem:[#allocation2 + $0x110] sm:$0xff] %vm4504_vm6, %v4377_v2  ;;  %4753 = vrot.lane.b32.xlu0 %v4136_v6, %s14434_s22 }
 0x3ec   : > { %v15599_v11 = vld [vmem:[#allocation5 + $0x3f1] ss:$2 sm:$0xff]  ;;  %v4014_v57 = vld [vmem:[#allocation5 + $0x3f0] ss:$2 sm:$0xff] }
 0x3ed   : > { %13220 = vmatmul.mubr.msk.bf16.gmra.mrb[12].mxu1 %vm4143_vm5, %v4989_v0  ;;  %v4700_v3 = vpop.permute.xlu1 %4699  ;;  %4247 = vst.msk [vmem:[#allocation2 + $0x209] sm:$0x7f] %vm4184_vm4, %v15599_v11 }
 0x3ee   : > { %4859 = vst.msk [vmem:[#allocation2 + $0x118] sm:$0xff] %vm4825_vm7, %v4700_v3  ;;  %v4698_v14 = vpop.permute.xlu0 %4697 }
 0x3ef   : > { %4374 = vrot.lane.b32.xlu1 %v3950_v4, %s14435_s23  ;;  %v15605_v16 = vld [vmem:[#allocation5 + $0x3e1] ss:$2 sm:$0xff]  ;;  %4858 = vst.msk [vmem:[#allocation2 + $0x110] sm:$0xff] %vm4825_vm7, %v4698_v14  ;;  %4372 = vrot.lane.b32.xlu0 %v3948_v15, %s14435_s23 }
 0x3f0   : > { %4246 = vst.msk [vmem:[#allocation2 + $0x201] sm:$0xff] %vm3759_vm2, %v15605_v16 }
 0x3f3   : > { %4382 = vrot.lane.b32.xlu1 %v3958_v19, %s14435_s23  ;;  %4380 = vrot.lane.b32.xlu0 %v3956_v20, %s14435_s23 }
 0x3f5   : > { %v4967_v59 = vld [vmem:[#allocation2 + $0x118] sm:$0xff] }
 0x3f6   : > { %v4966_v21 = vld [vmem:[#allocation2 + $0x110] sm:$0xff] }
 0x3f7   : > { %4695 = vrot.lane.b32.xlu1 %v15278_v26, %s14434_s22  ;;  %4693 = vrot.lane.b32.xlu0 %v15284_v28, %s14434_s22  ;;  %v4990_v22 = vpack.c.bf16 %v4967_v59, %v4966_v21 }
 0x3f8   : > { %v4387_v23 = vpop.permute.xlu1 %4386 }
 0x3f9   : > { %13223 = vmatprep.mubr.msk.bf16.mxu1 %vm4143_vm5, %v4990_v22  ;;  %4542 = vst.msk [vmem:[#allocation2 + $0x138] sm:$0xff] %vm4504_vm6, %v4387_v23  ;;  %v4890_v22 = vld [vmem:[#allocation2] sm:$0xff]  ;;  %v4891_v23 = vld [vmem:[#allocation2 + $0x8] sm:$0xff] }
 0x3fa   : > { %v4385_v24 = vpop.permute.xlu0 %4384 }
 0x3fb   : > { %4703 = vrot.lane.b32.xlu1 %v15318_v10, %s14434_s22  ;;  %4541 = vst.msk [vmem:[#allocation2 + $0x130] sm:$0xff] %vm4504_vm6, %v4385_v24  ;;  %4701 = vrot.lane.b32.xlu0 %v15323_v1, %s14434_s22  ;;  %v3972_v10 = vld [vmem:[#allocation5 + $0x2a0] ss:$2 sm:$0xff] }
 0x3fc   : > { %v4708_v26 = vpop.permute.xlu1 %4707 }
 0x3fd   : > { %4863 = vst.msk [vmem:[#allocation2 + $0x138] sm:$0xff] %vm4825_vm7, %v4708_v26 }
 0x3fe   : > { %v4706_v28 = vpop.permute.xlu0 %4705 }
 0x3ff   : > { %4390 = vrot.lane.b32.xlu1 %v3966_v25, %s14435_s23  ;;  %4862 = vst.msk [vmem:[#allocation2 + $0x130] sm:$0xff] %vm4825_vm7, %v4706_v28  ;;  %4388 = vrot.lane.b32.xlu0 %v3964_v27, %s14435_s23  ;;  %v4922_v27 = vpack.c.bf16 %v4891_v23, %v4890_v22 }
 0x403   : > { %4398 = vrot.lane.b32.xlu1 %v3974_v29, %s14435_s23  ;;  %4396 = vrot.lane.b32.xlu0 %v3972_v10, %s14435_s23 }
 0x404   : > { %v4969_v32 = vld [vmem:[#allocation2 + $0x138] sm:$0xff] }
 0x406   : > { %v4968_v1 = vld [vmem:[#allocation2 + $0x130] sm:$0xff] }
 0x407   : > { %4711 = vrot.lane.b32.xlu1 %v15357_v48, %s14434_s22  ;;  %4709 = vrot.lane.b32.xlu0 %v15363_v49, %s14434_s22  ;;  %v4991_v33 = vpack.c.bf16 %v4969_v32, %v4968_v1  ;;  %v3982_v49 = vld [vmem:[#allocation5 + $0x2f0] ss:$2 sm:$0xff] }
 0x408   : > { %v4395_v34 = vpop.permute.xlu1 %4394  ;;  %v4892_v1 = vld [vmem:[#allocation2 + $0x20] sm:$0xff] }
 0x409   : > { %13224 = vmatmul.mubr.msk.bf16.gmra.mrb[16].mxu1 %vm4143_vm5, %v4991_v33  ;;  %4546 = vst.msk [vmem:[#allocation2 + $0x158] sm:$0xff] %vm4504_vm6, %v4395_v34  ;;  %v4393_v35 = vpop.permute.xlu0 %4392  ;;  %v4895_v34 = vld [vmem:[#allocation2 + $0x48] sm:$0xff] }
 0x40a   : > { %4545 = vst.msk [vmem:[#allocation2 + $0x150] sm:$0xff] %vm4504_vm6, %v4393_v35 }
 0x40b   : > { %4719 = vrot.lane.b32.xlu1 %v15396_v30, %s14434_s22  ;;  %4717 = vrot.lane.b32.xlu0 %v15402_v31, %s14434_s22 }
 0x40c   : > { %v4716_v48 = vpop.permute.xlu1 %4715 }
 0x40d   : > { %4867 = vst.msk [vmem:[#allocation2 + $0x158] sm:$0xff] %vm4825_vm7, %v4716_v48  ;;  %v4714_v36 = vpop.permute.xlu0 %4713  ;;  %v4893_v48 = vld [vmem:[#allocation2 + $0x28] sm:$0xff] }
 0x40e   : > { %4866 = vst.msk [vmem:[#allocation2 + $0x150] sm:$0xff] %vm4825_vm7, %v4714_v36  ;;  %v15714_v36 = vpack.c.bf16 %v4893_v48, %v4892_v1 }
 0x40f   : > { %4406 = vrot.lane.b32.xlu1 %v3982_v49, %s14435_s23  ;;  %4404 = vrot.lane.b32.xlu0 %v3980_v37, %s14435_s23  ;;  %v4894_v49 = vld [vmem:[#allocation2 + $0x40] sm:$0xff]  ;;  %v13852_v37 = vld [vmem:[%s17552_s3 + $0x68] sm:$0xff]  }
 0x413   : > { %4414 = vrot.lane.b32.xlu1 %v3990_v38, %s14435_s23  ;;  %4412 = vrot.lane.b32.xlu0 %v3988_v39, %s14435_s23  ;;  %v15719_v38 = vpack.c.bf16 %v4895_v34, %v4894_v49 }
 0x414   : > { %v4971_v30 = vld [vmem:[#allocation2 + $0x158] sm:$0xff] }
 0x415   : > { %v4970_v31 = vld [vmem:[#allocation2 + $0x150] sm:$0xff] }
 0x416   : > { %v4992_v42 = vpack.c.bf16 %v4971_v30, %v4970_v31  ;;  %v13853_v31 = vld [vmem:[%s17552_s3 + $0x70] sm:$0xff]  }
 0x417   : > { %4727 = vrot.lane.b32.xlu1 %v15435_v12, %s14434_s22  ;;  %4725 = vrot.lane.b32.xlu0 %v15441_v13, %s14434_s22  ;;  %v3996_v13 = vld [vmem:[#allocation5 + $0x360] ss:$2 sm:$0xff] }
 0x418   : > { %13227 = vmatprep.mubr.msk.bf16.mxu1 %vm4143_vm5, %v4992_v42  ;;  %v4897_v42 = vld [vmem:[#allocation2 + $0x68] sm:$0xff] }
 0x419   : > { %v4403_v43 = vpop.permute.xlu1 %4402 }
 0x41a   : > { %4550 = vst.msk [vmem:[#allocation2 + $0x178] sm:$0xff] %vm4504_vm6, %v4403_v43  ;;  %v4401_v44 = vpop.permute.xlu0 %4400 }
 0x41b   : > { %4549 = vst.msk [vmem:[#allocation2 + $0x170] sm:$0xff] %vm4504_vm6, %v4401_v44  ;;  %4735 = vrot.lane.b32.xlu1 %v15480_v62, %s14434_s22  ;;  %4733 = vrot.lane.b32.xlu0 %v15486_v63, %s14434_s22  ;;  %v4899_v44 = vld [vmem:[#allocation2 + $0x88] sm:$0xff] }
 0x41d   : > { %v4724_v45 = vpop.permute.xlu1 %4723 }
 0x41e   : > { %4871 = vst.msk [vmem:[#allocation2 + $0x178] sm:$0xff] %vm4825_vm7, %v4724_v45  ;;  %v4722_v12 = vpop.permute.xlu0 %4721 }
 0x41f   : > { %4870 = vst.msk [vmem:[#allocation2 + $0x170] sm:$0xff] %vm4825_vm7, %v4722_v12  ;;  %4422 = vrot.lane.b32.xlu1 %v3998_v46, %s14435_s23  ;;  %4420 = vrot.lane.b32.xlu0 %v3996_v13, %s14435_s23  ;;  %v4896_v12 = vld [vmem:[#allocation2 + $0x60] sm:$0xff]  ;;  %v13854_v13 = vld [vmem:[%s17552_s3 + $0x78] sm:$0xff]  }
 0x420   : > { %v15733_v46 = vpack.c.bf16 %v4897_v42, %v4896_v12 }
 0x423   : > { %4430 = vrot.lane.b32.xlu1 %v4006_v47, %s14435_s23  ;;  %4428 = vrot.lane.b32.xlu0 %v4004_v52, %s14435_s23 }
 0x425   : > { %v4973_v62 = vld [vmem:[#allocation2 + $0x178] sm:$0xff] }
 0x426   : > { %v4972_v63 = vld [vmem:[#allocation2 + $0x170] sm:$0xff] }
 0x427   : > { %4743 = vrot.lane.b32.xlu1 %v15522_v50, %s14434_s22  ;;  %v4993_v53 = vpack.c.bf16 %v4973_v62, %v4972_v63  ;;  %4741 = vrot.lane.b32.xlu0 %v15528_v51, %s14434_s22  ;;  %v4012_v51 = vld [vmem:[#allocation5 + $0x3e0] ss:$2 sm:$0xff]  ;;  %v13855_v63 = vld [vmem:[%s17552_s3 + $0x80] sm:$0xff]  }
 0x429   : > { %13228 = vmatmul.mubr.msk.bf16.gmra.mrb[20].mxu1 %vm4143_vm5, %v4993_v53  ;;  %v4411_v54 = vpop.permute.xlu1 %4410  ;;  %v4901_v53 = vld [vmem:[#allocation2 + $0xa8] sm:$0xff] }
 0x42a   : > { %4554 = vst.msk [vmem:[#allocation2 + $0x198] sm:$0xff] %vm4504_vm6, %v4411_v54  ;;  %v4409_v55 = vpop.permute.xlu0 %4408 }
 0x42b   : > { %4553 = vst.msk [vmem:[#allocation2 + $0x190] sm:$0xff] %vm4504_vm6, %v4409_v55  ;;  %4751 = vrot.lane.b32.xlu1 %v15567_v40, %s14434_s22  ;;  %4749 = vrot.lane.b32.xlu0 %v15573_v41, %s14434_s22  ;;  %v4903_v55 = vld [vmem:[#allocation2 + $0xc8] sm:$0xff] }
 0x42d   : > { %v4732_v56 = vpop.permute.xlu1 %4731 }
 0x42e   : > { %4875 = vst.msk [vmem:[#allocation2 + $0x198] sm:$0xff] %vm4825_vm7, %v4732_v56  ;;  %v4730_v50 = vpop.permute.xlu0 %4729 }
 0x42f   : > { %4874 = vst.msk [vmem:[#allocation2 + $0x190] sm:$0xff] %vm4825_vm7, %v4730_v50  ;;  %4438 = vrot.lane.b32.xlu1 %v4014_v57, %s14435_s23  ;;  %4436 = vrot.lane.b32.xlu0 %v4012_v51, %s14435_s23  ;;  %v4900_v50 = vld [vmem:[#allocation2 + $0xa0] sm:$0xff] }
 0x430   : > { %v15751_v57 = vpack.c.bf16 %v4901_v53, %v4900_v50  ;;  %v4902_v51 = vld [vmem:[#allocation2 + $0xc0] sm:$0xff]  ;;  %v13860_v53 = vld [vmem:[%s17554_s5 + $0x78] sm:$0xff]  }
 0x431   : > { %v13864_v50 = vld [vmem:[%s17554_s5 + $0x98] sm:$0xff]  }
 0x433   : > { %4759 = vrot.lane.b32.xlu1 %v15599_v11, %s14434_s22  ;;  %4757 = vrot.lane.b32.xlu0 %v15605_v16, %s14434_s22 }
 0x435   : > { %v4975_v40 = vld [vmem:[#allocation2 + $0x198] sm:$0xff] }
 0x436   : > { %v4974_v41 = vld [vmem:[#allocation2 + $0x190] sm:$0xff] }
 0x437   : > { %v4994_v58 = vpack.c.bf16 %v4975_v40, %v4974_v41  ;;  %v13856_v40 = vld [vmem:[%s17552_s3 + $0x88] sm:$0xff]   ;;  %v15756_v41 = vpack.c.bf16 %v4903_v55, %v4902_v51 }
 0x438   : > { %v13862_v55 = vld [vmem:[%s17554_s5 + $0x88] sm:$0xff]  }
 0x439   : > { %13231 = vmatprep.mubr.msk.bf16.mxu1 %vm4143_vm5, %v4994_v58  ;;  %v4419_v60 = vpop.permute.xlu1 %4418 }
 0x43a   : > { %4558 = vst.msk [vmem:[#allocation2 + $0x1b8] sm:$0xff] %vm4504_vm6, %v4419_v60  ;;  %v4417_v61 = vpop.permute.xlu0 %4416 }
 0x43b   : > { %4557 = vst.msk [vmem:[#allocation2 + $0x1b0] sm:$0xff] %vm4504_vm6, %v4417_v61  ;;  %v4905_v61 = vld [vmem:[#allocation2 + $0xe8] sm:$0xff] }
 0x43d   : > { %v4740_v5 = vpop.permute.xlu1 %4739 }
 0x43e   : > { %4879 = vst.msk [vmem:[#allocation2 + $0x1b8] sm:$0xff] %vm4825_vm7, %v4740_v5  ;;  %v4738_v6 = vpop.permute.xlu0 %4737 }
 0x43f   : > { %4878 = vst.msk [vmem:[#allocation2 + $0x1b0] sm:$0xff] %vm4825_vm7, %v4738_v6 }
 0x445   : > { %v4977_v18 = vld [vmem:[#allocation2 + $0x1b8] sm:$0xff] }
 0x446   : > { %v4976_v7 = vld [vmem:[#allocation2 + $0x1b0] sm:$0xff] }
 0x447   : > { %v4995_v8 = vpack.c.bf16 %v4977_v18, %v4976_v7 }
 0x449   : > { %13232 = vmatmul.mubr.msk.bf16.gmra.mrb[24].mxu1 %vm4143_vm5, %v4995_v8  ;;  %v4427_v9 = vpop.permute.xlu1 %4426  ;;  %v4904_v8 = vld [vmem:[#allocation2 + $0xe0] sm:$0xff] }
 0x44a   : > { %4562 = vst.msk [vmem:[#allocation2 + $0x1d8] sm:$0xff] %vm4504_vm6, %v4427_v9  ;;  %v4425_v0 = vpop.permute.xlu0 %4424  ;;  %v15766_v9 = vpack.c.bf16 %v4905_v61, %v4904_v8 }
 0x44b   : > { %4561 = vst.msk [vmem:[#allocation2 + $0x1d0] sm:$0xff] %vm4504_vm6, %v4425_v0 }
 0x44d   : > { %v4748_v2 = vpop.permute.xlu1 %4747 }
 0x44e   : > { %4883 = vst.msk [vmem:[#allocation2 + $0x1d8] sm:$0xff] %vm4825_vm7, %v4748_v2  ;;  %v4746_v3 = vpop.permute.xlu0 %4745 }
 0x44f   : > { %4882 = vst.msk [vmem:[#allocation2 + $0x1d0] sm:$0xff] %vm4825_vm7, %v4746_v3 }
 0x455   : > { %v4979_v4 = vld [vmem:[#allocation2 + $0x1d8] sm:$0xff] }
 0x456   : > { %v4978_v11 = vld [vmem:[#allocation2 + $0x1d0] sm:$0xff] }
 0x457   : > { %v4996_v14 = vpack.c.bf16 %v4979_v4, %v4978_v11 }
 0x459   : > { %13235 = vmatprep.mubr.msk.bf16.mxu1 %vm4143_vm5, %v4996_v14  ;;  %v4435_v15 = vpop.permute.xlu1 %4434  ;;  %v4433_v16 = vpop.permute.xlu0 %4432 }
 0x45a   : > { %4566 = vst.msk [vmem:[#allocation2 + $0x1f8] sm:$0xff] %vm4504_vm6, %v4435_v15  ;;  %4565 = vst.msk [vmem:[#allocation2 + $0x1f0] sm:$0xff] %vm4504_vm6, %v4433_v16 }
 0x45d   : > { %v4756_v19 = vpop.permute.xlu1 %4755  ;;  %v4754_v20 = vpop.permute.xlu0 %4753 }
 0x45e   : > { %4887 = vst.msk [vmem:[#allocation2 + $0x1f8] sm:$0xff] %vm4825_vm7, %v4756_v19  ;;  %4886 = vst.msk [vmem:[#allocation2 + $0x1f0] sm:$0xff] %vm4825_vm7, %v4754_v20 }
 0x461   : > { %v4375_v59 = vpop.permute.xlu1 %4374  ;;  %v4373_v21 = vpop.permute.xlu0 %4372 }
 0x462   : > { %4536 = vst.msk [vmem:[#allocation2 + $0x108] sm:$0xff] %vm4504_vm6, %v4375_v59  ;;  %4535 = vst.msk [vmem:[#allocation2 + $0x100] sm:$0xff] %vm4504_vm6, %v4373_v21 }
 0x465   : > { %v4383_v24 = vpop.permute.xlu1 %4382  ;;  %v4981_v26 = vld [vmem:[#allocation2 + $0x1f8] sm:$0xff]  ;;  %v4381_v25 = vpop.permute.xlu0 %4380  ;;  %v4980_v28 = vld [vmem:[#allocation2 + $0x1f0] sm:$0xff] }
 0x466   : > { %4540 = vst.msk [vmem:[#allocation2 + $0x128] sm:$0xff] %vm4504_vm6, %v4383_v24  ;;  %4539 = vst.msk [vmem:[#allocation2 + $0x120] sm:$0xff] %vm4504_vm6, %v4381_v25  ;;  %v4997_v29 = vpack.c.bf16 %v4981_v26, %v4980_v28 }
 0x468   : > { %13236 = vmatmul.mubr.msk.bf16.gmra.mrb[28].mxu1 %vm4143_vm5, %v4997_v29 }
 0x469   : > { %v4696_v10 = vpop.permute.xlu1 %4695  ;;  %v4694_v32 = vpop.permute.xlu0 %4693  ;;  %13251 = vmatprep.mubr.msk.bf16.mxu1 %vm4143_vm5, %v4922_v27 }
 0x46a   : > { %4857 = vst.msk [vmem:[#allocation2 + $0x108] sm:$0xff] %vm4825_vm7, %v4696_v10  ;;  %4856 = vst.msk [vmem:[#allocation2 + $0x100] sm:$0xff] %vm4825_vm7, %v4694_v32 }
 0x46d   : > { %v4704_v33 = vpop.permute.xlu1 %4703  ;;  %v4702_v35 = vpop.permute.xlu0 %4701 }
 0x46e   : > { %4861 = vst.msk [vmem:[#allocation2 + $0x128] sm:$0xff] %vm4825_vm7, %v4704_v33  ;;  %4860 = vst.msk [vmem:[#allocation2 + $0x120] sm:$0xff] %vm4825_vm7, %v4702_v35 }
 0x470   : > { %13252 = vmatmul.mubr.msk.bf16.vlgmr.msra.gmra.mrb[0].mxu1 %vm4143_vm5, %v15714_v36 }
 0x471   : > { %v4391_v39 = vpop.permute.xlu1 %4390  ;;  %13255 = vmatprep.mubr.msk.bf16.mxu1 %vm4143_vm5, %v15719_v38  ;;  %13284 = vmatpush3.bf16.msra.mxu1 %v15614_v17  ;;  %v4389_v30 = vpop.permute.xlu0 %4388  ;;  %v4898_v17 = vld [vmem:[#allocation2 + $0x80] sm:$0xff]  ;;  %v4907_v18 = vld [vmem:[#allocation2 + $0x108] sm:$0xff] }
 0x472   : > { %4544 = vst.msk [vmem:[#allocation2 + $0x148] sm:$0xff] %vm4504_vm6, %v4391_v39  ;;  %4543 = vst.msk [vmem:[#allocation2 + $0x140] sm:$0xff] %vm4504_vm6, %v4389_v30  ;;  %13285 = vmatprep.subr.bf16.mxu1 %v13852_v37  ;;  %v15738_v47 = vpack.c.bf16 %v4899_v44, %v4898_v17  ;;  %v4906_v6 = vld [vmem:[#allocation2 + $0x100] sm:$0xff] }
 0x473   : > { %v15768_v0 = vpack.c.bf16 %v4907_v18, %v4906_v6  ;;  %v13865_v18 = vld [vmem:[%s17554_s5 + $0xa0] sm:$0xff]  }
 0x475   : > { %v4399_v43 = vpop.permute.xlu1 %4398  ;;  %v4397_v45 = vpop.permute.xlu0 %4396  ;;  %13286 = vmatpush3.bf16.msra.mxu1 %v13852_v37  ;;  %v4908_v4 = vld [vmem:[#allocation2 + $0x120] sm:$0xff]  ;;  %v4909_v11 = vld [vmem:[#allocation2 + $0x128] sm:$0xff] }
 0x476   : > { %4548 = vst.msk [vmem:[#allocation2 + $0x168] sm:$0xff] %vm4504_vm6, %v4399_v43  ;;  %4547 = vst.msk [vmem:[#allocation2 + $0x160] sm:$0xff] %vm4504_vm6, %v4397_v45  ;;  %13287 = vmatprep.subr.bf16.mxu1 %v13853_v31  ;;  %v4931_v20 = vpack.c.bf16 %v4909_v11, %v4908_v4 }
 0x478   : > { %13256 = vmatmul.mubr.msk.bf16.gmra.mrb[4].mxu1 %vm4143_vm5, %v15733_v46 }
 0x479   : > { %v4712_v52 = vpop.permute.xlu1 %4711  ;;  %13259 = vmatprep.mubr.msk.bf16.mxu1 %vm4143_vm5, %v15738_v47  ;;  %v4710_v62 = vpop.permute.xlu0 %4709  ;;  %13288 = vmatpush3.bf16.msra.mxu1 %v13853_v31 }
 0x47a   : > { %4865 = vst.msk [vmem:[#allocation2 + $0x148] sm:$0xff] %vm4825_vm7, %v4712_v52  ;;  %4864 = vst.msk [vmem:[#allocation2 + $0x140] sm:$0xff] %vm4825_vm7, %v4710_v62  ;;  %13289 = vmatprep.subr.bf16.mxu1 %v13854_v13  ;;  %v14436_v52 = vmov 0   ;;  %v13858_v62 = vld [vmem:[%s17554_s5 + $0x68] sm:$0xff]  }
 0x47d   : > { %v4720_v54 = vpop.permute.xlu1 %4719  ;;  %v4718_v56 = vpop.permute.xlu0 %4717  ;;  %13290 = vmatpush3.bf16.msra.mxu1 %v13854_v13  ;;  %v15821_v13 = vld [vmem:[#allocation3] sm:$0xff] }
 0x47e   : > { %4869 = vst.msk [vmem:[#allocation2 + $0x168] sm:$0xff] %vm4825_vm7, %v4720_v54  ;;  %4868 = vst.msk [vmem:[#allocation2 + $0x160] sm:$0xff] %vm4825_vm7, %v4718_v56  ;;  %13291 = vmatprep.subr.bf16.mxu1 %v13855_v63  ;;  %v13861_v54 = vld [vmem:[%s17554_s5 + $0x80] sm:$0xff]   ;;  %v13863_v56 = vld [vmem:[%s17554_s5 + $0x90] sm:$0xff]  }
 0x47f   : > { %6008 = vst.msk [vmem:[#allocation3 + $0x8] sm:$0xff] %vm5911_vm8, %v15821_v13 }
 0x480   : > { %13260 = vmatmul.mubr.msk.bf16.gmra.mrb[8].mxu1 %vm4143_vm5, %v15751_v57  ;;  %6014 = vst.msk [vmem:[#allocation3 + $0x10] sm:$0x1] %vm6013_vm9, %v15821_v13  ;;  %6015 = vst.msk [vmem:[#allocation3 + $0x20] sm:$0x1] %vm6013_vm9, %v15821_v13 }
 0x481   : > { %v4407_v58 = vpop.permute.xlu1 %4406  ;;  %13263 = vmatprep.mubr.msk.bf16.mxu1 %vm4143_vm5, %v15756_v41  ;;  %v4405_v60 = vpop.permute.xlu0 %4404  ;;  %13292 = vmatpush3.bf16.msra.mxu1 %v13855_v63  ;;  %v4910_v15 = vld [vmem:[#allocation2 + $0x140] sm:$0xff]  ;;  %v4911_v16 = vld [vmem:[#allocation2 + $0x148] sm:$0xff]  ;;  %6016 = vst.msk [vmem:[#allocation3 + $0x30] sm:$0x1] %vm6013_vm9, %v15821_v13  ;;  %6017 = vst.msk [vmem:[#allocation3 + $0x40] sm:$0x1] %vm6013_vm9, %v15821_v13 }
 0x482   : > { %4552 = vst.msk [vmem:[#allocation2 + $0x188] sm:$0xff] %vm4504_vm6, %v4407_v58  ;;  %4551 = vst.msk [vmem:[#allocation2 + $0x180] sm:$0xff] %vm4504_vm6, %v4405_v60  ;;  %13293 = vmatprep.subr.bf16.mxu1 %v13856_v40  ;;  %v4932_v59 = vpack.c.bf16 %v4911_v16, %v4910_v15  ;;  %v13859_v63 = vld [vmem:[%s17554_s5 + $0x70] sm:$0xff]  }
 0x483   : > { %6018 = vst.msk [vmem:[#allocation3 + $0x50] sm:$0x1] %vm6013_vm9, %v15821_v13  ;;  %6019 = vst.msk [vmem:[#allocation3 + $0x60] sm:$0x1] %vm6013_vm9, %v15821_v13 }
 0x484   : > { %6020 = vst.msk [vmem:[#allocation3 + $0x70] sm:$0x1] %vm6013_vm9, %v15821_v13  ;;  %6021 = vst.msk [vmem:[#allocation3 + $0x80] sm:$0x1] %vm6013_vm9, %v15821_v13 }
 0x485   : > { %v4415_v5 = vpop.permute.xlu1 %4414  ;;  %v4413_v7 = vpop.permute.xlu0 %4412  ;;  %13294 = vmatpush3.bf16.msra.mxu1 %v13856_v40  ;;  %v4912_v23 = vld [vmem:[#allocation2 + $0x160] sm:$0xff]  ;;  %v4913_v24 = vld [vmem:[#allocation2 + $0x168] sm:$0xff]  ;;  %6022 = vst.msk [vmem:[#allocation3 + $0x90] sm:$0x1] %vm6013_vm9, %v15821_v13  ;;  %6023 = vst.msk [vmem:[#allocation3 + $0xa0] sm:$0x1] %vm6013_vm9, %v15821_v13 }
 0x486   : > { %4556 = vst.msk [vmem:[#allocation2 + $0x1a8] sm:$0xff] %vm4504_vm6, %v4415_v5  ;;  %4555 = vst.msk [vmem:[#allocation2 + $0x1a0] sm:$0xff] %vm4504_vm6, %v4413_v7  ;;  %v4933_v29 = vpack.c.bf16 %v4913_v24, %v4912_v23  ;;  %6373 = vmatprep.subr.bf16.mxu1 %v14436_v52  ;;  %v13868_v24 = vld [vmem:[%s17554_s5 + $0xb8] sm:$0xff]  }
 0x487   : > { %6024 = vst.msk [vmem:[#allocation3 + $0xb0] sm:$0x1] %vm6013_vm9, %v15821_v13  ;;  %6025 = vst.msk [vmem:[#allocation3 + $0xc0] sm:$0x1] %vm6013_vm9, %v15821_v13 }
 0x488   : > { %13264 = vmatmul.mubr.msk.bf16.gmra.mrb[12].mxu1 %vm4143_vm5, %v15766_v9  ;;  %6026 = vst.msk [vmem:[#allocation3 + $0xd0] sm:$0x1] %vm6013_vm9, %v15821_v13  ;;  %6027 = vst.msk [vmem:[#allocation3 + $0xe0] sm:$0x1] %vm6013_vm9, %v15821_v13 }
 0x489   : > { %v4728_v2 = vpop.permute.xlu1 %4727  ;;  %13267 = vmatprep.mubr.msk.bf16.mxu1 %vm4143_vm5, %v15768_v0  ;;  %v4726_v3 = vpop.permute.xlu0 %4725  ;;  %6028 = vst.msk [vmem:[#allocation3 + $0xf0] sm:$0x1] %vm6013_vm9, %v15821_v13  ;;  %6029 = vst.msk [vmem:[#allocation3 + $0x100] sm:$0x1] %vm6013_vm9, %v15821_v13 }
 0x48a   : > { %4873 = vst.msk [vmem:[#allocation2 + $0x188] sm:$0xff] %vm4825_vm7, %v4728_v2  ;;  %4872 = vst.msk [vmem:[#allocation2 + $0x180] sm:$0xff] %vm4825_vm7, %v4726_v3 }
 0x48d   : > { %v4736_v14 = vpop.permute.xlu1 %4735  ;;  %v4734_v19 = vpop.permute.xlu0 %4733 }
 0x48e   : > { %4877 = vst.msk [vmem:[#allocation2 + $0x1a8] sm:$0xff] %vm4825_vm7, %v4736_v14  ;;  %4876 = vst.msk [vmem:[#allocation2 + $0x1a0] sm:$0xff] %vm4825_vm7, %v4734_v19 }
 0x490   : > { %13268 = vmatmul.mubr.msk.bf16.gmra.mrb[16].mxu1 %vm4143_vm5, %v4931_v20 }
 0x491   : > { %v4423_v21 = vpop.permute.xlu1 %4422  ;;  %13271 = vmatprep.mubr.msk.bf16.mxu1 %vm4143_vm5, %v4932_v59  ;;  %v4421_v22 = vpop.permute.xlu0 %4420  ;;  %v4914_v25 = vld [vmem:[#allocation2 + $0x180] sm:$0xff]  ;;  %v4915_v28 = vld [vmem:[#allocation2 + $0x188] sm:$0xff] }
 0x492   : > { %4560 = vst.msk [vmem:[#allocation2 + $0x1c8] sm:$0xff] %vm4504_vm6, %v4423_v21  ;;  %4559 = vst.msk [vmem:[#allocation2 + $0x1c0] sm:$0xff] %vm4504_vm6, %v4421_v22  ;;  %v4934_v10 = vpack.c.bf16 %v4915_v28, %v4914_v25 }
 0x495   : > { %v4431_v26 = vpop.permute.xlu1 %4430  ;;  %v4429_v27 = vpop.permute.xlu0 %4428  ;;  %v4916_v33 = vld [vmem:[#allocation2 + $0x1a0] sm:$0xff]  ;;  %v4917_v34 = vld [vmem:[#allocation2 + $0x1a8] sm:$0xff] }
 0x496   : > { %4564 = vst.msk [vmem:[#allocation2 + $0x1e8] sm:$0xff] %vm4504_vm6, %v4431_v26  ;;  %4563 = vst.msk [vmem:[#allocation2 + $0x1e0] sm:$0xff] %vm4504_vm6, %v4429_v27  ;;  %v4935_v49 = vpack.c.bf16 %v4917_v34, %v4916_v33 }
 0x498   : > { %13272 = vmatmul.mubr.msk.bf16.gmra.mrb[20].mxu1 %vm4143_vm5, %v4933_v29 }
 0x499   : > { %v4744_v32 = vpop.permute.xlu1 %4743  ;;  %13275 = vmatprep.mubr.msk.bf16.mxu1 %vm4143_vm5, %v4934_v10  ;;  %v4742_v1 = vpop.permute.xlu0 %4741 }
 0x49a   : > { %4881 = vst.msk [vmem:[#allocation2 + $0x1c8] sm:$0xff] %vm4825_vm7, %v4744_v32  ;;  %4880 = vst.msk [vmem:[#allocation2 + $0x1c0] sm:$0xff] %vm4825_vm7, %v4742_v1 }
 0x49d   : > { %v4752_v35 = vpop.permute.xlu1 %4751  ;;  %v4750_v48 = vpop.permute.xlu0 %4749 }
 0x49e   : > { %4885 = vst.msk [vmem:[#allocation2 + $0x1e8] sm:$0xff] %vm4825_vm7, %v4752_v35  ;;  %4884 = vst.msk [vmem:[#allocation2 + $0x1e0] sm:$0xff] %vm4825_vm7, %v4750_v48 }
 0x4a0   : > { %13276 = vmatmul.mubr.msk.bf16.gmra.mrb[24].mxu1 %vm4143_vm5, %v4935_v49 }
 0x4a1   : > { %v4439_v37 = vpop.permute.xlu1 %4438  ;;  %v4919_v39 = vld [vmem:[#allocation2 + $0x1c8] sm:$0xff]  ;;  %v4437_v30 = vpop.permute.xlu0 %4436  ;;  %v4918_v31 = vld [vmem:[#allocation2 + $0x1c0] sm:$0xff] }
 0x4a2   : > { %4568 = vst.msk [vmem:[#allocation2 + $0x208] sm:$0xff] %vm4504_vm6, %v4439_v37  ;;  %4567 = vst.msk [vmem:[#allocation2 + $0x200] sm:$0xff] %vm4504_vm6, %v4437_v30  ;;  %v4936_v42 = vpack.c.bf16 %v4919_v39, %v4918_v31 }
 0x4a4   : > { %13279 = vmatprep.mubr.msk.bf16.mxu1 %vm4143_vm5, %v4936_v42 }
 0x4a5   : > { %v4760_v43 = vpop.permute.xlu1 %4759  ;;  %v4921_v44 = vld [vmem:[#allocation2 + $0x1e8] sm:$0xff]  ;;  %v4758_v45 = vpop.permute.xlu0 %4757  ;;  %v4920_v12 = vld [vmem:[#allocation2 + $0x1e0] sm:$0xff] }
 0x4a6   : > { %4889 = vst.msk [vmem:[#allocation2 + $0x208] sm:$0xff] %vm4825_vm7, %v4760_v43  ;;  %4888 = vst.msk [vmem:[#allocation2 + $0x200] sm:$0xff] %vm4825_vm7, %v4758_v45  ;;  %v4937_v17 = vpack.c.bf16 %v4921_v44, %v4920_v12 }
 0x4a8   : > { %13280 = vmatmul.mubr.msk.bf16.gmra.mrb[28].mxu1 %vm4143_vm5, %v4937_v17 }
 0x4a9   : > { %13295 = vmatprep.mubr.msk.bf16.mxu1 %vm4143_vm5, %v15714_v36 }
 0x4ad   : > { %v5532_v36 = vld [vmem:[#allocation2 + $0x200] sm:$0xff] }
 0x4b0   : > { %13296 = vmatmul.mubr.msk.bf16.vlgmr.msra.gmra.mrb[0].mxu1 %vm4143_vm5, %v15719_v38  ;;  %v5533_v38 = vld [vmem:[#allocation2 + $0x208] sm:$0xff] }
 0x4b1   : > { %13299 = vmatprep.mubr.msk.bf16.mxu1 %vm4143_vm5, %v15733_v46  ;;  %v5549_v46 = vpack.c.bf16 %v5533_v38, %v5532_v36 }
 0x4b8   : > { %13300 = vmatmul.mubr.msk.bf16.gmra.mrb[4].mxu1 %vm4143_vm5, %v15738_v47  ;;  %v13857_v47 = vld [vmem:[%s17554_s5 + $0x60] sm:$0xff]  }
 0x4b9   : > { %13303 = vmatprep.mubr.msk.bf16.mxu1 %vm4143_vm5, %v15751_v57  ;;  %6374 = vmatpush1.bf16.msra.mxu1 %v13857_v47  ;;  %v15893_v57 = vld [vmem:[%s17553_s4] ss:$0 sm:$0xff] }
 0x4ba   : > { %6375 = vmatprep.subr.bf16.mxu1 %v14436_v52 }
 0x4bd   : > { %6376 = vmatpush1.bf16.msra.mxu1 %v13858_v62 }
 0x4be   : > { %6377 = vmatprep.subr.bf16.mxu1 %v14436_v52 }
 0x4c0   : > { %13304 = vmatmul.mubr.msk.bf16.gmra.mrb[8].mxu1 %vm4143_vm5, %v15756_v41 }
 0x4c1   : > { %13307 = vmatprep.mubr.msk.bf16.mxu1 %vm4143_vm5, %v15766_v9  ;;  %6378 = vmatpush1.bf16.msra.mxu1 %v13859_v63 }
 0x4c2   : > { %6379 = vmatprep.subr.bf16.mxu1 %v14436_v52 }
 0x4c5   : > { %6380 = vmatpush1.bf16.msra.mxu1 %v13860_v53 }
 0x4c6   : > { %6381 = vmatprep.subr.bf16.mxu1 %v14436_v52 }
 0x4c8   : > { %13308 = vmatmul.mubr.msk.bf16.gmra.mrb[12].mxu1 %vm4143_vm5, %v15768_v0  ;;  %v13866_v0 = vld [vmem:[%s17554_s5 + $0xa8] sm:$0xff]  }
 0x4c9   : > { %13311 = vmatprep.mubr.msk.bf16.mxu1 %vm4143_vm5, %v4931_v20  ;;  %6382 = vmatpush1.bf16.msra.mxu1 %v13861_v54 }
 0x4ca   : > { %6383 = vmatprep.subr.bf16.mxu1 %v14436_v52 }
 0x4cd   : > { %6384 = vmatpush1.bf16.msra.mxu1 %v13862_v55 }
 0x4ce   : > { %6385 = vmatprep.subr.bf16.mxu1 %v14436_v52 }
 0x4d0   : > { %13312 = vmatmul.mubr.msk.bf16.gmra.mrb[16].mxu1 %vm4143_vm5, %v4932_v59  ;;  %v13867_v59 = vld [vmem:[%s17554_s5 + $0xb0] sm:$0xff]  }
 0x4d1   : > { %13315 = vmatprep.mubr.msk.bf16.mxu1 %vm4143_vm5, %v4933_v29  ;;  %6386 = vmatpush1.bf16.msra.mxu1 %v13863_v56 }
 0x4d2   : > { %6387 = vmatprep.subr.bf16.mxu1 %v14436_v52 }
 0x4d5   : > { %6388 = vmatpush1.bf16.msra.mxu1 %v13864_v50 }
 0x4d6   : > { %6389 = vmatprep.subr.bf16.mxu1 %v14436_v52 }
 0x4d8   : > { %13316 = vmatmul.mubr.msk.bf16.gmra.mrb[20].mxu1 %vm4143_vm5, %v4934_v10 }
 0x4d9   : > { %13319 = vmatprep.mubr.msk.bf16.mxu1 %vm4143_vm5, %v4935_v49  ;;  %6390 = vmatpush1.bf16.msra.mxu1 %v13865_v18 }
 0x4da   : > { %6391 = vmatprep.subr.bf16.mxu1 %v14436_v52 }
 0x4dd   : > { %6392 = vmatpush1.bf16.msra.mxu1 %v13866_v0 }
 0x4de   : > { %6393 = vmatprep.subr.bf16.mxu1 %v14436_v52 }
 0x4e0   : > { %13320 = vmatmul.mubr.msk.bf16.gmra.mrb[24].mxu1 %vm4143_vm5, %v4936_v42 }
 0x4e1   : > { %13323 = vmatprep.mubr.msk.bf16.mxu1 %vm4143_vm5, %v4937_v17  ;;  %6394 = vmatpush1.bf16.msra.mxu1 %v13867_v59 }
 0x4e2   : > { %6395 = vmatprep.subr.bf16.mxu1 %v14436_v52 }
 0x4e5   : > { %6396 = vmatpush1.bf16.msra.mxu1 %v13868_v24 }
 0x4e6   : > { %6522 = vmatprep.subr.bf16.mxu1 %v14436_v52 }
 0x4e8   : > { %13324 = vmatmul.mubr.msk.bf16.gmra.mrb[28].mxu1 %vm4143_vm5, %v5549_v46 }
 0x583   : > { %v13297_v51 = vpop.f32.mrb[0].mxu1 }
 0x584   : > { %v5849_v40 = vadd.f32 %v13297_v51, %v15893_v57  ;;  %v5681_v41 = vpop.f32.mrb[1].mxu1 }
 0x585   : > { %v5847_v58 = vadd.f32 %v15893_v57, %v5681_v41  ;;  %v13298_v60 = vpop.f32.mrb[2].mxu1 }
 0x586   : > { %v5881_v61 = vmax.f32 %v5849_v40, 0.0  ;;  %v5850_v5 = vadd.f32 %v13298_v60, %v15893_v57  ;;  %v5684_v6 = vpop.f32.mrb[3].mxu1 }
 0x587   : > { %v5879_v7 = vmax.f32 %v5847_v58, 0.0  ;;  %v5848_v8 = vadd.f32 %v15893_v57, %v5684_v6 }
 0x588   : > { %5914 = vst.msk [vmem:[#allocation6 + $0x10] sm:$0xff] %vm5911_vm8, %v5881_v61  ;;  %v5882_v9 = vmax.f32 %v5850_v5, 0.0 }
 0x589   : > { %5912 = vst.msk [vmem:[#allocation6] sm:$0xff] %vm5911_vm8, %v5879_v7  ;;  %v5880_v2 = vmax.f32 %v5848_v8, 0.0 }
 0x58a   : > { %5915 = vst.msk [vmem:[#allocation6 + $0x18] sm:$0xff] %vm5911_vm8, %v5882_v9 }
 0x58b   : > { %5913 = vst.msk [vmem:[#allocation6 + $0x8] sm:$0xff] %vm5911_vm8, %v5880_v2  ;;  %v13301_v3 = vpop.f32.mrb[4].mxu1 }
 0x58c   : > { %v5853_v4 = vadd.f32 %v13301_v3, %v15893_v57  ;;  %v5697_v11 = vpop.f32.mrb[5].mxu1 }
 0x58d   : > { %v5851_v14 = vadd.f32 %v15893_v57, %v5697_v11  ;;  %v13302_v15 = vpop.f32.mrb[6].mxu1 }
 0x58e   : > { %v5885_v16 = vmax.f32 %v5853_v4, 0.0  ;;  %v5854_v19 = vadd.f32 %v13302_v15, %v15893_v57  ;;  %v5700_v20 = vpop.f32.mrb[7].mxu1 }
 0x58f   : > { %v5883_v21 = vmax.f32 %v5851_v14, 0.0  ;;  %v5852_v22 = vadd.f32 %v15893_v57, %v5700_v20 }
 0x590   : > { %5918 = vst.msk [vmem:[#allocation6 + $0x30] sm:$0xff] %vm5911_vm8, %v5885_v16  ;;  %v5886_v23 = vmax.f32 %v5854_v19, 0.0 }
 0x591   : > { %5916 = vst.msk [vmem:[#allocation6 + $0x20] sm:$0xff] %vm5911_vm8, %v5883_v21  ;;  %v5884_v26 = vmax.f32 %v5852_v22, 0.0  ;;  %v5978_v25 = vld [vmem:[#allocation6 + $0x11] ss:$2 sm:$0xff] }
 0x592   : > { %v5976_v28 = vld [vmem:[#allocation6 + $0x1] ss:$2 sm:$0xff]  ;;  %5919 = vst.msk [vmem:[#allocation6 + $0x38] sm:$0xff] %vm5911_vm8, %v5886_v23  ;;  %v5944_v27 = vld [vmem:[#allocation6] ss:$2 sm:$0xff]  ;;  %v6047_v29 = vrot.slane %v5978_v25, 7 }
 0x593   : > { %6177 = vst.msk [vmem:[#allocation3 + $0x28] sm:$0xff] %vm5911_vm8, %v5978_v25  ;;  %6176 = vst.msk [vmem:[#allocation3 + $0x18] sm:$0xff] %vm5911_vm8, %v5976_v28  ;;  %v13305_v10 = vpop.f32.mrb[8].mxu1  ;;  %6111 = vrot.lane.b32.xlu0 %v5944_v27, %s14434_s22  ;;  %v6046_v32 = vrot.slane %v5976_v28, 7 }
 0x594   : > { %5917 = vst.msk [vmem:[#allocation6 + $0x28] sm:$0xff] %vm5911_vm8, %v5884_v26  ;;  %v5857_v1 = vadd.f32 %v13305_v10, %v15893_v57  ;;  %v5713_v33 = vpop.f32.mrb[9].mxu1 }
 0x595   : > { %6080 = vst.msk [vmem:[#allocation3 + $0x20] sm:$0xfe] %vm6078_vm10, %v6047_v29  ;;  %v5855_v34 = vadd.f32 %v15893_v57, %v5713_v33  ;;  %v13306_v35 = vpop.f32.mrb[10].mxu1  ;;  %6079 = vst.msk [vmem:[#allocation3 + $0x10] sm:$0xfe] %vm6078_vm10, %v6046_v32 }
 0x596   : > { %v5889_v48 = vmax.f32 %v5857_v1, 0.0  ;;  %v5858_v49 = vadd.f32 %v13306_v35, %v15893_v57  ;;  %v5716_v37 = vpop.f32.mrb[11].mxu1 }
 0x597   : > { %v5887_v39 = vmax.f32 %v5855_v34, 0.0  ;;  %v5856_v30 = vadd.f32 %v15893_v57, %v5716_v37 }
 0x598   : > { %5922 = vst.msk [vmem:[#allocation6 + $0x50] sm:$0xff] %vm5911_vm8, %v5889_v48  ;;  %v5890_v31 = vmax.f32 %v5858_v49, 0.0 }
 0x599   : > { %5920 = vst.msk [vmem:[#allocation6 + $0x40] sm:$0xff] %vm5911_vm8, %v5887_v39  ;;  %v5888_v42 = vmax.f32 %v5856_v30, 0.0  ;;  %v5982_v43 = vld [vmem:[#allocation6 + $0x31] ss:$2 sm:$0xff] }
 0x59a   : > { %5923 = vst.msk [vmem:[#allocation6 + $0x58] sm:$0xff] %vm5911_vm8, %v5890_v31  ;;  %v6049_v12 = vrot.slane %v5982_v43, 7  ;;  %6179 = vst.msk [vmem:[#allocation3 + $0x48] sm:$0xff] %vm5911_vm8, %v5982_v43  ;;  %v6241_v40 = vld [vmem:[#allocation3 + $0x18] sm:$0xff] }
 0x59b   : > { %v5980_v44 = vld [vmem:[#allocation6 + $0x21] ss:$2 sm:$0xff]  ;;  %v5948_v45 = vld [vmem:[#allocation6 + $0x20] ss:$2 sm:$0xff]  ;;  %5921 = vst.msk [vmem:[#allocation6 + $0x48] sm:$0xff] %vm5911_vm8, %v5888_v42  ;;  %v13309_v17 = vpop.f32.mrb[12].mxu1 }
 0x59c   : > { %6178 = vst.msk [vmem:[#allocation3 + $0x38] sm:$0xff] %vm5911_vm8, %v5980_v44  ;;  %6115 = vrot.lane.b32.xlu1 %v5948_v45, %s14434_s22  ;;  %v6048_v36 = vrot.slane %v5980_v44, 7  ;;  %v5861_v38 = vadd.f32 %v13309_v17, %v15893_v57  ;;  %v5729_v46 = vpop.f32.mrb[13].mxu1 }
 0x59d   : > { %6082 = vst.msk [vmem:[#allocation3 + $0x40] sm:$0xfe] %vm6078_vm10, %v6049_v12  ;;  %v5859_v47 = vadd.f32 %v15893_v57, %v5729_v46  ;;  %v13310_v62 = vpop.f32.mrb[14].mxu1 }
 0x59e   : > { %6081 = vst.msk [vmem:[#allocation3 + $0x30] sm:$0xfe] %vm6078_vm10, %v6048_v36  ;;  %v5893_v63 = vmax.f32 %v5861_v38, 0.0  ;;  %v5862_v53 = vadd.f32 %v13310_v62, %v15893_v57  ;;  %v5732_v54 = vpop.f32.mrb[15].mxu1 }
 0x59f   : > { %v5891_v55 = vmax.f32 %v5859_v47, 0.0  ;;  %v5860_v56 = vadd.f32 %v15893_v57, %v5732_v54 }
 0x5a0   : > { %5926 = vst.msk [vmem:[#allocation6 + $0x70] sm:$0xff] %vm5911_vm8, %v5893_v63  ;;  %v5894_v50 = vmax.f32 %v5862_v53, 0.0 }
 0x5a1   : > { %5924 = vst.msk [vmem:[#allocation6 + $0x60] sm:$0xff] %vm5911_vm8, %v5891_v55  ;;  %v5892_v51 = vmax.f32 %v5860_v56, 0.0  ;;  %v5986_v41 = vld [vmem:[#allocation6 + $0x51] ss:$2 sm:$0xff] }
 0x5a2   : > { %5927 = vst.msk [vmem:[#allocation6 + $0x78] sm:$0xff] %vm5911_vm8, %v5894_v50  ;;  %v5952_v58 = vld [vmem:[#allocation6 + $0x40] ss:$2 sm:$0xff]  ;;  %v5984_v61 = vld [vmem:[#allocation6 + $0x41] ss:$2 sm:$0xff]  ;;  %v6051_v5 = vrot.slane %v5986_v41, 7 }
 0x5a3   : > { %v6243_v60 = vld [vmem:[#allocation3 + $0x38] sm:$0xff]  ;;  %6181 = vst.msk [vmem:[#allocation3 + $0x68] sm:$0xff] %vm5911_vm8, %v5986_v41  ;;  %5925 = vst.msk [vmem:[#allocation6 + $0x68] sm:$0xff] %vm5911_vm8, %v5892_v51  ;;  %v13313_v6 = vpop.f32.mrb[16].mxu1  ;;  %6119 = vrot.lane.b32.xlu0 %v5952_v58, %s14434_s22  ;;  %v6050_v7 = vrot.slane %v5984_v61, 7 }
 0x5a4   : > { %v6257_v18 = vpack.c.bf16 %v6243_v60, %v6241_v40  ;;  %6180 = vst.msk [vmem:[#allocation3 + $0x58] sm:$0xff] %vm5911_vm8, %v5984_v61  ;;  %v5865_v8 = vadd.f32 %v13313_v6, %v15893_v57  ;;  %v5745_v9 = vpop.f32.mrb[17].mxu1 }
 0x5a5   : > { %6084 = vst.msk [vmem:[#allocation3 + $0x60] sm:$0xfe] %vm6078_vm10, %v6051_v5  ;;  %v5863_v0 = vadd.f32 %v15893_v57, %v5745_v9  ;;  %v13314_v2 = vpop.f32.mrb[18].mxu1  ;;  %6083 = vst.msk [vmem:[#allocation3 + $0x50] sm:$0xfe] %vm6078_vm10, %v6050_v7 }
 0x5a6   : > { %11624 = vmatprep.mubr.msk.bf16.mxu1 %vm5911_vm8, %v6257_v18  ;;  %v5897_v3 = vmax.f32 %v5865_v8, 0.0  ;;  %v5866_v4 = vadd.f32 %v13314_v2, %v15893_v57  ;;  %v5748_v11 = vpop.f32.mrb[19].mxu1 }
 0x5a7   : > { %v5895_v14 = vmax.f32 %v5863_v0, 0.0  ;;  %v5864_v15 = vadd.f32 %v15893_v57, %v5748_v11  ;;  %v5954_v11 = vld [vmem:[#allocation6 + $0x50] ss:$2 sm:$0xff] }
 0x5a8   : > { %5930 = vst.msk [vmem:[#allocation6 + $0x90] sm:$0xff] %vm5911_vm8, %v5897_v3  ;;  %v5898_v16 = vmax.f32 %v5866_v4, 0.0 }
 0x5a9   : > { %5928 = vst.msk [vmem:[#allocation6 + $0x80] sm:$0xff] %vm5911_vm8, %v5895_v14  ;;  %v5896_v19 = vmax.f32 %v5864_v15, 0.0  ;;  %v5990_v20 = vld [vmem:[#allocation6 + $0x71] ss:$2 sm:$0xff] }
 0x5aa   : > { %v5988_v59 = vld [vmem:[#allocation6 + $0x61] ss:$2 sm:$0xff]  ;;  %5931 = vst.msk [vmem:[#allocation6 + $0x98] sm:$0xff] %vm5911_vm8, %v5898_v16  ;;  %v5956_v21 = vld [vmem:[#allocation6 + $0x60] ss:$2 sm:$0xff]  ;;  %v6053_v22 = vrot.slane %v5990_v20, 7 }
 0x5ab   : > { %6183 = vst.msk [vmem:[#allocation3 + $0x88] sm:$0xff] %vm5911_vm8, %v5990_v20  ;;  %6182 = vst.msk [vmem:[#allocation3 + $0x78] sm:$0xff] %vm5911_vm8, %v5988_v59  ;;  %v13317_v23 = vpop.f32.mrb[20].mxu1  ;;  %6123 = vrot.lane.b32.xlu1 %v5956_v21, %s14434_s22  ;;  %v6052_v24 = vrot.slane %v5988_v59, 7  ;;  %v5950_v21 = vld [vmem:[#allocation6 + $0x30] ss:$2 sm:$0xff] }
 0x5ac   : > { %5929 = vst.msk [vmem:[#allocation6 + $0x88] sm:$0xff] %vm5911_vm8, %v5896_v19  ;;  %v5869_v26 = vadd.f32 %v13317_v23, %v15893_v57  ;;  %v5761_v25 = vpop.f32.mrb[21].mxu1  ;;  %v5958_v23 = vld [vmem:[#allocation6 + $0x70] ss:$2 sm:$0xff] }
 0x5ad   : > { %6086 = vst.msk [vmem:[#allocation3 + $0x80] sm:$0xfe] %vm6078_vm10, %v6053_v22  ;;  %v5867_v28 = vadd.f32 %v15893_v57, %v5761_v25  ;;  %v13318_v27 = vpop.f32.mrb[22].mxu1  ;;  %6085 = vst.msk [vmem:[#allocation3 + $0x70] sm:$0xfe] %vm6078_vm10, %v6052_v24 }
 0x5ae   : > { %v5901_v29 = vmax.f32 %v5869_v26, 0.0  ;;  %v5870_v10 = vadd.f32 %v13318_v27, %v15893_v57  ;;  %v5764_v32 = vpop.f32.mrb[23].mxu1 }
 0x5af   : > { %v5899_v1 = vmax.f32 %v5867_v28, 0.0  ;;  %v5868_v33 = vadd.f32 %v15893_v57, %v5764_v32 }
 0x5b0   : > { %5934 = vst.msk [vmem:[#allocation6 + $0xb0] sm:$0xff] %vm5911_vm8, %v5901_v29  ;;  %v5902_v34 = vmax.f32 %v5870_v10, 0.0 }
 0x5b1   : > { %5932 = vst.msk [vmem:[#allocation6 + $0xa0] sm:$0xff] %vm5911_vm8, %v5899_v1  ;;  %v5900_v35 = vmax.f32 %v5868_v33, 0.0  ;;  %v5994_v48 = vld [vmem:[#allocation6 + $0x91] ss:$2 sm:$0xff]  ;;  %v5962_v59 = vld [vmem:[#allocation6 + $0x90] ss:$2 sm:$0xff] }
 0x5b2   : > { %5935 = vst.msk [vmem:[#allocation6 + $0xb8] sm:$0xff] %vm5911_vm8, %v5902_v34  ;;  %v6055_v39 = vrot.slane %v5994_v48, 7  ;;  %6185 = vst.msk [vmem:[#allocation3 + $0xa8] sm:$0xff] %vm5911_vm8, %v5994_v48  ;;  %v6247_v27 = vld [vmem:[#allocation3 + $0x78] sm:$0xff]  ;;  %v13869_v1 = vld [vmem:[%s17554_s5] sm:$0xff]  }
 0x5b3   : > { %v5960_v49 = vld [vmem:[#allocation6 + $0x80] ss:$2 sm:$0xff]  ;;  %v5992_v37 = vld [vmem:[#allocation6 + $0x81] ss:$2 sm:$0xff]  ;;  %5933 = vst.msk [vmem:[#allocation6 + $0xa8] sm:$0xff] %vm5911_vm8, %v5900_v35  ;;  %v13321_v30 = vpop.f32.mrb[24].mxu1 }
 0x5b4   : > { %6127 = vrot.lane.b32.xlu0 %v5960_v49, %s14434_s22  ;;  %v6054_v31 = vrot.slane %v5992_v37, 7  ;;  %6184 = vst.msk [vmem:[#allocation3 + $0x98] sm:$0xff] %vm5911_vm8, %v5992_v37  ;;  %v5873_v42 = vadd.f32 %v13321_v30, %v15893_v57  ;;  %v5777_v43 = vpop.f32.mrb[25].mxu1  ;;  %v6245_v34 = vld [vmem:[#allocation3 + $0x58] sm:$0xff]  ;;  %v13870_v48 = vld [vmem:[%s17554_s5 + $0x8] sm:$0xff]   ;;  %v13871_v37 = vld [vmem:[%s17554_s5 + $0x10] sm:$0xff]  }
 0x5b5   : > { %6088 = vst.msk [vmem:[#allocation3 + $0xa0] sm:$0xfe] %vm6078_vm10, %v6055_v39  ;;  %v5871_v44 = vadd.f32 %v15893_v57, %v5777_v43  ;;  %v13322_v45 = vpop.f32.mrb[26].mxu1  ;;  %v6259_v35 = vpack.c.bf16 %v6247_v27, %v6245_v34  ;;  %v13872_v39 = vld [vmem:[%s17554_s5 + $0x18] sm:$0xff]  }
 0x5b6   : > { %6087 = vst.msk [vmem:[#allocation3 + $0x90] sm:$0xfe] %vm6078_vm10, %v6054_v31  ;;  %v5905_v12 = vmax.f32 %v5873_v42, 0.0  ;;  %v5874_v17 = vadd.f32 %v13322_v45, %v15893_v57  ;;  %v5780_v36 = vpop.f32.mrb[27].mxu1 }
 0x5b7   : > { %v5903_v38 = vmax.f32 %v5871_v44, 0.0  ;;  %v5872_v46 = vadd.f32 %v15893_v57, %v5780_v36  ;;  %v13873_v44 = vld [vmem:[%s17554_s5 + $0x20] sm:$0xff]   ;;  %v13874_v36 = vld [vmem:[%s17554_s5 + $0x28] sm:$0xff]  }
 0x5b8   : > { %5938 = vst.msk [vmem:[#allocation6 + $0xd0] sm:$0xff] %vm5911_vm8, %v5905_v12  ;;  %v5906_v47 = vmax.f32 %v5874_v17, 0.0 }
 0x5b9   : > { %5936 = vst.msk [vmem:[#allocation6 + $0xc0] sm:$0xff] %vm5911_vm8, %v5903_v38  ;;  %v5904_v62 = vmax.f32 %v5872_v46, 0.0  ;;  %v5998_v63 = vld [vmem:[#allocation6 + $0xb1] ss:$2 sm:$0xff]  ;;  %v5966_v24 = vld [vmem:[#allocation6 + $0xb0] ss:$2 sm:$0xff] }
 0x5ba   : > { %v5996_v53 = vld [vmem:[#allocation6 + $0xa1] ss:$2 sm:$0xff]  ;;  %5939 = vst.msk [vmem:[#allocation6 + $0xd8] sm:$0xff] %vm5911_vm8, %v5906_v47  ;;  %v5964_v54 = vld [vmem:[#allocation6 + $0xa0] ss:$2 sm:$0xff]  ;;  %v6057_v55 = vrot.slane %v5998_v63, 7 }
 0x5bb   : > { %6187 = vst.msk [vmem:[#allocation3 + $0xc8] sm:$0xff] %vm5911_vm8, %v5998_v63  ;;  %6186 = vst.msk [vmem:[#allocation3 + $0xb8] sm:$0xff] %vm5911_vm8, %v5996_v53  ;;  %6131 = vrot.lane.b32.xlu1 %v5964_v54, %s14434_s22  ;;  %v13325_v56 = vpop.f32.mrb[28].mxu1  ;;  %v6056_v50 = vrot.slane %v5996_v53, 7  ;;  %v6249_v12 = vld [vmem:[#allocation3 + $0x98] sm:$0xff]  ;;  %v13875_v46 = vld [vmem:[%s17554_s5 + $0x30] sm:$0xff]  }
 0x5bc   : > { %5937 = vst.msk [vmem:[#allocation6 + $0xc8] sm:$0xff] %vm5911_vm8, %v5904_v62  ;;  %v5877_v51 = vadd.f32 %v13325_v56, %v15893_v57  ;;  %v5793_v40 = vpop.f32.mrb[29].mxu1  ;;  %v13876_v47 = vld [vmem:[%s17554_s5 + $0x38] sm:$0xff]  }
 0x5bd   : > { %6090 = vst.msk [vmem:[#allocation3 + $0xc0] sm:$0xfe] %vm6078_vm10, %v6057_v55  ;;  %v5875_v41 = vadd.f32 %v15893_v57, %v5793_v40  ;;  %v13326_v58 = vpop.f32.mrb[30].mxu1  ;;  %6089 = vst.msk [vmem:[#allocation3 + $0xb0] sm:$0xfe] %vm6078_vm10, %v6056_v50  ;;  %v13877_v55 = vld [vmem:[%s17554_s5 + $0x40] sm:$0xff]  }
 0x5be   : > { %v5909_v60 = vmax.f32 %v5877_v51, 0.0  ;;  %v5878_v61 = vadd.f32 %v13326_v58, %v15893_v57  ;;  %v5796_v5 = vpop.f32.mrb[31].mxu1 }
 0x5bf   : > { %v5907_v6 = vmax.f32 %v5875_v41, 0.0  ;;  %v5876_v18 = vadd.f32 %v15893_v57, %v5796_v5  ;;  %v5946_v57 = vld [vmem:[#allocation6 + $0x10] ss:$2 sm:$0xff] }
 0x5c0   : > { %5942 = vst.msk [vmem:[#allocation6 + $0xf0] sm:$0xff] %vm5911_vm8, %v5909_v60  ;;  %v5910_v7 = vmax.f32 %v5878_v61, 0.0  ;;  %v13878_v41 = vld [vmem:[%s17554_s5 + $0x48] sm:$0xff]   ;;  %v13879_v61 = vld [vmem:[%s17554_s5 + $0x50] sm:$0xff]  }
 0x5c1   : > { %5940 = vst.msk [vmem:[#allocation6 + $0xe0] sm:$0xff] %vm5911_vm8, %v5907_v6  ;;  %v5908_v8 = vmax.f32 %v5876_v18, 0.0  ;;  %v6002_v9 = vld [vmem:[#allocation6 + $0xd1] ss:$2 sm:$0xff]  ;;  %v5970_v22 = vld [vmem:[#allocation6 + $0xd0] ss:$2 sm:$0xff] }
 0x5c2   : > { %5943 = vst.msk [vmem:[#allocation6 + $0xf8] sm:$0xff] %vm5911_vm8, %v5910_v7  ;;  %v6059_v3 = vrot.slane %v6002_v9, 7  ;;  %6189 = vst.msk [vmem:[#allocation3 + $0xe8] sm:$0xff] %vm5911_vm8, %v6002_v9  ;;  %v6251_v30 = vld [vmem:[#allocation3 + $0xb8] sm:$0xff]  ;;  %v6193_v7 = vld [vmem:[#allocation3 + $0x8] sm:$0xff] }
 0x5c3   : > { %v5968_v0 = vld [vmem:[#allocation6 + $0xc0] ss:$2 sm:$0xff]  ;;  %v6000_v2 = vld [vmem:[#allocation6 + $0xc1] ss:$2 sm:$0xff]  ;;  %5941 = vst.msk [vmem:[#allocation6 + $0xe8] sm:$0xff] %vm5911_vm8, %v5908_v8  ;;  %v6261_v17 = vpack.c.bf16 %v6251_v30, %v6249_v12  ;;  %v16086_v8 = vld [vmem:[#allocation3 + $0x28] sm:$0xff] }
 0x5c4   : > { %6135 = vrot.lane.b32.xlu0 %v5968_v0, %s14434_s22  ;;  %v6058_v4 = vrot.slane %v6000_v2, 7  ;;  %6188 = vst.msk [vmem:[#allocation3 + $0xd8] sm:$0xff] %vm5911_vm8, %v6000_v2  ;;  %v13880_v18 = vld [vmem:[%s17554_s5 + $0x58] sm:$0xff]   ;;  %v13887_v30 = vld [vmem:[%s17554_s5 + $0xf0] sm:$0xff]  }
 0x5c5   : > { %6092 = vst.msk [vmem:[#allocation3 + $0xe0] sm:$0xfe] %vm6078_vm10, %v6059_v3  ;;  %v13891_v12 = vld [vmem:[%s17554_s5 + $0x110] sm:$0xff]  }
 0x5c6   : > { %6091 = vst.msk [vmem:[#allocation3 + $0xd0] sm:$0xfe] %vm6078_vm10, %v6058_v4 }
 0x5c8   : > { %6113 = vrot.lane.b32.xlu0 %v5946_v57, %s14434_s22  ;;  %v6209_v57 = vpack.c.bf16 %v16086_v8, %v6193_v7  ;;  %v13908_v7 = vld [vmem:[%s17556_s7 + $0x1d0] ss:$8 sps:$4 sm:$0xff]  }
 0x5c9   : > { %v6006_v14 = vld [vmem:[#allocation6 + $0xf1] ss:$2 sm:$0xff]  ;;  %v5974_v26 = vld [vmem:[#allocation6 + $0xf0] ss:$2 sm:$0xff] }
 0x5ca   : > { %v6004_v15 = vld [vmem:[#allocation6 + $0xe1] ss:$2 sm:$0xff]  ;;  %v5972_v16 = vld [vmem:[#allocation6 + $0xe0] ss:$2 sm:$0xff]  ;;  %v6061_v19 = vrot.slane %v6006_v14, 7  ;;  %6191 = vst.msk [vmem:[#allocation3 + $0x108] sm:$0xff] %vm5911_vm8, %v6006_v14 }
 0x5cb   : > { %6190 = vst.msk [vmem:[#allocation3 + $0xf8] sm:$0xff] %vm5911_vm8, %v6004_v15  ;;  %6139 = vrot.lane.b32.xlu1 %v5972_v16, %s14434_s22  ;;  %v6060_v20 = vrot.slane %v6004_v15, 7  ;;  %v6253_v50 = vld [vmem:[#allocation3 + $0xd8] sm:$0xff]  ;;  %v16096_v15 = vld [vmem:[#allocation3 + $0x68] sm:$0xff] }
 0x5cc   : > { %6121 = vrot.lane.b32.xlu0 %v5954_v11, %s14434_s22  ;;  %6094 = vst.msk [vmem:[#allocation3 + $0x100] sm:$0xfe] %vm6078_vm10, %v6061_v19  ;;  %v13881_v19 = vld [vmem:[%s17554_s5 + $0xc0] sm:$0xff]  }
 0x5cd   : > { %6093 = vst.msk [vmem:[#allocation3 + $0xf0] sm:$0xfe] %vm6078_vm10, %v6060_v20 }
 0x5cf   : > { %6117 = vrot.lane.b32.xlu1 %v5950_v21, %s14434_s22 }
 0x5d0   : > { %6129 = vrot.lane.b32.xlu0 %v5962_v59, %s14434_s22  ;;  %v6197_v59 = vld [vmem:[#allocation3 + $0x48] sm:$0xff] }
 0x5d1   : > { %v6211_v21 = vpack.c.bf16 %v16096_v15, %v6197_v59 }
 0x5d2   : > { %v6255_v62 = vld [vmem:[#allocation3 + $0xf8] sm:$0xff] }
 0x5d3   : > { %6125 = vrot.lane.b32.xlu1 %v5958_v23, %s14434_s22  ;;  %v6263_v51 = vpack.c.bf16 %v6255_v62, %v6253_v50  ;;  %v6603_v62 = vld [vmem:[#allocation3 + $0x108] sm:$0xff] }
 0x5d4   : > { %6137 = vrot.lane.b32.xlu0 %v5970_v22, %s14434_s22  ;;  %v13882_v22 = vld [vmem:[%s17554_s5 + $0xc8] sm:$0xff]  }
 0x5d5   : > { %v13895_v50 = vld [vmem:[%s17556_s7 + $0x184] ss:$8 sps:$4 sm:$0xff]  }
 0x5d7   : > { %6133 = vrot.lane.b32.xlu1 %v5966_v24, %s14434_s22  ;;  %v6203_v24 = vld [vmem:[#allocation3 + $0xa8] sm:$0xff] }
 0x5db   : > { %6141 = vrot.lane.b32.xlu1 %v5974_v26, %s14434_s22 }
 0x605   : > { %v6112_v25 = vpop.permute.xlu0 %6111 }
 0x606   : > { %6160 = vst.msk [vmem:[#allocation3 + $0x10] sm:$0xff] %vm6159_vm11, %v6112_v25 }
 0x60d   : > { %v6240_v10 = vld [vmem:[#allocation3 + $0x10] sm:$0xff] }
 0x60e   : > { %v6116_v28 = vpop.permute.xlu1 %6115 }
 0x60f   : > { %6162 = vst.msk [vmem:[#allocation3 + $0x30] sm:$0xff] %vm6159_vm11, %v6116_v28  ;;  %v6201_v28 = vld [vmem:[#allocation3 + $0x88] sm:$0xff] }
 0x610   : > { %v6213_v27 = vpack.c.bf16 %v6203_v24, %v6201_v28 }
 0x615   : > { %v6120_v29 = vpop.permute.xlu0 %6119 }
 0x616   : > { %v6242_v32 = vld [vmem:[#allocation3 + $0x30] sm:$0xff]  ;;  %6164 = vst.msk [vmem:[#allocation3 + $0x50] sm:$0xff] %vm6159_vm11, %v6120_v29  ;;  %v13884_v29 = vld [vmem:[%s17554_s5 + $0xd8] sm:$0xff]  }
 0x617   : > { %v6256_v33 = vpack.c.bf16 %v6242_v32, %v6240_v10  ;;  %v6207_v32 = vld [vmem:[#allocation3 + $0xe8] sm:$0xff] }
 0x619   : > { %6406 = vmatmul.mubr.bf16.vlgmr.msra.gmra.mrb[32].mxu1 %v6256_v33  ;;  %v13885_v33 = vld [vmem:[%s17554_s5 + $0xe0] sm:$0xff]  }
 0x61a   : > { %11625 = vmatprep.mubr.msk.bf16.mxu1 %vm5911_vm8, %v6259_v35  ;;  %6523 = vmatpush1.bf16.msra.mxu1 %v13869_v1  ;;  %v6205_v35 = vld [vmem:[#allocation3 + $0xc8] sm:$0xff] }
 0x61b   : > { %6524 = vmatprep.subr.bf16.mxu1 %v14436_v52 }
 0x61d   : > { %v6124_v49 = vpop.permute.xlu1 %6123  ;;  %v6244_v42 = vld [vmem:[#allocation3 + $0x50] sm:$0xff] }
 0x61e   : > { %6525 = vmatpush1.bf16.msra.mxu1 %v13870_v48  ;;  %6166 = vst.msk [vmem:[#allocation3 + $0x70] sm:$0xff] %vm6159_vm11, %v6124_v49  ;;  %v6215_v48 = vpack.c.bf16 %v6207_v32, %v6205_v35  ;;  %v13886_v49 = vld [vmem:[%s17554_s5 + $0xe8] sm:$0xff]  }
 0x61f   : > { %6526 = vmatprep.subr.bf16.mxu1 %v14436_v52 }
 0x622   : > { %6527 = vmatpush1.bf16.msra.mxu1 %v13871_v37 }
 0x623   : > { %6528 = vmatprep.subr.bf16.mxu1 %v14436_v52 }
 0x625   : > { %v6246_v43 = vld [vmem:[#allocation3 + $0x70] sm:$0xff] }
 0x626   : > { %v6128_v31 = vpop.permute.xlu0 %6127  ;;  %6529 = vmatpush1.bf16.msra.mxu1 %v13872_v39  ;;  %v6258_v45 = vpack.c.bf16 %v6246_v43, %v6244_v42  ;;  %v6605_v42 = vpack.c.bf16 %v6197_v59, %v16086_v8  ;;  %v13888_v43 = vld [vmem:[%s17554_s5 + $0xf8] sm:$0xff]   ;;  %v13913_v8 = vld [vmem:[%s17556_s7 + $0x1e4] ss:$8 sps:$4 sm:$0xff]   ;;  %v13929_v59 = vld [vmem:[%s17556_s7 + $0x240] ss:$8 sps:$4 sm:$0xff]  }
 0x627   : > { %6168 = vst.msk [vmem:[#allocation3 + $0x90] sm:$0xff] %vm6159_vm11, %v6128_v31  ;;  %6530 = vmatprep.subr.bf16.mxu1 %v14436_v52 }
 0x628   : > { %6414 = vmatmul.mubr.bf16.gmra.mrb[36].mxu1 %v6258_v45  ;;  %v13890_v45 = vld [vmem:[%s17554_s5 + $0x108] sm:$0xff]  }
 0x629   : > { %11626 = vmatprep.mubr.msk.bf16.mxu1 %vm5911_vm8, %v6261_v17  ;;  %v13892_v17 = vld [vmem:[%s17554_s5 + $0x118] sm:$0xff]  }
 0x62a   : > { %6531 = vmatpush1.bf16.msra.mxu1 %v13873_v44  ;;  %v13889_v44 = vld [vmem:[%s17554_s5 + $0x100] sm:$0xff]  }
 0x62b   : > { %6532 = vmatprep.subr.bf16.mxu1 %v14436_v52 }
 0x62d   : > { %v6132_v38 = vpop.permute.xlu1 %6131 }
 0x62e   : > { %6533 = vmatpush1.bf16.msra.mxu1 %v13874_v36  ;;  %6170 = vst.msk [vmem:[#allocation3 + $0xb0] sm:$0xff] %vm6159_vm11, %v6132_v38  ;;  %v6248_v53 = vld [vmem:[#allocation3 + $0x90] sm:$0xff]  ;;  %v6607_v38 = vpack.c.bf16 %v6201_v28, %v16096_v15  ;;  %v13923_v15 = vld [vmem:[%s17556_s7 + $0x220] ss:$8 sps:$4 sm:$0xff]  }
 0x62f   : > { %6534 = vmatprep.subr.bf16.mxu1 %v14436_v52 }
 0x632   : > { %6535 = vmatpush1.bf16.msra.mxu1 %v13875_v46 }
 0x633   : > { %6536 = vmatprep.subr.bf16.mxu1 %v14436_v52 }
 0x635   : > { %v6250_v54 = vld [vmem:[#allocation3 + $0xb0] sm:$0xff] }
 0x636   : > { %v6136_v63 = vpop.permute.xlu0 %6135  ;;  %6537 = vmatpush1.bf16.msra.mxu1 %v13876_v47  ;;  %v6260_v56 = vpack.c.bf16 %v6250_v54, %v6248_v53  ;;  %v6609_v47 = vpack.c.bf16 %v6205_v35, %v6203_v24  ;;  %v6611_v53 = vpack.c.bf16 %v6603_v62, %v6207_v32  ;;  %v13935_v24 = vld [vmem:[%s17556_s7 + $0x260] ss:$8 sps:$4 sm:$0xff]  }
 0x637   : > { %6172 = vst.msk [vmem:[#allocation3 + $0xd0] sm:$0xff] %vm6159_vm11, %v6136_v63  ;;  %6538 = vmatprep.subr.bf16.mxu1 %v14436_v52 }
 0x638   : > { %6422 = vmatmul.mubr.bf16.gmra.mrb[40].mxu1 %v6260_v56  ;;  %v13893_v56 = vld [vmem:[%s17556_s7 + $0x180] ss:$8 sps:$4 sm:$0xff]  }
 0x639   : > { %11627 = vmatprep.mubr.msk.bf16.mxu1 %vm5911_vm8, %v6263_v51  ;;  %v13898_v51 = vld [vmem:[%s17556_s7 + $0x194] ss:$8 sps:$4 sm:$0xff]  }
 0x63a   : > { %v6114_v40 = vpop.permute.xlu0 %6113  ;;  %6539 = vmatpush1.bf16.msra.mxu1 %v13877_v55 }
 0x63b   : > { %6161 = vst.msk [vmem:[#allocation3 + $0x20] sm:$0xff] %vm6159_vm11, %v6114_v40  ;;  %6540 = vmatprep.subr.bf16.mxu1 %v14436_v52  ;;  %v13896_v40 = vld [vmem:[%s17556_s7 + $0x190] ss:$8 sps:$4 sm:$0xff]  }
 0x63d   : > { %v6140_v58 = vpop.permute.xlu1 %6139 }
 0x63e   : > { %v6122_v60 = vpop.permute.xlu0 %6121  ;;  %6541 = vmatpush1.bf16.msra.mxu1 %v13878_v41  ;;  %6174 = vst.msk [vmem:[#allocation3 + $0xf0] sm:$0xff] %vm6159_vm11, %v6140_v58  ;;  %v6252_v2 = vld [vmem:[#allocation3 + $0xd0] sm:$0xff]  ;;  %v13899_v41 = vld [vmem:[%s17556_s7 + $0x1a0] ss:$8 sps:$4 sm:$0xff]   ;;  %v13901_v58 = vld [vmem:[%s17556_s7 + $0x1a4] ss:$8 sps:$4 sm:$0xff]  }
 0x63f   : > { %6165 = vst.msk [vmem:[#allocation3 + $0x60] sm:$0xff] %vm6159_vm11, %v6122_v60  ;;  %6542 = vmatprep.subr.bf16.mxu1 %v14436_v52  ;;  %v13904_v60 = vld [vmem:[%s17556_s7 + $0x1b4] ss:$8 sps:$4 sm:$0xff]  }
 0x641   : > { %v6118_v5 = vpop.permute.xlu1 %6117 }
 0x642   : > { %v6130_v6 = vpop.permute.xlu0 %6129  ;;  %6543 = vmatpush1.bf16.msra.mxu1 %v13879_v61  ;;  %6163 = vst.msk [vmem:[#allocation3 + $0x40] sm:$0xff] %vm6159_vm11, %v6118_v5  ;;  %v16094_v14 = vld [vmem:[#allocation3 + $0x20] sm:$0xff]  ;;  %v13902_v61 = vld [vmem:[%s17556_s7 + $0x1b0] ss:$8 sps:$4 sm:$0xff]  }
 0x643   : > { %6169 = vst.msk [vmem:[#allocation3 + $0xa0] sm:$0xff] %vm6159_vm11, %v6130_v6  ;;  %6544 = vmatprep.subr.bf16.mxu1 %v14436_v52  ;;  %v6208_v20 = vpack.c.bf16 %v16094_v14, %v15821_v13  ;;  %v13883_v13 = vld [vmem:[%s17554_s5 + $0xd0] sm:$0xff]   ;;  %v13905_v5 = vld [vmem:[%s17556_s7 + $0x1c0] ss:$8 sps:$4 sm:$0xff]   ;;  %v13907_v6 = vld [vmem:[%s17556_s7 + $0x1c4] ss:$8 sps:$4 sm:$0xff]  }
 0x645   : > { %v6126_v9 = vpop.permute.xlu1 %6125  ;;  %v6254_v3 = vld [vmem:[#allocation3 + $0xf0] sm:$0xff] }
 0x646   : > { %v6138_v0 = vpop.permute.xlu0 %6137  ;;  %6545 = vmatpush1.bf16.msra.mxu1 %v13880_v18  ;;  %6167 = vst.msk [vmem:[#allocation3 + $0x80] sm:$0xff] %vm6159_vm11, %v6126_v9  ;;  %v6262_v4 = vpack.c.bf16 %v6254_v3, %v6252_v2  ;;  %v6198_v26 = vld [vmem:[#allocation3 + $0x60] sm:$0xff]  ;;  %v13910_v18 = vld [vmem:[%s17556_s7 + $0x1d4] ss:$8 sps:$4 sm:$0xff]   ;;  %v13914_v2 = vld [vmem:[%s17556_s7 + $0x1f0] ss:$8 sps:$4 sm:$0xff]  }
 0x647   : > { %6173 = vst.msk [vmem:[#allocation3 + $0xe0] sm:$0xff] %vm6159_vm11, %v6138_v0  ;;  %6721 = vmatprep.subr.bf16.mxu1 %v14436_v52  ;;  %v13911_v9 = vld [vmem:[%s17556_s7 + $0x1e0] ss:$8 sps:$4 sm:$0xff]   ;;  %v13916_v0 = vld [vmem:[%s17556_s7 + $0x1f4] ss:$8 sps:$4 sm:$0xff]  }
 0x648   : > { %6430 = vmatmul.mubr.bf16.gmra.mrb[44].mxu1 %v6262_v4  ;;  %v13919_v3 = vld [vmem:[%s17556_s7 + $0x204] ss:$8 sps:$4 sm:$0xff]   ;;  %v13917_v4 = vld [vmem:[%s17556_s7 + $0x200] ss:$8 sps:$4 sm:$0xff]  }
 0x649   : > { %v6134_v11 = vpop.permute.xlu1 %6133  ;;  %11640 = vmatprep.mubr.msk.bf16.mxu1 %vm5911_vm8, %v6209_v57  ;;  %v6196_v23 = vld [vmem:[#allocation3 + $0x40] sm:$0xff]  ;;  %v13922_v57 = vld [vmem:[%s17556_s7 + $0x214] ss:$8 sps:$4 sm:$0xff]  }
 0x64a   : > { %6171 = vst.msk [vmem:[#allocation3 + $0xc0] sm:$0xff] %vm6159_vm11, %v6134_v11  ;;  %v6210_v25 = vpack.c.bf16 %v6198_v26, %v6196_v23  ;;  %v6202_v1 = vld [vmem:[#allocation3 + $0xa0] sm:$0xff]  ;;  %v6604_v36 = vpack.c.bf16 %v6196_v23, %v16094_v14  ;;  %v13920_v11 = vld [vmem:[%s17556_s7 + $0x210] ss:$8 sps:$4 sm:$0xff]  }
 0x64b   : > { %v13925_v14 = vld [vmem:[%s17556_s7 + $0x224] ss:$8 sps:$4 sm:$0xff]  }
 0x64c   : > { %v13937_v23 = vld [vmem:[%s17556_s7 + $0x264] ss:$8 sps:$4 sm:$0xff]  }
 0x64d   : > { %v6142_v16 = vpop.permute.xlu1 %6141  ;;  %v6200_v10 = vld [vmem:[#allocation3 + $0x80] sm:$0xff] }
 0x64e   : > { %6175 = vst.msk [vmem:[#allocation3 + $0x100] sm:$0xff] %vm6159_vm11, %v6142_v16  ;;  %v6212_v34 = vpack.c.bf16 %v6202_v1, %v6200_v10  ;;  %v6206_v39 = vld [vmem:[#allocation3 + $0xe0] sm:$0xff]  ;;  %v6606_v46 = vpack.c.bf16 %v6200_v10, %v6198_v26  ;;  %v13928_v16 = vld [vmem:[%s17556_s7 + $0x234] ss:$8 sps:$4 sm:$0xff]  }
 0x64f   : > { %v13940_v26 = vld [vmem:[%s17556_s7 + $0x274] ss:$8 sps:$4 sm:$0xff]  }
 0x650   : > { %6555 = vmatmul.mubr.bf16.vlgmr.msra.gmra.mrb[48].mxu1 %v6208_v20  ;;  %v13931_v20 = vld [vmem:[%s17556_s7 + $0x244] ss:$8 sps:$4 sm:$0xff]  }
 0x651   : > { %6722 = vmatpush1.bf16.msra.mxu1 %v13881_v19  ;;  %11641 = vmatprep.mubr.msk.bf16.mxu1 %vm5911_vm8, %v6211_v21  ;;  %v6204_v37 = vld [vmem:[#allocation3 + $0xc0] sm:$0xff]  ;;  %v13926_v19 = vld [vmem:[%s17556_s7 + $0x230] ss:$8 sps:$4 sm:$0xff]   ;;  %v13934_v21 = vld [vmem:[%s17556_s7 + $0x254] ss:$8 sps:$4 sm:$0xff]  }
 0x652   : > { %6723 = vmatprep.subr.bf16.mxu1 %v14436_v52  ;;  %v6214_v31 = vpack.c.bf16 %v6206_v39, %v6204_v37  ;;  %v6608_v63 = vpack.c.bf16 %v6204_v37, %v6202_v1 }
 0x655   : > { %6724 = vmatpush1.bf16.msra.mxu1 %v13882_v22  ;;  %v6602_v54 = vld [vmem:[#allocation3 + $0x100] sm:$0xff]  ;;  %v13932_v22 = vld [vmem:[%s17556_s7 + $0x250] ss:$8 sps:$4 sm:$0xff]  }
 0x656   : > { %6725 = vmatprep.subr.bf16.mxu1 %v14436_v52  ;;  %v6610_v55 = vpack.c.bf16 %v6602_v54, %v6206_v39 }
 0x658   : > { %6563 = vmatmul.mubr.bf16.gmra.mrb[52].mxu1 %v6210_v25 }
 0x659   : > { %6726 = vmatpush1.bf16.msra.mxu1 %v13883_v13  ;;  %11642 = vmatprep.mubr.msk.bf16.mxu1 %vm5911_vm8, %v6213_v27  ;;  %v13938_v13 = vld [vmem:[%s17556_s7 + $0x270] ss:$8 sps:$4 sm:$0xff]   ;;  %v13943_v27 = vld [vmem:[%s17556_s7 + $0x284] ss:$8 sps:$4 sm:$0xff]  }
 0x65a   : > { %6727 = vmatprep.subr.bf16.mxu1 %v14436_v52 }
 0x65d   : > { %6728 = vmatpush1.bf16.msra.mxu1 %v13884_v29 }
 0x65e   : > { %6729 = vmatprep.subr.bf16.mxu1 %v14436_v52 }
 0x660   : > { %6571 = vmatmul.mubr.bf16.gmra.mrb[56].mxu1 %v6212_v34 }
 0x661   : > { %6730 = vmatpush1.bf16.msra.mxu1 %v13885_v33  ;;  %11643 = vmatprep.mubr.msk.bf16.mxu1 %vm5911_vm8, %v6215_v48 }
 0x662   : > { %6731 = vmatprep.subr.bf16.mxu1 %v14436_v52 }
 0x665   : > { %6732 = vmatpush1.bf16.msra.mxu1 %v13886_v49 }
 0x666   : > { %6733 = vmatprep.subr.bf16.mxu1 %v14436_v52 }
 0x668   : > { %6579 = vmatmul.mubr.bf16.gmra.mrb[60].mxu1 %v6214_v31 }
 0x669   : > { %6734 = vmatpush1.bf16.msra.mxu1 %v13887_v30  ;;  %11680 = vmatprep.mubr.msk.bf16.mxu1 %vm5911_vm8, %v6605_v42 }
 0x66a   : > { %6735 = vmatprep.subr.bf16.mxu1 %v14436_v52 }
 0x66d   : > { %6736 = vmatpush1.bf16.msra.mxu1 %v13888_v43 }
 0x66e   : > { %6737 = vmatprep.subr.bf16.mxu1 %v14436_v52 }
 0x671   : > { %6738 = vmatpush1.bf16.msra.mxu1 %v13889_v44 }
 0x672   : > { %6739 = vmatprep.subr.bf16.mxu1 %v14436_v52 }
 0x675   : > { %6740 = vmatpush1.bf16.msra.mxu1 %v13890_v45 }
 0x676   : > { %6741 = vmatprep.subr.bf16.mxu1 %v14436_v52 }
 0x679   : > { %6742 = vmatpush1.bf16.msra.mxu1 %v13891_v12 }
 0x67a   : > { %6743 = vmatprep.subr.bf16.mxu1 %v14436_v52 }
 0x67d   : > { %6744 = vmatpush1.bf16.msra.mxu1 %v13892_v17 }
 0x67e   : > { %7278 = vmatprep.subr.bf16.mxu1 %v13895_v50 }
 0x680   : > { %6754 = vmatmul.mubr.bf16.vlgmr.msra.gmra.mrb[64].mxu1 %v6604_v36 }
 0x681   : > { %11681 = vmatprep.mubr.msk.bf16.mxu1 %vm5911_vm8, %v6607_v38  ;;  %7279 = vmatpush1.bf16.msra.mxu1 %v13893_v56 }
 0x682   : > { %7280 = vmatprep.subr.bf16.mxu1 %v13898_v51 }
 0x685   : > { %7281 = vmatpush1.bf16.msra.mxu1 %v13896_v40 }
 0x686   : > { %7282 = vmatprep.subr.bf16.mxu1 %v13901_v58 }
 0x688   : > { %6762 = vmatmul.mubr.bf16.gmra.mrb[68].mxu1 %v6606_v46 }
 0x689   : > { %11682 = vmatprep.mubr.msk.bf16.mxu1 %vm5911_vm8, %v6609_v47  ;;  %7283 = vmatpush1.bf16.msra.mxu1 %v13899_v41 }
 0x68a   : > { %7284 = vmatprep.subr.bf16.mxu1 %v13904_v60 }
 0x68d   : > { %7285 = vmatpush1.bf16.msra.mxu1 %v13902_v61 }
 0x68e   : > { %7286 = vmatprep.subr.bf16.mxu1 %v13907_v6 }
 0x690   : > { %6770 = vmatmul.mubr.bf16.gmra.mrb[72].mxu1 %v6608_v63 }
 0x691   : > { %11683 = vmatprep.mubr.msk.bf16.mxu1 %vm5911_vm8, %v6611_v53  ;;  %7287 = vmatpush1.bf16.msra.mxu1 %v13905_v5 }
 0x692   : > { %7288 = vmatprep.subr.bf16.mxu1 %v13910_v18 }
 0x695   : > { %7289 = vmatpush1.bf16.msra.mxu1 %v13908_v7  ;;  %v16265_v7 = vld [vmem:[%s17555_s6] ss:$0 sm:$0xff] }
 0x696   : > { %7290 = vmatprep.subr.bf16.mxu1 %v13913_v8 }
 0x698   : > { %6778 = vmatmul.mubr.bf16.gmra.mrb[76].mxu1 %v6610_v55 }
 0x699   : > { %7291 = vmatpush1.bf16.msra.mxu1 %v13911_v9 }
 0x69a   : > { %7292 = vmatprep.subr.bf16.mxu1 %v13916_v0 }
 0x69d   : > { %7293 = vmatpush1.bf16.msra.mxu1 %v13914_v2 }
 0x69e   : > { %7294 = vmatprep.subr.bf16.mxu1 %v13919_v3 }
 0x6a1   : > { %7295 = vmatpush1.bf16.msra.mxu1 %v13917_v4 }
 0x6a2   : > { %7296 = vmatprep.subr.bf16.mxu1 %v13922_v57 }
 0x6a5   : > { %7297 = vmatpush1.bf16.msra.mxu1 %v13920_v11 }
 0x6a6   : > { %7298 = vmatprep.subr.bf16.mxu1 %v13925_v14 }
 0x6a9   : > { %7299 = vmatpush1.bf16.msra.mxu1 %v13923_v15 }
 0x6aa   : > { %7300 = vmatprep.subr.bf16.mxu1 %v13928_v16 }
 0x6ad   : > { %7301 = vmatpush1.bf16.msra.mxu1 %v13926_v19 }
 0x6ae   : > { %7302 = vmatprep.subr.bf16.mxu1 %v13931_v20 }
 0x6b1   : > { %7303 = vmatpush1.bf16.msra.mxu1 %v13929_v59 }
 0x6b2   : > { %7304 = vmatprep.subr.bf16.mxu1 %v13934_v21 }
 0x6b5   : > { %7305 = vmatpush1.bf16.msra.mxu1 %v13932_v22 }
 0x6b6   : > { %7306 = vmatprep.subr.bf16.mxu1 %v13937_v23 }
 0x6b9   : > { %7307 = vmatpush1.bf16.msra.mxu1 %v13935_v24 }
 0x6ba   : > { %7308 = vmatprep.subr.bf16.mxu1 %v13940_v26 }
 0x6bd   : > { %7309 = vmatpush1.bf16.msra.mxu1 %v13938_v13 }
 0x6be   : > { %7331 = vmatprep.subr.bf16.mxu1 %v13943_v27 }
 0x6ec   : > { %v6407_v25 = vpop.f32.mrb[32].mxu1 }
 0x6ed   : > { %v6409_v28 = vpop.f32.mrb[33].mxu1 }
 0x6ee   : > { %v6410_v29 = vpop.f32.mrb[34].mxu1 }
 0x6ef   : > { %v6412_v10 = vpop.f32.mrb[35].mxu1 }
 0x6fb   : > { %v6415_v32 = vpop.f32.mrb[36].mxu1 }
 0x6fc   : > { %v6417_v1 = vpop.f32.mrb[37].mxu1 }
 0x6fd   : > { %v6418_v33 = vpop.f32.mrb[38].mxu1 }
 0x6fe   : > { %v6420_v34 = vpop.f32.mrb[39].mxu1 }
 0x70b   : > { %v6423_v35 = vpop.f32.mrb[40].mxu1 }
 0x70c   : > { %v6425_v48 = vpop.f32.mrb[41].mxu1 }
 0x70d   : > { %v6426_v49 = vpop.f32.mrb[42].mxu1 }
 0x70e   : > { %v6428_v37 = vpop.f32.mrb[43].mxu1 }
 0x71b   : > { %v6431_v39 = vpop.f32.mrb[44].mxu1 }
 0x71c   : > { %v6433_v30 = vpop.f32.mrb[45].mxu1 }
 0x71d   : > { %v6434_v31 = vpop.f32.mrb[46].mxu1 }
 0x71e   : > { %v6436_v42 = vpop.f32.mrb[47].mxu1 }
 0x723   : > { %v6556_v43 = vpop.f32.mrb[48].mxu1 }
 0x724   : > { %v6557_v44 = vadd.f32 %v6556_v43, %v6407_v25  ;;  %v6558_v45 = vpop.f32.mrb[49].mxu1 }
 0x725   : > { %v6559_v12 = vpop.f32.mrb[50].mxu1 }
 0x726   : > { %v6560_v17 = vadd.f32 %v6559_v12, %v6410_v29  ;;  %v6561_v36 = vpop.f32.mrb[51].mxu1 }
 0x727   : > { %v13941_v36 = vld [vmem:[%s17556_s7 + $0x280] ss:$8 sps:$4 sm:$0xff]  }
 0x72b   : > { %v6564_v38 = vpop.f32.mrb[52].mxu1 }
 0x72c   : > { %v6565_v46 = vadd.f32 %v6564_v38, %v6415_v32  ;;  %v6566_v47 = vpop.f32.mrb[53].mxu1 }
 0x72d   : > { %v6567_v62 = vpop.f32.mrb[54].mxu1 }
 0x72e   : > { %v6568_v63 = vadd.f32 %v6567_v62, %v6418_v33  ;;  %v6569_v53 = vpop.f32.mrb[55].mxu1 }
 0x733   : > { %v6572_v54 = vpop.f32.mrb[56].mxu1 }
 0x734   : > { %v6573_v55 = vadd.f32 %v6572_v54, %v6423_v35  ;;  %v6574_v56 = vpop.f32.mrb[57].mxu1 }
 0x735   : > { %v6575_v50 = vpop.f32.mrb[58].mxu1 }
 0x736   : > { %v6576_v51 = vadd.f32 %v6575_v50, %v6426_v49  ;;  %v6577_v40 = vpop.f32.mrb[59].mxu1 }
 0x73b   : > { %v6580_v41 = vpop.f32.mrb[60].mxu1 }
 0x73c   : > { %v16258_v58 = vadd.f32 %v6580_v41, %v6431_v39  ;;  %v6582_v60 = vpop.f32.mrb[61].mxu1 }
 0x73d   : > { %v6583_v61 = vpop.f32.mrb[62].mxu1 }
 0x73e   : > { %v16260_v5 = vadd.f32 %v6583_v61, %v6434_v31  ;;  %v6585_v6 = vpop.f32.mrb[63].mxu1 }
 0x753   : > { %v6755_v18 = vpop.f32.mrb[64].mxu1 }
 0x754   : > { %v6786_v8 = vadd.f32 %v6755_v18, %v6557_v44  ;;  %v6757_v9 = vpop.f32.mrb[65].mxu1 }
 0x755   : > { %v6758_v0 = vpop.f32.mrb[66].mxu1  ;;  %v13944_v9 = vld [vmem:[%s17556_s7 + $0x290] ss:$8 sps:$4 sm:$0xff]  }
 0x756   : > { %v6801_v2 = vadd.f32 %v16265_v7, %v6786_v8  ;;  %v6787_v3 = vadd.f32 %v6758_v0, %v6560_v17  ;;  %v6760_v4 = vpop.f32.mrb[67].mxu1 }
 0x758   : > { %v6809_v57 = vmax.f32 %v6801_v2, 0.0  ;;  %v6802_v11 = vadd.f32 %v16265_v7, %v6787_v3 }
 0x75a   : > { %v6841_v14 = vrot.slane %v6809_v57, 7  ;;  %v6873_v15 = vrot.slane %v6809_v57, 1  ;;  %v16269_v16 = vmax.f32 %v6802_v11, 0.0 }
 0x75b   : > { %v6763_v19 = vpop.f32.mrb[68].mxu1 }
 0x75c   : > { %6857 = vst [vmem:[#allocation4 + $0x18] sm:$0xfe] %v6841_v14  ;;  %6889 = vst [vmem:[#allocation4 + $0x28] sm:$0x7f] %v6873_v15  ;;  %v6842_v20 = vrot.slane %v16269_v16, 7  ;;  %v6874_v59 = vrot.slane %v16269_v16, 1  ;;  %v6788_v21 = vadd.f32 %v6763_v19, %v6565_v46 }
 0x75d   : > { %v6765_v22 = vpop.f32.mrb[69].mxu1  ;;  %v13947_v14 = vld [vmem:[%s17556_s7 + $0x2a0] ss:$8 sps:$4 sm:$0xff]   ;;  %v13952_v19 = vld [vmem:[%s17556_s7 + $0x2b4] ss:$8 sps:$4 sm:$0xff]  }
 0x75e   : > { %v6766_v23 = vpop.f32.mrb[70].mxu1  ;;  %6858 = vst [vmem:[#allocation4 + $0x30] sm:$0xfe] %v6842_v20  ;;  %6890 = vst [vmem:[#allocation4 + $0x40] sm:$0x7f] %v6874_v59  ;;  %v6803_v24 = vadd.f32 %v16265_v7, %v6788_v21 }
 0x75f   : > { %v6789_v26 = vadd.f32 %v6766_v23, %v6568_v63  ;;  %v6768_v13 = vpop.f32.mrb[71].mxu1  ;;  %v13950_v59 = vld [vmem:[%s17556_s7 + $0x2b0] ss:$8 sps:$4 sm:$0xff]   ;;  %v13955_v21 = vld [vmem:[%s17556_s7 + $0x2c4] ss:$8 sps:$4 sm:$0xff]  }
 0x760   : > { %v6811_v25 = vmax.f32 %v6803_v24, 0.0  ;;  %v13953_v22 = vld [vmem:[%s17556_s7 + $0x2c0] ss:$8 sps:$4 sm:$0xff]   ;;  %v13958_v13 = vld [vmem:[%s17556_s7 + $0x2d4] ss:$8 sps:$4 sm:$0xff]  }
 0x761   : > { %v6804_v28 = vadd.f32 %v16265_v7, %v6789_v26 }
 0x762   : > { %v6843_v27 = vrot.slane %v6811_v25, 7  ;;  %v6875_v29 = vrot.slane %v6811_v25, 1  ;;  %v6984_v32 = vpack.c.bf16 %v6811_v25, %v6809_v57  ;;  %v13956_v25 = vld [vmem:[%s17556_s7 + $0x2d0] ss:$8 sps:$4 sm:$0xff]  }
 0x763   : > { %v16275_v10 = vmax.f32 %v6804_v28, 0.0  ;;  %v6771_v1 = vpop.f32.mrb[72].mxu1  ;;  %v6971_v38 = vld [vmem:[#allocation4 + $0x18] sm:$0xff]  ;;  %v13961_v28 = vld [vmem:[%s17556_s7 + $0x2e4] ss:$8 sps:$4 sm:$0xff]  }
 0x764   : > { %6859 = vst [vmem:[#allocation4 + $0x48] sm:$0xfe] %v6843_v27  ;;  %6891 = vst [vmem:[#allocation4 + $0x58] sm:$0x7f] %v6875_v29  ;;  %v6790_v35 = vadd.f32 %v6771_v1, %v6573_v55  ;;  %v6773_v48 = vpop.f32.mrb[73].mxu1  ;;  %7310 = vmatprep.mubr.bf16.mxu1 %v6984_v32 }
 0x765   : > { %v6844_v33 = vrot.slane %v16275_v10, 7  ;;  %v6876_v34 = vrot.slane %v16275_v10, 1  ;;  %v7744_v49 = vpack.c.bf16 %v16275_v10, %v16269_v16  ;;  %v6774_v37 = vpop.f32.mrb[74].mxu1  ;;  %v13946_v55 = vld [vmem:[%s17556_s7 + $0x294] ss:$8 sps:$4 sm:$0xff]   ;;  %v16300_v41 = vld [vmem:[#allocation4 + $0x40] sm:$0xff] }
 0x766   : > { %v6805_v39 = vadd.f32 %v16265_v7, %v6790_v35  ;;  %v6791_v30 = vadd.f32 %v6774_v37, %v6576_v51  ;;  %v6776_v31 = vpop.f32.mrb[75].mxu1  ;;  %v16294_v56 = vld [vmem:[#allocation4 + $0x30] sm:$0xff]  ;;  %v13959_v27 = vld [vmem:[%s17556_s7 + $0x2e0] ss:$8 sps:$4 sm:$0xff]   ;;  %v13967_v1 = vld [vmem:[%s17556_s7 + $0x4] ss:$8 sps:$4 sm:$0xff]  }
 0x767   : > { %6860 = vst [vmem:[#allocation4 + $0x60] sm:$0xfe] %v6844_v33  ;;  %6892 = vst [vmem:[#allocation4 + $0x70] sm:$0x7f] %v6876_v34  ;;  %v13964_v29 = vld [vmem:[%s17556_s7 + $0x2f4] ss:$8 sps:$4 sm:$0xff]  }
 0x768   : > { %v6813_v42 = vmax.f32 %v6805_v39, 0.0  ;;  %v6806_v43 = vadd.f32 %v16265_v7, %v6791_v30  ;;  %v13962_v32 = vld [vmem:[%s17556_s7 + $0x2f0] ss:$8 sps:$4 sm:$0xff]   ;;  %v6973_v34 = vld [vmem:[#allocation4 + $0x28] sm:$0xff]  ;;  %v13970_v37 = vld [vmem:[%s17556_s7 + $0x14] ss:$8 sps:$4 sm:$0xff]  }
 0x769   : > { %v13965_v35 = vld [vmem:[%s17556_s7] ss:$8 sps:$4 sm:$0xff]   ;;  %v13968_v39 = vld [vmem:[%s17556_s7 + $0x10] ss:$8 sps:$4 sm:$0xff]   ;;  %v13973_v30 = vld [vmem:[%s17556_s7 + $0x24] ss:$8 sps:$4 sm:$0xff]  }
 0x76a   : > { %v6845_v44 = vrot.slane %v6813_v42, 7  ;;  %v6877_v45 = vrot.slane %v6813_v42, 1  ;;  %v16283_v12 = vmax.f32 %v6806_v43, 0.0  ;;  %v13971_v43 = vld [vmem:[%s17556_s7 + $0x20] ss:$8 sps:$4 sm:$0xff]  }
 0x76b   : > { %v6779_v17 = vpop.f32.mrb[76].mxu1  ;;  %v6974_v46 = vld [vmem:[#allocation4 + $0x48] sm:$0xff]  ;;  %v6976_v33 = vld [vmem:[#allocation4 + $0x58] sm:$0xff] }
 0x76c   : > { %6861 = vst [vmem:[#allocation4 + $0x78] sm:$0xfe] %v6845_v44  ;;  %6893 = vst [vmem:[#allocation4 + $0x88] sm:$0x7f] %v6877_v45  ;;  %v6846_v47 = vrot.slane %v16283_v12, 7  ;;  %v6878_v62 = vrot.slane %v16283_v12, 1  ;;  %v6792_v63 = vadd.f32 %v6779_v17, %v16258_v58  ;;  %v6983_v54 = vpack.c.bf16 %v6974_v46, %v6971_v38 }
 0x76d   : > { %v6781_v53 = vpop.f32.mrb[77].mxu1  ;;  %v6921_v51 = vpack.c.bf16 %v16283_v12, %v16275_v10  ;;  %v6985_v48 = vpack.c.bf16 %v6976_v33, %v6973_v34  ;;  %v13976_v45 = vld [vmem:[%s17556_s7 + $0x34] ss:$8 sps:$4 sm:$0xff]   ;;  %v16379_v17 = vld [vmem:[#allocation3] sm:$0xff]  ;;  %v13974_v38 = vld [vmem:[%s17556_s7 + $0x30] ss:$8 sps:$4 sm:$0xff]  }
 0x76e   : > { %v6782_v50 = vpop.f32.mrb[78].mxu1  ;;  %v16298_v40 = vld [vmem:[#allocation4 + $0x60] sm:$0xff]  ;;  %v16302_v60 = vld [vmem:[#allocation4 + $0x70] sm:$0xff]  ;;  %6862 = vst [vmem:[#allocation4 + $0x90] sm:$0xfe] %v6846_v47  ;;  %v6807_v58 = vadd.f32 %v16265_v7, %v6792_v63  ;;  %7311 = vmatmul.mubr.bf16.vlgmr.msra.gmra.mrb[80].mxu1 %v6983_v54  ;;  %v14111_v33 = vld [vmem:[%s17558_s9 + $0x2c8] sm:$0xff]  }
 0x76f   : > { %6894 = vst [vmem:[#allocation4 + $0xa0] sm:$0x7f] %v6878_v62  ;;  %v6793_v61 = vadd.f32 %v6782_v50, %v16260_v5  ;;  %v6784_v6 = vpop.f32.mrb[79].mxu1  ;;  %v7743_v18 = vpack.c.bf16 %v16298_v40, %v16294_v56  ;;  %v7745_v8 = vpack.c.bf16 %v16302_v60, %v16300_v41  ;;  %7332 = vmatpush1.bf16.msra.mxu1 %v13941_v36  ;;  %v13949_v5 = vld [vmem:[%s17556_s7 + $0x2a4] ss:$8 sps:$4 sm:$0xff]  }
 0x770   : > { %v6815_v0 = vmax.f32 %v6807_v58, 0.0  ;;  %7333 = vmatprep.subr.bf16.mxu1 %v13946_v55  ;;  %v6918_v36 = vpack.c.bf16 %v16269_v16, %v16379_v17  ;;  %v13979_v46 = vld [vmem:[%s17556_s7 + $0x44] ss:$8 sps:$4 sm:$0xff]   ;;  %v13977_v47 = vld [vmem:[%s17556_s7 + $0x40] ss:$8 sps:$4 sm:$0xff]  }
 0x771   : > { %v6808_v2 = vadd.f32 %v16265_v7, %v6793_v61  ;;  %v13982_v62 = vld [vmem:[%s17556_s7 + $0x54] ss:$8 sps:$4 sm:$0xff]   ;;  %v13980_v63 = vld [vmem:[%s17556_s7 + $0x50] ss:$8 sps:$4 sm:$0xff]   ;;  %v13985_v53 = vld [vmem:[%s17556_s7 + $0x64] ss:$8 sps:$4 sm:$0xff]  }
 0x772   : > { %v6847_v3 = vrot.slane %v6815_v0, 7  ;;  %v6879_v4 = vrot.slane %v6815_v0, 1  ;;  %v6987_v11 = vpack.c.bf16 %v6815_v0, %v6813_v42  ;;  %v13983_v54 = vld [vmem:[%s17556_s7 + $0x60] ss:$8 sps:$4 sm:$0xff]   ;;  %v13988_v55 = vld [vmem:[%s17556_s7 + $0x74] ss:$8 sps:$4 sm:$0xff]  }
 0x773   : > { %v16317_v57 = vmax.f32 %v6808_v2, 0.0  ;;  %7334 = vmatpush1.bf16.msra.mxu1 %v13944_v9  ;;  %v6977_v23 = vld [vmem:[#allocation4 + $0x78] sm:$0xff]  ;;  %v6979_v42 = vld [vmem:[#allocation4 + $0x88] sm:$0xff] }
 0x774   : > { %6863 = vst [vmem:[#allocation4 + $0xa8] sm:$0xfe] %v6847_v3  ;;  %6895 = vst [vmem:[#allocation4 + $0xb8] sm:$0x7f] %v6879_v4  ;;  %7335 = vmatprep.subr.bf16.mxu1 %v13949_v5  ;;  %7320 = vmatprep.mubr.bf16.mxu1 %v6987_v11  ;;  %v13986_v50 = vld [vmem:[%s17556_s7 + $0x70] ss:$8 sps:$4 sm:$0xff]  }
 0x775   : > { %v6848_v15 = vrot.slane %v16317_v57, 7  ;;  %v6880_v7 = vrot.slane %v16317_v57, 1  ;;  %v7747_v20 = vpack.c.bf16 %v16317_v57, %v16283_v12  ;;  %v13991_v58 = vld [vmem:[%s17556_s7 + $0x84] ss:$8 sps:$4 sm:$0xff]   ;;  %v13989_v61 = vld [vmem:[%s17556_s7 + $0x80] ss:$8 sps:$4 sm:$0xff]  }
 0x776   : > { %v13994_v6 = vld [vmem:[%s17556_s7 + $0x94] ss:$8 sps:$4 sm:$0xff]   ;;  %v13992_v9 = vld [vmem:[%s17556_s7 + $0x90] ss:$8 sps:$4 sm:$0xff]   ;;  %v13997_v0 = vld [vmem:[%s17556_s7 + $0xa4] ss:$8 sps:$4 sm:$0xff]  }
 0x777   : > { %6864 = vst [vmem:[#allocation4 + $0xc0] sm:$0xfe] %v6848_v15  ;;  %6896 = vst [vmem:[#allocation4 + $0xd0] sm:$0x7f] %v6880_v7  ;;  %7336 = vmatpush1.bf16.msra.mxu1 %v13947_v14  ;;  %v13995_v2 = vld [vmem:[%s17556_s7 + $0xa0] ss:$8 sps:$4 sm:$0xff]  }
 0x778   : > { %7337 = vmatprep.subr.bf16.mxu1 %v13952_v19  ;;  %v14000_v5 = vld [vmem:[%s17556_s7 + $0xb4] ss:$8 sps:$4 sm:$0xff]   ;;  %v13998_v3 = vld [vmem:[%s17556_s7 + $0xb0] ss:$8 sps:$4 sm:$0xff]   ;;  %v14003_v4 = vld [vmem:[%s17556_s7 + $0xc4] ss:$8 sps:$4 sm:$0xff]  }
 0x779   : > { %v14001_v11 = vld [vmem:[%s17556_s7 + $0xc0] ss:$8 sps:$4 sm:$0xff]   ;;  %v14006_v14 = vld [vmem:[%s17556_s7 + $0xd4] ss:$8 sps:$4 sm:$0xff]   ;;  %v14004_v15 = vld [vmem:[%s17556_s7 + $0xd0] ss:$8 sps:$4 sm:$0xff]  }
 0x77a   : > { %v14009_v7 = vld [vmem:[%s17556_s7 + $0xe4] ss:$8 sps:$4 sm:$0xff]   ;;  %v14007_v19 = vld [vmem:[%s17556_s7 + $0xe0] ss:$8 sps:$4 sm:$0xff]   ;;  %v14022_v34 = vld [vmem:[%s17556_s7 + $0x130] ss:$8 sps:$4 sm:$0xff]  }
 0x77b   : > { %7338 = vmatpush1.bf16.msra.mxu1 %v13950_v59  ;;  %v6980_v24 = vld [vmem:[#allocation4 + $0xa8] sm:$0xff]  ;;  %v6982_v31 = vld [vmem:[#allocation4 + $0xb8] sm:$0xff] }
 0x77c   : > { %7339 = vmatprep.subr.bf16.mxu1 %v13955_v21  ;;  %v6986_v26 = vpack.c.bf16 %v6980_v24, %v6977_v23  ;;  %v6988_v44 = vpack.c.bf16 %v6982_v31, %v6979_v42  ;;  %v14012_v59 = vld [vmem:[%s17556_s7 + $0xf4] ss:$8 sps:$4 sm:$0xff]   ;;  %v14010_v21 = vld [vmem:[%s17556_s7 + $0xf0] ss:$8 sps:$4 sm:$0xff]   ;;  %v14013_v23 = vld [vmem:[%s17556_s7 + $0x100] ss:$8 sps:$4 sm:$0xff]   ;;  %v6917_v24 = vpack.c.bf16 %v16294_v56, %v16379_v17 }
 0x77d   : > { %v14114_v31 = vld [vmem:[%s17558_s9 + $0x290] sm:$0xff]   ;;  %v14117_v42 = vld [vmem:[%s17558_s9 + $0x2d8] sm:$0xff]   ;;  %v14091_v56 = vld [vmem:[%s17556_s7 + $0x420] ss:$8 sps:$4 sm:$0xff]  }
 0x77e   : > { %7321 = vmatmul.mubr.bf16.gmra.mrb[84].mxu1 %v6986_v26  ;;  %v14018_v26 = vld [vmem:[%s17556_s7 + $0x114] ss:$8 sps:$4 sm:$0xff]   ;;  %v14052_v10 = vld [vmem:[%s17556_s7 + $0x350] ss:$8 sps:$4 sm:$0xff]   ;;  %v14099_v57 = vld [vmem:[%s17556_s7 + $0x444] ss:$8 sps:$4 sm:$0xff]  }
 0x77f   : > { %7340 = vmatpush1.bf16.msra.mxu1 %v13953_v22  ;;  %7363 = vmatprep.mubr.bf16.mxu1 %v14436_v52  ;;  %v14015_v22 = vld [vmem:[%s17556_s7 + $0x104] ss:$8 sps:$4 sm:$0xff]   ;;  %v14054_v16 = vld [vmem:[%s17556_s7 + $0x354] ss:$8 sps:$4 sm:$0xff]  }
 0x780   : > { %7341 = vmatprep.subr.bf16.mxu1 %v13958_v13  ;;  %v14016_v13 = vld [vmem:[%s17556_s7 + $0x110] ss:$8 sps:$4 sm:$0xff]   ;;  %v14096_v12 = vld [vmem:[%s17556_s7 + $0x434] ss:$8 sps:$4 sm:$0xff]  }
 0x783   : > { %7342 = vmatpush1.bf16.msra.mxu1 %v13956_v25  ;;  %v14021_v25 = vld [vmem:[%s17556_s7 + $0x124] ss:$8 sps:$4 sm:$0xff]  }
 0x784   : > { %7343 = vmatprep.subr.bf16.mxu1 %v13961_v28  ;;  %v16478_v28 = vld [vmem:[#allocation4 + $0x90] sm:$0xff] }
 0x787   : > { %7344 = vmatpush1.bf16.msra.mxu1 %v13959_v27  ;;  %v14019_v27 = vld [vmem:[%s17556_s7 + $0x120] ss:$8 sps:$4 sm:$0xff]  }
 0x788   : > { %7345 = vmatprep.subr.bf16.mxu1 %v13964_v29  ;;  %v14024_v29 = vld [vmem:[%s17556_s7 + $0x134] ss:$8 sps:$4 sm:$0xff]  }
 0x78b   : > { %7346 = vmatpush1.bf16.msra.mxu1 %v13962_v32  ;;  %v14109_v32 = vld [vmem:[%s17558_s9 + $0x2c0] sm:$0xff]  }
 0x78c   : > { %7624 = vmatprep.subr.bf16.mxu1 %v13967_v1  ;;  %v14110_v1 = vld [vmem:[%s17558_s9 + $0x280] sm:$0xff]   ;;  %12557 = vmatprep.subr.bf16.mxu0 %v14109_v32 }
 0x78d   : > { %12558 = vmatpush3.bf16.msra.mxu0 %v14110_v1  ;;  %v14085_v32 = vld [vmem:[%s17556_s7 + $0x400] ss:$8 sps:$4 sm:$0xff]   ;;  %v14090_v1 = vld [vmem:[%s17556_s7 + $0x414] ss:$8 sps:$4 sm:$0xff]  }
 0x78e   : > { %7364 = vmatmul.mubr.bf16.vlgmr.msra.gmra.mrb[80].mxu1 %v6985_v48  ;;  %v14112_v48 = vld [vmem:[%s17558_s9 + $0x288] sm:$0xff]   ;;  %12559 = vmatprep.subr.bf16.mxu0 %v14111_v33  ;;  %v14088_v33 = vld [vmem:[%s17556_s7 + $0x410] ss:$8 sps:$4 sm:$0xff]  }
 0x78f   : > { %7625 = vmatpush1.bf16.msra.mxu1 %v13965_v35  ;;  %7373 = vmatprep.mubr.bf16.mxu1 %v14436_v52  ;;  %v14027_v35 = vld [vmem:[%s17556_s7 + $0x144] ss:$8 sps:$4 sm:$0xff]  }
 0x790   : > { %7626 = vmatprep.subr.bf16.mxu1 %v13970_v37  ;;  %v14113_v37 = vld [vmem:[%s17558_s9 + $0x2d0] sm:$0xff]  }
 0x791   : > { %12560 = vmatpush3.bf16.msra.mxu0 %v14112_v48  ;;  %v14100_v48 = vld [vmem:[%s17556_s7 + $0x450] ss:$8 sps:$4 sm:$0xff]  }
 0x792   : > { %12561 = vmatprep.subr.bf16.mxu0 %v14113_v37  ;;  %v14105_v37 = vld [vmem:[%s17556_s7 + $0x464] ss:$8 sps:$4 sm:$0xff]  }
 0x793   : > { %7627 = vmatpush1.bf16.msra.mxu1 %v13968_v39  ;;  %v14025_v39 = vld [vmem:[%s17556_s7 + $0x140] ss:$8 sps:$4 sm:$0xff]  }
 0x794   : > { %7628 = vmatprep.subr.bf16.mxu1 %v13973_v30  ;;  %v14030_v30 = vld [vmem:[%s17556_s7 + $0x154] ss:$8 sps:$4 sm:$0xff]  }
 0x795   : > { %12562 = vmatpush3.bf16.msra.mxu0 %v14114_v31  ;;  %v14106_v31 = vld [vmem:[%s17556_s7 + $0x470] ss:$8 sps:$4 sm:$0xff]  }
 0x796   : > { %7374 = vmatmul.mubr.bf16.gmra.mrb[84].mxu1 %v6988_v44  ;;  %v14033_v44 = vld [vmem:[%s17556_s7 + $0x164] ss:$8 sps:$4 sm:$0xff]   ;;  %12563 = vmatprep.subr.bf16.mxu0 %v14117_v42 }
 0x797   : > { %7629 = vmatpush1.bf16.msra.mxu1 %v13971_v43  ;;  %7656 = vmatprep.mubr.bf16.mxu1 %v6918_v36  ;;  %v14028_v43 = vld [vmem:[%s17556_s7 + $0x150] ss:$8 sps:$4 sm:$0xff]   ;;  %v14031_v36 = vld [vmem:[%s17556_s7 + $0x160] ss:$8 sps:$4 sm:$0xff]  }
 0x798   : > { %7630 = vmatprep.subr.bf16.mxu1 %v13976_v45  ;;  %v14119_v45 = vld [vmem:[%s17558_s9 + $0x298] sm:$0xff]   ;;  %v14115_v42 = vld [vmem:[%s17558_s9 + $0x40] sm:$0xff]  }
 0x799   : > { %12564 = vmatpush3.bf16.msra.mxu0 %v14119_v45  ;;  %v14120_v45 = vld [vmem:[%s17558_s9 + $0x8] sm:$0xff]  }
 0x79b   : > { %7631 = vmatpush1.bf16.msra.mxu1 %v13974_v38  ;;  %v14036_v38 = vld [vmem:[%s17556_s7 + $0x174] ss:$8 sps:$4 sm:$0xff]  }
 0x79c   : > { %7632 = vmatprep.subr.bf16.mxu1 %v13979_v46  ;;  %v14034_v46 = vld [vmem:[%s17556_s7 + $0x170] ss:$8 sps:$4 sm:$0xff]  }
 0x79f   : > { %7633 = vmatpush1.bf16.msra.mxu1 %v13977_v47  ;;  %v14039_v47 = vld [vmem:[%s17556_s7 + $0x304] ss:$8 sps:$4 sm:$0xff]  }
 0x7a0   : > { %7634 = vmatprep.subr.bf16.mxu1 %v13982_v62  ;;  %v14037_v62 = vld [vmem:[%s17556_s7 + $0x300] ss:$8 sps:$4 sm:$0xff]  }
 0x7a3   : > { %7635 = vmatpush1.bf16.msra.mxu1 %v13980_v63  ;;  %v6919_v63 = vpack.c.bf16 %v16300_v41, %v16379_v17  ;;  %v14043_v17 = vld [vmem:[%s17556_s7 + $0x320] ss:$8 sps:$4 sm:$0xff]  }
 0x7a4   : > { %7636 = vmatprep.subr.bf16.mxu1 %v13985_v53  ;;  %v14042_v53 = vld [vmem:[%s17556_s7 + $0x314] ss:$8 sps:$4 sm:$0xff]  }
 0x7a7   : > { %7637 = vmatpush1.bf16.msra.mxu1 %v13983_v54  ;;  %v14040_v54 = vld [vmem:[%s17556_s7 + $0x310] ss:$8 sps:$4 sm:$0xff]  }
 0x7a8   : > { %7638 = vmatprep.subr.bf16.mxu1 %v13988_v55  ;;  %v14045_v55 = vld [vmem:[%s17556_s7 + $0x324] ss:$8 sps:$4 sm:$0xff]  }
 0x7ab   : > { %7639 = vmatpush1.bf16.msra.mxu1 %v13986_v50  ;;  %v16558_v50 = vld [vmem:[#allocation4 + $0xa0] sm:$0xff] }
 0x7ac   : > { %7640 = vmatprep.subr.bf16.mxu1 %v13991_v58  ;;  %v6922_v58 = vpack.c.bf16 %v16558_v50, %v16302_v60  ;;  %v14124_v60 = vld [vmem:[%s17558_s9 + $0x18] sm:$0xff]  }
 0x7af   : > { %7641 = vmatpush1.bf16.msra.mxu1 %v13989_v61  ;;  %v14048_v61 = vld [vmem:[%s17556_s7 + $0x334] ss:$8 sps:$4 sm:$0xff]  }
 0x7b0   : > { %7642 = vmatprep.subr.bf16.mxu1 %v13994_v6  ;;  %v14046_v6 = vld [vmem:[%s17556_s7 + $0x330] ss:$8 sps:$4 sm:$0xff]  }
 0x7b3   : > { %7643 = vmatpush1.bf16.msra.mxu1 %v13992_v9  ;;  %v14051_v9 = vld [vmem:[%s17556_s7 + $0x344] ss:$8 sps:$4 sm:$0xff]  }
 0x7b4   : > { %7644 = vmatprep.subr.bf16.mxu1 %v13997_v0  ;;  %v14049_v0 = vld [vmem:[%s17556_s7 + $0x340] ss:$8 sps:$4 sm:$0xff]  }
 0x7b7   : > { %7645 = vmatpush1.bf16.msra.mxu1 %v13995_v2  ;;  %v14055_v2 = vld [vmem:[%s17556_s7 + $0x360] ss:$8 sps:$4 sm:$0xff]  }
 0x7b8   : > { %7646 = vmatprep.subr.bf16.mxu1 %v14000_v5  ;;  %v14060_v5 = vld [vmem:[%s17556_s7 + $0x374] ss:$8 sps:$4 sm:$0xff]  }
 0x7bb   : > { %7647 = vmatpush1.bf16.msra.mxu1 %v13998_v3  ;;  %v14058_v3 = vld [vmem:[%s17556_s7 + $0x370] ss:$8 sps:$4 sm:$0xff]  }
 0x7bc   : > { %7648 = vmatprep.subr.bf16.mxu1 %v14003_v4  ;;  %v14063_v4 = vld [vmem:[%s17556_s7 + $0x384] ss:$8 sps:$4 sm:$0xff]  }
 0x7bf   : > { %7649 = vmatpush1.bf16.msra.mxu1 %v14001_v11  ;;  %v14061_v11 = vld [vmem:[%s17556_s7 + $0x380] ss:$8 sps:$4 sm:$0xff]  }
 0x7c0   : > { %7650 = vmatprep.subr.bf16.mxu1 %v14006_v14  ;;  %v14066_v14 = vld [vmem:[%s17556_s7 + $0x394] ss:$8 sps:$4 sm:$0xff]  }
 0x7c3   : > { %7651 = vmatpush1.bf16.msra.mxu1 %v14004_v15  ;;  %v14064_v15 = vld [vmem:[%s17556_s7 + $0x390] ss:$8 sps:$4 sm:$0xff]  }
 0x7c4   : > { %7652 = vmatprep.subr.bf16.mxu1 %v14009_v7  ;;  %v14069_v7 = vld [vmem:[%s17556_s7 + $0x3a4] ss:$8 sps:$4 sm:$0xff]  }
 0x7c7   : > { %7653 = vmatpush1.bf16.msra.mxu1 %v14007_v19  ;;  %v14067_v19 = vld [vmem:[%s17556_s7 + $0x3a0] ss:$8 sps:$4 sm:$0xff]  }
 0x7c8   : > { %7654 = vmatprep.subr.bf16.mxu1 %v14012_v59  ;;  %v14072_v59 = vld [vmem:[%s17556_s7 + $0x3b4] ss:$8 sps:$4 sm:$0xff]  }
 0x7cb   : > { %7655 = vmatpush1.bf16.msra.mxu1 %v14010_v21  ;;  %v14070_v21 = vld [vmem:[%s17556_s7 + $0x3b0] ss:$8 sps:$4 sm:$0xff]  }
 0x7cc   : > { %7677 = vmatprep.subr.bf16.mxu1 %v14015_v22  ;;  %v14075_v22 = vld [vmem:[%s17556_s7 + $0x3c4] ss:$8 sps:$4 sm:$0xff]  }
 0x7ce   : > { %7657 = vmatmul.mubr.bf16.vlgmr.msra.gmra.mrb[80].mxu1 %v6917_v24  ;;  %v14078_v24 = vld [vmem:[%s17556_s7 + $0x3d4] ss:$8 sps:$4 sm:$0xff]  }
 0x7cf   : > { %7666 = vmatprep.mubr.bf16.mxu1 %v6921_v51  ;;  %7678 = vmatpush1.bf16.msra.mxu1 %v14013_v23  ;;  %v6920_v51 = vpack.c.bf16 %v16478_v28, %v16298_v40  ;;  %v14073_v23 = vld [vmem:[%s17556_s7 + $0x3c0] ss:$8 sps:$4 sm:$0xff]  }
 0x7d0   : > { %7679 = vmatprep.subr.bf16.mxu1 %v14018_v26  ;;  %v14076_v26 = vld [vmem:[%s17556_s7 + $0x3d0] ss:$8 sps:$4 sm:$0xff]  }
 0x7d3   : > { %7680 = vmatpush1.bf16.msra.mxu1 %v14016_v13  ;;  %v14081_v13 = vld [vmem:[%s17556_s7 + $0x3e4] ss:$8 sps:$4 sm:$0xff]  }
 0x7d4   : > { %7681 = vmatprep.subr.bf16.mxu1 %v14021_v25  ;;  %v14079_v25 = vld [vmem:[%s17556_s7 + $0x3e0] ss:$8 sps:$4 sm:$0xff]  }
 0x7d6   : > { %7667 = vmatmul.mubr.bf16.gmra.mrb[84].mxu1 %v6920_v51  ;;  %v14082_v51 = vld [vmem:[%s17556_s7 + $0x3f0] ss:$8 sps:$4 sm:$0xff]  }
 0x7d7   : > { %7682 = vmatpush1.bf16.msra.mxu1 %v14019_v27  ;;  %7709 = vmatprep.mubr.bf16.mxu1 %v14436_v52  ;;  %v14084_v27 = vld [vmem:[%s17556_s7 + $0x3f4] ss:$8 sps:$4 sm:$0xff]  }
 0x7d8   : > { %7683 = vmatprep.subr.bf16.mxu1 %v14024_v29  ;;  %v14087_v29 = vld [vmem:[%s17556_s7 + $0x404] ss:$8 sps:$4 sm:$0xff]  }
 0x7db   : > { %7684 = vmatpush1.bf16.msra.mxu1 %v14022_v34  ;;  %v14093_v34 = vld [vmem:[%s17556_s7 + $0x424] ss:$8 sps:$4 sm:$0xff]  }
 0x7dc   : > { %7685 = vmatprep.subr.bf16.mxu1 %v14027_v35  ;;  %v7740_v35 = vld [vmem:[#allocation4 + $0xc0] sm:$0xff] }
 0x7dd   : > { %v7746_v40 = vpack.c.bf16 %v7740_v35, %v16478_v28  ;;  %v14102_v28 = vld [vmem:[%s17556_s7 + $0x454] ss:$8 sps:$4 sm:$0xff]  }
 0x7df   : > { %7686 = vmatpush1.bf16.msra.mxu1 %v14025_v39  ;;  %v14103_v39 = vld [vmem:[%s17556_s7 + $0x460] ss:$8 sps:$4 sm:$0xff]  }
 0x7e0   : > { %7687 = vmatprep.subr.bf16.mxu1 %v14030_v30  ;;  %v14108_v30 = vld [vmem:[%s17556_s7 + $0x474] ss:$8 sps:$4 sm:$0xff]  }
 0x7e3   : > { %7688 = vmatpush1.bf16.msra.mxu1 %v14028_v43  ;;  %v14116_v43 = vld [vmem:[%s17558_s9] sm:$0xff]  }
 0x7e4   : > { %7689 = vmatprep.subr.bf16.mxu1 %v14033_v44  ;;  %v14118_v44 = vld [vmem:[%s17558_s9 + $0x48] sm:$0xff]  }
 0x7e7   : > { %7690 = vmatpush1.bf16.msra.mxu1 %v14031_v36  ;;  %v14121_v36 = vld [vmem:[%s17558_s9 + $0x50] sm:$0xff]  }
 0x7e8   : > { %7691 = vmatprep.subr.bf16.mxu1 %v14036_v38  ;;  %v7742_v38 = vld [vmem:[#allocation4 + $0xd0] sm:$0xff] }
 0x7e9   : > { %v7748_v41 = vpack.c.bf16 %v7742_v38, %v16558_v50  ;;  %v14132_v50 = vld [vmem:[%s17558_s9 + $0x2a8] sm:$0xff]  }
 0x7ea   : > { %v14146_v38 = vld [vmem:[%s17558_s9 + $0x88] sm:$0xff]  }
 0x7eb   : > { %7692 = vmatpush1.bf16.msra.mxu1 %v14034_v46  ;;  %v14122_v46 = vld [vmem:[%s17558_s9 + $0x10] sm:$0xff]  }
 0x7ec   : > { %8038 = vmatprep.subr.bf16.mxu1 %v14039_v47  ;;  %v14126_v47 = vld [vmem:[%s17558_s9 + $0x20] sm:$0xff]  }
 0x7ee   : > { %7710 = vmatmul.mubr.bf16.vlgmr.msra.gmra.mrb[80].mxu1 %v6919_v63  ;;  %v14128_v63 = vld [vmem:[%s17558_s9 + $0x2a0] sm:$0xff]  }
 0x7ef   : > { %8039 = vmatpush1.bf16.msra.mxu1 %v14037_v62  ;;  %7719 = vmatprep.mubr.bf16.mxu1 %v14436_v52  ;;  %v14127_v62 = vld [vmem:[%s17558_s9 + $0x2e0] sm:$0xff]  }
 0x7f0   : > { %8040 = vmatprep.subr.bf16.mxu1 %v14042_v53  ;;  %12565 = vmatprep.subr.bf16.mxu0 %v14127_v62  ;;  %v14129_v53 = vld [vmem:[%s17558_s9 + $0x68] sm:$0xff]   ;;  %v14153_v62 = vld [vmem:[%s17558_s9 + $0xd8] sm:$0xff]  }
 0x7f1   : > { %12566 = vmatpush3.bf16.msra.mxu0 %v14128_v63  ;;  %v14152_v63 = vld [vmem:[%s17558_s9 + $0x390] sm:$0xff]  }
 0x7f3   : > { %8041 = vmatpush1.bf16.msra.mxu1 %v14040_v54  ;;  %v14130_v54 = vld [vmem:[%s17558_s9 + $0x28] sm:$0xff]  }
 0x7f4   : > { %8042 = vmatprep.subr.bf16.mxu1 %v14045_v55  ;;  %v14131_v55 = vld [vmem:[%s17558_s9 + $0x2e8] sm:$0xff]  }
 0x7f5   : > { %12567 = vmatprep.subr.bf16.mxu0 %v14131_v55  ;;  %v14157_v55 = vld [vmem:[%s17558_s9 + $0xe0] sm:$0xff]  }
 0x7f6   : > { %7720 = vmatmul.mubr.bf16.gmra.mrb[84].mxu1 %v6922_v58  ;;  %12568 = vmatpush3.bf16.msra.mxu0 %v14132_v50  ;;  %v14134_v58 = vld [vmem:[%s17558_s9 + $0x30] sm:$0xff]   ;;  %v14156_v50 = vld [vmem:[%s17558_s9 + $0x398] sm:$0xff]  }
 0x7f7   : > { %8043 = vmatpush1.bf16.msra.mxu1 %v14043_v17  ;;  %8070 = vmatprep.mubr.bf16.mxu1 %v7744_v49  ;;  %v14057_v49 = vld [vmem:[%s17556_s7 + $0x364] ss:$8 sps:$4 sm:$0xff]   ;;  %v14133_v17 = vld [vmem:[%s17558_s9 + $0x70] sm:$0xff]  }
 0x7f8   : > { %8044 = vmatprep.subr.bf16.mxu1 %v14048_v61  ;;  %v14135_v61 = vld [vmem:[%s17558_s9 + $0x2f0] sm:$0xff]  }
 0x7f9   : > { %12569 = vmatprep.subr.bf16.mxu0 %v14135_v61  ;;  %v14161_v61 = vld [vmem:[%s17558_s9 + $0xe8] sm:$0xff]  }
 0x7fb   : > { %8045 = vmatpush1.bf16.msra.mxu1 %v14046_v6  ;;  %v14136_v6 = vld [vmem:[%s17558_s9 + $0x2b0] sm:$0xff]  }
 0x7fc   : > { %8046 = vmatprep.subr.bf16.mxu1 %v14051_v9  ;;  %v14137_v9 = vld [vmem:[%s17558_s9 + $0x78] sm:$0xff]   ;;  %12570 = vmatpush3.bf16.msra.mxu0 %v14136_v6  ;;  %v14160_v6 = vld [vmem:[%s17558_s9 + $0x3a0] sm:$0xff]  }
 0x7ff   : > { %8047 = vmatpush1.bf16.msra.mxu1 %v14049_v0  ;;  %v14138_v0 = vld [vmem:[%s17558_s9 + $0x38] sm:$0xff]  }
 0x800   : > { %8048 = vmatprep.subr.bf16.mxu1 %v14054_v16  ;;  %v14139_v16 = vld [vmem:[%s17558_s9 + $0x2f8] sm:$0xff]  }
 0x801   : > { %12571 = vmatprep.subr.bf16.mxu0 %v14139_v16  ;;  %v14165_v16 = vld [vmem:[%s17558_s9 + $0xf0] sm:$0xff]  }
 0x803   : > { %8049 = vmatpush1.bf16.msra.mxu1 %v14052_v10  ;;  %v14140_v10 = vld [vmem:[%s17558_s9 + $0x2b8] sm:$0xff]  }
 0x804   : > { %8050 = vmatprep.subr.bf16.mxu1 %v14057_v49  ;;  %v14141_v49 = vld [vmem:[%s17558_s9 + $0xc0] sm:$0xff]   ;;  %12572 = vmatpush3.bf16.msra.mxu0 %v14140_v10  ;;  %v14164_v10 = vld [vmem:[%s17558_s9 + $0x3a8] sm:$0xff]  }
 0x807   : > { %8051 = vmatpush1.bf16.msra.mxu1 %v14055_v2  ;;  %v14143_v2 = vld [vmem:[%s17558_s9 + $0x3c0] sm:$0xff]  }
 0x808   : > { %8052 = vmatprep.subr.bf16.mxu1 %v14060_v5  ;;  %12601 = vmatprep.subr.bf16.mxu0 %v14143_v2  ;;  %v8154_v5 = vlaneseq  ;;  %v14167_v2 = vld [vmem:[%s17558_s9 + $0x3f0] sm:$0xff]  }
 0x80b   : > { %8053 = vmatpush1.bf16.msra.mxu1 %v14058_v3  ;;  %v8155_v3 = vshrl.u32 %v8154_v5, 7  ;;  %v14169_v5 = vld [vmem:[%s17558_s9 + $0xf8] sm:$0xff]  }
 0x80c   : > { %8054 = vmatprep.subr.bf16.mxu1 %v14063_v4 }
 0x80d   : > { %v16785_v4 = vsub.s32 0, %v8155_v3 }
 0x80f   : > { %8055 = vmatpush1.bf16.msra.mxu1 %v14061_v11  ;;  %v8152_v11 = vld [vmem:[%s17557_s8] sm:$0x3] }
 0x810   : > { %8056 = vmatprep.subr.bf16.mxu1 %v14066_v14  ;;  %v16790_v14 = vsub.s32 1, %v8155_v3  ;;  %v14168_v3 = vld [vmem:[%s17558_s9 + $0x3b0] sm:$0xff]  }
 0x813   : > { %8057 = vmatpush1.bf16.msra.mxu1 %v14064_v15  ;;  %v8157_v15 = vrot.slane %v8152_v11, %v16785_v4 }
 0x814   : > { %8058 = vmatprep.subr.bf16.mxu1 %v14069_v7  ;;  %v8161_v7 = vrot.slane %v8152_v11, %v16790_v14 }
 0x817   : > { %8059 = vmatpush1.bf16.msra.mxu1 %v14067_v19 }
 0x818   : > { %8060 = vmatprep.subr.bf16.mxu1 %v14072_v59 }
 0x81b   : > { %8061 = vmatpush1.bf16.msra.mxu1 %v14070_v21 }
 0x81c   : > { %8062 = vmatprep.subr.bf16.mxu1 %v14075_v22 }
 0x81f   : > { %8063 = vmatpush1.bf16.msra.mxu1 %v14073_v23 }
 0x820   : > { %8064 = vmatprep.subr.bf16.mxu1 %v14078_v24 }
 0x823   : > { %8065 = vmatpush1.bf16.msra.mxu1 %v14076_v26 }
 0x824   : > { %8066 = vmatprep.subr.bf16.mxu1 %v14081_v13 }
 0x827   : > { %8067 = vmatpush1.bf16.msra.mxu1 %v14079_v25 }
 0x828   : > { %8068 = vmatprep.subr.bf16.mxu1 %v14084_v27 }
 0x82b   : > { %8069 = vmatpush1.bf16.msra.mxu1 %v14082_v51 }
 0x82c   : > { %8091 = vmatprep.subr.bf16.mxu1 %v14087_v29 }
 0x82e   : > { %8071 = vmatmul.mubr.bf16.vlgmr.msra.gmra.mrb[80].mxu1 %v7743_v18  ;;  %v14094_v18 = vld [vmem:[%s17556_s7 + $0x430] ss:$8 sps:$4 sm:$0xff]  }
 0x82f   : > { %8080 = vmatprep.mubr.bf16.mxu1 %v7747_v20  ;;  %8092 = vmatpush1.bf16.msra.mxu1 %v14085_v32  ;;  %v14097_v20 = vld [vmem:[%s17556_s7 + $0x440] ss:$8 sps:$4 sm:$0xff]  }
 0x830   : > { %8093 = vmatprep.subr.bf16.mxu1 %v14090_v1 }
 0x833   : > { %8094 = vmatpush1.bf16.msra.mxu1 %v14088_v33 }
 0x834   : > { %8095 = vmatprep.subr.bf16.mxu1 %v14093_v34 }
 0x836   : > { %8081 = vmatmul.mubr.bf16.gmra.mrb[84].mxu1 %v7746_v40 }
 0x837   : > { %8096 = vmatpush1.bf16.msra.mxu1 %v14091_v56  ;;  %8123 = vmatprep.mubr.bf16.mxu1 %v14436_v52 }
 0x838   : > { %8097 = vmatprep.subr.bf16.mxu1 %v14096_v12 }
 0x83b   : > { %8098 = vmatpush1.bf16.msra.mxu1 %v14094_v18 }
 0x83c   : > { %8099 = vmatprep.subr.bf16.mxu1 %v14099_v57 }
 0x83f   : > { %8100 = vmatpush1.bf16.msra.mxu1 %v14097_v20 }
 0x840   : > { %8101 = vmatprep.subr.bf16.mxu1 %v14102_v28 }
 0x843   : > { %8102 = vmatpush1.bf16.msra.mxu1 %v14100_v48 }
 0x844   : > { %8103 = vmatprep.subr.bf16.mxu1 %v14105_v37  ;;  %v14142_v37 = vld [vmem:[%s17558_s9 + $0x80] sm:$0xff]  }
 0x847   : > { %8104 = vmatpush1.bf16.msra.mxu1 %v14103_v39 }
 0x848   : > { %8105 = vmatprep.subr.bf16.mxu1 %v14108_v30 }
 0x84b   : > { %8106 = vmatpush1.bf16.msra.mxu1 %v14106_v31  ;;  %v14145_v31 = vld [vmem:[%s17558_s9 + $0xc8] sm:$0xff]  }
 0x84c   : > { %12447 = vmatprep.subr.bf16.mxu1 %v14115_v42 }
 0x84e   : > { %8124 = vmatmul.mubr.bf16.vlgmr.msra.gmra.mrb[80].mxu1 %v7745_v8  ;;  %v14125_v8 = vld [vmem:[%s17558_s9 + $0x60] sm:$0xff]  }
 0x84f   : > { %8133 = vmatprep.mubr.bf16.mxu1 %v14436_v52  ;;  %12448 = vmatpush3.bf16.msra.mxu1 %v14116_v43  ;;  %v14123_v52 = vld [vmem:[%s17558_s9 + $0x58] sm:$0xff]  }
 0x850   : > { %12449 = vmatprep.subr.bf16.mxu1 %v14118_v44 }
 0x853   : > { %12450 = vmatpush3.bf16.msra.mxu1 %v14120_v45 }
 0x854   : > { %12451 = vmatprep.subr.bf16.mxu1 %v14121_v36  ;;  %v14144_v36 = vld [vmem:[%s17558_s9 + $0x380] sm:$0xff]  }
 0x856   : > { %8134 = vmatmul.mubr.bf16.gmra.mrb[84].mxu1 %v7748_v41 }
 0x857   : > { %12452 = vmatpush3.bf16.msra.mxu1 %v14122_v46  ;;  %v14147_v46 = vld [vmem:[%s17558_s9 + $0x3c8] sm:$0xff]  }
 0x858   : > { %12453 = vmatprep.subr.bf16.mxu1 %v14123_v52  ;;  %v14149_v52 = vld [vmem:[%s17558_s9 + $0xd0] sm:$0xff]  }
 0x85b   : > { %12454 = vmatpush3.bf16.msra.mxu1 %v14124_v60  ;;  %v14148_v60 = vld [vmem:[%s17558_s9 + $0x388] sm:$0xff]  }
 0x85c   : > { %12455 = vmatprep.subr.bf16.mxu1 %v14125_v8  ;;  %v14150_v8 = vld [vmem:[%s17558_s9 + $0x90] sm:$0xff]  }
 0x85f   : > { %12456 = vmatpush3.bf16.msra.mxu1 %v14126_v47  ;;  %v14151_v47 = vld [vmem:[%s17558_s9 + $0x3d0] sm:$0xff]  }
 0x860   : > { %12457 = vmatprep.subr.bf16.mxu1 %v14129_v53  ;;  %v14154_v53 = vld [vmem:[%s17558_s9 + $0x98] sm:$0xff]  }
 0x863   : > { %12458 = vmatpush3.bf16.msra.mxu1 %v14130_v54  ;;  %v14155_v54 = vld [vmem:[%s17558_s9 + $0x3d8] sm:$0xff]  }
 0x864   : > { %12459 = vmatprep.subr.bf16.mxu1 %v14133_v17  ;;  %v14158_v17 = vld [vmem:[%s17558_s9 + $0xa0] sm:$0xff]  }
 0x867   : > { %12460 = vmatpush3.bf16.msra.mxu1 %v14134_v58  ;;  %v14159_v58 = vld [vmem:[%s17558_s9 + $0x3e0] sm:$0xff]  }
 0x868   : > { %12461 = vmatprep.subr.bf16.mxu1 %v14137_v9  ;;  %v14162_v9 = vld [vmem:[%s17558_s9 + $0xa8] sm:$0xff]  }
 0x86b   : > { %12462 = vmatpush3.bf16.msra.mxu1 %v14138_v0  ;;  %v14163_v0 = vld [vmem:[%s17558_s9 + $0x3e8] sm:$0xff]  }
 0x86c   : > { %12469 = vmatprep.subr.bf16.mxu1 %v14141_v49  ;;  %v14166_v49 = vld [vmem:[%s17558_s9 + $0xb0] sm:$0xff]  }
 0x921   : > { %v8125_v19 = vpop.f32.mrb[80].mxu1 }
 0x922   : > { %v8164_v59 = vadd.f32 %v8157_v15, %v8125_v19  ;;  %v8127_v21 = vpop.f32.mrb[81].mxu1 }
 0x923   : > { %v8165_v22 = vadd.f32 %v8161_v7, %v8127_v21  ;;  %v8129_v23 = vpop.f32.mrb[82].mxu1 }
 0x924   : > { %8172 = vst [vmem:[#allocation7] sm:$0xff] %v8164_v59  ;;  %v8166_v24 = vadd.f32 %v8157_v15, %v8129_v23  ;;  %v8131_v26 = vpop.f32.mrb[83].mxu1  ;;  %v14173_v59 = vld [vmem:[%s17558_s9 + $0x140] sm:$0xff]   ;;  %v14172_v23 = vld [vmem:[%s17558_s9 + $0x3b8] sm:$0xff]  }
 0x925   : > { %8173 = vst [vmem:[#allocation7 + $0x8] sm:$0xff] %v8165_v22  ;;  %v8167_v13 = vadd.f32 %v8161_v7, %v8131_v26  ;;  %v14174_v26 = vld [vmem:[%s17558_s9 + $0x100] sm:$0xff]  }
 0x926   : > { %8174 = vst [vmem:[#allocation7 + $0x10] sm:$0xff] %v8166_v24 }
 0x927   : > { %8175 = vst [vmem:[#allocation7 + $0x18] sm:$0xff] %v8167_v13 }
 0x929   : > { %v8135_v25 = vpop.f32.mrb[84].mxu1 }
 0x92a   : > { %v8168_v27 = vadd.f32 %v8157_v15, %v8135_v25  ;;  %v8137_v51 = vpop.f32.mrb[85].mxu1  ;;  %v14175_v25 = vld [vmem:[%s17558_s9 + $0x4c0] sm:$0xff]  }
 0x92b   : > { %v8169_v29 = vadd.f32 %v8161_v7, %v8137_v51  ;;  %v8139_v32 = vpop.f32.mrb[86].mxu1  ;;  %v14177_v51 = vld [vmem:[%s17558_s9 + $0x148] sm:$0xff]  }
 0x92c   : > { %8176 = vst [vmem:[#allocation7 + $0x20] sm:$0xff] %v8168_v27  ;;  %v8170_v1 = vadd.f32 %v8157_v15, %v8139_v32  ;;  %v8141_v33 = vpop.f32.mrb[87].mxu1  ;;  %v8180_v34 = vld [vmem:[#allocation7] ss:$8 sm:$0x3]  ;;  %v14176_v32 = vld [vmem:[%s17558_s9 + $0x480] sm:$0xff]  }
 0x92d   : > { %8177 = vst [vmem:[#allocation7 + $0x28] sm:$0xff] %v8169_v29  ;;  %v8171_v35 = vadd.f32 %v8161_v7, %v8141_v33  ;;  %v8185_v56 = vrot.slane %v8180_v34, %v16785_v4  ;;  %v8189_v40 = vrot.slane %v8180_v34, %v16790_v14  ;;  %v16796_v12 = vld [vmem:[#allocation7 + $0x2] ss:$8 sm:$0x3]  ;;  %v14178_v33 = vld [vmem:[%s17558_s9 + $0x108] sm:$0xff]  }
 0x92e   : > { %8178 = vst [vmem:[#allocation7 + $0x30] sm:$0xff] %v8170_v1  ;;  %v8204_v18 = vrot.slane %v16796_v12, %v16790_v14  ;;  %v8255_v57 = vld [vmem:[#allocation7 + $0x12] ss:$8 sm:$0x3]  ;;  %v14170_v15 = vld [vmem:[%s17558_s9 + $0xb8] sm:$0xff]   ;;  %v8200_v19 = vrot.slane %v16796_v12, %v16785_v4  ;;  %v14182_v12 = vld [vmem:[%s17558_s9 + $0x110] sm:$0xff]  }
 0x92f   : > { %v16800_v20 = vld [vmem:[#allocation7 + $0x16] ss:$8 sm:$0x3]  ;;  %8179 = vst [vmem:[#allocation7 + $0x38] sm:$0xff] %v8171_v35  ;;  %v8192_v28 = vpack.c.bf16 %v8185_v56, %v8185_v56  ;;  %v8193_v48 = vpack.c.bf16 %v8189_v40, %v8189_v40  ;;  %v8260_v39 = vrot.slane %v8255_v57, %v16785_v4  ;;  %v8264_v30 = vrot.slane %v8255_v57, %v16790_v14  ;;  %v14171_v7 = vld [vmem:[%s17558_s9 + $0x3f8] sm:$0xff]   ;;  %v14181_v56 = vld [vmem:[%s17558_s9 + $0x150] sm:$0xff]  }
 0x930   : > { %v8294_v42 = vrot.slane %v16800_v20, %v16790_v14  ;;  %v8208_v43 = vpack.c.bf16 %v8204_v18, %v8204_v18  ;;  %v16887_v11 = vld [vmem:[#allocation7 + $0x4] ss:$8 sm:$0x3]  ;;  %v8290_v24 = vrot.slane %v16800_v20, %v16785_v4  ;;  %v8207_v13 = vpack.c.bf16 %v8200_v19, %v8200_v19  ;;  %v14179_v34 = vld [vmem:[%s17558_s9 + $0x4c8] sm:$0xff]  }
 0x931   : > { %10500 = vmatprep.mubr.bf16.mxu1 %v8193_v48  ;;  %v8267_v44 = vpack.c.bf16 %v8260_v39, %v8260_v39  ;;  %v8268_v45 = vpack.c.bf16 %v8264_v30, %v8264_v30  ;;  %v8219_v21 = vrot.slane %v16887_v11, %v16790_v14  ;;  %v14180_v40 = vld [vmem:[%s17558_s9 + $0x488] sm:$0xff]   ;;  %v14183_v18 = vld [vmem:[%s17558_s9 + $0x4d0] sm:$0xff]   ;;  %v14185_v57 = vld [vmem:[%s17558_s9 + $0x158] sm:$0xff]  }
 0x932   : > { %10501 = vmatmul.mubr.bf16.vlgmr.msra.gmra.mrb[88].mxu1 %v8192_v28  ;;  %v8298_v41 = vpack.c.bf16 %v8294_v42, %v8294_v42  ;;  %v8297_v1 = vpack.c.bf16 %v8290_v24, %v8290_v24  ;;  %v14184_v20 = vld [vmem:[%s17558_s9 + $0x490] sm:$0xff]   ;;  %v14186_v28 = vld [vmem:[%s17558_s9 + $0x118] sm:$0xff]   ;;  %v14190_v30 = vld [vmem:[%s17558_s9 + $0x120] sm:$0xff]  }
 0x933   : > { %12470 = vmatpush3.bf16.msra.mxu1 %v14142_v37  ;;  %10540 = vmatprep.mubr.bf16.mxu1 %v8208_v43  ;;  %v8223_v29 = vpack.c.bf16 %v8219_v21, %v8219_v21  ;;  %v14187_v48 = vld [vmem:[%s17558_s9 + $0x4d8] sm:$0xff]   ;;  %v14189_v37 = vld [vmem:[%s17558_s9 + $0x160] sm:$0xff]   ;;  %v14193_v42 = vld [vmem:[%s17558_s9 + $0x168] sm:$0xff]  }
 0x934   : > { %10700 = vmatprep.mubr.bf16.mxu0 %v8268_v45  ;;  %12471 = vmatprep.subr.bf16.mxu1 %v14145_v31  ;;  %v16902_v22 = vld [vmem:[#allocation7 + $0x22] ss:$8 sm:$0x3]  ;;  %v14191_v31 = vld [vmem:[%s17558_s9 + $0x4e0] sm:$0xff]   ;;  %v14195_v45 = vld [vmem:[%s17558_s9 + $0x4e8] sm:$0xff]  }
 0x935   : > { %10701 = vmatmul.mubr.bf16.vlgmr.msra.gmra.mrb[128].mxu0 %v8267_v44  ;;  %v8324_v27 = vrot.slane %v16902_v22, %v16790_v14  ;;  %v14188_v39 = vld [vmem:[%s17558_s9 + $0x498] sm:$0xff]   ;;  %v14192_v43 = vld [vmem:[%s17558_s9 + $0x4a0] sm:$0xff]   ;;  %v14194_v44 = vld [vmem:[%s17558_s9 + $0x128] sm:$0xff]  }
 0x936   : > { %12602 = vmatpush3.bf16.msra.mxu0 %v14144_v36  ;;  %10780 = vmatprep.mubr.bf16.mxu0 %v8298_v41  ;;  %v14197_v36 = vld [vmem:[%s17558_s9 + $0x170] sm:$0xff]   ;;  %v14221_v24 = vld [vmem:[%s17558_s9 + $0x1e0] sm:$0xff]  }
 0x937   : > { %12472 = vmatpush3.bf16.msra.mxu1 %v14146_v38  ;;  %12603 = vmatprep.subr.bf16.mxu0 %v14147_v46  ;;  %v8328_v35 = vpack.c.bf16 %v8324_v27, %v8324_v27  ;;  %v14196_v38 = vld [vmem:[%s17558_s9 + $0x4a8] sm:$0xff]   ;;  %v14198_v46 = vld [vmem:[%s17558_s9 + $0x130] sm:$0xff]  }
 0x938   : > { %12473 = vmatprep.subr.bf16.mxu1 %v14149_v52  ;;  %v14199_v41 = vld [vmem:[%s17558_s9 + $0x4f0] sm:$0xff]   ;;  %v14201_v52 = vld [vmem:[%s17558_s9 + $0x178] sm:$0xff]   ;;  %v14225_v27 = vld [vmem:[%s17558_s9 + $0x1e8] sm:$0xff]  }
 0x939   : > { %v14215_v19 = vld [vmem:[%s17558_s9 + $0x5d0] sm:$0xff]  }
 0x93a   : > { %12604 = vmatpush3.bf16.msra.mxu0 %v14148_v60  ;;  %v14200_v60 = vld [vmem:[%s17558_s9 + $0x4b0] sm:$0xff]  }
 0x93b   : > { %12474 = vmatpush3.bf16.msra.mxu1 %v14150_v8  ;;  %12605 = vmatprep.subr.bf16.mxu0 %v14151_v47  ;;  %v16995_v8 = vld [vmem:[#allocation7 + $0x6] ss:$8 sm:$0x3] }
 0x93c   : > { %12475 = vmatprep.subr.bf16.mxu1 %v14153_v62  ;;  %v14202_v47 = vld [vmem:[%s17558_s9 + $0x138] sm:$0xff]   ;;  %v14216_v21 = vld [vmem:[%s17558_s9 + $0x590] sm:$0xff]  }
 0x93d   : > { %v14203_v62 = vld [vmem:[%s17558_s9 + $0x4f8] sm:$0xff]  }
 0x93e   : > { %12606 = vmatpush3.bf16.msra.mxu0 %v14152_v63  ;;  %v8215_v63 = vrot.slane %v16887_v11, %v16785_v4  ;;  %v14213_v11 = vld [vmem:[%s17558_s9 + $0x1d0] sm:$0xff]  }
 0x93f   : > { %12476 = vmatpush3.bf16.msra.mxu1 %v14154_v53  ;;  %12607 = vmatprep.subr.bf16.mxu0 %v14155_v54  ;;  %v14205_v53 = vld [vmem:[%s17558_s9 + $0x1c0] sm:$0xff]   ;;  %v8234_v54 = vrot.slane %v16995_v8, %v16790_v14 }
 0x940   : > { %12477 = vmatprep.subr.bf16.mxu1 %v14157_v55  ;;  %v17010_v55 = vld [vmem:[#allocation7 + $0x26] ss:$8 sm:$0x3] }
 0x942   : > { %12608 = vmatpush3.bf16.msra.mxu0 %v14156_v50  ;;  %v14204_v50 = vld [vmem:[%s17558_s9 + $0x4b8] sm:$0xff]  }
 0x943   : > { %12478 = vmatpush3.bf16.msra.mxu1 %v14158_v17  ;;  %12609 = vmatprep.subr.bf16.mxu0 %v14159_v58  ;;  %v8320_v17 = vrot.slane %v16902_v22, %v16785_v4  ;;  %v14206_v58 = vld [vmem:[%s17558_s9 + $0x180] sm:$0xff]   ;;  %v14218_v22 = vld [vmem:[%s17558_s9 + $0x198] sm:$0xff]  }
 0x944   : > { %12479 = vmatprep.subr.bf16.mxu1 %v14161_v61  ;;  %v8222_v61 = vpack.c.bf16 %v8215_v63, %v8215_v63  ;;  %v14247_v63 = vld [vmem:[%s17558_s9 + $0x6d0] sm:$0xff]  }
 0x946   : > { %12610 = vmatpush3.bf16.msra.mxu0 %v14160_v6  ;;  %v14207_v6 = vld [vmem:[%s17558_s9 + $0x5c0] sm:$0xff]  }
 0x947   : > { %12480 = vmatpush3.bf16.msra.mxu1 %v14162_v9  ;;  %12611 = vmatprep.subr.bf16.mxu0 %v14163_v0  ;;  %v8354_v9 = vrot.slane %v17010_v55, %v16790_v14  ;;  %v14209_v0 = vld [vmem:[%s17558_s9 + $0x1c8] sm:$0xff]  }
 0x948   : > { %12481 = vmatprep.subr.bf16.mxu1 %v14165_v16  ;;  %v8238_v16 = vpack.c.bf16 %v8234_v54, %v8234_v54  ;;  %v14248_v54 = vld [vmem:[%s17558_s9 + $0x690] sm:$0xff]  }
 0x94a   : > { %12612 = vmatpush3.bf16.msra.mxu0 %v14164_v10  ;;  %v14208_v10 = vld [vmem:[%s17558_s9 + $0x580] sm:$0xff]  }
 0x94b   : > { %12482 = vmatpush3.bf16.msra.mxu1 %v14166_v49  ;;  %12613 = vmatprep.subr.bf16.mxu0 %v14167_v2  ;;  %v8327_v49 = vpack.c.bf16 %v8320_v17, %v8320_v17  ;;  %v14210_v2 = vld [vmem:[%s17558_s9 + $0x188] sm:$0xff]   ;;  %v14253_v17 = vld [vmem:[%s17558_s9 + $0x260] sm:$0xff]  }
 0x94c   : > { %12483 = vmatprep.subr.bf16.mxu1 %v14169_v5  ;;  %v14211_v5 = vld [vmem:[%s17558_s9 + $0x5c8] sm:$0xff]  }
 0x94e   : > { %12614 = vmatpush3.bf16.msra.mxu0 %v14168_v3  ;;  %v8358_v3 = vpack.c.bf16 %v8354_v9, %v8354_v9  ;;  %v14257_v9 = vld [vmem:[%s17558_s9 + $0x268] sm:$0xff]  }
 0x94f   : > { %12484 = vmatpush3.bf16.msra.mxu1 %v14170_v15  ;;  %12615 = vmatprep.subr.bf16.mxu0 %v14171_v7  ;;  %v14212_v15 = vld [vmem:[%s17558_s9 + $0x588] sm:$0xff]   ;;  %v14214_v7 = vld [vmem:[%s17558_s9 + $0x190] sm:$0xff]  }
 0x950   : > { %12491 = vmatprep.subr.bf16.mxu1 %v14173_v59  ;;  %v14217_v59 = vld [vmem:[%s17558_s9 + $0x1d8] sm:$0xff]  }
 0x952   : > { %12616 = vmatpush3.bf16.msra.mxu0 %v14172_v23  ;;  %10541 = vmatmul.mubr.bf16.vlgmr.msra.gmra.mrb[92].mxu1 %v8207_v13  ;;  %v14219_v23 = vld [vmem:[%s17558_s9 + $0x5d8] sm:$0xff]   ;;  %v14222_v13 = vld [vmem:[%s17558_s9 + $0x1a0] sm:$0xff]  }
 0x953   : > { %12492 = vmatpush3.bf16.msra.mxu1 %v14174_v26  ;;  %10580 = vmatprep.mubr.bf16.mxu1 %v8223_v29  ;;  %v14220_v26 = vld [vmem:[%s17558_s9 + $0x598] sm:$0xff]   ;;  %v14226_v29 = vld [vmem:[%s17558_s9 + $0x1a8] sm:$0xff]  }
 0x954   : > { %12645 = vmatprep.subr.bf16.mxu0 %v14175_v25  ;;  %12493 = vmatprep.subr.bf16.mxu1 %v14177_v51  ;;  %v14223_v25 = vld [vmem:[%s17558_s9 + $0x5e0] sm:$0xff]  }
 0x955   : > { %10781 = vmatmul.mubr.bf16.vlgmr.msra.gmra.mrb[132].mxu0 %v8297_v1  ;;  %v14224_v51 = vld [vmem:[%s17558_s9 + $0x5a0] sm:$0xff]   ;;  %v14229_v1 = vld [vmem:[%s17558_s9 + $0x1f0] sm:$0xff]  }
 0x956   : > { %12646 = vmatpush3.bf16.msra.mxu0 %v14176_v32  ;;  %10860 = vmatprep.mubr.bf16.mxu0 %v8328_v35  ;;  %v14227_v32 = vld [vmem:[%s17558_s9 + $0x5e8] sm:$0xff]   ;;  %v14231_v35 = vld [vmem:[%s17558_s9 + $0x5f0] sm:$0xff]  }
 0x957   : > { %12494 = vmatpush3.bf16.msra.mxu1 %v14178_v33  ;;  %12647 = vmatprep.subr.bf16.mxu0 %v14179_v34  ;;  %v14228_v33 = vld [vmem:[%s17558_s9 + $0x5a8] sm:$0xff]   ;;  %v14230_v34 = vld [vmem:[%s17558_s9 + $0x1b0] sm:$0xff]  }
 0x958   : > { %12495 = vmatprep.subr.bf16.mxu1 %v14181_v56  ;;  %v14233_v56 = vld [vmem:[%s17558_s9 + $0x1f8] sm:$0xff]  }
 0x95a   : > { %12648 = vmatpush3.bf16.msra.mxu0 %v14180_v40  ;;  %v14232_v40 = vld [vmem:[%s17558_s9 + $0x5b0] sm:$0xff]  }
 0x95b   : > { %12496 = vmatpush3.bf16.msra.mxu1 %v14182_v12  ;;  %12649 = vmatprep.subr.bf16.mxu0 %v14183_v18  ;;  %v17103_v12 = vld [vmem:[#allocation7 + $0x10] ss:$8 sm:$0x3]  ;;  %v14234_v18 = vld [vmem:[%s17558_s9 + $0x1b8] sm:$0xff]  }
 0x95c   : > { %12497 = vmatprep.subr.bf16.mxu1 %v14185_v57  ;;  %v14235_v57 = vld [vmem:[%s17558_s9 + $0x5f8] sm:$0xff]  }
 0x95e   : > { %12650 = vmatpush3.bf16.msra.mxu0 %v14184_v20  ;;  %v8230_v20 = vrot.slane %v16995_v8, %v16785_v4  ;;  %v14245_v8 = vld [vmem:[%s17558_s9 + $0x250] sm:$0xff]  }
 0x95f   : > { %12498 = vmatpush3.bf16.msra.mxu1 %v14186_v28  ;;  %12651 = vmatprep.subr.bf16.mxu0 %v14187_v48  ;;  %v14237_v28 = vld [vmem:[%s17558_s9 + $0x240] sm:$0xff]   ;;  %v8249_v48 = vrot.slane %v17103_v12, %v16790_v14 }
 0x960   : > { %12499 = vmatprep.subr.bf16.mxu1 %v14189_v37  ;;  %v17118_v37 = vld [vmem:[#allocation7 + $0x32] ss:$8 sm:$0x3] }
 0x962   : > { %12652 = vmatpush3.bf16.msra.mxu0 %v14188_v39  ;;  %v14236_v39 = vld [vmem:[%s17558_s9 + $0x5b8] sm:$0xff]  }
 0x963   : > { %12500 = vmatpush3.bf16.msra.mxu1 %v14190_v30  ;;  %12653 = vmatprep.subr.bf16.mxu0 %v14191_v31  ;;  %v8350_v30 = vrot.slane %v17010_v55, %v16785_v4  ;;  %v14238_v31 = vld [vmem:[%s17558_s9 + $0x200] sm:$0xff]   ;;  %v14250_v55 = vld [vmem:[%s17558_s9 + $0x218] sm:$0xff]  }
 0x964   : > { %12501 = vmatprep.subr.bf16.mxu1 %v14193_v42  ;;  %v8237_v42 = vpack.c.bf16 %v8230_v20, %v8230_v20  ;;  %v14279_v20 = vld [vmem:[%s17558_s9 + $0x7d0] sm:$0xff]  }
 0x966   : > { %12654 = vmatpush3.bf16.msra.mxu0 %v14192_v43  ;;  %v14239_v43 = vld [vmem:[%s17558_s9 + $0x6c0] sm:$0xff]  }
 0x967   : > { %12502 = vmatpush3.bf16.msra.mxu1 %v14194_v44  ;;  %12655 = vmatprep.subr.bf16.mxu0 %v14195_v45  ;;  %v8384_v44 = vrot.slane %v17118_v37, %v16790_v14  ;;  %v14241_v45 = vld [vmem:[%s17558_s9 + $0x248] sm:$0xff]  }
 0x968   : > { %12503 = vmatprep.subr.bf16.mxu1 %v14197_v36  ;;  %v8253_v36 = vpack.c.bf16 %v8249_v48, %v8249_v48  ;;  %v14280_v48 = vld [vmem:[%s17558_s9 + $0x790] sm:$0xff]  }
 0x96a   : > { %12656 = vmatpush3.bf16.msra.mxu0 %v14196_v38  ;;  %v14240_v38 = vld [vmem:[%s17558_s9 + $0x680] sm:$0xff]  }
 0x96b   : > { %12504 = vmatpush3.bf16.msra.mxu1 %v14198_v46  ;;  %12657 = vmatprep.subr.bf16.mxu0 %v14199_v41  ;;  %v8357_v46 = vpack.c.bf16 %v8350_v30, %v8350_v30  ;;  %v14242_v41 = vld [vmem:[%s17558_s9 + $0x208] sm:$0xff]   ;;  %v14285_v30 = vld [vmem:[%s17558_s9 + $0x360] sm:$0xff]  }
 0x96c   : > { %12505 = vmatprep.subr.bf16.mxu1 %v14201_v52  ;;  %v14243_v52 = vld [vmem:[%s17558_s9 + $0x6c8] sm:$0xff]  }
 0x96e   : > { %12658 = vmatpush3.bf16.msra.mxu0 %v14200_v60  ;;  %v8388_v60 = vpack.c.bf16 %v8384_v44, %v8384_v44  ;;  %v14289_v44 = vld [vmem:[%s17558_s9 + $0x368] sm:$0xff]  }
 0x96f   : > { %12506 = vmatpush3.bf16.msra.mxu1 %v14202_v47  ;;  %12659 = vmatprep.subr.bf16.mxu0 %v14203_v62  ;;  %v14244_v47 = vld [vmem:[%s17558_s9 + $0x688] sm:$0xff]   ;;  %v14246_v62 = vld [vmem:[%s17558_s9 + $0x210] sm:$0xff]  }
 0x970   : > { %12513 = vmatprep.subr.bf16.mxu1 %v14205_v53  ;;  %v14249_v53 = vld [vmem:[%s17558_s9 + $0x258] sm:$0xff]  }
 0x972   : > { %12660 = vmatpush3.bf16.msra.mxu0 %v14204_v50  ;;  %10581 = vmatmul.mubr.bf16.vlgmr.msra.gmra.mrb[96].mxu1 %v8222_v61  ;;  %v14251_v50 = vld [vmem:[%s17558_s9 + $0x6d8] sm:$0xff]   ;;  %v14254_v61 = vld [vmem:[%s17558_s9 + $0x220] sm:$0xff]  }
 0x973   : > { %12514 = vmatpush3.bf16.msra.mxu1 %v14206_v58  ;;  %10620 = vmatprep.mubr.bf16.mxu1 %v8238_v16  ;;  %v14252_v58 = vld [vmem:[%s17558_s9 + $0x698] sm:$0xff]   ;;  %v14258_v16 = vld [vmem:[%s17558_s9 + $0x228] sm:$0xff]  }
 0x974   : > { %12689 = vmatprep.subr.bf16.mxu0 %v14207_v6  ;;  %12515 = vmatprep.subr.bf16.mxu1 %v14209_v0  ;;  %v14255_v6 = vld [vmem:[%s17558_s9 + $0x6e0] sm:$0xff]  }
 0x975   : > { %10861 = vmatmul.mubr.bf16.vlgmr.msra.gmra.mrb[136].mxu0 %v8327_v49  ;;  %v14256_v0 = vld [vmem:[%s17558_s9 + $0x6a0] sm:$0xff]   ;;  %v14261_v49 = vld [vmem:[%s17558_s9 + $0x270] sm:$0xff]  }
 0x976   : > { %12690 = vmatpush3.bf16.msra.mxu0 %v14208_v10  ;;  %10940 = vmatprep.mubr.bf16.mxu0 %v8358_v3  ;;  %v14259_v10 = vld [vmem:[%s17558_s9 + $0x6e8] sm:$0xff]   ;;  %v14263_v3 = vld [vmem:[%s17558_s9 + $0x6f0] sm:$0xff]  }
 0x977   : > { %12516 = vmatpush3.bf16.msra.mxu1 %v14210_v2  ;;  %12691 = vmatprep.subr.bf16.mxu0 %v14211_v5  ;;  %v14260_v2 = vld [vmem:[%s17558_s9 + $0x6a8] sm:$0xff]   ;;  %v14262_v5 = vld [vmem:[%s17558_s9 + $0x230] sm:$0xff]  }
 0x978   : > { %12517 = vmatprep.subr.bf16.mxu1 %v14213_v11  ;;  %v14265_v11 = vld [vmem:[%s17558_s9 + $0x278] sm:$0xff]  }
 0x97a   : > { %12692 = vmatpush3.bf16.msra.mxu0 %v14212_v15  ;;  %v14264_v15 = vld [vmem:[%s17558_s9 + $0x6b0] sm:$0xff]  }
 0x97b   : > { %12518 = vmatpush3.bf16.msra.mxu1 %v14214_v7  ;;  %12693 = vmatprep.subr.bf16.mxu0 %v14215_v19  ;;  %v17211_v7 = vld [vmem:[#allocation7 + $0x14] ss:$8 sm:$0x3]  ;;  %v14266_v19 = vld [vmem:[%s17558_s9 + $0x238] sm:$0xff]  }
 0x97c   : > { %12519 = vmatprep.subr.bf16.mxu1 %v14217_v59  ;;  %v14267_v59 = vld [vmem:[%s17558_s9 + $0x6f8] sm:$0xff]  }
 0x97e   : > { %12694 = vmatpush3.bf16.msra.mxu0 %v14216_v21  ;;  %v8245_v21 = vrot.slane %v17103_v12, %v16785_v4  ;;  %v14277_v12 = vld [vmem:[%s17558_s9 + $0x350] sm:$0xff]  }
 0x97f   : > { %12520 = vmatpush3.bf16.msra.mxu1 %v14218_v22  ;;  %12695 = vmatprep.subr.bf16.mxu0 %v14219_v23  ;;  %v14269_v22 = vld [vmem:[%s17558_s9 + $0x340] sm:$0xff]   ;;  %v8279_v23 = vrot.slane %v17211_v7, %v16790_v14 }
 0x980   : > { %12521 = vmatprep.subr.bf16.mxu1 %v14221_v24  ;;  %v17226_v24 = vld [vmem:[#allocation7 + $0x36] ss:$8 sm:$0x3] }
 0x982   : > { %12696 = vmatpush3.bf16.msra.mxu0 %v14220_v26  ;;  %v14268_v26 = vld [vmem:[%s17558_s9 + $0x6b8] sm:$0xff]  }
 0x983   : > { %12522 = vmatpush3.bf16.msra.mxu1 %v14222_v13  ;;  %12697 = vmatprep.subr.bf16.mxu0 %v14223_v25  ;;  %v8380_v13 = vrot.slane %v17118_v37, %v16785_v4  ;;  %v14270_v25 = vld [vmem:[%s17558_s9 + $0x300] sm:$0xff]   ;;  %v14282_v37 = vld [vmem:[%s17558_s9 + $0x318] sm:$0xff]  }
 0x984   : > { %12523 = vmatprep.subr.bf16.mxu1 %v14225_v27  ;;  %v8252_v27 = vpack.c.bf16 %v8245_v21, %v8245_v21  ;;  %v14314_v21 = vld [vmem:[%s17558_s9 + $0x430] sm:$0xff]  }
 0x986   : > { %12698 = vmatpush3.bf16.msra.mxu0 %v14224_v51  ;;  %v14271_v51 = vld [vmem:[%s17558_s9 + $0x7c0] sm:$0xff]  }
 0x987   : > { %12524 = vmatpush3.bf16.msra.mxu1 %v14226_v29  ;;  %12699 = vmatprep.subr.bf16.mxu0 %v14227_v32  ;;  %v8414_v29 = vrot.slane %v17226_v24, %v16790_v14  ;;  %v14273_v32 = vld [vmem:[%s17558_s9 + $0x348] sm:$0xff]  }
 0x988   : > { %12525 = vmatprep.subr.bf16.mxu1 %v14229_v1  ;;  %v8283_v1 = vpack.c.bf16 %v8279_v23, %v8279_v23  ;;  %v8330_v23 = vld [vmem:[#allocation7 + $0x24] ss:$8 sm:$0x3] }
 0x98a   : > { %12700 = vmatpush3.bf16.msra.mxu0 %v14228_v33  ;;  %v14272_v33 = vld [vmem:[%s17558_s9 + $0x780] sm:$0xff]  }
 0x98b   : > { %12526 = vmatpush3.bf16.msra.mxu1 %v14230_v34  ;;  %12701 = vmatprep.subr.bf16.mxu0 %v14231_v35  ;;  %v8387_v34 = vpack.c.bf16 %v8380_v13, %v8380_v13  ;;  %v14274_v35 = vld [vmem:[%s17558_s9 + $0x308] sm:$0xff]   ;;  %v14317_v13 = vld [vmem:[%s17558_s9 + $0x540] sm:$0xff]  }
 0x98c   : > { %12527 = vmatprep.subr.bf16.mxu1 %v14233_v56  ;;  %v14275_v56 = vld [vmem:[%s17558_s9 + $0x7c8] sm:$0xff]  }
 0x98e   : > { %12702 = vmatpush3.bf16.msra.mxu0 %v14232_v40  ;;  %v8418_v40 = vpack.c.bf16 %v8414_v29, %v8414_v29  ;;  %v14319_v29 = vld [vmem:[%s17558_s9 + $0x548] sm:$0xff]  }
 0x98f   : > { %12528 = vmatpush3.bf16.msra.mxu1 %v14234_v18  ;;  %12703 = vmatprep.subr.bf16.mxu0 %v14235_v57  ;;  %v14276_v18 = vld [vmem:[%s17558_s9 + $0x788] sm:$0xff]   ;;  %v14278_v57 = vld [vmem:[%s17558_s9 + $0x310] sm:$0xff]  }
 0x990   : > { %12535 = vmatprep.subr.bf16.mxu1 %v14237_v28  ;;  %v14281_v28 = vld [vmem:[%s17558_s9 + $0x358] sm:$0xff]  }
 0x992   : > { %12704 = vmatpush3.bf16.msra.mxu0 %v14236_v39  ;;  %10621 = vmatmul.mubr.bf16.vlgmr.msra.gmra.mrb[100].mxu1 %v8237_v42  ;;  %v14283_v39 = vld [vmem:[%s17558_s9 + $0x7d8] sm:$0xff]   ;;  %v14286_v42 = vld [vmem:[%s17558_s9 + $0x320] sm:$0xff]  }
 0x993   : > { %12536 = vmatpush3.bf16.msra.mxu1 %v14238_v31  ;;  %10660 = vmatprep.mubr.bf16.mxu1 %v8253_v36  ;;  %v14284_v31 = vld [vmem:[%s17558_s9 + $0x798] sm:$0xff]   ;;  %v14290_v36 = vld [vmem:[%s17558_s9 + $0x328] sm:$0xff]  }
 0x994   : > { %12733 = vmatprep.subr.bf16.mxu0 %v14239_v43  ;;  %12537 = vmatprep.subr.bf16.mxu1 %v14241_v45  ;;  %v14287_v43 = vld [vmem:[%s17558_s9 + $0x7e0] sm:$0xff]  }
 0x995   : > { %10941 = vmatmul.mubr.bf16.vlgmr.msra.gmra.mrb[140].mxu0 %v8357_v46  ;;  %v14288_v45 = vld [vmem:[%s17558_s9 + $0x7a0] sm:$0xff]   ;;  %v14293_v46 = vld [vmem:[%s17558_s9 + $0x370] sm:$0xff]  }
 0x996   : > { %12734 = vmatpush3.bf16.msra.mxu0 %v14240_v38  ;;  %11020 = vmatprep.mubr.bf16.mxu0 %v8388_v60  ;;  %v14291_v38 = vld [vmem:[%s17558_s9 + $0x7e8] sm:$0xff]   ;;  %v14295_v60 = vld [vmem:[%s17558_s9 + $0x7f0] sm:$0xff]  }
 0x997   : > { %12538 = vmatpush3.bf16.msra.mxu1 %v14242_v41  ;;  %12735 = vmatprep.subr.bf16.mxu0 %v14243_v52  ;;  %v14292_v41 = vld [vmem:[%s17558_s9 + $0x7a8] sm:$0xff]   ;;  %v14294_v52 = vld [vmem:[%s17558_s9 + $0x330] sm:$0xff]  }
 0x998   : > { %12539 = vmatprep.subr.bf16.mxu1 %v14245_v8  ;;  %v14297_v8 = vld [vmem:[%s17558_s9 + $0x378] sm:$0xff]  }
 0x99a   : > { %12736 = vmatpush3.bf16.msra.mxu0 %v14244_v47  ;;  %v14296_v47 = vld [vmem:[%s17558_s9 + $0x7b0] sm:$0xff]  }
 0x99b   : > { %12540 = vmatpush3.bf16.msra.mxu1 %v14246_v62  ;;  %12737 = vmatprep.subr.bf16.mxu0 %v14247_v63  ;;  %v8300_v62 = vld [vmem:[#allocation7 + $0x20] ss:$8 sm:$0x3] }
 0x99c   : > { %12541 = vmatprep.subr.bf16.mxu1 %v14249_v53  ;;  %v14298_v63 = vld [vmem:[%s17558_s9 + $0x338] sm:$0xff]  }
 0x99d   : > { %v14299_v53 = vld [vmem:[%s17558_s9 + $0x7f8] sm:$0xff]  }
 0x99e   : > { %12738 = vmatpush3.bf16.msra.mxu0 %v14248_v54  ;;  %v8275_v54 = vrot.slane %v17211_v7, %v16785_v4  ;;  %v14311_v7 = vld [vmem:[%s17558_s9 + $0x468] sm:$0xff]  }
 0x99f   : > { %12542 = vmatpush3.bf16.msra.mxu1 %v14250_v55  ;;  %12739 = vmatprep.subr.bf16.mxu0 %v14251_v50  ;;  %v14301_v55 = vld [vmem:[%s17558_s9 + $0x440] sm:$0xff]   ;;  %v8309_v50 = vrot.slane %v8300_v62, %v16790_v14 }
 0x9a0   : > { %12543 = vmatprep.subr.bf16.mxu1 %v14253_v17  ;;  %v14300_v17 = vld [vmem:[%s17558_s9 + $0x7b8] sm:$0xff]  }
 0x9a2   : > { %12740 = vmatpush3.bf16.msra.mxu0 %v14252_v58  ;;  %v8410_v58 = vrot.slane %v17226_v24, %v16785_v4  ;;  %v14316_v24 = vld [vmem:[%s17558_s9 + $0x438] sm:$0xff]  }
 0x9a3   : > { %12544 = vmatpush3.bf16.msra.mxu1 %v14254_v61  ;;  %12741 = vmatprep.subr.bf16.mxu0 %v14255_v6  ;;  %v14302_v61 = vld [vmem:[%s17558_s9 + $0x400] sm:$0xff]   ;;  %v8282_v6 = vpack.c.bf16 %v8275_v54, %v8275_v54  ;;  %v14336_v54 = vld [vmem:[%s17558_s9 + $0x608] sm:$0xff]  }
 0x9a4   : > { %12545 = vmatprep.subr.bf16.mxu1 %v14257_v9  ;;  %v14303_v9 = vld [vmem:[%s17558_s9 + $0x448] sm:$0xff]  }
 0x9a6   : > { %12742 = vmatpush3.bf16.msra.mxu0 %v14256_v0  ;;  %v8313_v0 = vpack.c.bf16 %v8309_v50, %v8309_v50  ;;  %v14338_v50 = vld [vmem:[%s17558_s9 + $0x610] sm:$0xff]  }
 0x9a7   : > { %12546 = vmatpush3.bf16.msra.mxu1 %v14258_v16  ;;  %12743 = vmatprep.subr.bf16.mxu0 %v14259_v10  ;;  %v8417_v16 = vpack.c.bf16 %v8410_v58, %v8410_v58  ;;  %v14304_v10 = vld [vmem:[%s17558_s9 + $0x408] sm:$0xff]   ;;  %v14340_v58 = vld [vmem:[%s17558_s9 + $0x618] sm:$0xff]  }
 0x9a8   : > { %12547 = vmatprep.subr.bf16.mxu1 %v14261_v49  ;;  %v14305_v49 = vld [vmem:[%s17558_s9 + $0x450] sm:$0xff]  }
 0x9aa   : > { %12744 = vmatpush3.bf16.msra.mxu0 %v14260_v2  ;;  %v14306_v2 = vld [vmem:[%s17558_s9 + $0x410] sm:$0xff]  }
 0x9ab   : > { %12548 = vmatpush3.bf16.msra.mxu1 %v14262_v5  ;;  %12745 = vmatprep.subr.bf16.mxu0 %v14263_v3  ;;  %v14307_v5 = vld [vmem:[%s17558_s9 + $0x458] sm:$0xff]  }
 0x9ac   : > { %12549 = vmatprep.subr.bf16.mxu1 %v14265_v11  ;;  %v14308_v3 = vld [vmem:[%s17558_s9 + $0x418] sm:$0xff]   ;;  %v14309_v11 = vld [vmem:[%s17558_s9 + $0x460] sm:$0xff]  }
 0x9ae   : > { %12746 = vmatpush3.bf16.msra.mxu0 %v14264_v15  ;;  %v14310_v15 = vld [vmem:[%s17558_s9 + $0x420] sm:$0xff]  }
 0x9af   : > { %12550 = vmatpush3.bf16.msra.mxu1 %v14266_v19  ;;  %12747 = vmatprep.subr.bf16.mxu0 %v14267_v59  ;;  %v14312_v19 = vld [vmem:[%s17558_s9 + $0x428] sm:$0xff]   ;;  %v14313_v59 = vld [vmem:[%s17558_s9 + $0x470] sm:$0xff]  }
 0x9b0   : > { %12579 = vmatprep.subr.bf16.mxu1 %v14269_v22  ;;  %v14315_v22 = vld [vmem:[%s17558_s9 + $0x478] sm:$0xff]  }
 0x9b2   : > { %12748 = vmatpush3.bf16.msra.mxu0 %v14268_v26  ;;  %10661 = vmatmul.mubr.bf16.vlgmr.msra.gmra.mrb[104].mxu1 %v8252_v27  ;;  %v8305_v26 = vrot.slane %v8300_v62, %v16785_v4  ;;  %v14318_v27 = vld [vmem:[%s17558_s9 + $0x500] sm:$0xff]  }
 0x9b3   : > { %12580 = vmatpush3.bf16.msra.mxu1 %v14270_v25  ;;  %10740 = vmatprep.mubr.bf16.mxu1 %v8283_v1  ;;  %v8339_v25 = vrot.slane %v8330_v23, %v16790_v14  ;;  %v14320_v1 = vld [vmem:[%s17558_s9 + $0x508] sm:$0xff]  }
 0x9b4   : > { %12777 = vmatprep.subr.bf16.mxu0 %v14271_v51  ;;  %12581 = vmatprep.subr.bf16.mxu1 %v14273_v32  ;;  %v8312_v51 = vpack.c.bf16 %v8305_v26, %v8305_v26  ;;  %v8390_v26 = vld [vmem:[#allocation7 + $0x34] ss:$8 sm:$0x3] }
 0x9b5   : > { %11021 = vmatmul.mubr.bf16.vlgmr.msra.gmra.mrb[144].mxu0 %v8387_v34  ;;  %v8343_v32 = vpack.c.bf16 %v8339_v25, %v8339_v25  ;;  %v14322_v34 = vld [vmem:[%s17558_s9 + $0x510] sm:$0xff]   ;;  %v14348_v25 = vld [vmem:[%s17558_s9 + $0x638] sm:$0xff]  }
 0x9b6   : > { %12778 = vmatpush3.bf16.msra.mxu0 %v14272_v33  ;;  %11100 = vmatprep.mubr.bf16.mxu0 %v8418_v40  ;;  %v14321_v33 = vld [vmem:[%s17558_s9 + $0x550] sm:$0xff]   ;;  %v14325_v40 = vld [vmem:[%s17558_s9 + $0x560] sm:$0xff]  }
 0x9b7   : > { %12582 = vmatpush3.bf16.msra.mxu1 %v14274_v35  ;;  %12779 = vmatprep.subr.bf16.mxu0 %v14275_v56  ;;  %v14323_v35 = vld [vmem:[%s17558_s9 + $0x558] sm:$0xff]  }
 0x9b8   : > { %12583 = vmatprep.subr.bf16.mxu1 %v14277_v12  ;;  %v14324_v56 = vld [vmem:[%s17558_s9 + $0x518] sm:$0xff]   ;;  %v14326_v12 = vld [vmem:[%s17558_s9 + $0x520] sm:$0xff]  }
 0x9ba   : > { %12780 = vmatpush3.bf16.msra.mxu0 %v14276_v18  ;;  %v14327_v18 = vld [vmem:[%s17558_s9 + $0x568] sm:$0xff]  }
 0x9bb   : > { %12584 = vmatpush3.bf16.msra.mxu1 %v14278_v57  ;;  %12781 = vmatprep.subr.bf16.mxu0 %v14279_v20  ;;  %v14328_v57 = vld [vmem:[%s17558_s9 + $0x528] sm:$0xff]   ;;  %v14329_v20 = vld [vmem:[%s17558_s9 + $0x570] sm:$0xff]  }
 0x9bc   : > { %12585 = vmatprep.subr.bf16.mxu1 %v14281_v28 }
 0x9be   : > { %12782 = vmatpush3.bf16.msra.mxu0 %v14280_v48 }
 0x9bf   : > { %12586 = vmatpush3.bf16.msra.mxu1 %v14282_v37  ;;  %12783 = vmatprep.subr.bf16.mxu0 %v14283_v39 }
 0x9c0   : > { %12587 = vmatprep.subr.bf16.mxu1 %v14285_v30  ;;  %v14330_v30 = vld [vmem:[%s17558_s9 + $0x530] sm:$0xff]  }
 0x9c2   : > { %12784 = vmatpush3.bf16.msra.mxu0 %v14284_v31 }
 0x9c3   : > { %12588 = vmatpush3.bf16.msra.mxu1 %v14286_v42  ;;  %12785 = vmatprep.subr.bf16.mxu0 %v14287_v43  ;;  %v14331_v43 = vld [vmem:[%s17558_s9 + $0x578] sm:$0xff]  }
 0x9c4   : > { %12589 = vmatprep.subr.bf16.mxu1 %v14289_v44 }
 0x9c6   : > { %12786 = vmatpush3.bf16.msra.mxu0 %v14288_v45 }
 0x9c7   : > { %12590 = vmatpush3.bf16.msra.mxu1 %v14290_v36  ;;  %12787 = vmatprep.subr.bf16.mxu0 %v14291_v38  ;;  %v8360_v38 = vld [vmem:[#allocation7 + $0x30] ss:$8 sm:$0x3] }
 0x9c8   : > { %12591 = vmatprep.subr.bf16.mxu1 %v14293_v46 }
 0x9ca   : > { %12788 = vmatpush3.bf16.msra.mxu0 %v14292_v41  ;;  %v14332_v41 = vld [vmem:[%s17558_s9 + $0x538] sm:$0xff]  }
 0x9cb   : > { %12592 = vmatpush3.bf16.msra.mxu1 %v14294_v52  ;;  %12789 = vmatprep.subr.bf16.mxu0 %v14295_v60  ;;  %v8335_v52 = vrot.slane %v8330_v23, %v16785_v4  ;;  %v14333_v60 = vld [vmem:[%s17558_s9 + $0x640] sm:$0xff]  }
 0x9cc   : > { %12593 = vmatprep.subr.bf16.mxu1 %v14297_v8  ;;  %v8369_v8 = vrot.slane %v8360_v38, %v16790_v14 }
 0x9cd   : > { %v8342_v62 = vpack.c.bf16 %v8335_v52, %v8335_v52 }
 0x9ce   : > { %12790 = vmatpush3.bf16.msra.mxu0 %v14296_v47  ;;  %v14334_v47 = vld [vmem:[%s17558_s9 + $0x600] sm:$0xff]  }
 0x9cf   : > { %12594 = vmatpush3.bf16.msra.mxu1 %v14298_v63  ;;  %12791 = vmatprep.subr.bf16.mxu0 %v14299_v53  ;;  %v14335_v63 = vld [vmem:[%s17558_s9 + $0x648] sm:$0xff]   ;;  %v8373_v53 = vpack.c.bf16 %v8369_v8, %v8369_v8  ;;  %v14364_v8 = vld [vmem:[%s17558_s9 + $0x738] sm:$0xff]  }
 0x9d0   : > { %12623 = vmatprep.subr.bf16.mxu1 %v14301_v55  ;;  %v14337_v55 = vld [vmem:[%s17558_s9 + $0x650] sm:$0xff]  }
 0x9d2   : > { %12792 = vmatpush3.bf16.msra.mxu0 %v14300_v17  ;;  %10741 = vmatmul.mubr.bf16.vlgmr.msra.gmra.mrb[108].mxu1 %v8282_v6  ;;  %v14339_v17 = vld [vmem:[%s17558_s9 + $0x658] sm:$0xff]   ;;  %v14342_v6 = vld [vmem:[%s17558_s9 + $0x620] sm:$0xff]  }
 0x9d3   : > { %12624 = vmatpush3.bf16.msra.mxu1 %v14302_v61  ;;  %10820 = vmatprep.mubr.bf16.mxu1 %v8313_v0  ;;  %v14341_v61 = vld [vmem:[%s17558_s9 + $0x660] sm:$0xff]   ;;  %v14344_v0 = vld [vmem:[%s17558_s9 + $0x628] sm:$0xff]  }
 0x9d4   : > { %12625 = vmatprep.subr.bf16.mxu1 %v14303_v9  ;;  %v14343_v9 = vld [vmem:[%s17558_s9 + $0x668] sm:$0xff]  }
 0x9d5   : > { %11101 = vmatmul.mubr.bf16.vlgmr.msra.gmra.mrb[148].mxu0 %v8417_v16  ;;  %v8931_v16 = vld [vmem:[%s17559_s10] sm:$0x1] }
 0x9d7   : > { %12626 = vmatpush3.bf16.msra.mxu1 %v14304_v10  ;;  %v14345_v10 = vld [vmem:[%s17558_s9 + $0x670] sm:$0xff]  }
 0x9d8   : > { %12627 = vmatprep.subr.bf16.mxu1 %v14305_v49 }
 0x9db   : > { %12628 = vmatpush3.bf16.msra.mxu1 %v14306_v2 }
 0x9dc   : > { %12629 = vmatprep.subr.bf16.mxu1 %v14307_v5 }
 0x9df   : > { %12630 = vmatpush3.bf16.msra.mxu1 %v14308_v3 }
 0x9e0   : > { %12631 = vmatprep.subr.bf16.mxu1 %v14309_v11 }
 0x9e3   : > { %12632 = vmatpush3.bf16.msra.mxu1 %v14310_v15  ;;  %v14346_v15 = vld [vmem:[%s17558_s9 + $0x630] sm:$0xff]  }
 0x9e4   : > { %12633 = vmatprep.subr.bf16.mxu1 %v14311_v7 }
 0x9e7   : > { %12634 = vmatpush3.bf16.msra.mxu1 %v14312_v19 }
 0x9e8   : > { %12635 = vmatprep.subr.bf16.mxu1 %v14313_v59  ;;  %v14347_v59 = vld [vmem:[%s17558_s9 + $0x678] sm:$0xff]  }
 0x9eb   : > { %12636 = vmatpush3.bf16.msra.mxu1 %v14314_v21 }
 0x9ec   : > { %12637 = vmatprep.subr.bf16.mxu1 %v14315_v22 }
 0x9ef   : > { %12638 = vmatpush3.bf16.msra.mxu1 %v14316_v24 }
 0x9f0   : > { %12667 = vmatprep.subr.bf16.mxu1 %v14317_v13 }
 0x9f2   : > { %10821 = vmatmul.mubr.bf16.vlgmr.msra.gmra.mrb[112].mxu1 %v8312_v51  ;;  %v14349_v51 = vld [vmem:[%s17558_s9 + $0x740] sm:$0xff]  }
 0x9f3   : > { %12668 = vmatpush3.bf16.msra.mxu1 %v14318_v27  ;;  %10900 = vmatprep.mubr.bf16.mxu1 %v8343_v32  ;;  %v8365_v27 = vrot.slane %v8360_v38, %v16785_v4  ;;  %v14350_v32 = vld [vmem:[%s17558_s9 + $0x700] sm:$0xff]  }
 0x9f4   : > { %12669 = vmatprep.subr.bf16.mxu1 %v14319_v29  ;;  %v8399_v29 = vrot.slane %v8390_v26, %v16790_v14  ;;  %v14353_v14 = vld [vmem:[%s17558_s9 + $0x750] sm:$0xff]  }
 0x9f7   : > { %12670 = vmatpush3.bf16.msra.mxu1 %v14320_v1  ;;  %v8372_v1 = vpack.c.bf16 %v8365_v27, %v8365_v27 }
 0x9f8   : > { %12671 = vmatprep.subr.bf16.mxu1 %v14321_v33  ;;  %v14351_v33 = vld [vmem:[%s17558_s9 + $0x748] sm:$0xff]  }
 0x9fb   : > { %12672 = vmatpush3.bf16.msra.mxu1 %v14322_v34  ;;  %v8403_v34 = vpack.c.bf16 %v8399_v29, %v8399_v29 }
 0x9fc   : > { %12673 = vmatprep.subr.bf16.mxu1 %v14323_v35  ;;  %v14352_v35 = vld [vmem:[%s17558_s9 + $0x708] sm:$0xff]  }
 0x9ff   : > { %12674 = vmatpush3.bf16.msra.mxu1 %v14324_v56  ;;  %v14354_v56 = vld [vmem:[%s17558_s9 + $0x710] sm:$0xff]  }
 0xa00   : > { %12675 = vmatprep.subr.bf16.mxu1 %v14325_v40  ;;  %v14355_v40 = vld [vmem:[%s17558_s9 + $0x758] sm:$0xff]  }
 0xa03   : > { %12676 = vmatpush3.bf16.msra.mxu1 %v14326_v12  ;;  %v14356_v12 = vld [vmem:[%s17558_s9 + $0x718] sm:$0xff]  }
 0xa04   : > { %12677 = vmatprep.subr.bf16.mxu1 %v14327_v18  ;;  %v14357_v18 = vld [vmem:[%s17558_s9 + $0x760] sm:$0xff]  }
 0xa05   : > { %v12463_v28 = vpop.f32.mrb[88].mxu1 }
 0xa06   : > { %v12464_v48 = vpop.f32.mrb[89].mxu1 }
 0xa07   : > { %v12465_v37 = vadd.f32 %v12464_v48, %v12463_v28  ;;  %12678 = vmatpush3.bf16.msra.mxu1 %v14328_v57  ;;  %v12466_v39 = vpop.f32.mrb[90].mxu1  ;;  %v14358_v57 = vld [vmem:[%s17558_s9 + $0x720] sm:$0xff]   ;;  %v14360_v28 = vld [vmem:[%s17558_s9 + $0x728] sm:$0xff]   ;;  %v14361_v48 = vld [vmem:[%s17558_s9 + $0x770] sm:$0xff]  }
 0xa08   : > { %v12573_v31 = vpop.f32.mrb[128].mxu0  ;;  %v12467_v42 = vpop.f32.mrb[91].mxu1  ;;  %12679 = vmatprep.subr.bf16.mxu1 %v14329_v20  ;;  %v14359_v20 = vld [vmem:[%s17558_s9 + $0x768] sm:$0xff]  }
 0xa09   : > { %v12574_v44 = vpop.f32.mrb[129].mxu0  ;;  %v10503_v5 = vadd.f32 %v12465_v37, %v8931_v16  ;;  %v14362_v42 = vld [vmem:[%s17558_s9 + $0x730] sm:$0xff]  }
 0xa0a   : > { %v17428_v45 = vadd.f32 %v12574_v44, %v12573_v31  ;;  %v12576_v36 = vpop.f32.mrb[130].mxu0 }
 0xa0b   : > { %v12577_v46 = vpop.f32.mrb[131].mxu0  ;;  %12680 = vmatpush3.bf16.msra.mxu1 %v14330_v30  ;;  %v14363_v36 = vld [vmem:[%s17558_s9 + $0x778] sm:$0xff]  }
 0xa0c   : > { %12681 = vmatprep.subr.bf16.mxu1 %v14331_v43 }
 0xa0f   : > { %12682 = vmatpush3.bf16.msra.mxu1 %v14332_v41 }
 0xa10   : > { %12711 = vmatprep.subr.bf16.mxu1 %v14333_v60 }
 0xa12   : > { %10901 = vmatmul.mubr.bf16.vlgmr.msra.gmra.mrb[116].mxu1 %v8342_v62 }
 0xa13   : > { %12712 = vmatpush3.bf16.msra.mxu1 %v14334_v47  ;;  %10980 = vmatprep.mubr.bf16.mxu1 %v8373_v53  ;;  %v8395_v47 = vrot.slane %v8390_v26, %v16785_v4 }
 0xa14   : > { %12713 = vmatprep.subr.bf16.mxu1 %v14335_v63 }
 0xa15   : > { %v8402_v62 = vpack.c.bf16 %v8395_v47, %v8395_v47 }
 0xa17   : > { %12714 = vmatpush3.bf16.msra.mxu1 %v14336_v54 }
 0xa18   : > { %12715 = vmatprep.subr.bf16.mxu1 %v14337_v55 }
 0xa1b   : > { %12716 = vmatpush3.bf16.msra.mxu1 %v14338_v50 }
 0xa1c   : > { %12717 = vmatprep.subr.bf16.mxu1 %v14339_v17 }
 0xa1f   : > { %12718 = vmatpush3.bf16.msra.mxu1 %v14340_v58 }
 0xa20   : > { %12719 = vmatprep.subr.bf16.mxu1 %v14341_v61 }
 0xa23   : > { %12720 = vmatpush3.bf16.msra.mxu1 %v14342_v6 }
 0xa24   : > { %12721 = vmatprep.subr.bf16.mxu1 %v14343_v9 }
 0xa25   : > { %v12485_v49 = vpop.f32.mrb[92].mxu1 }
 0xa26   : > { %v12486_v2 = vpop.f32.mrb[93].mxu1 }
 0xa27   : > { %v12487_v3 = vadd.f32 %v12486_v2, %v12485_v49  ;;  %v12488_v11 = vpop.f32.mrb[94].mxu1  ;;  %12722 = vmatpush3.bf16.msra.mxu1 %v14344_v0 }
 0xa28   : > { %v12617_v7 = vpop.f32.mrb[132].mxu0  ;;  %v12489_v19 = vpop.f32.mrb[95].mxu1  ;;  %12723 = vmatprep.subr.bf16.mxu1 %v14345_v10 }
 0xa29   : > { %v10543_v21 = vadd.f32 %v12487_v3, %v10503_v5  ;;  %v12618_v22 = vpop.f32.mrb[133].mxu0 }
 0xa2a   : > { %v17483_v23 = vadd.f32 %v12618_v22, %v12617_v7  ;;  %v12620_v24 = vpop.f32.mrb[134].mxu0 }
 0xa2b   : > { %v12621_v13 = vpop.f32.mrb[135].mxu0  ;;  %12724 = vmatpush3.bf16.msra.mxu1 %v14346_v15 }
 0xa2c   : > { %12725 = vmatprep.subr.bf16.mxu1 %v14347_v59 }
 0xa2f   : > { %12726 = vmatpush3.bf16.msra.mxu1 %v14348_v25 }
 0xa30   : > { %12755 = vmatprep.subr.bf16.mxu1 %v14349_v51 }
 0xa32   : > { %10981 = vmatmul.mubr.bf16.vlgmr.msra.gmra.mrb[120].mxu1 %v8372_v1 }
 0xa33   : > { %12756 = vmatpush3.bf16.msra.mxu1 %v14350_v32  ;;  %11060 = vmatprep.mubr.bf16.mxu1 %v8403_v34 }
 0xa34   : > { %12757 = vmatprep.subr.bf16.mxu1 %v14351_v33 }
 0xa37   : > { %12758 = vmatpush3.bf16.msra.mxu1 %v14352_v35 }
 0xa38   : > { %12759 = vmatprep.subr.bf16.mxu1 %v14353_v14 }
 0xa3b   : > { %12760 = vmatpush3.bf16.msra.mxu1 %v14354_v56 }
 0xa3c   : > { %12761 = vmatprep.subr.bf16.mxu1 %v14355_v40 }
 0xa3f   : > { %12762 = vmatpush3.bf16.msra.mxu1 %v14356_v12 }
 0xa40   : > { %12763 = vmatprep.subr.bf16.mxu1 %v14357_v18 }
 0xa43   : > { %12764 = vmatpush3.bf16.msra.mxu1 %v14358_v57 }
 0xa44   : > { %12765 = vmatprep.subr.bf16.mxu1 %v14359_v20 }
 0xa45   : > { %v12507_v37 = vpop.f32.mrb[96].mxu1 }
 0xa46   : > { %v12508_v39 = vpop.f32.mrb[97].mxu1 }
 0xa47   : > { %v12509_v30 = vadd.f32 %v12508_v39, %v12507_v37  ;;  %v12510_v31 = vpop.f32.mrb[98].mxu1  ;;  %12766 = vmatpush3.bf16.msra.mxu1 %v14360_v28 }
 0xa48   : > { %v12661_v43 = vpop.f32.mrb[136].mxu0  ;;  %v12511_v44 = vpop.f32.mrb[99].mxu1  ;;  %12767 = vmatprep.subr.bf16.mxu1 %v14361_v48 }
 0xa49   : > { %v10583_v38 = vadd.f32 %v12509_v30, %v10543_v21  ;;  %v12662_v46 = vpop.f32.mrb[137].mxu0 }
 0xa4a   : > { %v12663_v41 = vadd.f32 %v12662_v46, %v12661_v43  ;;  %v12664_v52 = vpop.f32.mrb[138].mxu0 }
 0xa4b   : > { %v12665_v60 = vpop.f32.mrb[139].mxu0  ;;  %12768 = vmatpush3.bf16.msra.mxu1 %v14362_v42 }
 0xa4c   : > { %12769 = vmatprep.subr.bf16.mxu1 %v14363_v36 }
 0xa4f   : > { %12770 = vmatpush3.bf16.msra.mxu1 %v14364_v8 }
 0xa52   : > { %11061 = vmatmul.mubr.bf16.vlgmr.msra.gmra.mrb[124].mxu1 %v8402_v62 }
 0xa65   : > { %v12529_v63 = vpop.f32.mrb[100].mxu1 }
 0xa66   : > { %v12530_v53 = vpop.f32.mrb[101].mxu1 }
 0xa67   : > { %v12531_v54 = vadd.f32 %v12530_v53, %v12529_v63  ;;  %v12532_v55 = vpop.f32.mrb[102].mxu1 }
 0xa68   : > { %v12705_v50 = vpop.f32.mrb[140].mxu0  ;;  %v12533_v17 = vpop.f32.mrb[103].mxu1 }
 0xa69   : > { %v10623_v58 = vadd.f32 %v12531_v54, %v10583_v38  ;;  %v12706_v61 = vpop.f32.mrb[141].mxu0 }
 0xa6a   : > { %v12707_v6 = vadd.f32 %v12706_v61, %v12705_v50  ;;  %v12708_v9 = vpop.f32.mrb[142].mxu0 }
 0xa6b   : > { %v12709_v0 = vpop.f32.mrb[143].mxu0 }
 0xa85   : > { %v12551_v16 = vpop.f32.mrb[104].mxu1 }
 0xa86   : > { %v12552_v10 = vpop.f32.mrb[105].mxu1 }
 0xa87   : > { %v12553_v49 = vadd.f32 %v12552_v10, %v12551_v16  ;;  %v12554_v2 = vpop.f32.mrb[106].mxu1 }
 0xa88   : > { %v12749_v4 = vpop.f32.mrb[144].mxu0  ;;  %v12555_v5 = vpop.f32.mrb[107].mxu1 }
 0xa89   : > { %v10663_v3 = vadd.f32 %v12553_v49, %v10623_v58  ;;  %v12750_v11 = vpop.f32.mrb[145].mxu0 }
 0xa8a   : > { %v12751_v15 = vadd.f32 %v12750_v11, %v12749_v4  ;;  %v12752_v7 = vpop.f32.mrb[146].mxu0 }
 0xa8b   : > { %v12753_v19 = vpop.f32.mrb[147].mxu0  ;;  %v10703_v59 = vadd.f32 %v17428_v45, %v10663_v3 }
 0xaa5   : > { %v12595_v21 = vpop.f32.mrb[108].mxu1 }
 0xaa6   : > { %v12596_v22 = vpop.f32.mrb[109].mxu1 }
 0xaa7   : > { %v12597_v24 = vadd.f32 %v12596_v22, %v12595_v21  ;;  %v12598_v26 = vpop.f32.mrb[110].mxu1 }
 0xaa8   : > { %v12793_v13 = vpop.f32.mrb[148].mxu0  ;;  %v12599_v25 = vpop.f32.mrb[111].mxu1 }
 0xaa9   : > { %v10743_v27 = vadd.f32 %v12597_v24, %v10703_v59  ;;  %v12794_v51 = vpop.f32.mrb[149].mxu0 }
 0xaaa   : > { %v12795_v29 = vadd.f32 %v12794_v51, %v12793_v13  ;;  %v12796_v32 = vpop.f32.mrb[150].mxu0 }
 0xaab   : > { %v12797_v1 = vpop.f32.mrb[151].mxu0  ;;  %v10783_v33 = vadd.f32 %v17483_v23, %v10743_v27 }
 0xac5   : > { %v12639_v34 = vpop.f32.mrb[112].mxu1 }
 0xac6   : > { %v12640_v35 = vpop.f32.mrb[113].mxu1 }
 0xac7   : > { %v12641_v14 = vadd.f32 %v12640_v35, %v12639_v34  ;;  %v12642_v56 = vpop.f32.mrb[114].mxu1 }
 0xac8   : > { %v12643_v40 = vpop.f32.mrb[115].mxu1 }
 0xac9   : > { %v10823_v12 = vadd.f32 %v12641_v14, %v10783_v33 }
 0xacb   : > { %v10863_v45 = vadd.f32 %v12663_v41, %v10823_v12 }
 0xae5   : > { %v12683_v18 = vpop.f32.mrb[116].mxu1 }
 0xae6   : > { %v12684_v57 = vpop.f32.mrb[117].mxu1 }
 0xae7   : > { %v12685_v20 = vadd.f32 %v12684_v57, %v12683_v18  ;;  %v12686_v28 = vpop.f32.mrb[118].mxu1 }
 0xae8   : > { %v12687_v48 = vpop.f32.mrb[119].mxu1 }
 0xae9   : > { %v10903_v37 = vadd.f32 %v12685_v20, %v10863_v45 }
 0xaeb   : > { %v10943_v39 = vadd.f32 %v12707_v6, %v10903_v37 }
 0xb05   : > { %v12727_v30 = vpop.f32.mrb[120].mxu1 }
 0xb06   : > { %v12728_v31 = vpop.f32.mrb[121].mxu1 }
 0xb07   : > { %v12729_v42 = vadd.f32 %v12728_v31, %v12727_v30  ;;  %v12730_v43 = vpop.f32.mrb[122].mxu1 }
 0xb08   : > { %v12731_v23 = vpop.f32.mrb[123].mxu1 }
 0xb09   : > { %v10983_v44 = vadd.f32 %v12729_v42, %v10943_v39 }
 0xb0b   : > { %v11023_v36 = vadd.f32 %v12751_v15, %v10983_v44 }
 0xb25   : > { %v12771_v38 = vpop.f32.mrb[124].mxu1 }
 0xb26   : > { %v12772_v46 = vpop.f32.mrb[125].mxu1 }
 0xb27   : > { %v12773_v52 = vadd.f32 %v12772_v46, %v12771_v38  ;;  %v12774_v60 = vpop.f32.mrb[126].mxu1 }
 0xb28   : > { %v12775_v41 = vpop.f32.mrb[127].mxu1 }
 0xb29   : > { %v11063_v8 = vadd.f32 %v12773_v52, %v11023_v36 }
 0xb2b   : > { %v11103_v47 = vadd.f32 %v12795_v29, %v11063_v8 }
 0xb2d   : > { %11108 = vst.msk [vmem:[%s382_s29] sm:$0x1] %vm4150_vm3, %v11103_v47 }
 0xb2e PF: > { %s21_s17 = sadd.s32 1, %s14431_s17  }
 0xb2f   : > { %p18_p4 = scmp.ge.s32.totalorder %s21_s17, 4  }
 0xb31   :  { %20 = sbr.rel (!%p18_p4) target bundleno = 1 (0x1), region = 284 }

</bundles_post_ra>
